<compile_context>
chip_gen: v5e
topology: v5e:2x2
jax: 0.10.0
libtpu: 0.0.40
codegen_flags: <defaults>
</compile_context>

<pallas_src>
import numpy as np

import jax
import jax.numpy as jnp
from jax import lax
from jax.experimental import pallas as pl
from jax.experimental.pallas import tpu as pltpu

C1 = 32              # conv channel count
L1 = 14 * C1         # 448: pool1 row lane width  [x (14) * channel (32)]
L2 = 7 * C1          # 224: pool2 row lane width  [x (7)  * channel (32)]


# ---------------------------------------------------------------------------
# The fused kernel (one image per grid step)
# ---------------------------------------------------------------------------

def _simplenet_kernel(x_ref,       # (1, 4, 8, 32)  row-mod-4 planes of padded 32x32 input
                      w1b_ref,     # (3, 2, 32, 448) banded conv1 weights [dy, rx]
                      b1_ref,      # (1, 448)
                      w2b_ref,     # (3, 2, 448, 224) banded conv2 weights [dy, rx]
                      b2_ref,      # (1, 224)
                      wfc1_ref,    # (7, 224, 64)  fc1 weights split per pooled row
                      bfc1_ref,    # (1, 64)
                      wfc2_ref,    # (64, 10)
                      bfc2_ref,    # (1, 10)
                      out_ref,     # (1, 1, 10)
                      pe_scr,      # (8, 448) scratch: p1 even rows (+ zero pad row)
                      po_scr):     # (8, 448) scratch: p1 odd rows  (+ zero pad row)
    f32 = jnp.float32

    # ---- stage 1: conv1(3x3, pad=1) + bias + ReLU + 2x2 max-pool, fused ----
    # x_ref[0, k] holds padded-input rows {k, k+4, k+8, ...}, so every row
    # access below is a contiguous static slice of 7 rows.
    def conv1_pooled_rows(q):          # q = parity of the pooled output row
        quad = None
        for ry in range(2):            # row inside the 2x2 pooling window
            for rx in range(2):        # col inside the 2x2 pooling window
                acc = None
                for dy in range(3):    # conv tap row
                    s = 2 * q + ry + dy
                    rows = x_ref[0, s % 4]                       # (8, 32)
                    rows = rows[(s // 4):(s // 4) + 7, :]        # (7, 32)
                    part = jnp.dot(rows, w1b_ref[dy, rx],
                                   preferred_element_type=f32)   # (7, 448)
                    acc = part if acc is None else acc + part
                quad = acc if quad is None else jnp.maximum(quad, acc)
        # relu(max(q) + b) == max(relu(q + b)) -> exact fusion of ReLU + pool
        return jnp.maximum(quad + b1_ref[...], 0.0)              # (7, 448)

    # p1 (14x14x32) stored by output-row parity plus one explicit zero row so
    # stage 2 only ever needs contiguous row slices (zero rows = conv padding).
    pe_scr[0:7, :] = conv1_pooled_rows(0)        # p1 rows y = 0, 2, ..., 12
    pe_scr[7:8, :] = jnp.zeros((1, L1), f32)     # p1 row  y = 14   (zero pad)
    po_scr[1:8, :] = conv1_pooled_rows(1)        # p1 rows y = 1, 3, ..., 13
    po_scr[0:1, :] = jnp.zeros((1, L1), f32)     # p1 row  y = -1   (zero pad)

    # ---- stage 2: conv2(3x3, pad=1) + bias + ReLU + 2x2 max-pool, fused ----
    def p1_rows(t):      # the 7 p1 rows {2*m + t}, m = 0..6, with zero padding
        if t == -1:
            return po_scr[0:7, :]
        if t == 0:
            return pe_scr[0:7, :]
        if t == 1:
            return po_scr[1:8, :]
        return pe_scr[1:8, :]            # t == 2

    quad2 = None
    for ry2 in range(2):
        for rx2 in range(2):
            acc = None
            for dy in range(3):
                rows = p1_rows(ry2 + dy - 1)                     # (7, 448)
                part = jnp.dot(rows, w2b_ref[dy, rx2],
                               preferred_element_type=f32)       # (7, 224)
                acc = part if acc is None else acc + part
            quad2 = acc if quad2 is None else jnp.maximum(quad2, acc)
    p2 = jnp.maximum(quad2 + b2_ref[...], 0.0)                   # (7, 224)

    # ---- stage 3: flatten + fc1 + ReLU + fc2, fused ----
    # The NCHW flatten order is absorbed into wfc1 at init; contracting the
    # 7x224 activation row-by-row avoids any in-kernel reshape.
    # TODO(synk): nn.Dropout() is identity at inference; train-mode masking omitted.
    h = None
    for y in range(7):
        part = jnp.dot(p2[y:y + 1, :], wfc1_ref[y],
                       preferred_element_type=f32)               # (1, 64)
        h = part if h is None else h + part
    h = jnp.maximum(h + bfc1_ref[...], 0.0)
    logits = jnp.dot(h, wfc2_ref[...], preferred_element_type=f32) + bfc2_ref[...]
    out_ref[0] = logits                                          # (1, 10)


# ---------------------------------------------------------------------------
# Forward wrapper
# ---------------------------------------------------------------------------

def simplenet_forward(x_nchw, params):
    B = x_nchw.shape[0]
    x = x_nchw.reshape(B, 28, 28).astype(jnp.float32)
    # Zero-pad to 32x32 (conv 'same' padding + row alignment), image at
    # [1:29, 1:29]; split rows by (row mod 4) so the fused conv+pool stages
    # only need contiguous row slices inside the kernel.  These are tiny
    # (4 KiB/image) input-prep ops, not activation round-trips.
    xp = jnp.zeros((B, 32, 32), jnp.float32).at[:, 1:29, 1:29].set(x)
    planes = jnp.stack([xp[:, k::4, :] for k in range(4)], axis=1)   # (B, 4, 8, 32)

    out = pl.pallas_call(
        _simplenet_kernel,
        out_shape=jax.ShapeDtypeStruct((B, 1, 10), jnp.float32),
        grid=(B,),
        in_specs=[
            pl.BlockSpec((1, 4, 8, 32), lambda i: (i, 0, 0, 0)),
            # weights / biases: constant index maps -> resident in VMEM
            pl.BlockSpec((3, 2, 32, L1), lambda i: (0, 0, 0, 0)),
            pl.BlockSpec((1, L1), lambda i: (0, 0)),
            pl.BlockSpec((3, 2, L1, L2), lambda i: (0, 0, 0, 0)),
            pl.BlockSpec((1, L2), lambda i: (0, 0)),
            pl.BlockSpec((7, L2, 64), lambda i: (0, 0, 0)),
            pl.BlockSpec((1, 64), lambda i: (0, 0)),
            pl.BlockSpec((64, 10), lambda i: (0, 0)),
            pl.BlockSpec((1, 10), lambda i: (0, 0)),
        ],
        out_specs=pl.BlockSpec((1, 1, 10), lambda i: (i, 0, 0)),
        scratch_shapes=[pltpu.VMEM((8, L1), jnp.float32),
                        pltpu.VMEM((8, L1), jnp.float32)],
        compiler_params=pltpu.CompilerParams(
            dimension_semantics=("parallel",),
            vmem_limit_bytes=32 * 1024 * 1024),
    )(planes, params["w1b"], params["b1r"], params["w2b"], params["b2r"],
      params["wfc1"], params["bfc1"], params["wfc2"], params["bfc2"])
    return out.reshape(B, 10)


# ---------------------------------------------------------------------------
# Parameter construction / packing (all repacking done once, at init)
# ---------------------------------------------------------------------------

def _build_banded_conv1(w1):
    """w1: (32, 1, 3, 3) OIHW -> (3, 2, 32, 448) banded matrices [dy, rx]."""
    w = np.asarray(w1, np.float32)
    out = np.zeros((3, 2, 32, L1), np.float32)
    for dy in range(3):
        for rx in range(2):
            for xo in range(14):
                for dx in range(3):
                    c_in = 2 * xo + rx + dx            # padded-input column, 0..29
                    out[dy, rx, c_in, xo * C1:(xo + 1) * C1] = w[:, 0, dy, dx]
    return jnp.asarray(out)


def _build_banded_conv2(w2):
    """w2: (32, 32, 3, 3) OIHW -> (3, 2, 448, 224) banded matrices [dy, rx]."""
    w = np.asarray(w2, np.float32)
    out = np.zeros((3, 2, L1, L2), np.float32)
    for dy in range(3):
        for rx in range(2):
            for xo in range(7):
                for dx in range(3):
                    x_in = 2 * xo + rx + dx - 1        # p1 x position, -1..14
                    if 0 <= x_in <= 13:
                        out[dy, rx, x_in * C1:(x_in + 1) * C1,
                            xo * C1:(xo + 1) * C1] = w[:, :, dy, dx].T   # [ci, co]
    return jnp.asarray(out)


def _pack_fc1(fc1_w):
    """fc1_w: (64, 1568) over torch flatten order co*49 + y*7 + x
       -> (7, 224, 64) indexed [y, x*32 + co, out]."""
    w = np.asarray(fc1_w, np.float32).reshape(64, 32, 7, 7)      # [o, co, y, x]
    w = np.transpose(w, (2, 3, 1, 0)).reshape(7, L2, 64)         # [y, x*32+co, o]
    return jnp.asarray(w)


def pack_params(raw):
    return {
        "w1b": _build_banded_conv1(raw["w1"]),
        "b1r": jnp.asarray(np.tile(np.asarray(raw["b1"], np.float32), 14).reshape(1, L1)),
        "w2b": _build_banded_conv2(raw["w2"]),
        "b2r": jnp.asarray(np.tile(np.asarray(raw["b2"], np.float32), 7).reshape(1, L2)),
        "wfc1": _pack_fc1(raw["fc1_w"]),
        "bfc1": raw["fc1_b"].reshape(1, 64),
        "wfc2": raw["fc2_w"].T,                     # pre-transposed at init
        "bfc2": raw["fc2_b"].reshape(1, 10),
    }


def init_params(key):
    """Deterministic synthetic parameters, PyTorch shape conventions."""
    ks = jax.random.split(key, 8)
    raw = {
        "w1": jax.random.normal(ks[0], (32, 1, 3, 3), jnp.float32) * 0.10,
        "b1": jax.random.normal(ks[1], (32,), jnp.float32) * 0.10,
        "w2": jax.random.normal(ks[2], (32, 32, 3, 3), jnp.float32) * 0.05,
        "b2": jax.random.normal(ks[3], (32,), jnp.float32) * 0.05,
        "fc1_w": jax.random.normal(ks[4], (64, 32 * 7 * 7), jnp.float32) * 0.02,
        "fc1_b": jax.random.normal(ks[5], (64,), jnp.float32) * 0.02,
        "fc2_w": jax.random.normal(ks[6], (10, 64), jnp.float32) * 0.05,
        "fc2_b": jax.random.normal(ks[7], (10,), jnp.float32) * 0.05,
    }
    return raw, pack_params(raw)


# ---------------------------------------------------------------------------
# Pure-JAX reference (eval-mode SimpleNet) for a correctness self-check
# ---------------------------------------------------------------------------

def simplenet_reference(x_nchw, raw):
    hp = lax.Precision.HIGHEST
    dn = ("NCHW", "OIHW", "NCHW")
    y = lax.conv_general_dilated(x_nchw, raw["w1"], (1, 1), "SAME",
                                 dimension_numbers=dn, precision=hp)
    y = jnp.maximum(y + raw["b1"][None, :, None, None], 0.0)
    y = lax.reduce_window(y, -jnp.inf, lax.max, (1, 1, 2, 2), (1, 1, 2, 2), "VALID")
    y = lax.conv_general_dilated(y, raw["w2"], (1, 1), "SAME",
                                 dimension_numbers=dn, precision=hp)
    y = jnp.maximum(y + raw["b2"][None, :, None, None], 0.0)
    y = lax.reduce_window(y, -jnp.inf, lax.max, (1, 1, 2, 2), (1, 1, 2, 2), "VALID")
    y = y.reshape(x_nchw.shape[0], 32 * 7 * 7)              # NCHW flatten == torch view
    y = jnp.maximum(jnp.dot(y, raw["fc1_w"].T, precision=hp) + raw["fc1_b"], 0.0)
    return jnp.dot(y, raw["fc2_w"].T, precision=hp) + raw["fc2_b"]


if __name__ == "__main__":
    key = jax.random.PRNGKey(0)
    pkey, xkey = jax.random.split(key)
    raw, packed = init_params(pkey)
    # Fashion-MNIST style input: the 32*7*7 flatten implies 1x28x28 inputs.
    x = jax.random.normal(xkey, (2, 1, 28, 28), jnp.float32)

    out = jax.jit(simplenet_forward)(x, packed)
    out = jax.block_until_ready(out)
    assert out.shape == (2, 10) and out.dtype == jnp.float32

    ref = jax.block_until_ready(simplenet_reference(x, raw))
    max_err = float(jnp.max(jnp.abs(out - ref)))
    assert max_err < 1e-2, f"mismatch vs reference: max abs err = {max_err}"

    print("KERNEL_OK")
</pallas_src>

<mosaic_0001>
module attributes {stable_mosaic.version = 11 : i64} {
  func.func @_simplenet_kernel(%arg0: i32, %arg1: memref<1x4x8x32xf32, #tpu.memory_space<vmem>>, %arg2: memref<3x2x32x448xf32, #tpu.memory_space<vmem>>, %arg3: memref<1x448xf32, #tpu.memory_space<vmem>>, %arg4: memref<3x2x448x224xf32, #tpu.memory_space<vmem>>, %arg5: memref<1x224xf32, #tpu.memory_space<vmem>>, %arg6: memref<7x224x64xf32, #tpu.memory_space<vmem>>, %arg7: memref<1x64xf32, #tpu.memory_space<vmem>>, %arg8: memref<64x10xf32, #tpu.memory_space<vmem>>, %arg9: memref<1x10xf32, #tpu.memory_space<vmem>>, %arg10: memref<1x1x10xf32, #tpu.memory_space<vmem>>, %arg11: memref<8x448xf32, #tpu.memory_space<vmem>>, %arg12: memref<8x448xf32, #tpu.memory_space<vmem>>) attributes {dimension_semantics = [#tpu.dimension_semantics<parallel>], iteration_bounds = array<i64: 2>, scalar_prefetch = 0 : i64, scratch_operands = 2 : i64, tpu.core_type = #tpu.core_type<tc>, window_params = [{transform_indices = @transform_0, window_bounds = array<i64: 1, 4, 8, 32>}, {pipeline_mode = #tpu.pipeline_mode<synchronous>, transform_indices = @transform_1, window_bounds = array<i64: 3, 2, 32, 448>}, {pipeline_mode = #tpu.pipeline_mode<synchronous>, transform_indices = @transform_2, window_bounds = array<i64: 1, 448>}, {pipeline_mode = #tpu.pipeline_mode<synchronous>, transform_indices = @transform_3, window_bounds = array<i64: 3, 2, 448, 224>}, {pipeline_mode = #tpu.pipeline_mode<synchronous>, transform_indices = @transform_4, window_bounds = array<i64: 1, 224>}, {pipeline_mode = #tpu.pipeline_mode<synchronous>, transform_indices = @transform_5, window_bounds = array<i64: 7, 224, 64>}, {pipeline_mode = #tpu.pipeline_mode<synchronous>, transform_indices = @transform_6, window_bounds = array<i64: 1, 64>}, {pipeline_mode = #tpu.pipeline_mode<synchronous>, transform_indices = @transform_7, window_bounds = array<i64: 64, 10>}, {pipeline_mode = #tpu.pipeline_mode<synchronous>, transform_indices = @transform_8, window_bounds = array<i64: 1, 10>}, {transform_indices = @transform_9, window_bounds = array<i64: 1, 1, 10>}]} {
    %c0 = arith.constant 0 : index
    %c0_0 = arith.constant 0 : index
    %c0_1 = arith.constant 0 : index
    %c0_2 = arith.constant 0 : index
    %0 = vector.load %arg1[%c0, %c0_0, %c0_1, %c0_2] : memref<1x4x8x32xf32, #tpu.memory_space<vmem>>, vector<1x1x8x32xf32>
    %1 = vector.shape_cast %0 : vector<1x1x8x32xf32> to vector<8x32xf32>
    %2 = vector.extract_strided_slice %1 {offsets = [0, 0], sizes = [7, 32], strides = [1, 1]} : vector<8x32xf32> to vector<7x32xf32>
    %c0_3 = arith.constant 0 : index
    %c0_4 = arith.constant 0 : index
    %c0_5 = arith.constant 0 : index
    %c0_6 = arith.constant 0 : index
    %3 = vector.load %arg2[%c0_3, %c0_4, %c0_5, %c0_6] : memref<3x2x32x448xf32, #tpu.memory_space<vmem>>, vector<1x1x32x448xf32>
    %4 = vector.shape_cast %3 : vector<1x1x32x448xf32> to vector<32x448xf32>
    %cst = arith.constant dense<0.000000e+00> : vector<7x448xf32>
    %5 = tpu.matmul %2, %4, %cst {dimension_numbers = #tpu.dot_dimension_numbers<[1], [0], [0], [1], [0, 0, 1, 1], [], []>} : vector<7x32xf32>, vector<32x448xf32>, vector<7x448xf32> -> vector<7x448xf32>
    %c0_7 = arith.constant 0 : index
    %c1 = arith.constant 1 : index
    %c0_8 = arith.constant 0 : index
    %c0_9 = arith.constant 0 : index
    %6 = vector.load %arg1[%c0_7, %c1, %c0_8, %c0_9] : memref<1x4x8x32xf32, #tpu.memory_space<vmem>>, vector<1x1x8x32xf32>
    %7 = vector.shape_cast %6 : vector<1x1x8x32xf32> to vector<8x32xf32>
    %8 = vector.extract_strided_slice %7 {offsets = [0, 0], sizes = [7, 32], strides = [1, 1]} : vector<8x32xf32> to vector<7x32xf32>
    %c1_10 = arith.constant 1 : index
    %c0_11 = arith.constant 0 : index
    %c0_12 = arith.constant 0 : index
    %c0_13 = arith.constant 0 : index
    %9 = vector.load %arg2[%c1_10, %c0_11, %c0_12, %c0_13] : memref<3x2x32x448xf32, #tpu.memory_space<vmem>>, vector<1x1x32x448xf32>
    %10 = vector.shape_cast %9 : vector<1x1x32x448xf32> to vector<32x448xf32>
    %cst_14 = arith.constant dense<0.000000e+00> : vector<7x448xf32>
    %11 = tpu.matmul %8, %10, %cst_14 {dimension_numbers = #tpu.dot_dimension_numbers<[1], [0], [0], [1], [0, 0, 1, 1], [], []>} : vector<7x32xf32>, vector<32x448xf32>, vector<7x448xf32> -> vector<7x448xf32>
    %12 = arith.addf %5, %11 : vector<7x448xf32>
    %c0_15 = arith.constant 0 : index
    %c2 = arith.constant 2 : index
    %c0_16 = arith.constant 0 : index
    %c0_17 = arith.constant 0 : index
    %13 = vector.load %arg1[%c0_15, %c2, %c0_16, %c0_17] : memref<1x4x8x32xf32, #tpu.memory_space<vmem>>, vector<1x1x8x32xf32>
    %14 = vector.shape_cast %13 : vector<1x1x8x32xf32> to vector<8x32xf32>
    %15 = vector.extract_strided_slice %14 {offsets = [0, 0], sizes = [7, 32], strides = [1, 1]} : vector<8x32xf32> to vector<7x32xf32>
    %c2_18 = arith.constant 2 : index
    %c0_19 = arith.constant 0 : index
    %c0_20 = arith.constant 0 : index
    %c0_21 = arith.constant 0 : index
    %16 = vector.load %arg2[%c2_18, %c0_19, %c0_20, %c0_21] : memref<3x2x32x448xf32, #tpu.memory_space<vmem>>, vector<1x1x32x448xf32>
    %17 = vector.shape_cast %16 : vector<1x1x32x448xf32> to vector<32x448xf32>
    %cst_22 = arith.constant dense<0.000000e+00> : vector<7x448xf32>
    %18 = tpu.matmul %15, %17, %cst_22 {dimension_numbers = #tpu.dot_dimension_numbers<[1], [0], [0], [1], [0, 0, 1, 1], [], []>} : vector<7x32xf32>, vector<32x448xf32>, vector<7x448xf32> -> vector<7x448xf32>
    %19 = arith.addf %12, %18 : vector<7x448xf32>
    %c0_23 = arith.constant 0 : index
    %c0_24 = arith.constant 0 : index
    %c0_25 = arith.constant 0 : index
    %c0_26 = arith.constant 0 : index
    %20 = vector.load %arg1[%c0_23, %c0_24, %c0_25, %c0_26] : memref<1x4x8x32xf32, #tpu.memory_space<vmem>>, vector<1x1x8x32xf32>
    %21 = vector.shape_cast %20 : vector<1x1x8x32xf32> to vector<8x32xf32>
    %22 = vector.extract_strided_slice %21 {offsets = [0, 0], sizes = [7, 32], strides = [1, 1]} : vector<8x32xf32> to vector<7x32xf32>
    %c0_27 = arith.constant 0 : index
    %c1_28 = arith.constant 1 : index
    %c0_29 = arith.constant 0 : index
    %c0_30 = arith.constant 0 : index
    %23 = vector.load %arg2[%c0_27, %c1_28, %c0_29, %c0_30] : memref<3x2x32x448xf32, #tpu.memory_space<vmem>>, vector<1x1x32x448xf32>
    %24 = vector.shape_cast %23 : vector<1x1x32x448xf32> to vector<32x448xf32>
    %cst_31 = arith.constant dense<0.000000e+00> : vector<7x448xf32>
    %25 = tpu.matmul %22, %24, %cst_31 {dimension_numbers = #tpu.dot_dimension_numbers<[1], [0], [0], [1], [0, 0, 1, 1], [], []>} : vector<7x32xf32>, vector<32x448xf32>, vector<7x448xf32> -> vector<7x448xf32>
    %c0_32 = arith.constant 0 : index
    %c1_33 = arith.constant 1 : index
    %c0_34 = arith.constant 0 : index
    %c0_35 = arith.constant 0 : index
    %26 = vector.load %arg1[%c0_32, %c1_33, %c0_34, %c0_35] : memref<1x4x8x32xf32, #tpu.memory_space<vmem>>, vector<1x1x8x32xf32>
    %27 = vector.shape_cast %26 : vector<1x1x8x32xf32> to vector<8x32xf32>
    %28 = vector.extract_strided_slice %27 {offsets = [0, 0], sizes = [7, 32], strides = [1, 1]} : vector<8x32xf32> to vector<7x32xf32>
    %c1_36 = arith.constant 1 : index
    %c1_37 = arith.constant 1 : index
    %c0_38 = arith.constant 0 : index
    %c0_39 = arith.constant 0 : index
    %29 = vector.load %arg2[%c1_36, %c1_37, %c0_38, %c0_39] : memref<3x2x32x448xf32, #tpu.memory_space<vmem>>, vector<1x1x32x448xf32>
    %30 = vector.shape_cast %29 : vector<1x1x32x448xf32> to vector<32x448xf32>
    %cst_40 = arith.constant dense<0.000000e+00> : vector<7x448xf32>
    %31 = tpu.matmul %28, %30, %cst_40 {dimension_numbers = #tpu.dot_dimension_numbers<[1], [0], [0], [1], [0, 0, 1, 1], [], []>} : vector<7x32xf32>, vector<32x448xf32>, vector<7x448xf32> -> vector<7x448xf32>
    %32 = arith.addf %25, %31 : vector<7x448xf32>
    %c0_41 = arith.constant 0 : index
    %c2_42 = arith.constant 2 : index
    %c0_43 = arith.constant 0 : index
    %c0_44 = arith.constant 0 : index
    %33 = vector.load %arg1[%c0_41, %c2_42, %c0_43, %c0_44] : memref<1x4x8x32xf32, #tpu.memory_space<vmem>>, vector<1x1x8x32xf32>
    %34 = vector.shape_cast %33 : vector<1x1x8x32xf32> to vector<8x32xf32>
    %35 = vector.extract_strided_slice %34 {offsets = [0, 0], sizes = [7, 32], strides = [1, 1]} : vector<8x32xf32> to vector<7x32xf32>
    %c2_45 = arith.constant 2 : index
    %c1_46 = arith.constant 1 : index
    %c0_47 = arith.constant 0 : index
    %c0_48 = arith.constant 0 : index
    %36 = vector.load %arg2[%c2_45, %c1_46, %c0_47, %c0_48] : memref<3x2x32x448xf32, #tpu.memory_space<vmem>>, vector<1x1x32x448xf32>
    %37 = vector.shape_cast %36 : vector<1x1x32x448xf32> to vector<32x448xf32>
    %cst_49 = arith.constant dense<0.000000e+00> : vector<7x448xf32>
    %38 = tpu.matmul %35, %37, %cst_49 {dimension_numbers = #tpu.dot_dimension_numbers<[1], [0], [0], [1], [0, 0, 1, 1], [], []>} : vector<7x32xf32>, vector<32x448xf32>, vector<7x448xf32> -> vector<7x448xf32>
    %39 = arith.addf %32, %38 : vector<7x448xf32>
    %40 = arith.maximumf %19, %39 : vector<7x448xf32>
    %c0_50 = arith.constant 0 : index
    %c1_51 = arith.constant 1 : index
    %c0_52 = arith.constant 0 : index
    %c0_53 = arith.constant 0 : index
    %41 = vector.load %arg1[%c0_50, %c1_51, %c0_52, %c0_53] : memref<1x4x8x32xf32, #tpu.memory_space<vmem>>, vector<1x1x8x32xf32>
    %42 = vector.shape_cast %41 : vector<1x1x8x32xf32> to vector<8x32xf32>
    %43 = vector.extract_strided_slice %42 {offsets = [0, 0], sizes = [7, 32], strides = [1, 1]} : vector<8x32xf32> to vector<7x32xf32>
    %c0_54 = arith.constant 0 : index
    %c0_55 = arith.constant 0 : index
    %c0_56 = arith.constant 0 : index
    %c0_57 = arith.constant 0 : index
    %44 = vector.load %arg2[%c0_54, %c0_55, %c0_56, %c0_57] : memref<3x2x32x448xf32, #tpu.memory_space<vmem>>, vector<1x1x32x448xf32>
    %45 = vector.shape_cast %44 : vector<1x1x32x448xf32> to vector<32x448xf32>
    %cst_58 = arith.constant dense<0.000000e+00> : vector<7x448xf32>
    %46 = tpu.matmul %43, %45, %cst_58 {dimension_numbers = #tpu.dot_dimension_numbers<[1], [0], [0], [1], [0, 0, 1, 1], [], []>} : vector<7x32xf32>, vector<32x448xf32>, vector<7x448xf32> -> vector<7x448xf32>
    %c0_59 = arith.constant 0 : index
    %c2_60 = arith.constant 2 : index
    %c0_61 = arith.constant 0 : index
    %c0_62 = arith.constant 0 : index
    %47 = vector.load %arg1[%c0_59, %c2_60, %c0_61, %c0_62] : memref<1x4x8x32xf32, #tpu.memory_space<vmem>>, vector<1x1x8x32xf32>
    %48 = vector.shape_cast %47 : vector<1x1x8x32xf32> to vector<8x32xf32>
    %49 = vector.extract_strided_slice %48 {offsets = [0, 0], sizes = [7, 32], strides = [1, 1]} : vector<8x32xf32> to vector<7x32xf32>
    %c1_63 = arith.constant 1 : index
    %c0_64 = arith.constant 0 : index
    %c0_65 = arith.constant 0 : index
    %c0_66 = arith.constant 0 : index
    %50 = vector.load %arg2[%c1_63, %c0_64, %c0_65, %c0_66] : memref<3x2x32x448xf32, #tpu.memory_space<vmem>>, vector<1x1x32x448xf32>
    %51 = vector.shape_cast %50 : vector<1x1x32x448xf32> to vector<32x448xf32>
    %cst_67 = arith.constant dense<0.000000e+00> : vector<7x448xf32>
    %52 = tpu.matmul %49, %51, %cst_67 {dimension_numbers = #tpu.dot_dimension_numbers<[1], [0], [0], [1], [0, 0, 1, 1], [], []>} : vector<7x32xf32>, vector<32x448xf32>, vector<7x448xf32> -> vector<7x448xf32>
    %53 = arith.addf %46, %52 : vector<7x448xf32>
    %c0_68 = arith.constant 0 : index
    %c3 = arith.constant 3 : index
    %c0_69 = arith.constant 0 : index
    %c0_70 = arith.constant 0 : index
    %54 = vector.load %arg1[%c0_68, %c3, %c0_69, %c0_70] : memref<1x4x8x32xf32, #tpu.memory_space<vmem>>, vector<1x1x8x32xf32>
    %55 = vector.shape_cast %54 : vector<1x1x8x32xf32> to vector<8x32xf32>
    %56 = vector.extract_strided_slice %55 {offsets = [0, 0], sizes = [7, 32], strides = [1, 1]} : vector<8x32xf32> to vector<7x32xf32>
    %c2_71 = arith.constant 2 : index
    %c0_72 = arith.constant 0 : index
    %c0_73 = arith.constant 0 : index
    %c0_74 = arith.constant 0 : index
    %57 = vector.load %arg2[%c2_71, %c0_72, %c0_73, %c0_74] : memref<3x2x32x448xf32, #tpu.memory_space<vmem>>, vector<1x1x32x448xf32>
    %58 = vector.shape_cast %57 : vector<1x1x32x448xf32> to vector<32x448xf32>
    %cst_75 = arith.constant dense<0.000000e+00> : vector<7x448xf32>
    %59 = tpu.matmul %56, %58, %cst_75 {dimension_numbers = #tpu.dot_dimension_numbers<[1], [0], [0], [1], [0, 0, 1, 1], [], []>} : vector<7x32xf32>, vector<32x448xf32>, vector<7x448xf32> -> vector<7x448xf32>
    %60 = arith.addf %53, %59 : vector<7x448xf32>
    %61 = arith.maximumf %40, %60 : vector<7x448xf32>
    %c0_76 = arith.constant 0 : index
    %c1_77 = arith.constant 1 : index
    %c0_78 = arith.constant 0 : index
    %c0_79 = arith.constant 0 : index
    %62 = vector.load %arg1[%c0_76, %c1_77, %c0_78, %c0_79] : memref<1x4x8x32xf32, #tpu.memory_space<vmem>>, vector<1x1x8x32xf32>
    %63 = vector.shape_cast %62 : vector<1x1x8x32xf32> to vector<8x32xf32>
    %64 = vector.extract_strided_slice %63 {offsets = [0, 0], sizes = [7, 32], strides = [1, 1]} : vector<8x32xf32> to vector<7x32xf32>
    %c0_80 = arith.constant 0 : index
    %c1_81 = arith.constant 1 : index
    %c0_82 = arith.constant 0 : index
    %c0_83 = arith.constant 0 : index
    %65 = vector.load %arg2[%c0_80, %c1_81, %c0_82, %c0_83] : memref<3x2x32x448xf32, #tpu.memory_space<vmem>>, vector<1x1x32x448xf32>
    %66 = vector.shape_cast %65 : vector<1x1x32x448xf32> to vector<32x448xf32>
    %cst_84 = arith.constant dense<0.000000e+00> : vector<7x448xf32>
    %67 = tpu.matmul %64, %66, %cst_84 {dimension_numbers = #tpu.dot_dimension_numbers<[1], [0], [0], [1], [0, 0, 1, 1], [], []>} : vector<7x32xf32>, vector<32x448xf32>, vector<7x448xf32> -> vector<7x448xf32>
    %c0_85 = arith.constant 0 : index
    %c2_86 = arith.constant 2 : index
    %c0_87 = arith.constant 0 : index
    %c0_88 = arith.constant 0 : index
    %68 = vector.load %arg1[%c0_85, %c2_86, %c0_87, %c0_88] : memref<1x4x8x32xf32, #tpu.memory_space<vmem>>, vector<1x1x8x32xf32>
    %69 = vector.shape_cast %68 : vector<1x1x8x32xf32> to vector<8x32xf32>
    %70 = vector.extract_strided_slice %69 {offsets = [0, 0], sizes = [7, 32], strides = [1, 1]} : vector<8x32xf32> to vector<7x32xf32>
    %c1_89 = arith.constant 1 : index
    %c1_90 = arith.constant 1 : index
    %c0_91 = arith.constant 0 : index
    %c0_92 = arith.constant 0 : index
    %71 = vector.load %arg2[%c1_89, %c1_90, %c0_91, %c0_92] : memref<3x2x32x448xf32, #tpu.memory_space<vmem>>, vector<1x1x32x448xf32>
    %72 = vector.shape_cast %71 : vector<1x1x32x448xf32> to vector<32x448xf32>
    %cst_93 = arith.constant dense<0.000000e+00> : vector<7x448xf32>
    %73 = tpu.matmul %70, %72, %cst_93 {dimension_numbers = #tpu.dot_dimension_numbers<[1], [0], [0], [1], [0, 0, 1, 1], [], []>} : vector<7x32xf32>, vector<32x448xf32>, vector<7x448xf32> -> vector<7x448xf32>
    %74 = arith.addf %67, %73 : vector<7x448xf32>
    %c0_94 = arith.constant 0 : index
    %c3_95 = arith.constant 3 : index
    %c0_96 = arith.constant 0 : index
    %c0_97 = arith.constant 0 : index
    %75 = vector.load %arg1[%c0_94, %c3_95, %c0_96, %c0_97] : memref<1x4x8x32xf32, #tpu.memory_space<vmem>>, vector<1x1x8x32xf32>
    %76 = vector.shape_cast %75 : vector<1x1x8x32xf32> to vector<8x32xf32>
    %77 = vector.extract_strided_slice %76 {offsets = [0, 0], sizes = [7, 32], strides = [1, 1]} : vector<8x32xf32> to vector<7x32xf32>
    %c2_98 = arith.constant 2 : index
    %c1_99 = arith.constant 1 : index
    %c0_100 = arith.constant 0 : index
    %c0_101 = arith.constant 0 : index
    %78 = vector.load %arg2[%c2_98, %c1_99, %c0_100, %c0_101] : memref<3x2x32x448xf32, #tpu.memory_space<vmem>>, vector<1x1x32x448xf32>
    %79 = vector.shape_cast %78 : vector<1x1x32x448xf32> to vector<32x448xf32>
    %cst_102 = arith.constant dense<0.000000e+00> : vector<7x448xf32>
    %80 = tpu.matmul %77, %79, %cst_102 {dimension_numbers = #tpu.dot_dimension_numbers<[1], [0], [0], [1], [0, 0, 1, 1], [], []>} : vector<7x32xf32>, vector<32x448xf32>, vector<7x448xf32> -> vector<7x448xf32>
    %81 = arith.addf %74, %80 : vector<7x448xf32>
    %82 = arith.maximumf %61, %81 : vector<7x448xf32>
    %c0_103 = arith.constant 0 : index
    %c0_104 = arith.constant 0 : index
    %83 = vector.load %arg3[%c0_103, %c0_104] : memref<1x448xf32, #tpu.memory_space<vmem>>, vector<1x448xf32>
    %84 = vector.broadcast %83 : vector<1x448xf32> to vector<7x448xf32>
    %85 = arith.addf %82, %84 : vector<7x448xf32>
    %cst_105 = arith.constant 0.000000e+00 : f32
    %86 = vector.broadcast %cst_105 : f32 to vector<7x448xf32>
    %87 = arith.maximumf %85, %86 : vector<7x448xf32>
    %c0_106 = arith.constant 0 : index
    %c0_107 = arith.constant 0 : index
    %88 = vector.load %arg11[%c0_106, %c0_107] : memref<8x448xf32, #tpu.memory_space<vmem>>, vector<7x448xf32>
    tpu.vector_store %arg11[%c0_106, %c0_107], %87 {strides = array<i32>} : memref<8x448xf32, #tpu.memory_space<vmem>>, vector<7x448xf32>,
    %cst_108 = arith.constant 0.000000e+00 : f32
    %89 = vector.broadcast %cst_108 : f32 to vector<1x448xf32>
    %c7 = arith.constant 7 : index
    %c0_109 = arith.constant 0 : index
    %90 = vector.load %arg11[%c7, %c0_109] : memref<8x448xf32, #tpu.memory_space<vmem>>, vector<1x448xf32>
    tpu.vector_store %arg11[%c7, %c0_109], %89 {strides = array<i32>} : memref<8x448xf32, #tpu.memory_space<vmem>>, vector<1x448xf32>,
    %c0_110 = arith.constant 0 : index
    %c2_111 = arith.constant 2 : index
    %c0_112 = arith.constant 0 : index
    %c0_113 = arith.constant 0 : index
    %91 = vector.load %arg1[%c0_110, %c2_111, %c0_112, %c0_113] : memref<1x4x8x32xf32, #tpu.memory_space<vmem>>, vector<1x1x8x32xf32>
    %92 = vector.shape_cast %91 : vector<1x1x8x32xf32> to vector<8x32xf32>
    %93 = vector.extract_strided_slice %92 {offsets = [0, 0], sizes = [7, 32], strides = [1, 1]} : vector<8x32xf32> to vector<7x32xf32>
    %c0_114 = arith.constant 0 : index
    %c0_115 = arith.constant 0 : index
    %c0_116 = arith.constant 0 : index
    %c0_117 = arith.constant 0 : index
    %94 = vector.load %arg2[%c0_114, %c0_115, %c0_116, %c0_117] : memref<3x2x32x448xf32, #tpu.memory_space<vmem>>, vector<1x1x32x448xf32>
    %95 = vector.shape_cast %94 : vector<1x1x32x448xf32> to vector<32x448xf32>
    %cst_118 = arith.constant dense<0.000000e+00> : vector<7x448xf32>
    %96 = tpu.matmul %93, %95, %cst_118 {dimension_numbers = #tpu.dot_dimension_numbers<[1], [0], [0], [1], [0, 0, 1, 1], [], []>} : vector<7x32xf32>, vector<32x448xf32>, vector<7x448xf32> -> vector<7x448xf32>
    %c0_119 = arith.constant 0 : index
    %c3_120 = arith.constant 3 : index
    %c0_121 = arith.constant 0 : index
    %c0_122 = arith.constant 0 : index
    %97 = vector.load %arg1[%c0_119, %c3_120, %c0_121, %c0_122] : memref<1x4x8x32xf32, #tpu.memory_space<vmem>>, vector<1x1x8x32xf32>
    %98 = vector.shape_cast %97 : vector<1x1x8x32xf32> to vector<8x32xf32>
    %99 = vector.extract_strided_slice %98 {offsets = [0, 0], sizes = [7, 32], strides = [1, 1]} : vector<8x32xf32> to vector<7x32xf32>
    %c1_123 = arith.constant 1 : index
    %c0_124 = arith.constant 0 : index
    %c0_125 = arith.constant 0 : index
    %c0_126 = arith.constant 0 : index
    %100 = vector.load %arg2[%c1_123, %c0_124, %c0_125, %c0_126] : memref<3x2x32x448xf32, #tpu.memory_space<vmem>>, vector<1x1x32x448xf32>
    %101 = vector.shape_cast %100 : vector<1x1x32x448xf32> to vector<32x448xf32>
    %cst_127 = arith.constant dense<0.000000e+00> : vector<7x448xf32>
    %102 = tpu.matmul %99, %101, %cst_127 {dimension_numbers = #tpu.dot_dimension_numbers<[1], [0], [0], [1], [0, 0, 1, 1], [], []>} : vector<7x32xf32>, vector<32x448xf32>, vector<7x448xf32> -> vector<7x448xf32>
    %103 = arith.addf %96, %102 : vector<7x448xf32>
    %c0_128 = arith.constant 0 : index
    %c0_129 = arith.constant 0 : index
    %c0_130 = arith.constant 0 : index
    %c0_131 = arith.constant 0 : index
    %104 = vector.load %arg1[%c0_128, %c0_129, %c0_130, %c0_131] : memref<1x4x8x32xf32, #tpu.memory_space<vmem>>, vector<1x1x8x32xf32>
    %105 = vector.shape_cast %104 : vector<1x1x8x32xf32> to vector<8x32xf32>
    %106 = vector.extract_strided_slice %105 {offsets = [1, 0], sizes = [7, 32], strides = [1, 1]} : vector<8x32xf32> to vector<7x32xf32>
    %c2_132 = arith.constant 2 : index
    %c0_133 = arith.constant 0 : index
    %c0_134 = arith.constant 0 : index
    %c0_135 = arith.constant 0 : index
    %107 = vector.load %arg2[%c2_132, %c0_133, %c0_134, %c0_135] : memref<3x2x32x448xf32, #tpu.memory_space<vmem>>, vector<1x1x32x448xf32>
    %108 = vector.shape_cast %107 : vector<1x1x32x448xf32> to vector<32x448xf32>
    %cst_136 = arith.constant dense<0.000000e+00> : vector<7x448xf32>
    %109 = tpu.matmul %106, %108, %cst_136 {dimension_numbers = #tpu.dot_dimension_numbers<[1], [0], [0], [1], [0, 0, 1, 1], [], []>} : vector<7x32xf32>, vector<32x448xf32>, vector<7x448xf32> -> vector<7x448xf32>
    %110 = arith.addf %103, %109 : vector<7x448xf32>
    %c0_137 = arith.constant 0 : index
    %c2_138 = arith.constant 2 : index
    %c0_139 = arith.constant 0 : index
    %c0_140 = arith.constant 0 : index
    %111 = vector.load %arg1[%c0_137, %c2_138, %c0_139, %c0_140] : memref<1x4x8x32xf32, #tpu.memory_space<vmem>>, vector<1x1x8x32xf32>
    %112 = vector.shape_cast %111 : vector<1x1x8x32xf32> to vector<8x32xf32>
    %113 = vector.extract_strided_slice %112 {offsets = [0, 0], sizes = [7, 32], strides = [1, 1]} : vector<8x32xf32> to vector<7x32xf32>
    %c0_141 = arith.constant 0 : index
    %c1_142 = arith.constant 1 : index
    %c0_143 = arith.constant 0 : index
    %c0_144 = arith.constant 0 : index
    %114 = vector.load %arg2[%c0_141, %c1_142, %c0_143, %c0_144] : memref<3x2x32x448xf32, #tpu.memory_space<vmem>>, vector<1x1x32x448xf32>
    %115 = vector.shape_cast %114 : vector<1x1x32x448xf32> to vector<32x448xf32>
    %cst_145 = arith.constant dense<0.000000e+00> : vector<7x448xf32>
    %116 = tpu.matmul %113, %115, %cst_145 {dimension_numbers = #tpu.dot_dimension_numbers<[1], [0], [0], [1], [0, 0, 1, 1], [], []>} : vector<7x32xf32>, vector<32x448xf32>, vector<7x448xf32> -> vector<7x448xf32>
    %c0_146 = arith.constant 0 : index
    %c3_147 = arith.constant 3 : index
    %c0_148 = arith.constant 0 : index
    %c0_149 = arith.constant 0 : index
    %117 = vector.load %arg1[%c0_146, %c3_147, %c0_148, %c0_149] : memref<1x4x8x32xf32, #tpu.memory_space<vmem>>, vector<1x1x8x32xf32>
    %118 = vector.shape_cast %117 : vector<1x1x8x32xf32> to vector<8x32xf32>
    %119 = vector.extract_strided_slice %118 {offsets = [0, 0], sizes = [7, 32], strides = [1, 1]} : vector<8x32xf32> to vector<7x32xf32>
    %c1_150 = arith.constant 1 : index
    %c1_151 = arith.constant 1 : index
    %c0_152 = arith.constant 0 : index
    %c0_153 = arith.constant 0 : index
    %120 = vector.load %arg2[%c1_150, %c1_151, %c0_152, %c0_153] : memref<3x2x32x448xf32, #tpu.memory_space<vmem>>, vector<1x1x32x448xf32>
    %121 = vector.shape_cast %120 : vector<1x1x32x448xf32> to vector<32x448xf32>
    %cst_154 = arith.constant dense<0.000000e+00> : vector<7x448xf32>
    %122 = tpu.matmul %119, %121, %cst_154 {dimension_numbers = #tpu.dot_dimension_numbers<[1], [0], [0], [1], [0, 0, 1, 1], [], []>} : vector<7x32xf32>, vector<32x448xf32>, vector<7x448xf32> -> vector<7x448xf32>
    %123 = arith.addf %116, %122 : vector<7x448xf32>
    %c0_155 = arith.constant 0 : index
    %c0_156 = arith.constant 0 : index
    %c0_157 = arith.constant 0 : index
    %c0_158 = arith.constant 0 : index
    %124 = vector.load %arg1[%c0_155, %c0_156, %c0_157, %c0_158] : memref<1x4x8x32xf32, #tpu.memory_space<vmem>>, vector<1x1x8x32xf32>
    %125 = vector.shape_cast %124 : vector<1x1x8x32xf32> to vector<8x32xf32>
    %126 = vector.extract_strided_slice %125 {offsets = [1, 0], sizes = [7, 32], strides = [1, 1]} : vector<8x32xf32> to vector<7x32xf32>
    %c2_159 = arith.constant 2 : index
    %c1_160 = arith.constant 1 : index
    %c0_161 = arith.constant 0 : index
    %c0_162 = arith.constant 0 : index
    %127 = vector.load %arg2[%c2_159, %c1_160, %c0_161, %c0_162] : memref<3x2x32x448xf32, #tpu.memory_space<vmem>>, vector<1x1x32x448xf32>
    %128 = vector.shape_cast %127 : vector<1x1x32x448xf32> to vector<32x448xf32>
    %cst_163 = arith.constant dense<0.000000e+00> : vector<7x448xf32>
    %129 = tpu.matmul %126, %128, %cst_163 {dimension_numbers = #tpu.dot_dimension_numbers<[1], [0], [0], [1], [0, 0, 1, 1], [], []>} : vector<7x32xf32>, vector<32x448xf32>, vector<7x448xf32> -> vector<7x448xf32>
    %130 = arith.addf %123, %129 : vector<7x448xf32>
    %131 = arith.maximumf %110, %130 : vector<7x448xf32>
    %c0_164 = arith.constant 0 : index
    %c3_165 = arith.constant 3 : index
    %c0_166 = arith.constant 0 : index
    %c0_167 = arith.constant 0 : index
    %132 = vector.load %arg1[%c0_164, %c3_165, %c0_166, %c0_167] : memref<1x4x8x32xf32, #tpu.memory_space<vmem>>, vector<1x1x8x32xf32>
    %133 = vector.shape_cast %132 : vector<1x1x8x32xf32> to vector<8x32xf32>
    %134 = vector.extract_strided_slice %133 {offsets = [0, 0], sizes = [7, 32], strides = [1, 1]} : vector<8x32xf32> to vector<7x32xf32>
    %c0_168 = arith.constant 0 : index
    %c0_169 = arith.constant 0 : index
    %c0_170 = arith.constant 0 : index
    %c0_171 = arith.constant 0 : index
    %135 = vector.load %arg2[%c0_168, %c0_169, %c0_170, %c0_171] : memref<3x2x32x448xf32, #tpu.memory_space<vmem>>, vector<1x1x32x448xf32>
    %136 = vector.shape_cast %135 : vector<1x1x32x448xf32> to vector<32x448xf32>
    %cst_172 = arith.constant dense<0.000000e+00> : vector<7x448xf32>
    %137 = tpu.matmul %134, %136, %cst_172 {dimension_numbers = #tpu.dot_dimension_numbers<[1], [0], [0], [1], [0, 0, 1, 1], [], []>} : vector<7x32xf32>, vector<32x448xf32>, vector<7x448xf32> -> vector<7x448xf32>
    %c0_173 = arith.constant 0 : index
    %c0_174 = arith.constant 0 : index
    %c0_175 = arith.constant 0 : index
    %c0_176 = arith.constant 0 : index
    %138 = vector.load %arg1[%c0_173, %c0_174, %c0_175, %c0_176] : memref<1x4x8x32xf32, #tpu.memory_space<vmem>>, vector<1x1x8x32xf32>
    %139 = vector.shape_cast %138 : vector<1x1x8x32xf32> to vector<8x32xf32>
    %140 = vector.extract_strided_slice %139 {offsets = [1, 0], sizes = [7, 32], strides = [1, 1]} : vector<8x32xf32> to vector<7x32xf32>
    %c1_177 = arith.constant 1 : index
    %c0_178 = arith.constant 0 : index
    %c0_179 = arith.constant 0 : index
    %c0_180 = arith.constant 0 : index
    %141 = vector.load %arg2[%c1_177, %c0_178, %c0_179, %c0_180] : memref<3x2x32x448xf32, #tpu.memory_space<vmem>>, vector<1x1x32x448xf32>
    %142 = vector.shape_cast %141 : vector<1x1x32x448xf32> to vector<32x448xf32>
    %cst_181 = arith.constant dense<0.000000e+00> : vector<7x448xf32>
    %143 = tpu.matmul %140, %142, %cst_181 {dimension_numbers = #tpu.dot_dimension_numbers<[1], [0], [0], [1], [0, 0, 1, 1], [], []>} : vector<7x32xf32>, vector<32x448xf32>, vector<7x448xf32> -> vector<7x448xf32>
    %144 = arith.addf %137, %143 : vector<7x448xf32>
    %c0_182 = arith.constant 0 : index
    %c1_183 = arith.constant 1 : index
    %c0_184 = arith.constant 0 : index
    %c0_185 = arith.constant 0 : index
    %145 = vector.load %arg1[%c0_182, %c1_183, %c0_184, %c0_185] : memref<1x4x8x32xf32, #tpu.memory_space<vmem>>, vector<1x1x8x32xf32>
    %146 = vector.shape_cast %145 : vector<1x1x8x32xf32> to vector<8x32xf32>
    %147 = vector.extract_strided_slice %146 {offsets = [1, 0], sizes = [7, 32], strides = [1, 1]} : vector<8x32xf32> to vector<7x32xf32>
    %c2_186 = arith.constant 2 : index
    %c0_187 = arith.constant 0 : index
    %c0_188 = arith.constant 0 : index
    %c0_189 = arith.constant 0 : index
    %148 = vector.load %arg2[%c2_186, %c0_187, %c0_188, %c0_189] : memref<3x2x32x448xf32, #tpu.memory_space<vmem>>, vector<1x1x32x448xf32>
    %149 = vector.shape_cast %148 : vector<1x1x32x448xf32> to vector<32x448xf32>
    %cst_190 = arith.constant dense<0.000000e+00> : vector<7x448xf32>
    %150 = tpu.matmul %147, %149, %cst_190 {dimension_numbers = #tpu.dot_dimension_numbers<[1], [0], [0], [1], [0, 0, 1, 1], [], []>} : vector<7x32xf32>, vector<32x448xf32>, vector<7x448xf32> -> vector<7x448xf32>
    %151 = arith.addf %144, %150 : vector<7x448xf32>
    %152 = arith.maximumf %131, %151 : vector<7x448xf32>
    %c0_191 = arith.constant 0 : index
    %c3_192 = arith.constant 3 : index
    %c0_193 = arith.constant 0 : index
    %c0_194 = arith.constant 0 : index
    %153 = vector.load %arg1[%c0_191, %c3_192, %c0_193, %c0_194] : memref<1x4x8x32xf32, #tpu.memory_space<vmem>>, vector<1x1x8x32xf32>
    %154 = vector.shape_cast %153 : vector<1x1x8x32xf32> to vector<8x32xf32>
    %155 = vector.extract_strided_slice %154 {offsets = [0, 0], sizes = [7, 32], strides = [1, 1]} : vector<8x32xf32> to vector<7x32xf32>
    %c0_195 = arith.constant 0 : index
    %c1_196 = arith.constant 1 : index
    %c0_197 = arith.constant 0 : index
    %c0_198 = arith.constant 0 : index
    %156 = vector.load %arg2[%c0_195, %c1_196, %c0_197, %c0_198] : memref<3x2x32x448xf32, #tpu.memory_space<vmem>>, vector<1x1x32x448xf32>
    %157 = vector.shape_cast %156 : vector<1x1x32x448xf32> to vector<32x448xf32>
    %cst_199 = arith.constant dense<0.000000e+00> : vector<7x448xf32>
    %158 = tpu.matmul %155, %157, %cst_199 {dimension_numbers = #tpu.dot_dimension_numbers<[1], [0], [0], [1], [0, 0, 1, 1], [], []>} : vector<7x32xf32>, vector<32x448xf32>, vector<7x448xf32> -> vector<7x448xf32>
    %c0_200 = arith.constant 0 : index
    %c0_201 = arith.constant 0 : index
    %c0_202 = arith.constant 0 : index
    %c0_203 = arith.constant 0 : index
    %159 = vector.load %arg1[%c0_200, %c0_201, %c0_202, %c0_203] : memref<1x4x8x32xf32, #tpu.memory_space<vmem>>, vector<1x1x8x32xf32>
    %160 = vector.shape_cast %159 : vector<1x1x8x32xf32> to vector<8x32xf32>
    %161 = vector.extract_strided_slice %160 {offsets = [1, 0], sizes = [7, 32], strides = [1, 1]} : vector<8x32xf32> to vector<7x32xf32>
    %c1_204 = arith.constant 1 : index
    %c1_205 = arith.constant 1 : index
    %c0_206 = arith.constant 0 : index
    %c0_207 = arith.constant 0 : index
    %162 = vector.load %arg2[%c1_204, %c1_205, %c0_206, %c0_207] : memref<3x2x32x448xf32, #tpu.memory_space<vmem>>, vector<1x1x32x448xf32>
    %163 = vector.shape_cast %162 : vector<1x1x32x448xf32> to vector<32x448xf32>
    %cst_208 = arith.constant dense<0.000000e+00> : vector<7x448xf32>
    %164 = tpu.matmul %161, %163, %cst_208 {dimension_numbers = #tpu.dot_dimension_numbers<[1], [0], [0], [1], [0, 0, 1, 1], [], []>} : vector<7x32xf32>, vector<32x448xf32>, vector<7x448xf32> -> vector<7x448xf32>
    %165 = arith.addf %158, %164 : vector<7x448xf32>
    %c0_209 = arith.constant 0 : index
    %c1_210 = arith.constant 1 : index
    %c0_211 = arith.constant 0 : index
    %c0_212 = arith.constant 0 : index
    %166 = vector.load %arg1[%c0_209, %c1_210, %c0_211, %c0_212] : memref<1x4x8x32xf32, #tpu.memory_space<vmem>>, vector<1x1x8x32xf32>
    %167 = vector.shape_cast %166 : vector<1x1x8x32xf32> to vector<8x32xf32>
    %168 = vector.extract_strided_slice %167 {offsets = [1, 0], sizes = [7, 32], strides = [1, 1]} : vector<8x32xf32> to vector<7x32xf32>
    %c2_213 = arith.constant 2 : index
    %c1_214 = arith.constant 1 : index
    %c0_215 = arith.constant 0 : index
    %c0_216 = arith.constant 0 : index
    %169 = vector.load %arg2[%c2_213, %c1_214, %c0_215, %c0_216] : memref<3x2x32x448xf32, #tpu.memory_space<vmem>>, vector<1x1x32x448xf32>
    %170 = vector.shape_cast %169 : vector<1x1x32x448xf32> to vector<32x448xf32>
    %cst_217 = arith.constant dense<0.000000e+00> : vector<7x448xf32>
    %171 = tpu.matmul %168, %170, %cst_217 {dimension_numbers = #tpu.dot_dimension_numbers<[1], [0], [0], [1], [0, 0, 1, 1], [], []>} : vector<7x32xf32>, vector<32x448xf32>, vector<7x448xf32> -> vector<7x448xf32>
    %172 = arith.addf %165, %171 : vector<7x448xf32>
    %173 = arith.maximumf %152, %172 : vector<7x448xf32>
    %c0_218 = arith.constant 0 : index
    %c0_219 = arith.constant 0 : index
    %174 = vector.load %arg3[%c0_218, %c0_219] : memref<1x448xf32, #tpu.memory_space<vmem>>, vector<1x448xf32>
    %175 = vector.broadcast %174 : vector<1x448xf32> to vector<7x448xf32>
    %176 = arith.addf %173, %175 : vector<7x448xf32>
    %cst_220 = arith.constant 0.000000e+00 : f32
    %177 = vector.broadcast %cst_220 : f32 to vector<7x448xf32>
    %178 = arith.maximumf %176, %177 : vector<7x448xf32>
    %c1_221 = arith.constant 1 : index
    %c0_222 = arith.constant 0 : index
    %179 = vector.load %arg12[%c1_221, %c0_222] : memref<8x448xf32, #tpu.memory_space<vmem>>, vector<7x448xf32>
    tpu.vector_store %arg12[%c1_221, %c0_222], %178 {strides = array<i32>} : memref<8x448xf32, #tpu.memory_space<vmem>>, vector<7x448xf32>,
    %cst_223 = arith.constant 0.000000e+00 : f32
    %180 = vector.broadcast %cst_223 : f32 to vector<1x448xf32>
    %c0_224 = arith.constant 0 : index
    %c0_225 = arith.constant 0 : index
    %181 = vector.load %arg12[%c0_224, %c0_225] : memref<8x448xf32, #tpu.memory_space<vmem>>, vector<1x448xf32>
    tpu.vector_store %arg12[%c0_224, %c0_225], %180 {strides = array<i32>} : memref<8x448xf32, #tpu.memory_space<vmem>>, vector<1x448xf32>,
    %c0_226 = arith.constant 0 : index
    %c0_227 = arith.constant 0 : index
    %182 = vector.load %arg12[%c0_226, %c0_227] : memref<8x448xf32, #tpu.memory_space<vmem>>, vector<7x448xf32>
    %c0_228 = arith.constant 0 : index
    %c0_229 = arith.constant 0 : index
    %c0_230 = arith.constant 0 : index
    %c0_231 = arith.constant 0 : index
    %183 = vector.load %arg4[%c0_228, %c0_229, %c0_230, %c0_231] : memref<3x2x448x224xf32, #tpu.memory_space<vmem>>, vector<1x1x448x224xf32>
    %184 = vector.shape_cast %183 : vector<1x1x448x224xf32> to vector<448x224xf32>
    %cst_232 = arith.constant dense<0.000000e+00> : vector<7x224xf32>
    %185 = tpu.matmul %182, %184, %cst_232 {dimension_numbers = #tpu.dot_dimension_numbers<[1], [0], [0], [1], [0, 0, 1, 1], [], []>} : vector<7x448xf32>, vector<448x224xf32>, vector<7x224xf32> -> vector<7x224xf32>
    %c0_233 = arith.constant 0 : index
    %c0_234 = arith.constant 0 : index
    %186 = vector.load %arg11[%c0_233, %c0_234] : memref<8x448xf32, #tpu.memory_space<vmem>>, vector<7x448xf32>
    %c1_235 = arith.constant 1 : index
    %c0_236 = arith.constant 0 : index
    %c0_237 = arith.constant 0 : index
    %c0_238 = arith.constant 0 : index
    %187 = vector.load %arg4[%c1_235, %c0_236, %c0_237, %c0_238] : memref<3x2x448x224xf32, #tpu.memory_space<vmem>>, vector<1x1x448x224xf32>
    %188 = vector.shape_cast %187 : vector<1x1x448x224xf32> to vector<448x224xf32>
    %cst_239 = arith.constant dense<0.000000e+00> : vector<7x224xf32>
    %189 = tpu.matmul %186, %188, %cst_239 {dimension_numbers = #tpu.dot_dimension_numbers<[1], [0], [0], [1], [0, 0, 1, 1], [], []>} : vector<7x448xf32>, vector<448x224xf32>, vector<7x224xf32> -> vector<7x224xf32>
    %190 = arith.addf %185, %189 : vector<7x224xf32>
    %c1_240 = arith.constant 1 : index
    %c0_241 = arith.constant 0 : index
    %191 = vector.load %arg12[%c1_240, %c0_241] : memref<8x448xf32, #tpu.memory_space<vmem>>, vector<7x448xf32>
    %c2_242 = arith.constant 2 : index
    %c0_243 = arith.constant 0 : index
    %c0_244 = arith.constant 0 : index
    %c0_245 = arith.constant 0 : index
    %192 = vector.load %arg4[%c2_242, %c0_243, %c0_244, %c0_245] : memref<3x2x448x224xf32, #tpu.memory_space<vmem>>, vector<1x1x448x224xf32>
    %193 = vector.shape_cast %192 : vector<1x1x448x224xf32> to vector<448x224xf32>
    %cst_246 = arith.constant dense<0.000000e+00> : vector<7x224xf32>
    %194 = tpu.matmul %191, %193, %cst_246 {dimension_numbers = #tpu.dot_dimension_numbers<[1], [0], [0], [1], [0, 0, 1, 1], [], []>} : vector<7x448xf32>, vector<448x224xf32>, vector<7x224xf32> -> vector<7x224xf32>
    %195 = arith.addf %190, %194 : vector<7x224xf32>
    %c0_247 = arith.constant 0 : index
    %c0_248 = arith.constant 0 : index
    %196 = vector.load %arg12[%c0_247, %c0_248] : memref<8x448xf32, #tpu.memory_space<vmem>>, vector<7x448xf32>
    %c0_249 = arith.constant 0 : index
    %c1_250 = arith.constant 1 : index
    %c0_251 = arith.constant 0 : index
    %c0_252 = arith.constant 0 : index
    %197 = vector.load %arg4[%c0_249, %c1_250, %c0_251, %c0_252] : memref<3x2x448x224xf32, #tpu.memory_space<vmem>>, vector<1x1x448x224xf32>
    %198 = vector.shape_cast %197 : vector<1x1x448x224xf32> to vector<448x224xf32>
    %cst_253 = arith.constant dense<0.000000e+00> : vector<7x224xf32>
    %199 = tpu.matmul %196, %198, %cst_253 {dimension_numbers = #tpu.dot_dimension_numbers<[1], [0], [0], [1], [0, 0, 1, 1], [], []>} : vector<7x448xf32>, vector<448x224xf32>, vector<7x224xf32> -> vector<7x224xf32>
    %c0_254 = arith.constant 0 : index
    %c0_255 = arith.constant 0 : index
    %200 = vector.load %arg11[%c0_254, %c0_255] : memref<8x448xf32, #tpu.memory_space<vmem>>, vector<7x448xf32>
    %c1_256 = arith.constant 1 : index
    %c1_257 = arith.constant 1 : index
    %c0_258 = arith.constant 0 : index
    %c0_259 = arith.constant 0 : index
    %201 = vector.load %arg4[%c1_256, %c1_257, %c0_258, %c0_259] : memref<3x2x448x224xf32, #tpu.memory_space<vmem>>, vector<1x1x448x224xf32>
    %202 = vector.shape_cast %201 : vector<1x1x448x224xf32> to vector<448x224xf32>
    %cst_260 = arith.constant dense<0.000000e+00> : vector<7x224xf32>
    %203 = tpu.matmul %200, %202, %cst_260 {dimension_numbers = #tpu.dot_dimension_numbers<[1], [0], [0], [1], [0, 0, 1, 1], [], []>} : vector<7x448xf32>, vector<448x224xf32>, vector<7x224xf32> -> vector<7x224xf32>
    %204 = arith.addf %199, %203 : vector<7x224xf32>
    %c1_261 = arith.constant 1 : index
    %c0_262 = arith.constant 0 : index
    %205 = vector.load %arg12[%c1_261, %c0_262] : memref<8x448xf32, #tpu.memory_space<vmem>>, vector<7x448xf32>
    %c2_263 = arith.constant 2 : index
    %c1_264 = arith.constant 1 : index
    %c0_265 = arith.constant 0 : index
    %c0_266 = arith.constant 0 : index
    %206 = vector.load %arg4[%c2_263, %c1_264, %c0_265, %c0_266] : memref<3x2x448x224xf32, #tpu.memory_space<vmem>>, vector<1x1x448x224xf32>
    %207 = vector.shape_cast %206 : vector<1x1x448x224xf32> to vector<448x224xf32>
    %cst_267 = arith.constant dense<0.000000e+00> : vector<7x224xf32>
    %208 = tpu.matmul %205, %207, %cst_267 {dimension_numbers = #tpu.dot_dimension_numbers<[1], [0], [0], [1], [0, 0, 1, 1], [], []>} : vector<7x448xf32>, vector<448x224xf32>, vector<7x224xf32> -> vector<7x224xf32>
    %209 = arith.addf %204, %208 : vector<7x224xf32>
    %210 = arith.maximumf %195, %209 : vector<7x224xf32>
    %c0_268 = arith.constant 0 : index
    %c0_269 = arith.constant 0 : index
    %211 = vector.load %arg11[%c0_268, %c0_269] : memref<8x448xf32, #tpu.memory_space<vmem>>, vector<7x448xf32>
    %c0_270 = arith.constant 0 : index
    %c0_271 = arith.constant 0 : index
    %c0_272 = arith.constant 0 : index
    %c0_273 = arith.constant 0 : index
    %212 = vector.load %arg4[%c0_270, %c0_271, %c0_272, %c0_273] : memref<3x2x448x224xf32, #tpu.memory_space<vmem>>, vector<1x1x448x224xf32>
    %213 = vector.shape_cast %212 : vector<1x1x448x224xf32> to vector<448x224xf32>
    %cst_274 = arith.constant dense<0.000000e+00> : vector<7x224xf32>
    %214 = tpu.matmul %211, %213, %cst_274 {dimension_numbers = #tpu.dot_dimension_numbers<[1], [0], [0], [1], [0, 0, 1, 1], [], []>} : vector<7x448xf32>, vector<448x224xf32>, vector<7x224xf32> -> vector<7x224xf32>
    %c1_275 = arith.constant 1 : index
    %c0_276 = arith.constant 0 : index
    %215 = vector.load %arg12[%c1_275, %c0_276] : memref<8x448xf32, #tpu.memory_space<vmem>>, vector<7x448xf32>
    %c1_277 = arith.constant 1 : index
    %c0_278 = arith.constant 0 : index
    %c0_279 = arith.constant 0 : index
    %c0_280 = arith.constant 0 : index
    %216 = vector.load %arg4[%c1_277, %c0_278, %c0_279, %c0_280] : memref<3x2x448x224xf32, #tpu.memory_space<vmem>>, vector<1x1x448x224xf32>
    %217 = vector.shape_cast %216 : vector<1x1x448x224xf32> to vector<448x224xf32>
    %cst_281 = arith.constant dense<0.000000e+00> : vector<7x224xf32>
    %218 = tpu.matmul %215, %217, %cst_281 {dimension_numbers = #tpu.dot_dimension_numbers<[1], [0], [0], [1], [0, 0, 1, 1], [], []>} : vector<7x448xf32>, vector<448x224xf32>, vector<7x224xf32> -> vector<7x224xf32>
    %219 = arith.addf %214, %218 : vector<7x224xf32>
    %c1_282 = arith.constant 1 : index
    %c0_283 = arith.constant 0 : index
    %220 = vector.load %arg11[%c1_282, %c0_283] : memref<8x448xf32, #tpu.memory_space<vmem>>, vector<7x448xf32>
    %c2_284 = arith.constant 2 : index
    %c0_285 = arith.constant 0 : index
    %c0_286 = arith.constant 0 : index
    %c0_287 = arith.constant 0 : index
    %221 = vector.load %arg4[%c2_284, %c0_285, %c0_286, %c0_287] : memref<3x2x448x224xf32, #tpu.memory_space<vmem>>, vector<1x1x448x224xf32>
    %222 = vector.shape_cast %221 : vector<1x1x448x224xf32> to vector<448x224xf32>
    %cst_288 = arith.constant dense<0.000000e+00> : vector<7x224xf32>
    %223 = tpu.matmul %220, %222, %cst_288 {dimension_numbers = #tpu.dot_dimension_numbers<[1], [0], [0], [1], [0, 0, 1, 1], [], []>} : vector<7x448xf32>, vector<448x224xf32>, vector<7x224xf32> -> vector<7x224xf32>
    %224 = arith.addf %219, %223 : vector<7x224xf32>
    %225 = arith.maximumf %210, %224 : vector<7x224xf32>
    %c0_289 = arith.constant 0 : index
    %c0_290 = arith.constant 0 : index
    %226 = vector.load %arg11[%c0_289, %c0_290] : memref<8x448xf32, #tpu.memory_space<vmem>>, vector<7x448xf32>
    %c0_291 = arith.constant 0 : index
    %c1_292 = arith.constant 1 : index
    %c0_293 = arith.constant 0 : index
    %c0_294 = arith.constant 0 : index
    %227 = vector.load %arg4[%c0_291, %c1_292, %c0_293, %c0_294] : memref<3x2x448x224xf32, #tpu.memory_space<vmem>>, vector<1x1x448x224xf32>
    %228 = vector.shape_cast %227 : vector<1x1x448x224xf32> to vector<448x224xf32>
    %cst_295 = arith.constant dense<0.000000e+00> : vector<7x224xf32>
    %229 = tpu.matmul %226, %228, %cst_295 {dimension_numbers = #tpu.dot_dimension_numbers<[1], [0], [0], [1], [0, 0, 1, 1], [], []>} : vector<7x448xf32>, vector<448x224xf32>, vector<7x224xf32> -> vector<7x224xf32>
    %c1_296 = arith.constant 1 : index
    %c0_297 = arith.constant 0 : index
    %230 = vector.load %arg12[%c1_296, %c0_297] : memref<8x448xf32, #tpu.memory_space<vmem>>, vector<7x448xf32>
    %c1_298 = arith.constant 1 : index
    %c1_299 = arith.constant 1 : index
    %c0_300 = arith.constant 0 : index
    %c0_301 = arith.constant 0 : index
    %231 = vector.load %arg4[%c1_298, %c1_299, %c0_300, %c0_301] : memref<3x2x448x224xf32, #tpu.memory_space<vmem>>, vector<1x1x448x224xf32>
    %232 = vector.shape_cast %231 : vector<1x1x448x224xf32> to vector<448x224xf32>
    %cst_302 = arith.constant dense<0.000000e+00> : vector<7x224xf32>
    %233 = tpu.matmul %230, %232, %cst_302 {dimension_numbers = #tpu.dot_dimension_numbers<[1], [0], [0], [1], [0, 0, 1, 1], [], []>} : vector<7x448xf32>, vector<448x224xf32>, vector<7x224xf32> -> vector<7x224xf32>
    %234 = arith.addf %229, %233 : vector<7x224xf32>
    %c1_303 = arith.constant 1 : index
    %c0_304 = arith.constant 0 : index
    %235 = vector.load %arg11[%c1_303, %c0_304] : memref<8x448xf32, #tpu.memory_space<vmem>>, vector<7x448xf32>
    %c2_305 = arith.constant 2 : index
    %c1_306 = arith.constant 1 : index
    %c0_307 = arith.constant 0 : index
    %c0_308 = arith.constant 0 : index
    %236 = vector.load %arg4[%c2_305, %c1_306, %c0_307, %c0_308] : memref<3x2x448x224xf32, #tpu.memory_space<vmem>>, vector<1x1x448x224xf32>
    %237 = vector.shape_cast %236 : vector<1x1x448x224xf32> to vector<448x224xf32>
    %cst_309 = arith.constant dense<0.000000e+00> : vector<7x224xf32>
    %238 = tpu.matmul %235, %237, %cst_309 {dimension_numbers = #tpu.dot_dimension_numbers<[1], [0], [0], [1], [0, 0, 1, 1], [], []>} : vector<7x448xf32>, vector<448x224xf32>, vector<7x224xf32> -> vector<7x224xf32>
    %239 = arith.addf %234, %238 : vector<7x224xf32>
    %240 = arith.maximumf %225, %239 : vector<7x224xf32>
    %c0_310 = arith.constant 0 : index
    %c0_311 = arith.constant 0 : index
    %241 = vector.load %arg5[%c0_310, %c0_311] : memref<1x224xf32, #tpu.memory_space<vmem>>, vector<1x224xf32>
    %242 = vector.broadcast %241 : vector<1x224xf32> to vector<7x224xf32>
    %243 = arith.addf %240, %242 : vector<7x224xf32>
    %cst_312 = arith.constant 0.000000e+00 : f32
    %244 = vector.broadcast %cst_312 : f32 to vector<7x224xf32>
    %245 = arith.maximumf %243, %244 : vector<7x224xf32>
    %246 = vector.extract_strided_slice %245 {offsets = [0, 0], sizes = [1, 224], strides = [1, 1]} : vector<7x224xf32> to vector<1x224xf32>
    %c0_313 = arith.constant 0 : index
    %c0_314 = arith.constant 0 : index
    %c0_315 = arith.constant 0 : index
    %247 = vector.load %arg6[%c0_313, %c0_314, %c0_315] : memref<7x224x64xf32, #tpu.memory_space<vmem>>, vector<1x224x64xf32>
    %248 = vector.shape_cast %247 : vector<1x224x64xf32> to vector<224x64xf32>
    %cst_316 = arith.constant dense<0.000000e+00> : vector<1x64xf32>
    %249 = tpu.matmul %246, %248, %cst_316 {dimension_numbers = #tpu.dot_dimension_numbers<[1], [0], [0], [1], [0, 0, 1, 1], [], []>} : vector<1x224xf32>, vector<224x64xf32>, vector<1x64xf32> -> vector<1x64xf32>
    %250 = vector.extract_strided_slice %245 {offsets = [1, 0], sizes = [1, 224], strides = [1, 1]} : vector<7x224xf32> to vector<1x224xf32>
    %c1_317 = arith.constant 1 : index
    %c0_318 = arith.constant 0 : index
    %c0_319 = arith.constant 0 : index
    %251 = vector.load %arg6[%c1_317, %c0_318, %c0_319] : memref<7x224x64xf32, #tpu.memory_space<vmem>>, vector<1x224x64xf32>
    %252 = vector.shape_cast %251 : vector<1x224x64xf32> to vector<224x64xf32>
    %cst_320 = arith.constant dense<0.000000e+00> : vector<1x64xf32>
    %253 = tpu.matmul %250, %252, %cst_320 {dimension_numbers = #tpu.dot_dimension_numbers<[1], [0], [0], [1], [0, 0, 1, 1], [], []>} : vector<1x224xf32>, vector<224x64xf32>, vector<1x64xf32> -> vector<1x64xf32>
    %254 = arith.addf %249, %253 : vector<1x64xf32>
    %255 = vector.extract_strided_slice %245 {offsets = [2, 0], sizes = [1, 224], strides = [1, 1]} : vector<7x224xf32> to vector<1x224xf32>
    %c2_321 = arith.constant 2 : index
    %c0_322 = arith.constant 0 : index
    %c0_323 = arith.constant 0 : index
    %256 = vector.load %arg6[%c2_321, %c0_322, %c0_323] : memref<7x224x64xf32, #tpu.memory_space<vmem>>, vector<1x224x64xf32>
    %257 = vector.shape_cast %256 : vector<1x224x64xf32> to vector<224x64xf32>
    %cst_324 = arith.constant dense<0.000000e+00> : vector<1x64xf32>
    %258 = tpu.matmul %255, %257, %cst_324 {dimension_numbers = #tpu.dot_dimension_numbers<[1], [0], [0], [1], [0, 0, 1, 1], [], []>} : vector<1x224xf32>, vector<224x64xf32>, vector<1x64xf32> -> vector<1x64xf32>
    %259 = arith.addf %254, %258 : vector<1x64xf32>
    %260 = vector.extract_strided_slice %245 {offsets = [3, 0], sizes = [1, 224], strides = [1, 1]} : vector<7x224xf32> to vector<1x224xf32>
    %c3_325 = arith.constant 3 : index
    %c0_326 = arith.constant 0 : index
    %c0_327 = arith.constant 0 : index
    %261 = vector.load %arg6[%c3_325, %c0_326, %c0_327] : memref<7x224x64xf32, #tpu.memory_space<vmem>>, vector<1x224x64xf32>
    %262 = vector.shape_cast %261 : vector<1x224x64xf32> to vector<224x64xf32>
    %cst_328 = arith.constant dense<0.000000e+00> : vector<1x64xf32>
    %263 = tpu.matmul %260, %262, %cst_328 {dimension_numbers = #tpu.dot_dimension_numbers<[1], [0], [0], [1], [0, 0, 1, 1], [], []>} : vector<1x224xf32>, vector<224x64xf32>, vector<1x64xf32> -> vector<1x64xf32>
    %264 = arith.addf %259, %263 : vector<1x64xf32>
    %265 = vector.extract_strided_slice %245 {offsets = [4, 0], sizes = [1, 224], strides = [1, 1]} : vector<7x224xf32> to vector<1x224xf32>
    %c4 = arith.constant 4 : index
    %c0_329 = arith.constant 0 : index
    %c0_330 = arith.constant 0 : index
    %266 = vector.load %arg6[%c4, %c0_329, %c0_330] : memref<7x224x64xf32, #tpu.memory_space<vmem>>, vector<1x224x64xf32>
    %267 = vector.shape_cast %266 : vector<1x224x64xf32> to vector<224x64xf32>
    %cst_331 = arith.constant dense<0.000000e+00> : vector<1x64xf32>
    %268 = tpu.matmul %265, %267, %cst_331 {dimension_numbers = #tpu.dot_dimension_numbers<[1], [0], [0], [1], [0, 0, 1, 1], [], []>} : vector<1x224xf32>, vector<224x64xf32>, vector<1x64xf32> -> vector<1x64xf32>
    %269 = arith.addf %264, %268 : vector<1x64xf32>
    %270 = vector.extract_strided_slice %245 {offsets = [5, 0], sizes = [1, 224], strides = [1, 1]} : vector<7x224xf32> to vector<1x224xf32>
    %c5 = arith.constant 5 : index
    %c0_332 = arith.constant 0 : index
    %c0_333 = arith.constant 0 : index
    %271 = vector.load %arg6[%c5, %c0_332, %c0_333] : memref<7x224x64xf32, #tpu.memory_space<vmem>>, vector<1x224x64xf32>
    %272 = vector.shape_cast %271 : vector<1x224x64xf32> to vector<224x64xf32>
    %cst_334 = arith.constant dense<0.000000e+00> : vector<1x64xf32>
    %273 = tpu.matmul %270, %272, %cst_334 {dimension_numbers = #tpu.dot_dimension_numbers<[1], [0], [0], [1], [0, 0, 1, 1], [], []>} : vector<1x224xf32>, vector<224x64xf32>, vector<1x64xf32> -> vector<1x64xf32>
    %274 = arith.addf %269, %273 : vector<1x64xf32>
    %275 = vector.extract_strided_slice %245 {offsets = [6, 0], sizes = [1, 224], strides = [1, 1]} : vector<7x224xf32> to vector<1x224xf32>
    %c6 = arith.constant 6 : index
    %c0_335 = arith.constant 0 : index
    %c0_336 = arith.constant 0 : index
    %276 = vector.load %arg6[%c6, %c0_335, %c0_336] : memref<7x224x64xf32, #tpu.memory_space<vmem>>, vector<1x224x64xf32>
    %277 = vector.shape_cast %276 : vector<1x224x64xf32> to vector<224x64xf32>
    %cst_337 = arith.constant dense<0.000000e+00> : vector<1x64xf32>
    %278 = tpu.matmul %275, %277, %cst_337 {dimension_numbers = #tpu.dot_dimension_numbers<[1], [0], [0], [1], [0, 0, 1, 1], [], []>} : vector<1x224xf32>, vector<224x64xf32>, vector<1x64xf32> -> vector<1x64xf32>
    %279 = arith.addf %274, %278 : vector<1x64xf32>
    %c0_338 = arith.constant 0 : index
    %c0_339 = arith.constant 0 : index
    %280 = vector.load %arg7[%c0_338, %c0_339] : memref<1x64xf32, #tpu.memory_space<vmem>>, vector<1x64xf32>
    %281 = arith.addf %279, %280 : vector<1x64xf32>
    %cst_340 = arith.constant 0.000000e+00 : f32
    %282 = vector.broadcast %cst_340 : f32 to vector<1x64xf32>
    %283 = arith.maximumf %281, %282 : vector<1x64xf32>
    %c0_341 = arith.constant 0 : index
    %c0_342 = arith.constant 0 : index
    %284 = vector.load %arg8[%c0_341, %c0_342] : memref<64x10xf32, #tpu.memory_space<vmem>>, vector<64x10xf32>
    %cst_343 = arith.constant dense<0.000000e+00> : vector<1x10xf32>
    %285 = tpu.matmul %283, %284, %cst_343 {dimension_numbers = #tpu.dot_dimension_numbers<[1], [0], [0], [1], [0, 0, 1, 1], [], []>} : vector<1x64xf32>, vector<64x10xf32>, vector<1x10xf32> -> vector<1x10xf32>
    %c0_344 = arith.constant 0 : index
    %c0_345 = arith.constant 0 : index
    %286 = vector.load %arg9[%c0_344, %c0_345] : memref<1x10xf32, #tpu.memory_space<vmem>>, vector<1x10xf32>
    %287 = arith.addf %285, %286 : vector<1x10xf32>
    %c0_346 = arith.constant 0 : index
    %c0_347 = arith.constant 0 : index
    %c0_348 = arith.constant 0 : index
    %288 = vector.load %arg10[%c0_346, %c0_347, %c0_348] : memref<1x1x10xf32, #tpu.memory_space<vmem>>, vector<1x1x10xf32>
    %289 = vector.shape_cast %288 : vector<1x1x10xf32> to vector<1x10xf32>
    %290 = vector.shape_cast %287 : vector<1x10xf32> to vector<1x1x10xf32>
    tpu.vector_store %arg10[%c0_346, %c0_347, %c0_348], %290 {strides = array<i32>} : memref<1x1x10xf32, #tpu.memory_space<vmem>>, vector<1x1x10xf32>,
    return
  }
  func.func @transform_0(%arg0: i32) -> (i32, i32, i32, i32) {
    %c0_i32 = arith.constant 0 : i32
    %c0_i32_0 = arith.constant 0 : i32
    %c0_i32_1 = arith.constant 0 : i32
    %c0_i32_2 = arith.constant 0 : i32
    return %arg0, %c0_i32, %c0_i32_0, %c0_i32_1 : i32, i32, i32, i32
  }
  func.func @transform_1(%arg0: i32) -> (i32, i32, i32, i32) {
    %c0_i32 = arith.constant 0 : i32
    %c0_i32_0 = arith.constant 0 : i32
    %c0_i32_1 = arith.constant 0 : i32
    %c0_i32_2 = arith.constant 0 : i32
    %c0_i32_3 = arith.constant 0 : i32
    return %c0_i32, %c0_i32_0, %c0_i32_1, %c0_i32_2 : i32, i32, i32, i32
  }
  func.func @transform_2(%arg0: i32) -> (i32, i32) {
    %c0_i32 = arith.constant 0 : i32
    %c0_i32_0 = arith.constant 0 : i32
    %c0_i32_1 = arith.constant 0 : i32
    return %c0_i32, %c0_i32_0 : i32, i32
  }
  func.func @transform_3(%arg0: i32) -> (i32, i32, i32, i32) {
    %c0_i32 = arith.constant 0 : i32
    %c0_i32_0 = arith.constant 0 : i32
    %c0_i32_1 = arith.constant 0 : i32
    %c0_i32_2 = arith.constant 0 : i32
    %c0_i32_3 = arith.constant 0 : i32
    return %c0_i32, %c0_i32_0, %c0_i32_1, %c0_i32_2 : i32, i32, i32, i32
  }
  func.func @transform_4(%arg0: i32) -> (i32, i32) {
    %c0_i32 = arith.constant 0 : i32
    %c0_i32_0 = arith.constant 0 : i32
    %c0_i32_1 = arith.constant 0 : i32
    return %c0_i32, %c0_i32_0 : i32, i32
  }
  func.func @transform_5(%arg0: i32) -> (i32, i32, i32) {
    %c0_i32 = arith.constant 0 : i32
    %c0_i32_0 = arith.constant 0 : i32
    %c0_i32_1 = arith.constant 0 : i32
    %c0_i32_2 = arith.constant 0 : i32
    return %c0_i32, %c0_i32_0, %c0_i32_1 : i32, i32, i32
  }
  func.func @transform_6(%arg0: i32) -> (i32, i32) {
    %c0_i32 = arith.constant 0 : i32
    %c0_i32_0 = arith.constant 0 : i32
    %c0_i32_1 = arith.constant 0 : i32
    return %c0_i32, %c0_i32_0 : i32, i32
  }
  func.func @transform_7(%arg0: i32) -> (i32, i32) {
    %c0_i32 = arith.constant 0 : i32
    %c0_i32_0 = arith.constant 0 : i32
    %c0_i32_1 = arith.constant 0 : i32
    return %c0_i32, %c0_i32_0 : i32, i32
  }
  func.func @transform_8(%arg0: i32) -> (i32, i32) {
    %c0_i32 = arith.constant 0 : i32
    %c0_i32_0 = arith.constant 0 : i32
    %c0_i32_1 = arith.constant 0 : i32
    return %c0_i32, %c0_i32_0 : i32, i32
  }
  func.func @transform_9(%arg0: i32) -> (i32, i32, i32) {
    %c0_i32 = arith.constant 0 : i32
    %c0_i32_0 = arith.constant 0 : i32
    %c0_i32_1 = arith.constant 0 : i32
    return %arg0, %c0_i32, %c0_i32_0 : i32, i32, i32
  }
}

</mosaic_0001>

<bundles_post_ra>
// kernel: simplenet_forward.1
= control target key start
LH: loop header
LB: loop body
LE: loop exit
PB: predicated region body
PF: predicated region fallthrough
CT: control target
= control target key end

     0   :  { %s9605_s0 = inlined_call_operand.vmem [shape: f32[2,4,8,32], index: 0, kind: input, shape index: {}]   ;;  %s9606_s1 = inlined_call_operand.hbm [shape: f32[3,2,32,448], index: 1, kind: input, shape index: {}]   ;;  %s9607_s2 = inlined_call_operand.hbm [shape: f32[1,448], index: 2, kind: input, shape index: {}]   ;;  %s9608_s3 = inlined_call_operand.hbm [shape: f32[3,2,448,224], index: 3, kind: input, shape index: {}]   ;;  %s9609_s4 = inlined_call_operand.hbm [shape: f32[1,224], index: 4, kind: input, shape index: {}]   ;;  %s9610_s5 = inlined_call_operand.vmem [shape: f32[7,224,64], index: 5, kind: input, shape index: {}]   ;;  %s9611_s6 = inlined_call_operand.hbm [shape: f32[1,64], index: 6, kind: input, shape index: {}]   ;;  %s9612_s7 = inlined_call_operand.vmem [shape: f32[64,10], index: 7, kind: input, shape index: {}]   ;;  %s9613_s8 = inlined_call_operand.hbm [shape: f32[1,10], index: 8, kind: input, shape index: {}]   ;;  %s9614_s9 = inlined_call_operand.hbm [shape: f32[2,1,10], index: 9, kind: output, shape index: {}]  }
   0x1   :  { %9726 = sst [smem:[#allocation83_spill]] %s9606_s1 }
   0x2   :  { %9727 = sst [smem:[#allocation84_spill]] %s9607_s2 }
   0x3   :  { %9728 = sst [smem:[#allocation85_spill]] %s9608_s3 }
   0x4   :  { %9729 = sst [smem:[#allocation86_spill]] %s9609_s4 }
   0x5   :  { %14 = vsyncpa [#allocation5], 0 }
   0x6   :  { %15 = vsyncpa [#allocation8], 0 }
   0x7   :  { %16 = vsyncpa [#allocation11], 0 }
   0x8   :  { %17 = vsyncpa [#allocation14], 0 }
   0x9   :  { %18 = vsyncpa [#allocation6], 0 }
   0xa   :  { %20 = vsyncpa [#allocation6 + $0x1], 0  ;;  %s7491_s30 = smov 0   ;;  %s7493_s10 = smov 0  }
   0xb   :  { %s7495_s11 = smov 0   ;;  %s7497_s12 = smov 0  }
   0xc LB: > { %9730 = sst [smem:[#allocation21_spill]] %s7424_s11  ;;  %s7512_s13 = sadd.s32 4294967295, %s7428_s12   ;;  %s7428_s12 = sphi %s7497_s12, %s9941_s12   ;;  %s7424_s11 = sphi %s7495_s11, %s9940_s11   ;;  %s7420_s10 = sphi %s7493_s10, %s9939_s10   ;;  %s7416_s30 = sphi %s7491_s30, %s9938_s30  }
   0xd   : > { %s6057_s14 = sadd.s32 4294967294, %s7428_s12   ;;  %s7516_s15 = sadd.s32 1, %s7428_s12  }
   0xe   : > { %s227_s16 = sadd.s32 1, %s7424_s11  ;;  %s224_s17 = ssub.s32 %s7428_s12, %s7516_s15 }
   0xf   : > { %p237_p0 = scmp.ne.s32.totalorder %s7424_s11, %s7420_s10  ;;  %p225_p1 = scmp.eq.s32.totalorder %s224_s17, 0 }
  0x10   : > { %p238_p2 = scmp.eq.s32.totalorder %s7512_s13, 1  ;;  %p243_p3 = scmp.ne.s32.totalorder %s7420_s10, %s7416_s30 }
  0x11   : > { %p244_p4 = scmp.eq.s32.totalorder %s6057_s14, 1  ;;  %p6058_p7 = scmp.ge.s32.totalorder %s7428_s12, 1 }
  0x12   : > { %s7527_s18 = scalar_select %p225_p1, %s7424_s11, %s227_s16  }
  0x13   : > { %p7529_p5 = por %p238_p2, %p237_p0  ;;  %p7533_p6 = por %p244_p4, %p243_p3 }
  0x14   : > { %9731 = sst [smem:[#allocation22_spill]] %s7527_s18  ;;  %p251_p8 = scmp.lt.s32.totalorder %s7428_s12, 3 }
  0x15   : > { %p6429_p9 = scmp.eq.s32.totalorder %s7512_s13, 0  ;;  %s9735_s2 = sld [smem:[#allocation84_spill]] }
  0x16   : > { %p7540_p10 = pnand %p6058_p7, %p251_p8  ;;  %s7430_s25 = smov [#allocation7]  }
  0x17   : > { %s279_s26 = sshll.u32 %s7430_s25, 4  ;;  %s9736_s4 = sld [smem:[#allocation86_spill]]  ;;  %s280_s26 = int_to_ptr.vmem [resolvable:$true] %s279_s26 }
  0x18   : > { %p6406_p11 = pneg %p7540_p10  ;;  %s9738_s1 = sld [smem:[#allocation83_spill]] }
  0x19   : > { %s7431_s23 = smov [#allocation10]   ;;  %s7432_s27 = smov [#allocation4]  }
  0x1a   : > { %p7554_p12 = pnand %p6429_p9, %p6406_p11  ;;  %s305_s25 = sshll.u32 %s7431_s23, 4  ;;  %s306_s25 = int_to_ptr.vmem [resolvable:$true] %s305_s25 }
  0x1b   : > { %s277_s24 = sshll.u32 %s9735_s2, 4  ;;  %s264_s28 = sshll.u32 %s7432_s27, 4  ;;  %s278_s24 = int_to_ptr.hbm [resolvable:$true] %s277_s24  ;;  %s265_s28 = int_to_ptr.vmem [resolvable:$true] %s264_s28 }
  0x1c   : > { %6412 = dma.hbm_to_vmem [thread:$0]  (!%p7554_p12), %s278_s24, 64, %s280_s26, [#allocation8]  }
  0x1d   : > { %s303_s29 = sshll.u32 %s9736_s4, 4  ;;  %s9739_s3 = sld [smem:[#allocation85_spill]]  ;;  %s304_s29 = int_to_ptr.hbm [resolvable:$true] %s303_s29 }
  0x1e   : > { %s262_s22 = sshll.u32 %s9738_s1, 4  ;;  %s7433_s11 = smov 512   ;;  %s263_s22 = int_to_ptr.hbm [resolvable:$true] %s262_s22 }
  0x1f   : > { %6418 = dma.hbm_to_vmem [thread:$0]  (!%p7554_p12), %s304_s29, 32, %s306_s25, [#allocation11]  }
  0x20   : > { %s7434_s16 = smov 32   ;;  %s7435_s17 = smov [#allocation9]  }
  0x21   : > { %6409 = dma.hbm_to_vmem [thread:$0]  (!%p7554_p12), %s263_s22, 12288, %s265_s28, [#allocation5], %s7433_s11, %s7433_s11, %s7434_s16  }
  0x22   : > { %s290_s24 = sshll.u32 %s7435_s17, 4  ;;  %s7436_s26 = smov 256   ;;  %s291_s24 = int_to_ptr.vmem [resolvable:$true] %s290_s24 }
  0x23   : > { %s288_s18 = sshll.u32 %s9739_s3, 4  ;;  %s7437_s23 = smov 16   ;;  %s289_s18 = int_to_ptr.hbm [resolvable:$true] %s288_s18 }
  0x24   : > { %6415 = dma.hbm_to_vmem [thread:$0]  (!%p7554_p12), %s289_s18, 86016, %s291_s24, [#allocation8], %s7436_s26, %s7436_s26, %s7437_s23  }
  0x25   : > { %s318_s27 = sshll.u32 %s9611_s6, 4  ;;  %s7438_s2 = smov [#allocation12]   ;;  %s319_s27 = int_to_ptr.hbm [resolvable:$true] %s318_s27 }
  0x26   : > { %s320_s4 = sshll.u32 %s7438_s2, 4  ;;  %s333_s11 = sshll.u32 %s9613_s8, 4  ;;  %s321_s4 = int_to_ptr.vmem [resolvable:$true] %s320_s4  ;;  %s334_s11 = int_to_ptr.hbm [resolvable:$true] %s333_s11 }
  0x27   : > { %6421 = dma.hbm_to_vmem [thread:$0]  (!%p7554_p12), %s319_s27, 16, %s321_s4, [#allocation11]  }
  0x28   : > { %s7439_s22 = smov [#allocation13]   ;;  %356 = sbr.rel (%p7540_p10) target bundleno = 1519 (0x5ef), region = 56 }
  0x29   : > { %s335_s28 = sshll.u32 %s7439_s22, 4  ;;  %s336_s28 = int_to_ptr.vmem [resolvable:$true] %s335_s28 }
  0x2a   : > { %6424 = dma.hbm_to_vmem [thread:$0]  (!%p7554_p12), %s334_s11, 16, %s336_s28, [#allocation14]  }
  0x2d   : > { %7395 = dma.done.wait (%p6429_p9), [#allocation5], 12288  }
  0x2e   : > { %7397 = vsyncadd (%p6429_p9), [#allocation5], 4294955008 }
  0x2f   : > { %7399 = dma.done.wait (%p6429_p9), [#allocation8], 86080  }
  0x30   : > { %7401 = vsyncadd (%p6429_p9), [#allocation8], 4294881216 }
  0x31   : > { %7403 = dma.done.wait (%p6429_p9), [#allocation11], 48  }
  0x32   : > { %7405 = vsyncadd (%p6429_p9), [#allocation11], 4294967248 }
  0x33   : > { %7407 = dma.done.wait (%p6429_p9), [#allocation14], 16  }
  0x34   : > { %7409 = vsyncadd (%p6429_p9), [#allocation14], 4294967280  ;;  %p417_p13 = scmp.lt.s32.totalorder %s7512_s13, 1  ;;  %v7602_v0 = vld [vmem:[#allocation4 + $0x160] sm:$0xff]  ;;  %v7604_v1 = vld [vmem:[#allocation4 + $0x168] sm:$0xff]  ;;  %vm458_vm0 = vcmask 261120   ;;  %s5938_s18 = scalar_lea.hbm %s9614_s9, %s7512_s13 }
  0x35   : > { %9740 = vst [vmem:[#allocation23_spill] sm:$0xff] %v7604_v1  ;;  %v7606_v2 = vld [vmem:[#allocation4 + $0x178] sm:$0xff]  ;;  %474 = vmatpush.msra.mxu0 %v7602_v0  ;;  %494 = vmatpush.msra.mxu2 %v7604_v1  ;;  %v7610_v3 = vld [vmem:[#allocation4 + $0x68] sm:$0xff]  ;;  %v7612_v4 = vld [vmem:[#allocation4 + $0x140] sm:$0xff]  ;;  %vm1552_vm2 = vcmask 522240   ;;  %vm2933_vm3 = vcmask 523264  }
  0x36   : > { %s418_s1 = scalar_select %p417_p13, %s7512_s13, 1  ;;  %v7614_v5 = vld [vmem:[#allocation4 + $0x148] sm:$0xff]  ;;  %534 = vmatpush.msra.mxu3 %v7606_v2  ;;  %577 = vmatpush.msra.mxu1 %v7610_v3  ;;  %v7618_v6 = vld [vmem:[#allocation4 + $0x158] sm:$0xff]  ;;  %v7622_v8 = vld [vmem:[#allocation4 + $0x120] sm:$0xff]  ;;  %vm2696_vm4 = vcmask 523265   ;;  %vm5432_vm5 = vcmask 785408  }
  0x37   : > { %9741 = vst [vmem:[#allocation24_spill] sm:$0xff] %v7614_v5  ;;  %v7620_v7 = vld [vmem:[#allocation4 + $0x48] sm:$0xff]  ;;  %475 = vmatpush.msra.mxu0 %v7612_v4  ;;  %495 = vmatpush.msra.mxu2 %v7614_v5  ;;  %v7628_v10 = vld [vmem:[#allocation4 + $0x138] sm:$0xff]  ;;  %v7639_v12 = vld [vmem:[#allocation4 + $0x100] sm:$0xff]  ;;  %s415_s28 = sand.u32 1, %s7420_s10   ;;  %s5942_s16 = sshll.u32 %s5938_s18, 4  ;;  %s5943_s16 = int_to_ptr.hbm [resolvable:$true] %s5942_s16 }
  0x38   : > { %s6379_s3 = sshll.u32 %s418_s1, 5  ;;  %v7626_v9 = vld [vmem:[#allocation4 + $0x128] sm:$0xff]  ;;  %535 = vmatpush.msra.mxu3 %v7618_v6  ;;  %578 = vmatpush.msra.mxu1 %v7620_v7  ;;  %v7645_v14 = vld [vmem:[#allocation4 + $0x118] sm:$0xff]  ;;  %v7661_v18 = vld [vmem:[#allocation4 + $0x170] sm:$0xff]  ;;  %s416_s21 = scalar_lea.vmem [#allocation15], %s415_s28  ;;  %vm5927_vm6 = vcmask 73728  }
  0x39   : > { %v7630_v11 = vld [vmem:[#allocation4 + $0x28] sm:$0xff]  ;;  %s7635_s14 = scalar_lea.vmem %s9605_s0, %s6379_s3  ;;  %476 = vmatpush.msra.mxu0 %v7622_v8  ;;  %496 = vmatpush.msra.mxu2 %v7626_v9  ;;  %9743 = vst [vmem:[#allocation26_spill] sm:$0xff] %v7645_v14  ;;  %v7663_v19 = vld [vmem:[#allocation4 + $0x60] sm:$0xff]  ;;  %v7669_v20 = vld [vmem:[#allocation4 + $0x78] sm:$0xff]  ;;  %s5930_s17 = scalar_lea.sflag [#allocation6], %s415_s28 }
  0x3a   : > { %v7641_v13 = vld [vmem:[#allocation4 + $0x108] sm:$0xff]  ;;  %536 = vmatpush.msra.mxu3 %v7628_v10  ;;  %579 = vmatpush.msra.mxu1 %v7630_v11  ;;  %v7657_v17 = vld [vmem:[%s7635_s14] sm:$0xff]  ;;  %9746 = vst [vmem:[#allocation29_spill] sm:$0xff] %v7661_v18  ;;  %v7677_v22 = vld [vmem:[#allocation4 + $0x150] sm:$0xff]  ;;  %s7364_s24 = sshra.s32 %s5943_s16, 4  ;;  %s7370_s29 = scalar_lea.hbm %s9614_s9, 2  ;;  %s7365_s24 = int_to_ptr.hbm [resolvable:$true] %s7364_s24 }
  0x3b   : > { %9742 = vst [vmem:[#allocation25_spill] sm:$0xff] %v7641_v13  ;;  %v7647_v15 = vld [vmem:[#allocation4 + $0x8] sm:$0xff]  ;;  %477 = vmatpush.msra.mxu0 %v7639_v12  ;;  %497 = vmatpush.msra.mxu2 %v7641_v13  ;;  %v7679_v23 = vld [vmem:[#allocation4 + $0x40] sm:$0xff]  ;;  %v7683_v24 = vld [vmem:[#allocation4 + $0x58] sm:$0xff]  ;;  %s7366_s26 = scalar_lea.hbm %s7365_s24, 1  ;;  %p7371_p3 = scmp.lt.s32.totalorder %s7365_s24, %s9614_s9 }
  0x3c   : > { %9744 = vst [vmem:[#allocation27_spill] sm:$0xff] %v7647_v15  ;;  %v7652_v16 = vld [vmem:[%s7635_s14 + $0x8] sm:$0xff]  ;;  %537 = vmatpush.msra.mxu3 %v7645_v14  ;;  %580 = vmatpush.msra.mxu1 %v7647_v15  ;;  %v7689_v26 = vld [vmem:[#allocation4 + $0x130] sm:$0xff]  ;;  %v7691_v27 = vld [vmem:[#allocation4 + $0x20] sm:$0xff]  ;;  %p7367_p0 = scmp.ne.s32.totalorder %s7365_s24, %s7366_s26  ;;  %p7372_p4 = scmp.lt.s32.totalorder %s7370_s29, %s7366_s26 }
  0x3d   : > { %9745 = vst [vmem:[#allocation28_spill] sm:$0xff] %v7657_v17  ;;  %6076 = vmatmul.msk.f32.vlgmr.msra.gmra.mxu0 %vm458_vm0, %v7652_v16  ;;  %6077 = vmatmul.msk.f32.vlgmr.msra.gmra.mxu2 %vm458_vm0, %v7652_v16  ;;  %v7671_v21 = vld [vmem:[#allocation4 + $0x268] sm:$0xff]  ;;  %v7695_v28 = vld [vmem:[#allocation4 + $0x38] sm:$0xff]  ;;  %v7701_v30 = vld [vmem:[#allocation4 + $0x110] sm:$0xff] }
  0x3e   : > { %9747 = vst [vmem:[#allocation30_spill] sm:$0xff] %v7669_v20  ;;  %6079 = vmatmul.msk.f32.vlgmr.msra.gmra.mxu3 %vm458_vm0, %v7652_v16  ;;  %6081 = vmatmul.msk.f32.vlgmr.msra.gmra.mxu1 %vm458_vm0, %v7657_v17  ;;  %v7685_v25 = vld [vmem:[#allocation4 + $0x248] sm:$0xff]  ;;  %v7703_v31 = vld [vmem:[#allocation4] sm:$0xff]  ;;  %v7707_v32 = vld [vmem:[#allocation4 + $0x18] sm:$0xff]  ;;  %p7368_p1 = pnand %p7367_p0, %p7529_p5  ;;  %p7373_p7 = por %p7372_p4, %p7371_p3 }
  0x3f   : > { %9748 = vst [vmem:[#allocation31_spill] sm:$0xff] %v7671_v21  ;;  %514 = vmatpush.msrb.mxu2 %v7661_v18  ;;  %557 = vmatpush.msrb.mxu0 %v7663_v19  ;;  %v7697_v29 = vld [vmem:[#allocation4 + $0x228] sm:$0xff]  ;;  %v7716_v34 = vld [vmem:[%s7635_s14 + $0x10] sm:$0xff]  ;;  %v7722_v36 = vld [vmem:[#allocation4 + $0x260] sm:$0xff] }
  0x40   : > { %617 = vmatpush.msrb.mxu3 %v7669_v20  ;;  %679 = vmatpush.msrb.mxu1 %v7671_v21  ;;  %9749 = vst [vmem:[#allocation32_spill] sm:$0xff] %v7701_v30  ;;  %v7709_v33 = vld [vmem:[#allocation4 + $0x208] sm:$0xff]  ;;  %v7720_v35 = vld [vmem:[#allocation4 + $0x70] sm:$0xff]  ;;  %v7728_v37 = vld [vmem:[#allocation4 + $0x278] sm:$0xff]  ;;  %p7369_p2 = pneg %p7368_p1 }
  0x41   : > { %515 = vmatpush.msrb.mxu2 %v7677_v22  ;;  %558 = vmatpush.msrb.mxu0 %v7679_v23  ;;  %9750 = vst [vmem:[#allocation33_spill] sm:$0xff] %v7707_v32  ;;  %v7730_v38 = vld [vmem:[#allocation4 + $0x1e8] sm:$0xff]  ;;  %v7736_v39 = vld [vmem:[#allocation4 + $0x50] sm:$0xff]  ;;  %v7738_v40 = vld [vmem:[#allocation4 + $0x240] sm:$0xff] }
  0x42   : > { %618 = vmatpush.msrb.mxu3 %v7683_v24  ;;  %680 = vmatpush.msrb.mxu1 %v7685_v25  ;;  %9751 = vst [vmem:[#allocation34_spill] sm:$0xff] %v7709_v33  ;;  %v7742_v41 = vld [vmem:[#allocation4 + $0x258] sm:$0xff]  ;;  %v7744_v42 = vld [vmem:[#allocation4 + $0x1c8] sm:$0xff]  ;;  %v7748_v43 = vld [vmem:[#allocation4 + $0x30] sm:$0xff]  ;;  %p7374_p8 = pnand %p7373_p7, %p7369_p2 }
  0x43   : > { %516 = vmatpush.msrb.mxu2 %v7689_v26  ;;  %559 = vmatpush.msrb.mxu0 %v7691_v27  ;;  %9752 = vst [vmem:[#allocation35_spill] sm:$0xff] %v7720_v35  ;;  %v7750_v44 = vld [vmem:[#allocation4 + $0x220] sm:$0xff]  ;;  %v7754_v45 = vld [vmem:[#allocation4 + $0x238] sm:$0xff]  ;;  %v7756_v46 = vld [vmem:[#allocation4 + $0x1a8] sm:$0xff] }
  0x44   : > { %619 = vmatpush.msrb.mxu3 %v7695_v28  ;;  %681 = vmatpush.msrb.mxu1 %v7697_v29  ;;  %9753 = vst [vmem:[#allocation36_spill] sm:$0xff] %v7728_v37  ;;  %v7760_v47 = vld [vmem:[#allocation4 + $0x10] sm:$0xff]  ;;  %v7762_v48 = vld [vmem:[#allocation4 + $0x200] sm:$0xff]  ;;  %v7766_v49 = vld [vmem:[#allocation4 + $0x218] sm:$0xff] }
  0x45   : > { %517 = vmatpush.msrb.mxu2 %v7701_v30  ;;  %560 = vmatpush.msrb.mxu0 %v7703_v31  ;;  %9754 = vst [vmem:[#allocation37_spill] sm:$0xff] %v7730_v38  ;;  %v7768_v50 = vld [vmem:[#allocation4 + $0x188] sm:$0xff]  ;;  %v7776_v51 = vld [vmem:[#allocation4 + $0x270] sm:$0xff]  ;;  %v7778_v52 = vld [vmem:[#allocation4 + $0x1e0] sm:$0xff] }
  0x46   : > { %620 = vmatpush.msrb.mxu3 %v7707_v32  ;;  %682 = vmatpush.msrb.mxu1 %v7709_v33  ;;  %9755 = vst [vmem:[#allocation38_spill] sm:$0xff] %v7736_v39  ;;  %v7784_v53 = vld [vmem:[#allocation4 + $0x1f8] sm:$0xff]  ;;  %v7786_v54 = vld [vmem:[#allocation4 + $0xe8] sm:$0xff]  ;;  %v7792_v55 = vld [vmem:[#allocation4 + $0x250] sm:$0xff] }
  0x47   : > { %6078 = vmatmul.msk.f32.vlgmr.msrb.gmra.mxu2 %vm458_vm0, %v7652_v16  ;;  %6080 = vmatmul.msk.f32.vlgmr.msrb.gmra.mxu0 %vm458_vm0, %v7657_v17  ;;  %9756 = vst [vmem:[#allocation39_spill] sm:$0xff] %v7742_v41  ;;  %v7794_v56 = vld [vmem:[#allocation4 + $0x1c0] sm:$0xff]  ;;  %v7798_v57 = vld [vmem:[#allocation4 + $0x1d8] sm:$0xff]  ;;  %v7800_v58 = vld [vmem:[#allocation4 + $0xc8] sm:$0xff] }
  0x48   : > { %6083 = vmatmul.msk.f32.vlgmr.msrb.gmra.mxu3 %vm458_vm0, %v7657_v17  ;;  %6086 = vmatmul.msk.f32.vlgmr.msrb.gmra.mxu1 %vm458_vm0, %v7716_v34  ;;  %9757 = vst [vmem:[#allocation40_spill] sm:$0xff] %v7744_v42  ;;  %v7804_v59 = vld [vmem:[#allocation4 + $0x230] sm:$0xff]  ;;  %v7806_v60 = vld [vmem:[#allocation4 + $0x1a0] sm:$0xff]  ;;  %v7810_v61 = vld [vmem:[#allocation4 + $0x1b8] sm:$0xff] }
  0x49   : > { %597 = vmatpush.msra.mxu2 %v7720_v35  ;;  %659 = vmatpush.msra.mxu0 %v7722_v36  ;;  %9758 = vst [vmem:[#allocation41_spill] sm:$0xff] %v7748_v43  ;;  %v7812_v62 = vld [vmem:[#allocation4 + $0xa8] sm:$0xff]  ;;  %v7816_v63 = vld [vmem:[#allocation4 + $0x210] sm:$0xff] }
  0x4a   : > { %719 = vmatpush.msra.mxu3 %v7728_v37  ;;  %797 = vmatpush.msra.mxu1 %v7730_v38  ;;  %9759 = vst [vmem:[#allocation42_spill] sm:$0xff] %v7750_v44 }
  0x4b   : > { %598 = vmatpush.msra.mxu2 %v7736_v39  ;;  %660 = vmatpush.msra.mxu0 %v7738_v40  ;;  %9760 = vst [vmem:[#allocation43_spill] sm:$0xff] %v7754_v45 }
  0x4c   : > { %9761 = vst [vmem:[#allocation44_spill] sm:$0xff] %v7756_v46  ;;  %720 = vmatpush.msra.mxu3 %v7742_v41  ;;  %798 = vmatpush.msra.mxu1 %v7744_v42 }
  0x4d   : > { %9762 = vst [vmem:[#allocation45_spill] sm:$0xff] %v7760_v47  ;;  %599 = vmatpush.msra.mxu2 %v7748_v43  ;;  %661 = vmatpush.msra.mxu0 %v7750_v44 }
  0x4e   : > { %9763 = vst [vmem:[#allocation46_spill] sm:$0xff] %v7762_v48  ;;  %721 = vmatpush.msra.mxu3 %v7754_v45  ;;  %799 = vmatpush.msra.mxu1 %v7756_v46 }
  0x4f   : > { %9764 = vst [vmem:[#allocation47_spill] sm:$0xff] %v7766_v49  ;;  %600 = vmatpush.msra.mxu2 %v7760_v47  ;;  %662 = vmatpush.msra.mxu0 %v7762_v48 }
  0x50   : > { %9765 = vst [vmem:[#allocation48_spill] sm:$0xff] %v7768_v50  ;;  %722 = vmatpush.msra.mxu3 %v7766_v49  ;;  %800 = vmatpush.msra.mxu1 %v7768_v50 }
  0x51   : > { %9766 = vst [vmem:[#allocation49_spill] sm:$0xff] %v7776_v51  ;;  %6082 = vmatmul.msk.f32.vlgmr.msra.gmra.mxu2 %vm458_vm0, %v7657_v17  ;;  %6085 = vmatmul.msk.f32.vlgmr.msra.gmra.mxu0 %vm458_vm0, %v7716_v34 }
  0x52   : > { %9767 = vst [vmem:[#allocation50_spill] sm:$0xff] %v7778_v52  ;;  %6088 = vmatmul.msk.f32.vlgmr.msra.gmra.mxu3 %vm458_vm0, %v7716_v34  ;;  %6090 = vmatmul.msk.f32.vlgmr.msra.gmra.mxu1 %vm458_vm0, %v7652_v16 }
  0x53   : > { %9768 = vst [vmem:[#allocation51_spill] sm:$0xff] %v7784_v53  ;;  %699 = vmatpush.msrb.mxu2 %v7776_v51  ;;  %777 = vmatpush.msrb.mxu0 %v7778_v52 }
  0x54   : > { %9769 = vst [vmem:[#allocation52_spill] sm:$0xff] %v7786_v54  ;;  %837 = vmatpush.msrb.mxu3 %v7784_v53  ;;  %877 = vmatpush.msrb.mxu1 %v7786_v54  ;;  %v7818_v53 = vld [vmem:[#allocation4 + $0x180] sm:$0xff]  ;;  %v7822_v54 = vld [vmem:[#allocation4 + $0x198] sm:$0xff] }
  0x55   : > { %9770 = vst [vmem:[#allocation53_spill] sm:$0xff] %v7792_v55  ;;  %700 = vmatpush.msrb.mxu2 %v7792_v55  ;;  %778 = vmatpush.msrb.mxu0 %v7794_v56  ;;  %v7824_v55 = vld [vmem:[#allocation4 + $0x88] sm:$0xff] }
  0x56   : > { %9771 = vst [vmem:[#allocation54_spill] sm:$0xff] %v7794_v56  ;;  %838 = vmatpush.msrb.mxu3 %v7798_v57  ;;  %878 = vmatpush.msrb.mxu1 %v7800_v58  ;;  %v7866_v56 = vld [vmem:[#allocation4 + $0xb8] sm:$0xff] }
  0x57   : > { %9772 = vst [vmem:[#allocation55_spill] sm:$0xff] %v7798_v57  ;;  %701 = vmatpush.msrb.mxu2 %v7804_v59  ;;  %779 = vmatpush.msrb.mxu0 %v7806_v60  ;;  %v7862_v57 = vld [vmem:[#allocation4 + $0xa0] sm:$0xff] }
  0x58   : > { %9773 = vst [vmem:[#allocation56_spill] sm:$0xff] %v7800_v58  ;;  %839 = vmatpush.msrb.mxu3 %v7810_v61  ;;  %879 = vmatpush.msrb.mxu1 %v7812_v62  ;;  %v7832_v58 = vld [vmem:[#allocation4 + $0x1f0] sm:$0xff] }
  0x59   : > { %9774 = vst [vmem:[#allocation57_spill] sm:$0xff] %v7804_v59  ;;  %702 = vmatpush.msrb.mxu2 %v7816_v63  ;;  %780 = vmatpush.msrb.mxu0 %v7818_v53  ;;  %v7834_v59 = vld [vmem:[#allocation4 + $0xe0] sm:$0xff] }
  0x5a   : > { %9775 = vst [vmem:[#allocation58_spill] sm:$0xff] %v7806_v60  ;;  %840 = vmatpush.msrb.mxu3 %v7822_v54  ;;  %880 = vmatpush.msrb.mxu1 %v7824_v55  ;;  %v7860_v60 = vld [vmem:[#allocation4 + $0x1b0] sm:$0xff] }
  0x5b   : > { %9776 = vst [vmem:[#allocation59_spill] sm:$0xff] %v7810_v61  ;;  %6087 = vmatmul.msk.f32.vlgmr.msrb.gmra.mxu2 %vm458_vm0, %v7716_v34  ;;  %6089 = vmatmul.msk.f32.vlgmr.msrb.gmra.mxu0 %vm458_vm0, %v7652_v16  ;;  %v7840_v61 = vld [vmem:[#allocation4 + $0xf8] sm:$0xff] }
  0x5c   : > { %9777 = vst [vmem:[#allocation60_spill] sm:$0xff] %v7812_v62  ;;  %v7842_v62 = vld [vmem:[#allocation4 + $0x2e8] sm:$0xff]  ;;  %6092 = vmatmul.msk.f32.vlgmr.msrb.gmra.mxu3 %vm458_vm0, %v7652_v16  ;;  %6094 = vmatmul.msk.f32.vlgmr.msrb.gmra.mxu1 %vm458_vm0, %v7657_v17 }
  0x5d   : > { %9778 = vst [vmem:[#allocation61_spill] sm:$0xff] %v7816_v63  ;;  %817 = vmatpush.msra.mxu2 %v7832_v58  ;;  %857 = vmatpush.msra.mxu0 %v7834_v59  ;;  %v7856_v63 = vld [vmem:[#allocation4 + $0x2c8] sm:$0xff] }
  0x5e   : > { %9779 = vst [vmem:[#allocation62_spill] sm:$0xff] %v7818_v53  ;;  %v7854_v53 = vld [vmem:[#allocation4 + $0xd8] sm:$0xff]  ;;  %917 = vmatpush.msra.mxu3 %v7840_v61  ;;  %974 = vmatpush.msra.mxu1 %v7842_v62 }
  0x5f   : > { %9780 = vst [vmem:[#allocation63_spill] sm:$0xff] %v7822_v54  ;;  %v7850_v54 = vld [vmem:[#allocation4 + $0xc0] sm:$0xff] }
  0x60   : > { %9781 = vst [vmem:[#allocation64_spill] sm:$0xff] %v7824_v55  ;;  %v7848_v55 = vld [vmem:[#allocation4 + $0x1d0] sm:$0xff]  ;;  %858 = vmatpush.msra.mxu0 %v7850_v54  ;;  %918 = vmatpush.msra.mxu3 %v7854_v53 }
  0x61   : > { %9782 = vst [vmem:[#allocation65_spill] sm:$0xff] %v7832_v58  ;;  %818 = vmatpush.msra.mxu2 %v7848_v55  ;;  %v7868_v58 = vld [vmem:[#allocation4 + $0x2a8] sm:$0xff]  ;;  %975 = vmatpush.msra.mxu1 %v7856_v63 }
  0x62   : > { %9783 = vst [vmem:[#allocation66_spill] sm:$0xff] %v7834_v59  ;;  %v7872_v59 = vld [vmem:[#allocation4 + $0x190] sm:$0xff]  ;;  %859 = vmatpush.msra.mxu0 %v7862_v57  ;;  %919 = vmatpush.msra.mxu3 %v7866_v56 }
  0x63   : > { %9784 = vst [vmem:[#allocation67_spill] sm:$0xff] %v7840_v61  ;;  %v7874_v61 = vld [vmem:[#allocation4 + $0x80] sm:$0xff]  ;;  %819 = vmatpush.msra.mxu2 %v7860_v60  ;;  %976 = vmatpush.msra.mxu1 %v7868_v58 }
  0x64   : > { %9785 = vst [vmem:[#allocation68_spill] sm:$0xff] %v7842_v62  ;;  %v7878_v62 = vld [vmem:[#allocation4 + $0x98] sm:$0xff]  ;;  %860 = vmatpush.msra.mxu0 %v7874_v61 }
  0x65   : > { %9786 = vst [vmem:[#allocation69_spill] sm:$0xff] %v7848_v55  ;;  %v7880_v55 = vld [vmem:[#allocation4 + $0x288] sm:$0xff]  ;;  %820 = vmatpush.msra.mxu2 %v7872_v59  ;;  %920 = vmatpush.msra.mxu3 %v7878_v62 }
  0x66   : > { %9787 = vst [vmem:[#allocation70_spill] sm:$0xff] %v7856_v63  ;;  %977 = vmatpush.msra.mxu1 %v7880_v55  ;;  %v7888_v63 = vld [vmem:[#allocation4 + $0xf0] sm:$0xff]  ;;  %6091 = vmatmul.msk.f32.vlgmr.msra.gmra.mxu2 %vm458_vm0, %v7652_v16 }
  0x67   : > { %9788 = vst [vmem:[#allocation71_spill] sm:$0xff] %v7860_v60  ;;  %v7890_v60 = vld [vmem:[#allocation4 + $0x2e0] sm:$0xff]  ;;  %6093 = vmatmul.msk.f32.vlgmr.msra.gmra.mxu0 %vm458_vm0, %v7657_v17  ;;  %6096 = vmatmul.msk.f32.vlgmr.msra.gmra.mxu3 %vm458_vm0, %v7657_v17 }
  0x68   : > { %9789 = vst [vmem:[#allocation72_spill] sm:$0xff] %v7862_v57  ;;  %6098 = vmatmul.msk.f32.vlgmr.msra.gmra.mxu1 %vm458_vm0, %v7716_v34  ;;  %897 = vmatpush.msrb.mxu2 %v7888_v63  ;;  %v7918_v57 = vld [vmem:[#allocation4 + $0x2b8] sm:$0xff] }
  0x69   : > { %9790 = vst [vmem:[#allocation73_spill] sm:$0xff] %v7866_v56  ;;  %v7896_v56 = vld [vmem:[#allocation4 + $0x2f8] sm:$0xff]  ;;  %954 = vmatpush.msrb.mxu0 %v7890_v60  ;;  %1062 = vmatpush.msrb.mxu1 %v7604_v1 }
  0x6a   : > { %9791 = vst [vmem:[#allocation74_spill] sm:$0xff] %v7868_v58  ;;  %1014 = vmatpush.msrb.mxu3 %v7896_v56  ;;  %v7914_v58 = vld [vmem:[#allocation4 + $0x2a0] sm:$0xff]  ;;  %v7928_v1 = vld [vmem:[#allocation4 + $0x298] sm:$0xff] }
  0x6b   : > { %9792 = vst [vmem:[#allocation75_spill] sm:$0xff] %v7872_v59  ;;  %v7912_v59 = vld [vmem:[#allocation4 + $0xb0] sm:$0xff]  ;;  %1063 = vmatpush.msrb.mxu1 %v7614_v5 }
  0x6c   : > { %9793 = vst [vmem:[#allocation76_spill] sm:$0xff] %v7874_v61  ;;  %v7908_v61 = vld [vmem:[#allocation4 + $0x2d8] sm:$0xff]  ;;  %v7936_v5 = vld [vmem:[#allocation4 + $0x2f0] sm:$0xff] }
  0x6d   : > { %9794 = vst [vmem:[#allocation77_spill] sm:$0xff] %v7878_v62  ;;  %v7902_v62 = vld [vmem:[#allocation4 + $0xd0] sm:$0xff]  ;;  %1015 = vmatpush.msrb.mxu3 %v7908_v61  ;;  %1064 = vmatpush.msrb.mxu1 %v7626_v9 }
  0x6e   : > { %9795 = vst [vmem:[#allocation78_spill] sm:$0xff] %v7880_v55  ;;  %v7904_v55 = vld [vmem:[#allocation4 + $0x2c0] sm:$0xff]  ;;  %898 = vmatpush.msrb.mxu2 %v7902_v62 }
  0x6f   : > { %9796 = vst [vmem:[#allocation79_spill] sm:$0xff] %v7888_v63  ;;  %955 = vmatpush.msrb.mxu0 %v7904_v55  ;;  %v7924_v63 = vld [vmem:[#allocation4 + $0x280] sm:$0xff]  ;;  %1016 = vmatpush.msrb.mxu3 %v7918_v57 }
  0x70   : > { %9797 = vst [vmem:[#allocation80_spill] sm:$0xff] %v7890_v60  ;;  %v7922_v60 = vld [vmem:[#allocation4 + $0x90] sm:$0xff]  ;;  %899 = vmatpush.msrb.mxu2 %v7912_v59  ;;  %1065 = vmatpush.msrb.mxu1 %v7641_v13 }
  0x71   : > { %9798 = vst [vmem:[#allocation81_spill] sm:$0xff] %v7902_v62  ;;  %956 = vmatpush.msrb.mxu0 %v7914_v58  ;;  %1017 = vmatpush.msrb.mxu3 %v7928_v1  ;;  %v7958_v13 = vld [vmem:[#allocation4 + $0x290] sm:$0xff] }
  0x72   : > { %9799 = vst [vmem:[#allocation82_spill] sm:$0xff] %v7922_v60  ;;  %900 = vmatpush.msrb.mxu2 %v7922_v60  ;;  %6100 = vmatmul.msk.f32.vlgmr.msrb.gmra.mxu3 %vm458_vm0, %v7716_v34  ;;  %v7946_v60 = vld [vmem:[#allocation4 + $0x2d0] sm:$0xff] }
  0x73   : > { %957 = vmatpush.msrb.mxu0 %v7924_v63  ;;  %6095 = vmatmul.msk.f32.vlgmr.msrb.gmra.mxu2 %vm458_vm0, %v7657_v17  ;;  %v7952_v17 = vld [vmem:[#allocation4 + $0x2b0] sm:$0xff] }
  0x74   : > { %6097 = vmatmul.msk.f32.vlgmr.msrb.gmra.mxu0 %vm458_vm0, %v7716_v34  ;;  %6102 = vmatmul.msk.f32.vlgmr.msrb.gmra.mxu1 %vm458_vm0, %v7716_v34 }
  0x75   : > { %994 = vmatpush.msra.mxu2 %v7936_v5  ;;  %1042 = vmatpush.msra.mxu0 %v7602_v0 }
  0x76   : > { %1102 = vmatpush.msra.mxu3 %v7606_v2  ;;  %1142 = vmatpush.msra.mxu1 %v7610_v3 }
  0x77   : > { %995 = vmatpush.msra.mxu2 %v7946_v60  ;;  %1043 = vmatpush.msra.mxu0 %v7612_v4 }
  0x78   : > { %1103 = vmatpush.msra.mxu3 %v7618_v6  ;;  %1143 = vmatpush.msra.mxu1 %v7620_v7 }
  0x79   : > { %996 = vmatpush.msra.mxu2 %v7952_v17  ;;  %1044 = vmatpush.msra.mxu0 %v7622_v8 }
  0x7a   : > { %1104 = vmatpush.msra.mxu3 %v7628_v10  ;;  %1144 = vmatpush.msra.mxu1 %v7630_v11 }
  0x7b   : > { %997 = vmatpush.msra.mxu2 %v7958_v13  ;;  %1045 = vmatpush.msra.mxu0 %v7639_v12 }
  0x7c   : > { %1105 = vmatpush.msra.mxu3 %v7645_v14  ;;  %1145 = vmatpush.msra.mxu1 %v7647_v15 }
  0x7d   : > { %6099 = vmatmul.msk.f32.vlgmr.msra.gmra.mxu2 %vm458_vm0, %v7716_v34  ;;  %6101 = vmatmul.msk.f32.vlgmr.msra.gmra.mxu0 %vm458_vm0, %v7716_v34 }
  0x7e   : > { %6104 = vmatmul.msk.f32.vlgmr.msra.gmra.mxu3 %vm458_vm0, %v7716_v34  ;;  %6106 = vmatmul.msk.f32.vlgmr.msra.gmra.mxu1 %vm458_vm0, %v7652_v16 }
  0x7f   : > { %1082 = vmatpush.msrb.mxu2 %v7661_v18  ;;  %1122 = vmatpush.msrb.mxu0 %v7663_v19 }
  0x80   : > { %1182 = vmatpush.msrb.mxu3 %v7669_v20  ;;  %1227 = vmatpush.msrb.mxu1 %v7671_v21  ;;  %v7991_v21 = vld [vmem:[%s7635_s14 + $0x18] sm:$0xff] }
  0x81   : > { %1083 = vmatpush.msrb.mxu2 %v7677_v22  ;;  %1123 = vmatpush.msrb.mxu0 %v7679_v23 }
  0x82   : > { %1183 = vmatpush.msrb.mxu3 %v7683_v24  ;;  %1228 = vmatpush.msrb.mxu1 %v7685_v25 }
  0x83   : > { %1084 = vmatpush.msrb.mxu2 %v7689_v26  ;;  %1124 = vmatpush.msrb.mxu0 %v7691_v27 }
  0x84   : > { %1184 = vmatpush.msrb.mxu3 %v7695_v28  ;;  %1229 = vmatpush.msrb.mxu1 %v7697_v29 }
  0x85   : > { %1085 = vmatpush.msrb.mxu2 %v7701_v30  ;;  %1125 = vmatpush.msrb.mxu0 %v7703_v31 }
  0x86   : > { %1185 = vmatpush.msrb.mxu3 %v7707_v32  ;;  %1230 = vmatpush.msrb.mxu1 %v7709_v33 }
  0x87   : > { %6103 = vmatmul.msk.f32.vlgmr.msrb.gmra.mxu2 %vm458_vm0, %v7716_v34  ;;  %6105 = vmatmul.msk.f32.vlgmr.msrb.gmra.mxu0 %vm458_vm0, %v7652_v16 }
  0x88   : > { %6108 = vmatmul.msk.f32.vlgmr.msrb.gmra.mxu3 %vm458_vm0, %v7652_v16  ;;  %6111 = vmatmul.msk.f32.vlgmr.msrb.gmra.mxu1 %vm458_vm0, %v7991_v21 }
  0x89   : > { %1162 = vmatpush.msra.mxu2 %v7720_v35  ;;  %1207 = vmatpush.msra.mxu0 %v7722_v36 }
  0x8a   : > { %1267 = vmatpush.msra.mxu3 %v7728_v37  ;;  %1315 = vmatpush.msra.mxu1 %v7730_v38 }
  0x8b   : > { %1163 = vmatpush.msra.mxu2 %v7736_v39  ;;  %1208 = vmatpush.msra.mxu0 %v7738_v40 }
  0x8c   : > { %1268 = vmatpush.msra.mxu3 %v7742_v41  ;;  %1316 = vmatpush.msra.mxu1 %v7744_v42  ;;  %v9808_v42 = vld [vmem:[#allocation59_spill] sm:$0xff] }
  0x8d   : > { %1164 = vmatpush.msra.mxu2 %v7748_v43  ;;  %1209 = vmatpush.msra.mxu0 %v7750_v44  ;;  %v9806_v44 = vld [vmem:[#allocation57_spill] sm:$0xff]  ;;  %v9807_v43 = vld [vmem:[#allocation58_spill] sm:$0xff] }
  0x8e   : > { %1269 = vmatpush.msra.mxu3 %v7754_v45  ;;  %1317 = vmatpush.msra.mxu1 %v7756_v46  ;;  %v9804_v46 = vld [vmem:[#allocation55_spill] sm:$0xff]  ;;  %v9805_v45 = vld [vmem:[#allocation56_spill] sm:$0xff] }
  0x8f   : > { %1165 = vmatpush.msra.mxu2 %v7760_v47  ;;  %1210 = vmatpush.msra.mxu0 %v7762_v48  ;;  %v9800_v48 = vld [vmem:[#allocation51_spill] sm:$0xff]  ;;  %v9803_v47 = vld [vmem:[#allocation54_spill] sm:$0xff] }
  0x90   : > { %1270 = vmatpush.msra.mxu3 %v7766_v49  ;;  %1318 = vmatpush.msra.mxu1 %v7768_v50  ;;  %v9801_v49 = vld [vmem:[#allocation52_spill] sm:$0xff]  ;;  %v9802_v50 = vld [vmem:[#allocation53_spill] sm:$0xff] }
  0x91   : > { %6107 = vmatmul.msk.f32.vlgmr.msra.gmra.mxu2 %vm458_vm0, %v7652_v16  ;;  %6110 = vmatmul.msk.f32.vlgmr.msra.gmra.mxu0 %vm458_vm0, %v7991_v21 }
  0x92   : > { %6113 = vmatmul.msk.f32.vlgmr.msra.gmra.mxu3 %vm458_vm0, %v7991_v21  ;;  %6115 = vmatmul.msk.f32.vlgmr.msra.gmra.mxu1 %vm458_vm0, %v7716_v34 }
  0x93   : > { %1247 = vmatpush.msrb.mxu2 %v7776_v51  ;;  %1295 = vmatpush.msrb.mxu0 %v7778_v52  ;;  %v9809_v51 = vld [vmem:[#allocation60_spill] sm:$0xff]  ;;  %v9810_v52 = vld [vmem:[#allocation61_spill] sm:$0xff] }
  0x94   : > { %1355 = vmatpush.msrb.mxu3 %v9800_v48  ;;  %1395 = vmatpush.msrb.mxu1 %v9801_v49  ;;  %v9811_v48 = vld [vmem:[#allocation62_spill] sm:$0xff]  ;;  %v9812_v49 = vld [vmem:[#allocation63_spill] sm:$0xff] }
  0x95   : > { %1248 = vmatpush.msrb.mxu2 %v9802_v50  ;;  %1296 = vmatpush.msrb.mxu0 %v9803_v47  ;;  %v9813_v50 = vld [vmem:[#allocation64_spill] sm:$0xff] }
  0x96   : > { %1356 = vmatpush.msrb.mxu3 %v9804_v46  ;;  %1396 = vmatpush.msrb.mxu1 %v9805_v45  ;;  %v9822_v45 = vld [vmem:[#allocation73_spill] sm:$0xff] }
  0x97   : > { %1249 = vmatpush.msrb.mxu2 %v9806_v44  ;;  %1297 = vmatpush.msrb.mxu0 %v9807_v43  ;;  %v9820_v43 = vld [vmem:[#allocation71_spill] sm:$0xff]  ;;  %v9821_v44 = vld [vmem:[#allocation72_spill] sm:$0xff] }
  0x98   : > { %1357 = vmatpush.msrb.mxu3 %v9808_v42  ;;  %1397 = vmatpush.msrb.mxu1 %v9809_v51  ;;  %v9814_v51 = vld [vmem:[#allocation65_spill] sm:$0xff]  ;;  %v9819_v42 = vld [vmem:[#allocation70_spill] sm:$0xff] }
  0x99   : > { %1250 = vmatpush.msrb.mxu2 %v9810_v52  ;;  %1298 = vmatpush.msrb.mxu0 %v9811_v48  ;;  %v9815_v52 = vld [vmem:[#allocation66_spill] sm:$0xff]  ;;  %v9816_v48 = vld [vmem:[#allocation67_spill] sm:$0xff] }
  0x9a   : > { %1358 = vmatpush.msrb.mxu3 %v9812_v49  ;;  %1398 = vmatpush.msrb.mxu1 %v9813_v50  ;;  %v9817_v49 = vld [vmem:[#allocation68_spill] sm:$0xff]  ;;  %v9818_v50 = vld [vmem:[#allocation69_spill] sm:$0xff] }
  0x9b   : > { %6112 = vmatmul.msk.f32.vlgmr.msrb.gmra.mxu2 %vm458_vm0, %v7991_v21  ;;  %6114 = vmatmul.msk.f32.vlgmr.msrb.gmra.mxu0 %vm458_vm0, %v7716_v34 }
  0x9c   : > { %6117 = vmatmul.msk.f32.vlgmr.msrb.gmra.mxu3 %vm458_vm0, %v7716_v34  ;;  %6119 = vmatmul.msk.f32.vlgmr.msrb.gmra.mxu1 %vm458_vm0, %v7652_v16 }
  0x9d   : > { %1335 = vmatpush.msra.mxu2 %v9814_v51  ;;  %1375 = vmatpush.msra.mxu0 %v9815_v52  ;;  %v9823_v51 = vld [vmem:[#allocation74_spill] sm:$0xff]  ;;  %v9824_v52 = vld [vmem:[#allocation75_spill] sm:$0xff] }
  0x9e   : > { %1435 = vmatpush.msra.mxu3 %v9816_v48  ;;  %1475 = vmatpush.msra.mxu1 %v9817_v49  ;;  %v9825_v48 = vld [vmem:[#allocation76_spill] sm:$0xff]  ;;  %v9826_v49 = vld [vmem:[#allocation77_spill] sm:$0xff] }
  0x9f   : > { %1336 = vmatpush.msra.mxu2 %v9818_v50  ;;  %1376 = vmatpush.msra.mxu0 %v7850_v54  ;;  %v9827_v50 = vld [vmem:[#allocation78_spill] sm:$0xff] }
  0xa0   : > { %1436 = vmatpush.msra.mxu3 %v7854_v53  ;;  %1476 = vmatpush.msra.mxu1 %v9819_v42 }
  0xa1   : > { %1337 = vmatpush.msra.mxu2 %v9820_v43  ;;  %1377 = vmatpush.msra.mxu0 %v9821_v44 }
  0xa2   : > { %1437 = vmatpush.msra.mxu3 %v9822_v45  ;;  %1477 = vmatpush.msra.mxu1 %v9823_v51  ;;  %v9828_v51 = vld [vmem:[#allocation79_spill] sm:$0xff] }
  0xa3   : > { %1338 = vmatpush.msra.mxu2 %v9824_v52  ;;  %1378 = vmatpush.msra.mxu0 %v9825_v48  ;;  %v9829_v52 = vld [vmem:[#allocation80_spill] sm:$0xff] }
  0xa4   : > { %1438 = vmatpush.msra.mxu3 %v9826_v49  ;;  %1478 = vmatpush.msra.mxu1 %v9827_v50  ;;  %v9830_v49 = vld [vmem:[#allocation23_spill] sm:$0xff]  ;;  %v9831_v50 = vld [vmem:[#allocation24_spill] sm:$0xff] }
  0xa5   : > { %6116 = vmatmul.msk.f32.vlgmr.msra.gmra.mxu2 %vm458_vm0, %v7716_v34  ;;  %6118 = vmatmul.msk.f32.vlgmr.msra.gmra.mxu0 %vm458_vm0, %v7652_v16 }
  0xa6   : > { %6121 = vmatmul.msk.f32.vlgmr.msra.gmra.mxu3 %vm458_vm0, %v7652_v16  ;;  %6123 = vmatmul.msk.f32.vlgmr.msra.gmra.mxu1 %vm458_vm0, %v7991_v21 }
  0xa7   : > { %1415 = vmatpush.msrb.mxu2 %v9828_v51  ;;  %1455 = vmatpush.msrb.mxu0 %v9829_v52  ;;  %v9832_v51 = vld [vmem:[#allocation82_spill] sm:$0xff] }
  0xa8   : > { %1515 = vmatpush.msrb.mxu3 %v7896_v56  ;;  %1630 = vmatpush.msrb.mxu1 %v9830_v49 }
  0xa9   : > { %1416 = vmatpush.msrb.mxu2 %v7902_v62  ;;  %1456 = vmatpush.msrb.mxu0 %v7904_v55  ;;  %v9833_v62 = vld [vmem:[#allocation25_spill] sm:$0xff] }
  0xaa   : > { %1516 = vmatpush.msrb.mxu3 %v7908_v61  ;;  %1631 = vmatpush.msrb.mxu1 %v9831_v50 }
  0xab   : > { %1417 = vmatpush.msrb.mxu2 %v7912_v59  ;;  %1457 = vmatpush.msrb.mxu0 %v7914_v58 }
  0xac   : > { %1517 = vmatpush.msrb.mxu3 %v7918_v57  ;;  %1632 = vmatpush.msrb.mxu1 %v7626_v9 }
  0xad   : > { %1418 = vmatpush.msrb.mxu2 %v9832_v51  ;;  %1458 = vmatpush.msrb.mxu0 %v7924_v63 }
  0xae   : > { %1518 = vmatpush.msrb.mxu3 %v7928_v1  ;;  %1633 = vmatpush.msrb.mxu1 %v9833_v62 }
  0xaf   : > { %6120 = vmatmul.msk.f32.vlgmr.msrb.gmra.mxu2 %vm458_vm0, %v7652_v16  ;;  %6122 = vmatmul.msk.f32.vlgmr.msrb.gmra.mxu0 %vm458_vm0, %v7991_v21  ;;  %v9834_v16 = vld [vmem:[#allocation31_spill] sm:$0xff] }
  0xb0   : > { %6125 = vmatmul.msk.f32.vlgmr.msrb.gmra.mxu3 %vm458_vm0, %v7991_v21  ;;  %6129 = vmatmul.msk.f32.vlgmr.msrb.gmra.mxu1 %vm458_vm0, %v7991_v21 }
  0xb1   : > { %1495 = vmatpush.msra.mxu2 %v7936_v5  ;;  %1610 = vmatpush.msra.mxu0 %v7602_v0 }
  0xb2   : > { %1670 = vmatpush.msra.mxu3 %v7606_v2  ;;  %1713 = vmatpush.msra.mxu1 %v7610_v3 }
  0xb3   : > { %1496 = vmatpush.msra.mxu2 %v7946_v60  ;;  %1611 = vmatpush.msra.mxu0 %v7612_v4 }
  0xb4   : > { %1671 = vmatpush.msra.mxu3 %v7618_v6  ;;  %1714 = vmatpush.msra.mxu1 %v7620_v7 }
  0xb5   : > { %1497 = vmatpush.msra.mxu2 %v7952_v17  ;;  %1612 = vmatpush.msra.mxu0 %v7622_v8 }
  0xb6   : > { %1672 = vmatpush.msra.mxu3 %v7628_v10  ;;  %1715 = vmatpush.msra.mxu1 %v7630_v11 }
  0xb7   : > { %1498 = vmatpush.msra.mxu2 %v7958_v13  ;;  %1613 = vmatpush.msra.mxu0 %v7639_v12 }
  0xb8   : > { %1673 = vmatpush.msra.mxu3 %v7645_v14  ;;  %1716 = vmatpush.msra.mxu1 %v7647_v15  ;;  %v9837_v14 = vld [vmem:[#allocation28_spill] sm:$0xff] }
  0xb9   : > { %6124 = vmatmul.msk.f32.vlgmr.msra.gmra.mxu2 %vm458_vm0, %v7991_v21  ;;  %6128 = vmatmul.msk.f32.vlgmr.msra.gmra.mxu0 %vm458_vm0, %v7991_v21 }
  0xba   : > { %6131 = vmatmul.msk.f32.vlgmr.msra.gmra.mxu3 %vm458_vm0, %v7991_v21  ;;  %6133 = vmatmul.msk.f32.vlgmr.msra.gmra.mxu1 %vm458_vm0, %v7716_v34  ;;  %v8133_v15 = vpop.f32.mrf.mxu0 }
  0xbb   : > { %1650 = vmatpush.msrb.mxu2 %v7661_v18  ;;  %1693 = vmatpush.msrb.mxu0 %v7663_v19  ;;  %9835 = vst [vmem:[#allocation71_spill] sm:$0xff] %v8133_v15  ;;  %v8135_v18 = vpop.f32.mrf.mxu1 }
  0xbc   : > { %1753 = vmatpush.msrb.mxu3 %v7669_v20  ;;  %1814 = vmatpush.msrb.mxu1 %v9834_v16  ;;  %9836 = vst [vmem:[#allocation72_spill] sm:$0xff] %v8135_v18  ;;  %v8138_v20 = vrot.slane %v9837_v14, 1  ;;  %v9840_v18 = vld [vmem:[#allocation40_spill] sm:$0xff] }
  0xbd   : > { %1651 = vmatpush.msrb.mxu2 %v7677_v22  ;;  %1694 = vmatpush.msrb.mxu0 %v7679_v23 }
  0xbe   : > { %1754 = vmatpush.msrb.mxu3 %v7683_v24  ;;  %1815 = vmatpush.msrb.mxu1 %v7685_v25 }
  0xbf   : > { %1652 = vmatpush.msrb.mxu2 %v7689_v26  ;;  %1695 = vmatpush.msrb.mxu0 %v7691_v27 }
  0xc0   : > { %1755 = vmatpush.msrb.mxu3 %v7695_v28  ;;  %1816 = vmatpush.msrb.mxu1 %v7697_v29  ;;  %v8160_v14 = vpop.f32.mrf.mxu2 }
  0xc1   : > { %1653 = vmatpush.msrb.mxu2 %v7701_v30  ;;  %1696 = vmatpush.msrb.mxu0 %v7703_v31  ;;  %9838 = vst [vmem:[#allocation73_spill] sm:$0xff] %v8160_v14  ;;  %v8162_v15 = vpop.f32.mrf.mxu3  ;;  %v9847_v30 = vld [vmem:[#allocation45_spill] sm:$0xff]  ;;  %v9848_v14 = vld [vmem:[#allocation46_spill] sm:$0xff] }
  0xc2   : > { %1756 = vmatpush.msrb.mxu3 %v7707_v32  ;;  %1817 = vmatpush.msrb.mxu1 %v7709_v33  ;;  %9839 = vst [vmem:[#allocation76_spill] sm:$0xff] %v8162_v15  ;;  %v9841_v33 = vld [vmem:[#allocation41_spill] sm:$0xff]  ;;  %v9849_v15 = vld [vmem:[#allocation47_spill] sm:$0xff] }
  0xc3   : > { %6130 = vmatmul.msk.f32.vlgmr.msrb.gmra.mxu2 %vm458_vm0, %v7991_v21  ;;  %6132 = vmatmul.msk.f32.vlgmr.msrb.gmra.mxu0 %vm458_vm0, %v7716_v34 }
  0xc4   : > { %6135 = vmatmul.msk.f32.vlgmr.msrb.gmra.mxu3 %vm458_vm0, %v7716_v34  ;;  %6137 = vmatmul.msk.f32.vlgmr.msrb.gmra.mxu1 %vm458_vm0, %v8138_v20  ;;  %v8168_v32 = vpop.f32.mrf.mxu0 }
  0xc5   : > { %1733 = vmatpush.msra.mxu2 %v7720_v35  ;;  %1794 = vmatpush.msra.mxu0 %v7722_v36  ;;  %v9842_v35 = vld [vmem:[#allocation42_spill] sm:$0xff]  ;;  %9843 = vst [vmem:[#allocation80_spill] sm:$0xff] %v8168_v32  ;;  %v9851_v32 = vld [vmem:[#allocation49_spill] sm:$0xff] }
  0xc6   : > { %1854 = vmatpush.msra.mxu3 %v7728_v37  ;;  %1930 = vmatpush.msra.mxu1 %v7730_v38  ;;  %v8170_v37 = vpop.f32.mrf.mxu1  ;;  %v9845_v38 = vld [vmem:[#allocation43_spill] sm:$0xff] }
  0xc7   : > { %1734 = vmatpush.msra.mxu2 %v7736_v39  ;;  %1795 = vmatpush.msra.mxu0 %v7738_v40  ;;  %9844 = vst [vmem:[#allocation23_spill] sm:$0xff] %v8170_v37  ;;  %v9846_v39 = vld [vmem:[#allocation44_spill] sm:$0xff]  ;;  %v9852_v37 = vld [vmem:[#allocation50_spill] sm:$0xff] }
  0xc8   : > { %1855 = vmatpush.msra.mxu3 %v7742_v41  ;;  %1931 = vmatpush.msra.mxu1 %v9840_v18  ;;  %v9850_v41 = vld [vmem:[#allocation48_spill] sm:$0xff]  ;;  %v9859_v18 = vld [vmem:[#allocation57_spill] sm:$0xff] }
  0xc9   : > { %1735 = vmatpush.msra.mxu2 %v9841_v33  ;;  %1796 = vmatpush.msra.mxu0 %v9842_v35  ;;  %v9858_v33 = vld [vmem:[#allocation56_spill] sm:$0xff] }
  0xca   : > { %1856 = vmatpush.msra.mxu3 %v9845_v38  ;;  %1932 = vmatpush.msra.mxu1 %v9846_v39  ;;  %v8192_v39 = vpop.f32.mrf.mxu2 }
  0xcb   : > { %1736 = vmatpush.msra.mxu2 %v9847_v30  ;;  %1797 = vmatpush.msra.mxu0 %v9848_v14  ;;  %v9853_v30 = vld [vmem:[#allocation51_spill] sm:$0xff]  ;;  %9856 = vst [vmem:[#allocation24_spill] sm:$0xff] %v8192_v39  ;;  %v8194_v38 = vpop.f32.mrf.mxu3  ;;  %v9866_v39 = vld [vmem:[#allocation62_spill] sm:$0xff] }
  0xcc   : > { %1857 = vmatpush.msra.mxu3 %v9849_v15  ;;  %1933 = vmatpush.msra.mxu1 %v9850_v41  ;;  %v9854_v15 = vld [vmem:[#allocation52_spill] sm:$0xff]  ;;  %v9855_v41 = vld [vmem:[#allocation53_spill] sm:$0xff]  ;;  %9857 = vst [vmem:[#allocation82_spill] sm:$0xff] %v8194_v38  ;;  %v9867_v38 = vld [vmem:[#allocation63_spill] sm:$0xff] }
  0xcd   : > { %6134 = vmatmul.msk.f32.vlgmr.msra.gmra.mxu2 %vm458_vm0, %v7716_v34  ;;  %6136 = vmatmul.msk.f32.vlgmr.msra.gmra.mxu0 %vm458_vm0, %v8138_v20 }
  0xce   : > { %6139 = vmatmul.msk.f32.vlgmr.msra.gmra.mxu3 %vm458_vm0, %v8138_v20  ;;  %6141 = vmatmul.msk.f32.vlgmr.msra.gmra.mxu1 %vm458_vm0, %v7991_v21 }
  0xcf   : > { %1834 = vmatpush.msrb.mxu2 %v9851_v32  ;;  %1910 = vmatpush.msrb.mxu0 %v9852_v37  ;;  %v9860_v32 = vld [vmem:[#allocation58_spill] sm:$0xff]  ;;  %v8200_v37 = vpop.f32.mrf.mxu0 }
  0xd0   : > { %1970 = vmatpush.msrb.mxu3 %v9853_v30  ;;  %2010 = vmatpush.msrb.mxu1 %v9854_v15  ;;  %9861 = vst [vmem:[#allocation25_spill] sm:$0xff] %v8200_v37  ;;  %v8202_v30 = vpop.f32.mrf.mxu1  ;;  %v9863_v15 = vld [vmem:[#allocation59_spill] sm:$0xff]  ;;  %v9869_v37 = vld [vmem:[#allocation66_spill] sm:$0xff] }
  0xd1   : > { %1835 = vmatpush.msrb.mxu2 %v9855_v41  ;;  %1911 = vmatpush.msrb.mxu0 %v9803_v47  ;;  %9862 = vst [vmem:[#allocation31_spill] sm:$0xff] %v8202_v30  ;;  %v9864_v41 = vld [vmem:[#allocation60_spill] sm:$0xff]  ;;  %v9865_v47 = vld [vmem:[#allocation61_spill] sm:$0xff] }
  0xd2   : > { %1971 = vmatpush.msrb.mxu3 %v9804_v46  ;;  %2011 = vmatpush.msrb.mxu1 %v9858_v33  ;;  %v9868_v46 = vld [vmem:[#allocation64_spill] sm:$0xff]  ;;  %v9870_v30 = vld [vmem:[#allocation65_spill] sm:$0xff] }
  0xd3   : > { %1836 = vmatpush.msrb.mxu2 %v9859_v18  ;;  %1912 = vmatpush.msrb.mxu0 %v9860_v32 }
  0xd4   : > { %1972 = vmatpush.msrb.mxu3 %v9863_v15  ;;  %2012 = vmatpush.msrb.mxu1 %v9864_v41  ;;  %v8224_v41 = vpop.f32.mrf.mxu2 }
  0xd5   : > { %1837 = vmatpush.msrb.mxu2 %v9865_v47  ;;  %1913 = vmatpush.msrb.mxu0 %v9866_v39  ;;  %v9871_v47 = vld [vmem:[#allocation67_spill] sm:$0xff]  ;;  %9874 = vst [vmem:[#allocation28_spill] sm:$0xff] %v8224_v41  ;;  %v8226_v15 = vpop.f32.mrf.mxu3 }
  0xd6   : > { %1973 = vmatpush.msrb.mxu3 %v9867_v38  ;;  %2013 = vmatpush.msrb.mxu1 %v9868_v46  ;;  %v9872_v38 = vld [vmem:[#allocation68_spill] sm:$0xff]  ;;  %v9873_v46 = vld [vmem:[#allocation69_spill] sm:$0xff]  ;;  %9875 = vst [vmem:[#allocation42_spill] sm:$0xff] %v8226_v15  ;;  %v9878_v41 = vld [vmem:[#allocation75_spill] sm:$0xff] }
  0xd7   : > { %6138 = vmatmul.msk.f32.vlgmr.msrb.gmra.mxu2 %vm458_vm0, %v8138_v20  ;;  %6140 = vmatmul.msk.f32.vlgmr.msrb.gmra.mxu0 %vm458_vm0, %v7991_v21  ;;  %v9879_v15 = vld [vmem:[#allocation77_spill] sm:$0xff] }
  0xd8   : > { %6143 = vmatmul.msk.f32.vlgmr.msrb.gmra.mxu3 %vm458_vm0, %v7991_v21  ;;  %1990 = vmatpush.msra.mxu0 %v9869_v37 }
  0xd9   : > { %6145 = vmatmul.msk.f32.vlgmr.msrb.gmra.mxu1 %vm458_vm0, %v7716_v34  ;;  %1950 = vmatpush.msra.mxu2 %v9870_v30  ;;  %v8232_v30 = vpop.f32.mrf.mxu0 }
  0xda   : > { %2050 = vmatpush.msra.mxu3 %v9871_v47  ;;  %2106 = vmatpush.msra.mxu1 %v9872_v38  ;;  %9876 = vst [vmem:[#allocation46_spill] sm:$0xff] %v8232_v30  ;;  %v8234_v47 = vpop.f32.mrf.mxu1  ;;  %v9877_v38 = vld [vmem:[#allocation74_spill] sm:$0xff]  ;;  %v9881_v30 = vld [vmem:[#allocation79_spill] sm:$0xff] }
  0xdb   : > { %1991 = vmatpush.msra.mxu0 %v7850_v54  ;;  %1951 = vmatpush.msra.mxu2 %v9873_v46 }
  0xdc   : > { %2051 = vmatpush.msra.mxu3 %v7854_v53  ;;  %2107 = vmatpush.msra.mxu1 %v9819_v42  ;;  %v9880_v42 = vld [vmem:[#allocation78_spill] sm:$0xff] }
  0xdd   : > { %1992 = vmatpush.msra.mxu0 %v9821_v44  ;;  %1952 = vmatpush.msra.mxu2 %v9820_v43 }
  0xde   : > { %2052 = vmatpush.msra.mxu3 %v9822_v45  ;;  %2108 = vmatpush.msra.mxu1 %v9877_v38 }
  0xdf   : > { %1993 = vmatpush.msra.mxu0 %v9825_v48  ;;  %1953 = vmatpush.msra.mxu2 %v9878_v41  ;;  %v8258_v41 = vpop.f32.mrf.mxu3 }
  0xe0   : > { %2053 = vmatpush.msra.mxu3 %v9879_v15  ;;  %2109 = vmatpush.msra.mxu1 %v9880_v42  ;;  %v9882_v42 = vld [vmem:[#allocation81_spill] sm:$0xff]  ;;  %v8256_v15 = vpop.f32.mrf.mxu2 }
  0xe1   : > { %2086 = vmatpush.msrb.mxu0 %v9829_v52  ;;  %6142 = vmatmul.msk.f32.vlgmr.msra.gmra.mxu2 %vm458_vm0, %v7991_v21 }
  0xe2   : > { %6144 = vmatmul.msk.f32.vlgmr.msra.gmra.mxu0 %vm458_vm0, %v7716_v34  ;;  %6147 = vmatmul.msk.f32.vlgmr.msra.gmra.mxu3 %vm458_vm0, %v7716_v34 }
  0xe3   : > { %6149 = vmatmul.msk.f32.vlgmr.msra.gmra.mxu1 %vm458_vm0, %v8138_v20  ;;  %2030 = vmatpush.msrb.mxu2 %v9881_v30 }
  0xe4   : > { %2087 = vmatpush.msrb.mxu0 %v7904_v55  ;;  %2146 = vmatpush.msrb.mxu3 %v7896_v56  ;;  %v8264_v30 = vpop.f32.mrf.mxu0 }
  0xe5   : > { %2194 = vmatpush.msrb.mxu1 %v9830_v49  ;;  %2031 = vmatpush.msrb.mxu2 %v9882_v42  ;;  %v8266_v38 = vpop.f32.mrf.mxu1 }
  0xe6   : > { %2088 = vmatpush.msrb.mxu0 %v7914_v58  ;;  %2147 = vmatpush.msrb.mxu3 %v7908_v61 }
  0xe7   : > { %2195 = vmatpush.msrb.mxu1 %v9831_v50  ;;  %2032 = vmatpush.msrb.mxu2 %v7912_v59 }
  0xe8   : > { %2089 = vmatpush.msrb.mxu0 %v7924_v63  ;;  %2148 = vmatpush.msrb.mxu3 %v7918_v57 }
  0xe9   : > { %2196 = vmatpush.msrb.mxu1 %v7626_v9  ;;  %2033 = vmatpush.msrb.mxu2 %v9832_v51 }
  0xea   : > { %2174 = vmatpush.msra.mxu0 %v7602_v0  ;;  %2149 = vmatpush.msrb.mxu3 %v7928_v1  ;;  %v8288_v0 = vpop.f32.mrf.mxu2  ;;  %v8290_v9 = vpop.f32.mrf.mxu3 }
  0xeb   : > { %2197 = vmatpush.msrb.mxu1 %v9833_v62  ;;  %6146 = vmatmul.msk.f32.vlgmr.msrb.gmra.mxu2 %vm458_vm0, %v7716_v34  ;;  %v9896_v62 = vld [vmem:[#allocation40_spill] sm:$0xff] }
  0xec   : > { %6148 = vmatmul.msk.f32.vlgmr.msrb.gmra.mxu0 %vm458_vm0, %v8138_v20  ;;  %6151 = vmatmul.msk.f32.vlgmr.msrb.gmra.mxu3 %vm458_vm0, %v8138_v20 }
  0xed   : > { %2175 = vmatpush.msra.mxu0 %v7612_v4  ;;  %6153 = vmatmul.msk.f32.vlgmr.msrb.gmra.mxu1 %vm458_vm0, %v8138_v20 }
  0xee   : > { %2126 = vmatpush.msra.mxu2 %v7936_v5  ;;  %2234 = vmatpush.msra.mxu3 %v7606_v2  ;;  %v9883_v2 = vld [vmem:[#allocation26_spill] sm:$0xff] }
  0xef   : > { %2274 = vmatpush.msra.mxu1 %v7610_v3  ;;  %2176 = vmatpush.msra.mxu0 %v7622_v8  ;;  %v9884_v3 = vld [vmem:[#allocation27_spill] sm:$0xff] }
  0xf0   : > { %2127 = vmatpush.msra.mxu2 %v7946_v60  ;;  %2235 = vmatpush.msra.mxu3 %v7618_v6  ;;  %v9885_v6 = vld [vmem:[#allocation29_spill] sm:$0xff] }
  0xf1   : > { %2275 = vmatpush.msra.mxu1 %v7620_v7  ;;  %2177 = vmatpush.msra.mxu0 %v7639_v12  ;;  %v8296_v4 = vpop.f32.mrf.mxu0  ;;  %v8298_v34 = vpop.f32.mrf.mxu1  ;;  %v9886_v7 = vld [vmem:[#allocation30_spill] sm:$0xff] }
  0xf2   : > { %2128 = vmatpush.msra.mxu2 %v7952_v17  ;;  %2236 = vmatpush.msra.mxu3 %v7628_v10 }
  0xf3   : > { %2254 = vmatpush.msrb.mxu0 %v7663_v19  ;;  %2276 = vmatpush.msra.mxu1 %v7630_v11  ;;  %v6160_v11 = vld [vmem:[%s7635_s14 + $0x8] sm:$0xff]  ;;  %s5940_s14 = sshll.u32 %s416_s21, 4  ;;  %s5941_s14 = int_to_ptr.vmem [resolvable:$true] %s5940_s14 }
  0xf4   : > { %2129 = vmatpush.msra.mxu2 %v7958_v13  ;;  %2237 = vmatpush.msra.mxu3 %v9883_v2  ;;  %v9898_v2 = vld [vmem:[#allocation43_spill] sm:$0xff] }
  0xf5   : > { %2255 = vmatpush.msrb.mxu0 %v7679_v23  ;;  %2277 = vmatpush.msra.mxu1 %v9884_v3  ;;  %v8322_v10 = vpop.f32.mrf.mxu3  ;;  %v8339_v23 = vrot.slane %v6160_v11, 1  ;;  %v9899_v3 = vld [vmem:[#allocation54_spill] sm:$0xff]  ;;  %v9903_v11 = vld [vmem:[#allocation48_spill] sm:$0xff] }
  0xf6   : > { %6150 = vmatmul.msk.f32.vlgmr.msra.gmra.mxu2 %vm458_vm0, %v8138_v20  ;;  %6152 = vmatmul.msk.f32.vlgmr.msra.gmra.mxu0 %vm458_vm0, %v8138_v20  ;;  %v8320_v8 = vpop.f32.mrf.mxu2 }
  0xf7   : > { %6155 = vmatmul.msk.f32.vlgmr.msra.gmra.mxu3 %vm458_vm0, %v8138_v20  ;;  %6157 = vmatmul.msk.f32.vlgmr.msra.gmra.mxu1 %vm458_vm0, %v7991_v21 }
  0xf8   : > { %2214 = vmatpush.msrb.mxu2 %v9885_v6  ;;  %2256 = vmatpush.msrb.mxu0 %v7691_v27  ;;  %v9891_v27 = vld [vmem:[#allocation36_spill] sm:$0xff] }
  0xf9   : > { %2314 = vmatpush.msrb.mxu3 %v9886_v7  ;;  %2359 = vmatpush.msrb.mxu1 %v9834_v16  ;;  %v9897_v16 = vld [vmem:[#allocation41_spill] sm:$0xff]  ;;  %v9900_v6 = vld [vmem:[#allocation44_spill] sm:$0xff]  ;;  %v9902_v7 = vld [vmem:[#allocation47_spill] sm:$0xff] }
  0xfa   : > { %2215 = vmatpush.msrb.mxu2 %v7677_v22  ;;  %2257 = vmatpush.msrb.mxu0 %v7703_v31  ;;  %v8329_v12 = vpop.f32.mrf.mxu0  ;;  %v9887_v22 = vld [vmem:[#allocation32_spill] sm:$0xff] }
  0xfb   : > { %2315 = vmatpush.msrb.mxu3 %v7683_v24  ;;  %2360 = vmatpush.msrb.mxu1 %v7685_v25  ;;  %v8331_v19 = vpop.f32.mrf.mxu1  ;;  %v9888_v24 = vld [vmem:[#allocation33_spill] sm:$0xff]  ;;  %v9889_v25 = vld [vmem:[#allocation34_spill] sm:$0xff] }
  0xfc   : > { %2339 = vmatpush.msra.mxu0 %v7722_v36  ;;  %2216 = vmatpush.msrb.mxu2 %v7689_v26  ;;  %v9890_v26 = vld [vmem:[#allocation35_spill] sm:$0xff]  ;;  %v9893_v36 = vld [vmem:[#allocation38_spill] sm:$0xff] }
  0xfd   : > { %2316 = vmatpush.msrb.mxu3 %v7695_v28  ;;  %2361 = vmatpush.msrb.mxu1 %v7697_v29  ;;  %v9892_v28 = vld [vmem:[#allocation37_spill] sm:$0xff] }
  0xfe   : > { %2340 = vmatpush.msra.mxu0 %v7738_v40  ;;  %2217 = vmatpush.msrb.mxu2 %v9887_v22  ;;  %v9894_v40 = vld [vmem:[#allocation39_spill] sm:$0xff]  ;;  %v9904_v22 = vld [vmem:[#allocation49_spill] sm:$0xff] }
  0xff   : > { %2317 = vmatpush.msrb.mxu3 %v9888_v24  ;;  %2362 = vmatpush.msrb.mxu1 %v9889_v25 }
 0x100   : > { %6154 = vmatmul.msk.f32.vlgmr.msrb.gmra.mxu2 %vm458_vm0, %v8138_v20  ;;  %6156 = vmatmul.msk.f32.vlgmr.msrb.gmra.mxu0 %vm458_vm0, %v7991_v21  ;;  %v8355_v29 = vpop.f32.mrf.mxu2 }
 0x101   : > { %6159 = vmatmul.msk.f32.vlgmr.msrb.gmra.mxu3 %vm458_vm0, %v7991_v21  ;;  %2341 = vmatpush.msra.mxu0 %v9842_v35  ;;  %v8357_v31 = vpop.f32.mrf.mxu3  ;;  %v9895_v35 = vld [vmem:[#allocation50_spill] sm:$0xff] }
 0x102   : > { %6162 = vmatmul.msk.f32.vlgmr.msrb.gmra.mxu1 %vm458_vm0, %v8339_v23  ;;  %2294 = vmatpush.msra.mxu2 %v9890_v26  ;;  %v9906_v26 = vld [vmem:[#allocation52_spill] sm:$0xff] }
 0x103   : > { %2399 = vmatpush.msra.mxu3 %v9891_v27  ;;  %2447 = vmatpush.msra.mxu1 %v9892_v28  ;;  %v9907_v28 = vld [vmem:[#allocation53_spill] sm:$0xff] }
 0x104   : > { %2342 = vmatpush.msra.mxu0 %v9848_v14  ;;  %2295 = vmatpush.msra.mxu2 %v9893_v36  ;;  %v8363_v49 = vpop.f32.mrf.mxu0  ;;  %v9901_v14 = vld [vmem:[#allocation45_spill] sm:$0xff]  ;;  %v9908_v36 = vld [vmem:[#allocation55_spill] sm:$0xff] }
 0x105   : > { %2400 = vmatpush.msra.mxu3 %v9894_v40  ;;  %v8365_v50 = vpop.f32.mrf.mxu1  ;;  %2448 = vmatpush.msra.mxu1 %v9896_v62  ;;  %v9912_v62 = vld [vmem:[#allocation63_spill] sm:$0xff] }
 0x106   : > { %2427 = vmatpush.msrb.mxu0 %v9895_v35  ;;  %2296 = vmatpush.msra.mxu2 %v9897_v16  ;;  %v9910_v35 = vld [vmem:[#allocation60_spill] sm:$0xff] }
 0x107   : > { %2401 = vmatpush.msra.mxu3 %v9898_v2  ;;  %2449 = vmatpush.msra.mxu1 %v9900_v6  ;;  %v9913_v16 = vld [vmem:[#allocation64_spill] sm:$0xff] }
 0x108   : > { %2428 = vmatpush.msrb.mxu0 %v9899_v3  ;;  %2297 = vmatpush.msra.mxu2 %v9901_v14  ;;  %v9916_v2 = vld [vmem:[#allocation68_spill] sm:$0xff]  ;;  %v9917_v14 = vld [vmem:[#allocation31_spill] sm:$0xff] }
 0x109   : > { %2402 = vmatpush.msra.mxu3 %v9902_v7  ;;  %2450 = vmatpush.msra.mxu1 %v9903_v11  ;;  %v9918_v7 = vld [vmem:[#allocation70_spill] sm:$0xff]  ;;  %v9920_v11 = vld [vmem:[#allocation72_spill] sm:$0xff] }
 0x10a   : > { %2429 = vmatpush.msrb.mxu0 %v9860_v32  ;;  %6158 = vmatmul.msk.f32.vlgmr.msra.gmra.mxu2 %vm458_vm0, %v7991_v21  ;;  %v8385_v24 = vpop.f32.mrf.mxu2  ;;  %v9905_v32 = vld [vmem:[#allocation51_spill] sm:$0xff] }
 0x10b   : > { %6161 = vmatmul.msk.f32.vlgmr.msra.gmra.mxu0 %vm458_vm0, %v8339_v23  ;;  %6164 = vmatmul.msk.f32.vlgmr.msra.gmra.mxu3 %vm458_vm0, %v8339_v23  ;;  %v8387_v25 = vpop.f32.mrf.mxu3 }
 0x10c   : > { %6166 = vmatmul.msk.f32.vlgmr.msra.gmra.mxu1 %vm458_vm0, %v8138_v20  ;;  %2379 = vmatpush.msrb.mxu2 %v9904_v22 }
 0x10d   : > { %2430 = vmatpush.msrb.mxu0 %v9866_v39  ;;  %2487 = vmatpush.msrb.mxu3 %v9905_v32  ;;  %v9909_v39 = vld [vmem:[#allocation59_spill] sm:$0xff] }
 0x10e   : > { %2527 = vmatpush.msrb.mxu1 %v9906_v26  ;;  %v8393_v27 = vpop.f32.mrf.mxu0  ;;  %2380 = vmatpush.msrb.mxu2 %v9907_v28  ;;  %v9922_v32 = vld [vmem:[#allocation75_spill] sm:$0xff] }
 0x10f   : > { %2507 = vmatpush.msra.mxu0 %v9869_v37  ;;  %2488 = vmatpush.msrb.mxu3 %v9908_v36  ;;  %v1320_v40 = vpop.f32.mrf.mxu1  ;;  %v9911_v37 = vld [vmem:[#allocation61_spill] sm:$0xff] }
 0x110   : > { %2528 = vmatpush.msrb.mxu1 %v9858_v33  ;;  %2381 = vmatpush.msrb.mxu2 %v9859_v18 }
 0x111   : > { %2508 = vmatpush.msra.mxu0 %v7850_v54  ;;  %2489 = vmatpush.msrb.mxu3 %v9909_v39  ;;  %v9915_v54 = vld [vmem:[#allocation67_spill] sm:$0xff]  ;;  %v2881_v39 = vld [vmem:[#allocation9 + $0x8e0] sm:$0xff] }
 0x112   : > { %2529 = vmatpush.msrb.mxu1 %v9910_v35  ;;  %2382 = vmatpush.msrb.mxu2 %v9911_v37  ;;  %v8459_v35 = vld [vmem:[#allocation7] sm:$0xf] }
 0x113   : > { %2509 = vmatpush.msra.mxu0 %v9821_v44  ;;  %2490 = vmatpush.msrb.mxu3 %v9912_v62  ;;  %v9914_v44 = vld [vmem:[#allocation65_spill] sm:$0xff]  ;;  %v2847_v62 = vld [vmem:[#allocation9 + $0x7d0] sm:$0xff] }
 0x114   : > { %2530 = vmatpush.msrb.mxu1 %v9913_v16  ;;  %6163 = vmatmul.msk.f32.vlgmr.msrb.gmra.mxu2 %vm458_vm0, %v8339_v23  ;;  %v8408_v33 = vpop.f32.mrf.mxu2 }
 0x115   : > { %6165 = vmatmul.msk.f32.vlgmr.msrb.gmra.mxu0 %vm458_vm0, %v8138_v20  ;;  %6168 = vmatmul.msk.f32.vlgmr.msrb.gmra.mxu3 %vm458_vm0, %v8138_v20  ;;  %v8414_v18 = vpop.f32.mrf.mxu3 }
 0x116   : > { %2510 = vmatpush.msra.mxu0 %v9825_v48  ;;  %6170 = vmatmul.msk.f32.vlgmr.msrb.gmra.mxu1 %vm458_vm0, %v7991_v21  ;;  %v883_v48 = vadd.f32 %v8234_v47, %v9917_v14  ;;  %v9923_v47 = vld [vmem:[#allocation77_spill] sm:$0xff]  ;;  %v9927_v14 = vld [vmem:[#allocation46_spill] sm:$0xff] }
 0x117   : > { %2467 = vmatpush.msra.mxu2 %v9914_v44  ;;  %2567 = vmatpush.msra.mxu3 %v9915_v54  ;;  %v2879_v44 = vld [vmem:[#allocation9 + $0x8d0] sm:$0xff] }
 0x118   : > { %2587 = vmatpush.msrb.mxu0 %v9829_v52  ;;  %2607 = vmatpush.msra.mxu1 %v9916_v2  ;;  %v8423_v3 = vpop.f32.mrf.mxu0  ;;  %v9919_v52 = vld [vmem:[#allocation73_spill] sm:$0xff] }
 0x119   : > { %2468 = vmatpush.msra.mxu2 %v9873_v46  ;;  %2568 = vmatpush.msra.mxu3 %v7854_v53  ;;  %v1400_v6 = vpop.f32.mrf.mxu1  ;;  %v583_v22 = vadd.f32 %v9920_v11, %v9919_v52  ;;  %v1148_v46 = vadd.f32 %v8331_v19, %v8298_v34  ;;  %v9921_v53 = vld [vmem:[#allocation74_spill] sm:$0xff]  ;;  %v9925_v19 = vld [vmem:[#allocation23_spill] sm:$0xff]  ;;  %v9929_v52 = vld [vmem:[#allocation80_spill] sm:$0xff] }
 0x11a   : > { %2588 = vmatpush.msrb.mxu0 %v7904_v55  ;;  %2608 = vmatpush.msra.mxu1 %v9918_v7  ;;  %v1023_v55 = vadd.f32 %v8266_v38, %v883_v48  ;;  %v2849_v38 = vld [vmem:[#allocation9 + $0x7e0] sm:$0xff]  ;;  %v1401_v36 = vadd.f32 %v1400_v6, %v1320_v40  ;;  %v1534_v6 = vperm.slane %v8459_v35, 1  ;;  %v863_v48 = vadd.f32 %v8264_v30, %v9927_v14  ;;  %v9928_v7 = vld [vmem:[#allocation71_spill] sm:$0xff]  ;;  %v2843_v30 = vld [vmem:[#allocation9 + $0x7b0] sm:$0xff] }
 0x11b   : > { %2469 = vmatpush.msra.mxu2 %v9820_v43  ;;  %2569 = vmatpush.msra.mxu3 %v9822_v45  ;;  %v9924_v43 = vld [vmem:[#allocation78_spill] sm:$0xff]  ;;  %v2851_v45 = vld [vmem:[#allocation9 + $0x7f0] sm:$0xff]  ;;  %v728_v28 = vadd.f32 %v9925_v19, %v583_v22  ;;  %v1128_v22 = vadd.f32 %v8363_v49, %v8329_v12  ;;  %v923_v19 = vadd.f32 %v8290_v9, %v8258_v41 }
 0x11c   : > { %2589 = vmatpush.msrb.mxu0 %v7914_v58  ;;  %2609 = vmatpush.msra.mxu1 %v9921_v53  ;;  %v2883_v58 = vld [vmem:[#allocation9 + $0x8f0] sm:$0xff]  ;;  %v2845_v40 = vld [vmem:[#allocation9 + $0x7c0] sm:$0xff]  ;;  %v1022_v11 = vadd.f32 %v8296_v4, %v863_v48  ;;  %v9930_v4 = vld [vmem:[#allocation25_spill] sm:$0xff]  ;;  %v1188_v41 = vadd.f32 %v8387_v25, %v8357_v31 }
 0x11d   : > { %2470 = vmatpush.msra.mxu2 %v9922_v32  ;;  %2570 = vmatpush.msra.mxu3 %v9923_v47  ;;  %v1027_v37 = vmax.f32 %v728_v28, %v1023_v55  ;;  %v7440_v32 = vmov 0.0   ;;  %v2929_v49 = vld [vmem:[#allocation9 + $0xa60] sm:$0xff]  ;;  %v2927_v28 = vld [vmem:[#allocation9 + $0xa50] sm:$0xff] }
 0x11e   : > { %2590 = vmatpush.msrb.mxu0 %v7924_v63  ;;  %2610 = vmatpush.msra.mxu1 %v9924_v43  ;;  %v8444_v26 = vpop.f32.mrf.mxu2  ;;  %v1276_v63 = vadd.f32 %v8365_v50, %v1148_v46  ;;  %v2931_v46 = vld [vmem:[#allocation9 + $0xa70] sm:$0xff] }
 0x11f   : > { %6167 = vmatmul.msk.f32.vlgmr.msra.gmra.mxu2 %vm458_vm0, %v8138_v20  ;;  %6169 = vmatmul.msk.f32.vlgmr.msra.gmra.mxu0 %vm458_vm0, %v7991_v21  ;;  %v8450_v34 = vpop.f32.mrf.mxu3  ;;  %v9926_v20 = vld [vmem:[#allocation79_spill] sm:$0xff]  ;;  %v2835_v9 = vld [vmem:[#allocation9 + $0x770] sm:$0xff] }
 0x120   : > { %6172 = vmatmul.msk.f32.vlgmr.msra.gmra.mxu3 %vm458_vm0, %v7991_v21  ;;  %6174 = vmatmul.msk.f32.vlgmr.msra.gmra.mxu1 %vm458_vm0, %v8339_v23  ;;  %v1280_v50 = vmax.f32 %v1027_v37, %v1276_v63  ;;  %v2837_v63 = vld [vmem:[#allocation9 + $0x780] sm:$0xff]  ;;  %v2915_v31 = vld [vmem:[#allocation9 + $0x9f0] sm:$0xff] }
 0x121   : > { %2937 = vmatpush.msra.mxu0 %v2851_v45  ;;  %2547 = vmatpush.msrb.mxu2 %v9926_v20  ;;  %v2839_v45 = vld [vmem:[#allocation9 + $0x790] sm:$0xff]  ;;  %v1533_v20 = vperm.slane %v8459_v35, 0  ;;  %v9932_v37 = vld [vmem:[#allocation82_spill] sm:$0xff] }
 0x122   : > { %2647 = vmatpush.msrb.mxu3 %v7896_v56  ;;  %2957 = vmatpush.msrb.mxu1 %v2883_v58  ;;  %v1380_v16 = vpop.f32.mrf.mxu0  ;;  %v1554_v56 = vlaneseq  ;;  %v2923_v25 = vld [vmem:[#allocation9 + $0xa30] sm:$0xff] }
 0x123   : > { %2938 = vmatpush.msra.mxu0 %v2849_v38  ;;  %2548 = vmatpush.msrb.mxu2 %v9882_v42  ;;  %v1480_v54 = vpop.f32.mrf.mxu1  ;;  %v563_v42 = vadd.f32 %v9929_v52, %v9928_v7  ;;  %v1381_v58 = vadd.f32 %v1380_v16, %v8423_v3  ;;  %v2925_v16 = vld [vmem:[#allocation9 + $0xa40] sm:$0xff]  ;;  %v2867_v48 = vld [vmem:[#allocation9 + $0x870] sm:$0xff] }
 0x124   : > { %2648 = vmatpush.msrb.mxu3 %v7908_v61  ;;  %2958 = vmatpush.msrb.mxu1 %v2881_v39  ;;  %v1524_v2 = vadd.f32 %v1480_v54, %v1401_v36  ;;  %vm1556_vm1 = vcmp.lt.s32.totalorder %v1554_v56, 448  ;;  %v9931_v39 = vld [vmem:[#allocation76_spill] sm:$0xff]  ;;  %v2913_v56 = vld [vmem:[#allocation9 + $0x9e0] sm:$0xff] }
 0x125   : > { %2939 = vmatpush.msra.mxu0 %v2847_v62  ;;  %2549 = vmatpush.msrb.mxu2 %v7912_v59  ;;  %v2877_v59 = vld [vmem:[#allocation9 + $0x8c0] sm:$0xff]  ;;  %1559 = vst.msk [vmem:[#allocation2 + $0x7] ss:$8 sm:$0xf] %vm1556_vm1, %v7440_v32  ;;  %v727_v47 = vadd.f32 %v9930_v4, %v563_v42  ;;  %v623_v3 = vadd.f32 %v9932_v37, %v9931_v39 }
 0x126   : > { %2649 = vmatpush.msrb.mxu3 %v7918_v57  ;;  %2959 = vmatpush.msrb.mxu1 %v2879_v44  ;;  %v1528_v61 = vmax.f32 %v1280_v50, %v1524_v2  ;;  %2698 = vst.msk [vmem:[#allocation3] ss:$8 sm:$0xf] %vm1556_vm1, %v7440_v32  ;;  %v1025_v62 = vadd.f32 %v8322_v10, %v923_v19  ;;  %v9933_v50 = vld [vmem:[#allocation42_spill] sm:$0xff]  ;;  %v2863_v32 = vld [vmem:[#allocation9 + $0x850] sm:$0xff] }
 0x127   : > { %2940 = vmatpush.msra.mxu0 %v2845_v40  ;;  %2550 = vmatpush.msrb.mxu2 %v9832_v51  ;;  %v2841_v51 = vld [vmem:[#allocation9 + $0x7a0] sm:$0xff]  ;;  %v1026_v43 = vmax.f32 %v727_v47, %v1022_v11  ;;  %v730_v40 = vadd.f32 %v9933_v50, %v623_v3  ;;  %v1278_v10 = vadd.f32 %v8414_v18, %v1188_v41  ;;  %v2903_v41 = vld [vmem:[#allocation9 + $0x990] sm:$0xff] }
 0x128   : > { %2650 = vmatpush.msrb.mxu3 %v7928_v1  ;;  %6171 = vmatmul.msk.f32.vlgmr.msrb.gmra.mxu2 %vm458_vm0, %v7991_v21  ;;  %v1542_v57 = vadd.f32 %v1534_v6, %v1528_v61  ;;  %v8478_v53 = vpop.f32.mrf.mxu2  ;;  %v1275_v1 = vadd.f32 %v8393_v27, %v1128_v22  ;;  %v2875_v21 = vld [vmem:[#allocation9 + $0x8b0] sm:$0xff]  ;;  %v2873_v27 = vld [vmem:[#allocation9 + $0x8a0] sm:$0xff] }
 0x129   : > { %6173 = vmatmul.msk.f32.vlgmr.msrb.gmra.mxu0 %vm458_vm0, %v8339_v23  ;;  %6176 = vmatmul.msk.f32.vlgmr.msrb.gmra.mxu3 %vm458_vm0, %v8339_v23  ;;  %v1440_v12 = vpop.f32.mrf.mxu3  ;;  %v2869_v2 = vld [vmem:[#allocation9 + $0x880] sm:$0xff]  ;;  %v1029_v14 = vmax.f32 %v730_v40, %v1025_v62  ;;  %v2911_v22 = vld [vmem:[#allocation9 + $0x9d0] sm:$0xff] }
 0x12a   : > { %2941 = vmatpush.msra.mxu0 %v2843_v30  ;;  %2627 = vmatpush.msra.mxu2 %v7936_v5  ;;  %v1546_v55 = vmax.f32 %v1542_v57, 0.0  ;;  %v1279_v5 = vmax.f32 %v1026_v43, %v1275_v1  ;;  %v1441_v7 = vadd.f32 %v1440_v12, %v8450_v34  ;;  %v2921_v18 = vld [vmem:[#allocation9 + $0xa20] sm:$0xff]  ;;  %v2919_v34 = vld [vmem:[#allocation9 + $0xa10] sm:$0xff]  ;;  %v2852_v43 = vld [vmem:[#allocation9 + $0x7f8] sm:$0xff] }
 0x12b   : > { %2960 = vmatpush.msrb.mxu1 %v2877_v59  ;;  %3005 = vmatpush.msra.mxu3 %v2931_v46  ;;  %v2865_v11 = vld [vmem:[#allocation9 + $0x860] sm:$0xff]  ;;  %v1536_v59 = vperm.slane %v8459_v35, 3  ;;  %v903_v46 = vadd.f32 %v8320_v8, %v8288_v0  ;;  %v9935_v1 = vld [vmem:[#allocation28_spill] sm:$0xff] }
 0x12c   : > { %2942 = vmatpush.msra.mxu0 %v2841_v51  ;;  %2628 = vmatpush.msra.mxu2 %v7946_v60  ;;  %1550 = vst [vmem:[#allocation2 + $0x8] sm:$0x7f] %v1546_v55  ;;  %v1460_v38 = vpop.f32.mrf.mxu0  ;;  %v2871_v60 = vld [vmem:[#allocation9 + $0x890] sm:$0xff]  ;;  %v2829_v57 = vld [vmem:[#allocation9 + $0x740] sm:$0xff] }
 0x12d   : > { %2961 = vmatpush.msrb.mxu1 %v2875_v21  ;;  %3006 = vmatpush.msra.mxu3 %v2929_v49  ;;  %v1523_v36 = vadd.f32 %v1460_v38, %v1381_v58  ;;  %v8498_v54 = vpop.f32.mrf.mxu1  ;;  %v2909_v4 = vld [vmem:[#allocation9 + $0x9c0] sm:$0xff]  ;;  %v9934_v51 = vld [vmem:[#allocation24_spill] sm:$0xff]  ;;  %v1024_v21 = vadd.f32 %v8355_v29, %v903_v46  ;;  %v1168_v49 = vadd.f32 %v8408_v33, %v8385_v24  ;;  %v2850_v38 = vld [vmem:[#allocation9 + $0x7e8] sm:$0xff] }
 0x12e   : > { %2943 = vmatpush.msra.mxu0 %v2839_v45  ;;  %2629 = vmatpush.msra.mxu2 %v7952_v17  ;;  %v2833_v17 = vld [vmem:[#allocation9 + $0x760] sm:$0xff]  ;;  %v603_v12 = vadd.f32 %v9935_v1, %v9934_v51  ;;  %v2827_v55 = vld [vmem:[#allocation9 + $0x730] sm:$0xff]  ;;  %v2874_v46 = vld [vmem:[#allocation9 + $0x8a8] sm:$0xff] }
 0x12f   : > { %2962 = vmatpush.msrb.mxu1 %v2873_v27  ;;  %3007 = vmatpush.msra.mxu3 %v2927_v28  ;;  %v1527_v44 = vmax.f32 %v1279_v5, %v1523_v36  ;;  %v2917_v0 = vld [vmem:[#allocation9 + $0xa00] sm:$0xff]  ;;  %v1277_v29 = vadd.f32 %v8444_v26, %v1168_v49  ;;  %v2907_v28 = vld [vmem:[#allocation9 + $0x9b0] sm:$0xff]  ;;  %v2848_v26 = vld [vmem:[#allocation9 + $0x7d8] sm:$0xff] }
 0x130   : > { %2944 = vmatpush.msra.mxu0 %v2837_v63  ;;  %2630 = vmatpush.msra.mxu2 %v7958_v13  ;;  %v2831_v13 = vld [vmem:[#allocation9 + $0x750] sm:$0xff]  ;;  %v2861_v8 = vld [vmem:[#allocation9 + $0x840] sm:$0xff]  ;;  %v729_v19 = vadd.f32 %v8256_v15, %v603_v12  ;;  %v2872_v51 = vld [vmem:[#allocation9 + $0x898] sm:$0xff] }
 0x131   : > { %6175 = vmatmul.msk.f32.vlgmr.msra.gmra.mxu2 %vm458_vm0, %v8339_v23  ;;  %2963 = vmatpush.msrb.mxu1 %v2871_v60  ;;  %v1541_v6 = vadd.f32 %v1533_v20, %v1527_v44  ;;  %v1282_v23 = vmax.f32 %v1029_v14, %v1278_v10  ;;  %v2825_v27 = vld [vmem:[#allocation9 + $0x720] sm:$0xff]  ;;  %v2859_v33 = vld [vmem:[#allocation9 + $0x830] sm:$0xff]  ;;  %v2836_v1 = vld [vmem:[#allocation9 + $0x778] sm:$0xff] }
 0x132   : > { %2945 = vmatpush.msra.mxu0 %v2835_v9  ;;  %3008 = vmatpush.msra.mxu3 %v2925_v16  ;;  %v1420_v52 = vpop.f32.mrf.mxu2  ;;  %v1028_v63 = vmax.f32 %v729_v19, %v1024_v21  ;;  %v2823_v36 = vld [vmem:[#allocation9 + $0x710] sm:$0xff]  ;;  %v2905_v20 = vld [vmem:[#allocation9 + $0x9a0] sm:$0xff]  ;;  %v1535_v9 = vperm.slane %v8459_v35, 2  ;;  %v2884_v16 = vld [vmem:[#allocation9 + $0x8f8] sm:$0xff] }
 0x133   : > { %2964 = vmatpush.msrb.mxu1 %v2869_v2  ;;  %2977 = vmatpush.msrb.mxu2 %v2915_v31  ;;  %v1545_v42 = vmax.f32 %v1541_v6, 0.0  ;;  %v1520_v61 = vpop.f32.mrf.mxu3  ;;  %v1421_v15 = vadd.f32 %v1420_v52, %v8478_v53  ;;  %v2857_v39 = vld [vmem:[#allocation9 + $0x820] sm:$0xff]  ;;  %v2855_v44 = vld [vmem:[#allocation9 + $0x810] sm:$0xff]  ;;  %v2846_v53 = vld [vmem:[#allocation9 + $0x7c8] sm:$0xff] }
 0x134   : > { %2946 = vmatpush.msra.mxu0 %v2833_v17  ;;  %3009 = vmatpush.msra.mxu3 %v2923_v25  ;;  %v1526_v30 = vadd.f32 %v1520_v61, %v1441_v7  ;;  %v1281_v3 = vmax.f32 %v1028_v63, %v1277_v29  ;;  %v2821_v62 = vld [vmem:[#allocation9 + $0x700] sm:$0xff]  ;;  %v2882_v2 = vld [vmem:[#allocation9 + $0x8e8] sm:$0xff]  ;;  %v2916_v17 = vld [vmem:[#allocation9 + $0x9f8] sm:$0xff] }
 0x135   : > { %2965 = vmatpush.msrb.mxu1 %v2867_v48  ;;  %2978 = vmatpush.msrb.mxu2 %v2913_v56  ;;  %1549 = vst [vmem:[#allocation2] sm:$0x7f] %v1545_v42  ;;  %v2901_v50 = vld [vmem:[#allocation9 + $0x980] sm:$0xff]  ;;  %v2844_v25 = vld [vmem:[#allocation9 + $0x7b8] sm:$0xff]  ;;  %v2914_v56 = vld [vmem:[#allocation9 + $0x9e8] sm:$0xff] }
 0x136   : > { %2947 = vmatpush.msra.mxu0 %v2831_v13  ;;  %3010 = vmatpush.msra.mxu3 %v2921_v18  ;;  %v1530_v47 = vmax.f32 %v1282_v23, %v1526_v30  ;;  %v8514_v58 = vpop.f32.mrf.mxu0  ;;  %v2853_v31 = vld [vmem:[#allocation9 + $0x800] sm:$0xff]  ;;  %v2880_v6 = vld [vmem:[#allocation9 + $0x8d8] sm:$0xff]  ;;  %v2899_v7 = vld [vmem:[#allocation9 + $0x970] sm:$0xff] }
 0x137   : > { %2966 = vmatpush.msrb.mxu1 %v2865_v11  ;;  %2979 = vmatpush.msrb.mxu2 %v2911_v22  ;;  %v8518_v24 = vpop.f32.mrf.mxu1  ;;  %v8525_v14 = vld [vmem:[#allocation2 + $0x8] sm:$0x7f]  ;;  %v2912_v61 = vld [vmem:[#allocation9 + $0x9d8] sm:$0xff] }
 0x138   : > { %2948 = vmatpush.msra.mxu0 %v2829_v57  ;;  %3011 = vmatpush.msra.mxu3 %v2919_v34  ;;  %v1544_v45 = vadd.f32 %v1536_v59, %v1530_v47  ;;  %v2878_v18 = vld [vmem:[#allocation9 + $0x8c8] sm:$0xff]  ;;  %v2897_v23 = vld [vmem:[#allocation9 + $0x960] sm:$0xff]  ;;  %v2876_v11 = vld [vmem:[#allocation9 + $0x8b8] sm:$0xff] }
 0x139   : > { %2967 = vmatpush.msrb.mxu1 %v2863_v32  ;;  %2980 = vmatpush.msrb.mxu2 %v2909_v4  ;;  %v2842_v42 = vld [vmem:[#allocation9 + $0x7a8] sm:$0xff]  ;;  %v2840_v22 = vld [vmem:[#allocation9 + $0x798] sm:$0xff]  ;;  %v2895_v59 = vld [vmem:[#allocation9 + $0x950] sm:$0xff] }
 0x13a   : > { %2949 = vmatpush.msra.mxu0 %v2827_v55  ;;  %3012 = vmatpush.msra.mxu3 %v2917_v0  ;;  %v1548_v5 = vmax.f32 %v1544_v45, 0.0  ;;  %v2910_v30 = vld [vmem:[#allocation9 + $0x9c8] sm:$0xff]  ;;  %v2908_v32 = vld [vmem:[#allocation9 + $0x9b8] sm:$0xff]  ;;  %v2893_v4 = vld [vmem:[#allocation9 + $0x940] sm:$0xff] }
 0x13b   : > { %2968 = vmatpush.msrb.mxu1 %v2861_v8  ;;  %2981 = vmatpush.msrb.mxu2 %v2907_v28  ;;  %v2838_v57 = vld [vmem:[#allocation9 + $0x788] sm:$0xff]  ;;  %v2891_v55 = vld [vmem:[#allocation9 + $0x930] sm:$0xff]  ;;  %v2904_v8 = vld [vmem:[#allocation9 + $0x998] sm:$0xff] }
 0x13c   : > { %3017 = vmatpush.msrb.mxu3 %v2852_v43  ;;  %2950 = vmatpush.msra.mxu0 %v2825_v27  ;;  %1553 = vst.msk [vmem:[#allocation2 + $0x18] sm:$0x7f] %vm1552_vm2, %v1548_v5  ;;  %v1500_v37 = vpop.f32.mrf.mxu2  ;;  %v2906_v12 = vld [vmem:[#allocation9 + $0x9a8] sm:$0xff]  ;;  %v8536_v21 = vld [vmem:[#allocation2] sm:$0x7f] }
 0x13d   : > { %2969 = vmatpush.msrb.mxu1 %v2859_v33  ;;  %v1525_v60 = vadd.f32 %v1500_v37, %v1421_v15  ;;  %2982 = vmatpush.msrb.mxu2 %v2905_v20  ;;  %v8523_v10 = vpop.f32.mrf.mxu3  ;;  %v2870_v49 = vld [vmem:[#allocation9 + $0x888] sm:$0xff]  ;;  %v2868_v19 = vld [vmem:[#allocation9 + $0x878] sm:$0xff]  ;;  %v2889_v27 = vld [vmem:[#allocation9 + $0x920] sm:$0xff] }
 0x13e   : > { %3018 = vmatpush.msrb.mxu3 %v2850_v38  ;;  %2951 = vmatpush.msra.mxu0 %v2823_v36  ;;  %v2834_v43 = vld [vmem:[#allocation9 + $0x768] sm:$0xff]  ;;  %v2832_v28 = vld [vmem:[#allocation9 + $0x758] sm:$0xff]  ;;  %v2887_v38 = vld [vmem:[#allocation9 + $0x910] sm:$0xff] }
 0x13f   : > { %2970 = vmatpush.msrb.mxu1 %v2857_v39  ;;  %v1529_v40 = vmax.f32 %v1281_v3, %v1525_v60  ;;  %2983 = vmatpush.msrb.mxu2 %v2903_v41  ;;  %v2902_v29 = vld [vmem:[#allocation9 + $0x988] sm:$0xff]  ;;  %v2900_v5 = vld [vmem:[#allocation9 + $0x978] sm:$0xff]  ;;  %v2885_v20 = vld [vmem:[#allocation9 + $0x900] sm:$0xff] }
 0x140   : > { %3019 = vmatpush.msrb.mxu3 %v2848_v26  ;;  %2952 = vmatpush.msra.mxu0 %v2821_v62  ;;  %v8527_v48 = vpop.f32.mrf.mxu0  ;;  %v2866_v33 = vld [vmem:[#allocation9 + $0x868] sm:$0xff]  ;;  %v2864_v36 = vld [vmem:[#allocation9 + $0x858] sm:$0xff] }
 0x141   : > { %2971 = vmatpush.msrb.mxu1 %v2855_v44  ;;  %v1543_v35 = vadd.f32 %v1535_v9, %v1529_v40  ;;  %2984 = vmatpush.msrb.mxu2 %v2901_v50  ;;  %v8529_v13 = vpop.f32.mrf.mxu1  ;;  %v2830_v63 = vld [vmem:[#allocation9 + $0x748] sm:$0xff]  ;;  %v2828_v62 = vld [vmem:[#allocation9 + $0x738] sm:$0xff] }
 0x142   : > { %3037 = vmatpush.msrb.mxu0 %v2884_v16  ;;  %3020 = vmatpush.msrb.mxu3 %v2846_v53  ;;  %v2898_v39 = vld [vmem:[#allocation9 + $0x968] sm:$0xff]  ;;  %v2896_v41 = vld [vmem:[#allocation9 + $0x958] sm:$0xff] }
 0x143   : > { %2972 = vmatpush.msrb.mxu1 %v2853_v31  ;;  %v1547_v52 = vmax.f32 %v1543_v35, 0.0  ;;  %2985 = vmatpush.msrb.mxu2 %v2899_v7  ;;  %v8545_v26 = vld [vmem:[#allocation2 + $0x18] sm:$0x7f]  ;;  %v2862_v3 = vld [vmem:[#allocation9 + $0x848] sm:$0xff] }
 0x144   : > { %3038 = vmatpush.msrb.mxu0 %v2882_v2  ;;  %3021 = vmatpush.msrb.mxu3 %v2844_v25  ;;  %v2932_v60 = vld [vmem:[#allocation9 + $0xa78] sm:$0xff]  ;;  %v2826_v16 = vld [vmem:[#allocation9 + $0x728] sm:$0xff] }
 0x145   : > { %3057 = vmatpush.msra.mxu1 %v2916_v17  ;;  %1551 = vst [vmem:[#allocation2 + $0x10] sm:$0x7f] %v1547_v52  ;;  %2986 = vmatpush.msrb.mxu2 %v2897_v23  ;;  %v2860_v9 = vld [vmem:[#allocation9 + $0x838] sm:$0xff]  ;;  %v2894_v53 = vld [vmem:[#allocation9 + $0x948] sm:$0xff] }
 0x146   : > { %3039 = vmatpush.msrb.mxu0 %v2880_v6  ;;  %2973 = vmatmul.f32.vlgmr.msrb.gmra.mxu1 %v8525_v14  ;;  %v8532_v34 = vpop.f32.mrf.mxu2  ;;  %v2930_v50 = vld [vmem:[#allocation9 + $0xa68] sm:$0xff]  ;;  %v2824_v31 = vld [vmem:[#allocation9 + $0x718] sm:$0xff] }
 0x147   : > { %3058 = vmatpush.msra.mxu1 %v2914_v56  ;;  %3022 = vmatpush.msrb.mxu3 %v2842_v42  ;;  %v8534_v47 = vpop.f32.mrf.mxu3  ;;  %v2858_v2 = vld [vmem:[#allocation9 + $0x828] sm:$0xff]  ;;  %v2892_v17 = vld [vmem:[#allocation9 + $0x938] sm:$0xff] }
 0x148   : > { %3040 = vmatpush.msrb.mxu0 %v2878_v18  ;;  %2987 = vmatpush.msrb.mxu2 %v2895_v59  ;;  %v2928_v25 = vld [vmem:[#allocation9 + $0xa58] sm:$0xff]  ;;  %v2822_v6 = vld [vmem:[#allocation9 + $0x708] sm:$0xff] }
 0x149   : > { %3059 = vmatpush.msra.mxu1 %v2912_v61  ;;  %3023 = vmatpush.msrb.mxu3 %v2840_v22  ;;  %v2856_v35 = vld [vmem:[#allocation9 + $0x818] sm:$0xff]  ;;  %v2890_v56 = vld [vmem:[#allocation9 + $0x928] sm:$0xff] }
 0x14a   : > { %3041 = vmatpush.msrb.mxu0 %v2876_v11  ;;  %2988 = vmatpush.msrb.mxu2 %v2893_v4  ;;  %v8538_v0 = vpop.f32.mrf.mxu0  ;;  %v2926_v7 = vld [vmem:[#allocation9 + $0xa48] sm:$0xff]  ;;  %v2888_v61 = vld [vmem:[#allocation9 + $0x918] sm:$0xff] }
 0x14b   : > { %3060 = vmatpush.msra.mxu1 %v2910_v30  ;;  %3024 = vmatpush.msrb.mxu3 %v2838_v57  ;;  %v8540_v45 = vpop.f32.mrf.mxu1  ;;  %v2854_v52 = vld [vmem:[#allocation9 + $0x808] sm:$0xff]  ;;  %v2924_v11 = vld [vmem:[#allocation9 + $0xa38] sm:$0xff]  ;;  %v2766_v30 = vld [vmem:[#allocation9 + $0x1f0] sm:$0xff] }
 0x14c   : > { %3042 = vmatpush.msrb.mxu0 %v2874_v46  ;;  %2989 = vmatpush.msrb.mxu2 %v2891_v55  ;;  %v2818_v18 = vld [vmem:[#allocation2 + $0x10] sm:$0x7f]  ;;  %v2920_v4 = vld [vmem:[#allocation9 + $0xa18] sm:$0xff] }
 0x14d   : > { %3061 = vmatpush.msra.mxu1 %v2908_v32  ;;  %3025 = vmatpush.msrb.mxu3 %v2836_v1  ;;  %v2886_v22 = vld [vmem:[#allocation9 + $0x908] sm:$0xff]  ;;  %v2764_v32 = vld [vmem:[#allocation9 + $0x1e0] sm:$0xff]  ;;  %v2758_v55 = vld [vmem:[#allocation9 + $0x1b0] sm:$0xff] }
 0x14e   : > { %3043 = vmatpush.msrb.mxu0 %v2872_v51  ;;  %2990 = vmatpush.msrb.mxu2 %v2889_v27  ;;  %v2922_v59 = vld [vmem:[#allocation9 + $0xa28] sm:$0xff]  ;;  %v2762_v51 = vld [vmem:[#allocation9 + $0x1d0] sm:$0xff] }
 0x14f   : > { %3062 = vmatpush.msra.mxu1 %v2906_v12  ;;  %2953 = vmatmul.f32.vlgmr.msra.gmra.mxu0 %v8536_v21  ;;  %v2918_v1 = vld [vmem:[#allocation9 + $0xa08] sm:$0xff]  ;;  %v2730_v27 = vld [vmem:[#allocation9 + $0xd0] sm:$0xff] }
 0x150   : > { %3044 = vmatpush.msrb.mxu0 %v2870_v49  ;;  %3026 = vmatpush.msrb.mxu3 %v2834_v43  ;;  %v8543_v15 = vpop.f32.mrf.mxu2  ;;  %v2734_v49 = vld [vmem:[#allocation9 + $0xf0] sm:$0xff]  ;;  %v2756_v43 = vld [vmem:[#allocation9 + $0x1a0] sm:$0xff] }
 0x151   : > { %3063 = vmatpush.msra.mxu1 %v2904_v8  ;;  %2991 = vmatpush.msrb.mxu2 %v2887_v38  ;;  %v8547_v37 = vpop.f32.mrf.mxu3  ;;  %v2732_v8 = vld [vmem:[#allocation9 + $0xe0] sm:$0xff]  ;;  %v2814_v38 = vld [vmem:[#allocation9 + $0x370] sm:$0xff] }
 0x152   : > { %3045 = vmatpush.msrb.mxu0 %v2868_v19  ;;  %3027 = vmatpush.msrb.mxu3 %v2832_v28  ;;  %v2754_v28 = vld [vmem:[#allocation9 + $0x190] sm:$0xff] }
 0x153   : > { %3064 = vmatpush.msra.mxu1 %v2902_v29  ;;  %2992 = vmatpush.msrb.mxu2 %v2885_v20  ;;  %v2750_v20 = vld [vmem:[#allocation9 + $0x170] sm:$0xff] }
 0x154   : > { %3046 = vmatpush.msrb.mxu0 %v2866_v33  ;;  %3028 = vmatpush.msrb.mxu3 %v2830_v63  ;;  %v8551_v44 = vpop.f32.mrf.mxu0  ;;  %v2728_v33 = vld [vmem:[#allocation9 + $0xc0] sm:$0xff] }
 0x155   : > { %3065 = vmatpush.msra.mxu1 %v2900_v5  ;;  %6177 = vmatmul.msk.f32.vlgmr.msra.gmra.mxu3 %vm2933_vm3, %v8545_v26  ;;  %v2752_v5 = vld [vmem:[#allocation9 + $0x180] sm:$0xff] }
 0x156   : > { %3047 = vmatpush.msrb.mxu0 %v2864_v36  ;;  %3029 = vmatpush.msrb.mxu3 %v2828_v62  ;;  %v8553_v40 = vpop.f32.mrf.mxu1  ;;  %v2812_v63 = vld [vmem:[#allocation9 + $0x360] sm:$0xff]  ;;  %v2726_v36 = vld [vmem:[#allocation9 + $0xb0] sm:$0xff] }
 0x157   : > { %3066 = vmatpush.msra.mxu1 %v2898_v39  ;;  %3085 = vmatpush.msra.mxu2 %v2932_v60  ;;  %v2748_v62 = vld [vmem:[#allocation9 + $0x160] sm:$0xff]  ;;  %v2722_v60 = vld [vmem:[#allocation9 + $0x90] sm:$0xff] }
 0x158   : > { %3048 = vmatpush.msrb.mxu0 %v2862_v3  ;;  %3030 = vmatpush.msrb.mxu3 %v2826_v16 }
 0x159   : > { %3067 = vmatpush.msra.mxu1 %v2896_v41  ;;  %3086 = vmatpush.msra.mxu2 %v2930_v50  ;;  %v2810_v41 = vld [vmem:[#allocation9 + $0x350] sm:$0xff]  ;;  %v2808_v50 = vld [vmem:[#allocation9 + $0x340] sm:$0xff] }
 0x15a   : > { %3049 = vmatpush.msrb.mxu0 %v2860_v9  ;;  %3031 = vmatpush.msrb.mxu3 %v2824_v31  ;;  %v8555_v42 = vpop.f32.mrf.mxu2  ;;  %v2746_v9 = vld [vmem:[#allocation9 + $0x150] sm:$0xff]  ;;  %v2744_v31 = vld [vmem:[#allocation9 + $0x140] sm:$0xff] }
 0x15b   : > { %3068 = vmatpush.msra.mxu1 %v2894_v53  ;;  %3087 = vmatpush.msra.mxu2 %v2928_v25  ;;  %v8557_v23 = vpop.f32.mrf.mxu3  ;;  %v2720_v53 = vld [vmem:[#allocation9 + $0x80] sm:$0xff]  ;;  %v2718_v25 = vld [vmem:[#allocation9 + $0x70] sm:$0xff] }
 0x15c   : > { %3050 = vmatpush.msrb.mxu0 %v2858_v2  ;;  %3032 = vmatpush.msrb.mxu3 %v2822_v6  ;;  %v2742_v6 = vld [vmem:[#allocation9 + $0x130] sm:$0xff] }
 0x15d   : > { %3069 = vmatpush.msra.mxu1 %v2892_v17  ;;  %3088 = vmatpush.msra.mxu2 %v2926_v7  ;;  %v2798_v17 = vld [vmem:[#allocation9 + $0x2f0] sm:$0xff]  ;;  %v2804_v7 = vld [vmem:[#allocation9 + $0x320] sm:$0xff] }
 0x15e   : > { %3051 = vmatpush.msrb.mxu0 %v2856_v35  ;;  %2993 = vmatmul.f32.vlgmr.msrb.gmra.mxu2 %v2818_v18  ;;  %v2806_v35 = vld [vmem:[#allocation9 + $0x330] sm:$0xff] }
 0x15f   : > { %3070 = vmatpush.msra.mxu1 %v2890_v56  ;;  %v8560_v46 = vpop.f32.mrf.mxu0  ;;  %3033 = vmatmul.f32.vlgmr.msrb.gmra.mxu3 %v8536_v21  ;;  %v2796_v56 = vld [vmem:[#allocation9 + $0x2e0] sm:$0xff] }
 0x160   : > { %3052 = vmatpush.msrb.mxu0 %v2854_v52  ;;  %3089 = vmatpush.msra.mxu2 %v2924_v11  ;;  %v8563_v57 = vpop.f32.mrf.mxu1  ;;  %v2716_v52 = vld [vmem:[#allocation9 + $0x60] sm:$0xff]  ;;  %v2714_v11 = vld [vmem:[#allocation9 + $0x50] sm:$0xff] }
 0x161   : > { %3053 = vmatmul.f32.vlgmr.msrb.gmra.mxu0 %v8525_v14  ;;  %3071 = vmatpush.msra.mxu1 %v2888_v61  ;;  %v2760_v14 = vld [vmem:[#allocation9 + $0x1c0] sm:$0xff] }
 0x162   : > { %3120 = vmatpush.msra.mxu3 %v2766_v30  ;;  %3090 = vmatpush.msra.mxu2 %v2922_v59  ;;  %v2802_v30 = vld [vmem:[#allocation9 + $0x310] sm:$0xff] }
 0x163   : > { %3072 = vmatpush.msra.mxu1 %v2886_v22  ;;  %3140 = vmatpush.msra.mxu0 %v2798_v17  ;;  %v2794_v22 = vld [vmem:[#allocation9 + $0x2d0] sm:$0xff]  ;;  %v2765_v17 = vld [vmem:[#allocation9 + $0x1e8] sm:$0xff] }
 0x164   : > { %3073 = vmatmul.f32.vlgmr.msra.gmra.mxu1 %v2818_v18  ;;  %3121 = vmatpush.msra.mxu3 %v2764_v32  ;;  %v8565_v12 = vpop.f32.mrf.mxu2  ;;  %v2740_v18 = vld [vmem:[#allocation9 + $0x120] sm:$0xff]  ;;  %v2738_v32 = vld [vmem:[#allocation9 + $0x110] sm:$0xff] }
 0x165   : > { %3091 = vmatpush.msra.mxu2 %v2920_v4  ;;  %v8567_v21 = vpop.f32.mrf.mxu3  ;;  %3168 = vmatpush.msrb.mxu1 %v2814_v38  ;;  %v2712_v4 = vld [vmem:[#allocation9 + $0x40] sm:$0xff]  ;;  %v2790_v38 = vld [vmem:[#allocation9 + $0x2b0] sm:$0xff] }
 0x166   : > { %3122 = vmatpush.msra.mxu3 %v2762_v51  ;;  %3141 = vmatpush.msra.mxu0 %v2796_v56  ;;  %v2736_v51 = vld [vmem:[#allocation9 + $0x100] sm:$0xff]  ;;  %v2789_v56 = vld [vmem:[#allocation9 + $0x2a8] sm:$0xff] }
 0x167   : > { %3092 = vmatpush.msra.mxu2 %v2918_v1  ;;  %3169 = vmatpush.msrb.mxu1 %v2812_v63  ;;  %v2795_v63 = vld [vmem:[#allocation9 + $0x2d8] sm:$0xff] }
 0x168   : > { %6178 = vmatmul.msk.f32.vlgmr.msra.gmra.mxu2 %vm2933_vm3, %v8545_v26  ;;  %3123 = vmatpush.msra.mxu3 %v2760_v14  ;;  %v2724_v26 = vld [vmem:[#allocation9 + $0xa0] sm:$0xff]  ;;  %v2710_v14 = vld [vmem:[#allocation9 + $0x30] sm:$0xff] }
 0x169   : > { %3100 = vmatpush.msrb.mxu2 %v2734_v49  ;;  %v8571_v19 = vpop.f32.mrf.mxu0  ;;  %3170 = vmatpush.msrb.mxu1 %v2810_v41  ;;  %v2799_v49 = vld [vmem:[#allocation9 + $0x2f8] sm:$0xff]  ;;  %v2793_v41 = vld [vmem:[#allocation9 + $0x2c8] sm:$0xff] }
 0x16a   : > { %3124 = vmatpush.msra.mxu3 %v2758_v55  ;;  %v8573_v29 = vpop.f32.mrf.mxu1  ;;  %3142 = vmatpush.msra.mxu0 %v2794_v22  ;;  %v2787_v22 = vld [vmem:[#allocation9 + $0x298] sm:$0xff] }
 0x16b   : > { %3101 = vmatpush.msrb.mxu2 %v2732_v8  ;;  %3171 = vmatpush.msrb.mxu1 %v2808_v50  ;;  %v2792_v8 = vld [vmem:[#allocation9 + $0x2c0] sm:$0xff]  ;;  %v2786_v50 = vld [vmem:[#allocation9 + $0x290] sm:$0xff] }
 0x16c   : > { %3125 = vmatpush.msra.mxu3 %v2756_v43  ;;  %v2800_v43 = vld [vmem:[#allocation9 + $0x300] sm:$0xff]  ;;  %3143 = vmatpush.msra.mxu0 %v2792_v8  ;;  %v2778_v8 = vld [vmem:[#allocation9 + $0x250] sm:$0xff] }
 0x16d   : > { %3102 = vmatpush.msrb.mxu2 %v2730_v27  ;;  %3172 = vmatpush.msrb.mxu1 %v2806_v35  ;;  %v2708_v27 = vld [vmem:[#allocation9 + $0x20] sm:$0xff] }
 0x16e   : > { %3126 = vmatpush.msra.mxu3 %v2754_v28  ;;  %v8575_v39 = vpop.f32.mrf.mxu2  ;;  %v2797_v28 = vld [vmem:[#allocation9 + $0x2e8] sm:$0xff]  ;;  %3144 = vmatpush.msra.mxu0 %v2790_v38  ;;  %v2784_v35 = vld [vmem:[#allocation9 + $0x280] sm:$0xff] }
 0x16f   : > { %3103 = vmatpush.msrb.mxu2 %v2728_v33  ;;  %v8577_v3 = vpop.f32.mrf.mxu3  ;;  %3173 = vmatpush.msrb.mxu1 %v2804_v7  ;;  %v2735_v33 = vld [vmem:[#allocation9 + $0xf8] sm:$0xff]  ;;  %v2721_v38 = vld [vmem:[#allocation9 + $0x88] sm:$0xff] }
 0x170   : > { %3127 = vmatpush.msra.mxu3 %v2752_v5  ;;  %v2706_v5 = vld [vmem:[#allocation9 + $0x10] sm:$0xff] }
 0x171   : > { %3104 = vmatpush.msrb.mxu2 %v2726_v36  ;;  %3174 = vmatpush.msrb.mxu1 %v2802_v30  ;;  %v2733_v36 = vld [vmem:[#allocation9 + $0xe8] sm:$0xff] }
 0x172   : > { %3128 = vmatpush.msra.mxu3 %v2750_v20  ;;  %v2788_v20 = vld [vmem:[#allocation9 + $0x2a0] sm:$0xff]  ;;  %v2761_v30 = vld [vmem:[#allocation9 + $0x1c8] sm:$0xff] }
 0x173   : > { %3105 = vmatpush.msrb.mxu2 %v2724_v26  ;;  %v8579_v16 = vpop.f32.mrf.mxu0  ;;  %3175 = vmatpush.msrb.mxu1 %v2800_v43 }
 0x174   : > { %3129 = vmatpush.msra.mxu3 %v2748_v62  ;;  %v8581_v2 = vpop.f32.mrf.mxu1  ;;  %v2704_v62 = vld [vmem:[#allocation9] sm:$0xff]  ;;  %3145 = vmatpush.msra.mxu0 %v2788_v20  ;;  %v2719_v20 = vld [vmem:[#allocation9 + $0x78] sm:$0xff] }
 0x175   : > { %3106 = vmatpush.msrb.mxu2 %v2722_v60  ;;  %3180 = vmatpush.msra.mxu1 %v2735_v33  ;;  %v2757_v33 = vld [vmem:[#allocation9 + $0x1a8] sm:$0xff] }
 0x176   : > { %3130 = vmatpush.msra.mxu3 %v2746_v9  ;;  %v2767_v9 = vld [vmem:[#allocation9 + $0x1f8] sm:$0xff]  ;;  %3146 = vmatpush.msra.mxu0 %v2786_v50  ;;  %v2753_v50 = vld [vmem:[#allocation9 + $0x188] sm:$0xff] }
 0x177   : > { %3107 = vmatpush.msrb.mxu2 %v2720_v53  ;;  %v2731_v53 = vld [vmem:[#allocation9 + $0xd8] sm:$0xff]  ;;  %3181 = vmatpush.msra.mxu1 %v2733_v36 }
 0x178   : > { %3131 = vmatpush.msra.mxu3 %v2744_v31  ;;  %v2791_v31 = vld [vmem:[#allocation9 + $0x2b8] sm:$0xff]  ;;  %3147 = vmatpush.msra.mxu0 %v2784_v35  ;;  %v2777_v35 = vld [vmem:[#allocation9 + $0x248] sm:$0xff] }
 0x179   : > { %3108 = vmatpush.msrb.mxu2 %v2718_v25  ;;  %v8583_v61 = vpop.f32.mrf.mxu2  ;;  %v2729_v25 = vld [vmem:[#allocation9 + $0xc8] sm:$0xff]  ;;  %3182 = vmatpush.msra.mxu1 %v2731_v53  ;;  %v2755_v36 = vld [vmem:[#allocation9 + $0x198] sm:$0xff] }
 0x17a   : > { %3132 = vmatpush.msra.mxu3 %v2742_v6  ;;  %v8585_v59 = vpop.f32.mrf.mxu3 }
 0x17b   : > { %3109 = vmatpush.msrb.mxu2 %v2716_v52  ;;  %v2763_v52 = vld [vmem:[#allocation9 + $0x1d8] sm:$0xff]  ;;  %3183 = vmatpush.msra.mxu1 %v2729_v25  ;;  %v2016_v25 = vadd.f32 %v8553_v40, %v8540_v45  ;;  %v2713_v45 = vld [vmem:[#allocation9 + $0x48] sm:$0xff]  ;;  %v2768_v40 = vld [vmem:[#allocation9 + $0x200] sm:$0xff] }
 0x17c   : > { %3133 = vmatpush.msra.mxu3 %v2740_v18  ;;  %v2727_v18 = vld [vmem:[#allocation9 + $0xb8] sm:$0xff] }
 0x17d   : > { %3110 = vmatpush.msrb.mxu2 %v2714_v11  ;;  %v8587_v1 = vpop.f32.mrf.mxu0  ;;  %v2782_v11 = vld [vmem:[#allocation9 + $0x270] sm:$0xff]  ;;  %3184 = vmatpush.msra.mxu1 %v2727_v18 }
 0x17e   : > { %3134 = vmatpush.msra.mxu3 %v2738_v32  ;;  %3148 = vmatpush.msra.mxu0 %v2782_v11  ;;  %v2725_v32 = vld [vmem:[#allocation9 + $0xa8] sm:$0xff]  ;;  %v2770_v18 = vld [vmem:[#allocation9 + $0x210] sm:$0xff]  ;;  %v1719_v11 = vadd.f32 %v8518_v24, %v8498_v54  ;;  %v2747_v24 = vld [vmem:[#allocation9 + $0x158] sm:$0xff] }
 0x17f   : > { %v8589_v55 = vpop.f32.mrf.mxu1  ;;  %3111 = vmatpush.msrb.mxu2 %v2712_v4  ;;  %v2780_v4 = vld [vmem:[#allocation9 + $0x260] sm:$0xff]  ;;  %3185 = vmatpush.msra.mxu1 %v2725_v32  ;;  %v2749_v32 = vld [vmem:[#allocation9 + $0x168] sm:$0xff] }
 0x180   : > { %3135 = vmatpush.msra.mxu3 %v2736_v51  ;;  %v2785_v51 = vld [vmem:[#allocation9 + $0x288] sm:$0xff]  ;;  %3149 = vmatpush.msra.mxu0 %v2780_v4  ;;  %v2155_v4 = vadd.f32 %v8563_v57, %v2016_v25  ;;  %v2771_v57 = vld [vmem:[#allocation9 + $0x218] sm:$0xff]  ;;  %v1996_v25 = vadd.f32 %v8560_v46, %v8551_v44 }
 0x181   : > { %3112 = vmatpush.msrb.mxu2 %v2710_v14  ;;  %v2759_v14 = vld [vmem:[#allocation9 + $0x1b8] sm:$0xff]  ;;  %v2805_v46 = vld [vmem:[#allocation9 + $0x328] sm:$0xff] }
 0x182   : > { %3220 = vmatpush.msrb.mxu3 %v2799_v49  ;;  %v2723_v49 = vld [vmem:[#allocation9 + $0x98] sm:$0xff]  ;;  %3150 = vmatpush.msra.mxu0 %v2778_v8 }
 0x183   : > { %3113 = vmatpush.msrb.mxu2 %v2708_v27  ;;  %v8591_v26 = vpop.f32.mrf.mxu2  ;;  %v2783_v27 = vld [vmem:[#allocation9 + $0x278] sm:$0xff]  ;;  %3186 = vmatpush.msra.mxu1 %v2723_v49 }
 0x184   : > { %3221 = vmatpush.msrb.mxu3 %v2797_v28  ;;  %v8593_v60 = vpop.f32.mrf.mxu3  ;;  %v2815_v49 = vld [vmem:[#allocation9 + $0x378] sm:$0xff] }
 0x185   : > { %3114 = vmatpush.msrb.mxu2 %v2706_v5  ;;  %v2776_v5 = vld [vmem:[#allocation9 + $0x240] sm:$0xff]  ;;  %3187 = vmatpush.msra.mxu1 %v2721_v38  ;;  %v8619_v38 = vld [vmem:[#allocation7] sm:$0xf] }
 0x186   : > { %3222 = vmatpush.msrb.mxu3 %v2795_v63  ;;  %v2781_v63 = vld [vmem:[#allocation9 + $0x268] sm:$0xff]  ;;  %3151 = vmatpush.msra.mxu0 %v2776_v5 }
 0x187   : > { %3115 = vmatpush.msrb.mxu2 %v2704_v62  ;;  %v2774_v62 = vld [vmem:[#allocation9 + $0x230] sm:$0xff]  ;;  %3188 = vmatpush.msra.mxu1 %v2719_v20  ;;  %v2745_v5 = vld [vmem:[#allocation9 + $0x148] sm:$0xff] }
 0x188   : > { %3223 = vmatpush.msrb.mxu3 %v2793_v41  ;;  %v8595_v6 = vpop.f32.mrf.mxu0  ;;  %3152 = vmatpush.msra.mxu0 %v2774_v62  ;;  %v2769_v62 = vld [vmem:[#allocation9 + $0x208] sm:$0xff] }
 0x189   : > { %3200 = vmatpush.msra.mxu2 %v2767_v9  ;;  %v8597_v7 = vpop.f32.mrf.mxu1  ;;  %v2779_v9 = vld [vmem:[#allocation9 + $0x258] sm:$0xff] }
 0x18a   : > { %3224 = vmatpush.msrb.mxu3 %v2791_v31  ;;  %v2717_v31 = vld [vmem:[#allocation9 + $0x68] sm:$0xff] }
 0x18b   : > { %3201 = vmatpush.msra.mxu2 %v2765_v17  ;;  %v2772_v17 = vld [vmem:[#allocation9 + $0x220] sm:$0xff]  ;;  %3189 = vmatpush.msra.mxu1 %v2717_v31  ;;  %v2666_v31 = vperm.slane %v8619_v38, 1 }
 0x18c   : > { %3225 = vmatpush.msrb.mxu3 %v2789_v56  ;;  %v2751_v56 = vld [vmem:[#allocation9 + $0x178] sm:$0xff]  ;;  %3153 = vmatpush.msra.mxu0 %v2772_v17  ;;  %v2809_v17 = vld [vmem:[#allocation9 + $0x348] sm:$0xff] }
 0x18d   : > { %3202 = vmatpush.msra.mxu2 %v2763_v52  ;;  %v8599_v43 = vpop.f32.mrf.mxu2  ;;  %v2715_v52 = vld [vmem:[#allocation9 + $0x58] sm:$0xff] }
 0x18e   : > { %3226 = vmatpush.msrb.mxu3 %v2787_v22  ;;  %v8601_v28 = vpop.f32.mrf.mxu3  ;;  %v2280_v22 = vadd.f32 %v8581_v2, %v8573_v29  ;;  %3154 = vmatpush.msra.mxu0 %v2770_v18  ;;  %v2711_v29 = vld [vmem:[#allocation9 + $0x38] sm:$0xff]  ;;  %v1863_v2 = vadd.f32 %v8529_v13, %v1719_v11  ;;  %v1699_v11 = vadd.f32 %v8527_v48, %v8514_v58 }
 0x18f   : > { %3203 = vmatpush.msra.mxu2 %v2761_v30  ;;  %v2775_v30 = vld [vmem:[#allocation9 + $0x238] sm:$0xff]  ;;  %3190 = vmatpush.msra.mxu1 %v2715_v52  ;;  %v2056_v58 = vadd.f32 %v8567_v21, %v8557_v23 }
 0x190   : > { %3227 = vmatpush.msrb.mxu3 %v2785_v51  ;;  %3155 = vmatpush.msra.mxu0 %v2768_v40  ;;  %v2408_v8 = vadd.f32 %v8589_v55, %v2280_v22  ;;  %v2811_v13 = vld [vmem:[#allocation9 + $0x358] sm:$0xff]  ;;  %v2154_v22 = vadd.f32 %v8571_v19, %v1996_v25  ;;  %v1862_v40 = vadd.f32 %v8538_v0, %v1699_v11  ;;  %v3365_v11 = vld [vmem:[#allocation9 + $0x1120] sm:$0xff] }
 0x191   : > { %3204 = vmatpush.msra.mxu2 %v2759_v14  ;;  %v2773_v14 = vld [vmem:[#allocation9 + $0x228] sm:$0xff]  ;;  %3191 = vmatpush.msra.mxu1 %v2713_v45  ;;  %v2743_v55 = vld [vmem:[#allocation9 + $0x138] sm:$0xff]  ;;  %v2157_v0 = vadd.f32 %v8577_v3, %v2056_v58  ;;  %v3351_v58 = vld [vmem:[#allocation9 + $0x10b0] sm:$0xff] }
 0x192   : > { %3228 = vmatpush.msrb.mxu3 %v2783_v27  ;;  %v8603_v41 = vpop.f32.mrf.mxu0  ;;  %3248 = vmatpush.msrb.mxu0 %v2815_v49  ;;  %v2807_v18 = vld [vmem:[#allocation9 + $0x338] sm:$0xff]  ;;  %v2737_v49 = vld [vmem:[#allocation9 + $0x108] sm:$0xff] }
 0x193   : > { %3205 = vmatpush.msra.mxu2 %v2757_v33  ;;  %v2532_v53 = vpop.f32.mrf.mxu1  ;;  %v2813_v33 = vld [vmem:[#allocation9 + $0x368] sm:$0xff]  ;;  %3192 = vmatpush.msra.mxu1 %v2711_v29  ;;  %v2803_v19 = vld [vmem:[#allocation9 + $0x318] sm:$0xff] }
 0x194   : > { %3229 = vmatpush.msrb.mxu3 %v2781_v63  ;;  %v2533_v27 = vadd.f32 %v2532_v53, %v8597_v7  ;;  %v2709_v63 = vld [vmem:[#allocation9 + $0x28] sm:$0xff]  ;;  %3249 = vmatpush.msrb.mxu0 %v2813_v33  ;;  %v2707_v7 = vld [vmem:[#allocation9 + $0x18] sm:$0xff] }
 0x195   : > { %3206 = vmatpush.msra.mxu2 %v2755_v36  ;;  %v2159_v36 = vmax.f32 %v1863_v2, %v2155_v4  ;;  %3193 = vmatpush.msra.mxu1 %v2709_v63  ;;  %v2801_v2 = vld [vmem:[#allocation9 + $0x308] sm:$0xff] }
 0x196   : > { %3230 = vmatpush.msrb.mxu3 %v2779_v9  ;;  %3250 = vmatpush.msrb.mxu0 %v2811_v13 }
 0x197   : > { %3207 = vmatpush.msra.mxu2 %v2753_v50  ;;  %v8612_v51 = vpop.f32.mrf.mxu2  ;;  %v2412_v53 = vmax.f32 %v2159_v36, %v2408_v8  ;;  %3194 = vmatpush.msra.mxu1 %v2707_v7  ;;  %v2320_v8 = vadd.f32 %v8593_v60, %v8585_v59  ;;  %v2036_v59 = vadd.f32 %v8575_v39, %v8565_v12  ;;  %v3373_v12 = vld [vmem:[#allocation9 + $0x1160] sm:$0xff] }
 0x198   : > { %3231 = vmatpush.msrb.mxu3 %v2777_v35  ;;  %v8614_v54 = vpop.f32.mrf.mxu3  ;;  %v2741_v35 = vld [vmem:[#allocation9 + $0x128] sm:$0xff]  ;;  %3251 = vmatpush.msrb.mxu0 %v2809_v17 }
 0x199   : > { %3208 = vmatpush.msra.mxu2 %v2751_v56  ;;  %v2705_v56 = vld [vmem:[#allocation9 + $0x8] sm:$0xff]  ;;  %v2156_v13 = vadd.f32 %v8583_v61, %v2036_v59 }
 0x19a   : > { %3232 = vmatpush.msrb.mxu3 %v2775_v30  ;;  %v2260_v30 = vadd.f32 %v8587_v1, %v8579_v16  ;;  %3195 = vmatpush.msra.mxu1 %v2705_v56  ;;  %v2158_v16 = vmax.f32 %v1862_v40, %v2154_v22  ;;  %v2667_v56 = vperm.slane %v8619_v38, 2  ;;  %v3327_v40 = vld [vmem:[#allocation9 + $0xff0] sm:$0xff]  ;;  %v3290_v59 = vld [vmem:[#allocation9 + $0xec8] sm:$0xff] }
 0x19b   : > { %3209 = vmatpush.msra.mxu2 %v2749_v32  ;;  %v2739_v32 = vld [vmem:[#allocation9 + $0x118] sm:$0xff]  ;;  %3252 = vmatpush.msrb.mxu0 %v2807_v18 }
 0x19c   : > { %3233 = vmatpush.msrb.mxu3 %v2773_v14  ;;  %v2512_v20 = vpop.f32.mrf.mxu0  ;;  %v2407_v4 = vadd.f32 %v8595_v6, %v2260_v30  ;;  %v3357_v30 = vld [vmem:[#allocation9 + $0x10e0] sm:$0xff] }
 0x19d   : > { %3210 = vmatpush.msra.mxu2 %v2747_v24  ;;  %v2612_v9 = vpop.f32.mrf.mxu1  ;;  %v2513_v1 = vadd.f32 %v2512_v20, %v8603_v41  ;;  %3253 = vmatpush.msrb.mxu0 %v2805_v46  ;;  %v1759_v24 = vadd.f32 %v8534_v47, %v8523_v10  ;;  %v3361_v46 = vld [vmem:[#allocation9 + $0x1100] sm:$0xff] }
 0x19e   : > { %3234 = vmatpush.msrb.mxu3 %v2771_v57  ;;  %v2656_v50 = vadd.f32 %v2612_v9, %v2533_v27  ;;  %v2411_v23 = vmax.f32 %v2158_v16, %v2407_v4  ;;  %v2665_v27 = vperm.slane %v8619_v38, 0  ;;  %v2410_v57 = vadd.f32 %v8601_v28, %v2320_v8  ;;  %v3375_v28 = vld [vmem:[#allocation9 + $0x1170] sm:$0xff]  ;;  %v3353_v4 = vld [vmem:[#allocation9 + $0x10c0] sm:$0xff] }
 0x19f   : > { %3211 = vmatpush.msra.mxu2 %v2745_v5  ;;  %3254 = vmatpush.msrb.mxu0 %v2803_v19  ;;  %v1865_v41 = vadd.f32 %v8547_v37, %v1759_v24  ;;  %v1739_v37 = vadd.f32 %v8543_v15, %v8532_v34  ;;  %v3349_v19 = vld [vmem:[#allocation9 + $0x10a0] sm:$0xff]  ;;  %v3295_v24 = vld [vmem:[#allocation9 + $0xef0] sm:$0xff] }
 0x1a0   : > { %3235 = vmatpush.msrb.mxu3 %v2769_v62  ;;  %v2660_v52 = vmax.f32 %v2412_v53, %v2656_v50  ;;  %v2668_v62 = vperm.slane %v8619_v38, 3  ;;  %v3321_v16 = vld [vmem:[#allocation9 + $0xfc0] sm:$0xff] }
 0x1a1   : > { %3212 = vmatpush.msra.mxu2 %v2743_v55  ;;  %3255 = vmatpush.msrb.mxu0 %v2801_v2  ;;  %v2161_v47 = vmax.f32 %v1865_v41, %v2157_v0  ;;  %v1864_v39 = vadd.f32 %v8555_v42, %v1739_v37  ;;  %v3367_v42 = vld [vmem:[#allocation9 + $0x1130] sm:$0xff]  ;;  %v3296_v2 = vld [vmem:[#allocation9 + $0xef8] sm:$0xff]  ;;  %v3293_v8 = vld [vmem:[#allocation9 + $0xee0] sm:$0xff] }
 0x1a2   : > { %v2674_v45 = vadd.f32 %v2666_v31, %v2660_v52  ;;  %v2472_v44 = vpop.f32.mrf.mxu2  ;;  %v3371_v31 = vld [vmem:[#allocation9 + $0x1150] sm:$0xff]  ;;  %v3288_v37 = vld [vmem:[#allocation9 + $0xeb8] sm:$0xff] }
 0x1a3   : > { %3213 = vmatpush.msra.mxu2 %v2741_v35  ;;  %v2572_v14 = vpop.f32.mrf.mxu3  ;;  %v2414_v63 = vmax.f32 %v2161_v47, %v2410_v57  ;;  %v2160_v34 = vmax.f32 %v1864_v39, %v2156_v13  ;;  %v3359_v52 = vld [vmem:[#allocation9 + $0x10f0] sm:$0xff]  ;;  %v3292_v47 = vld [vmem:[#allocation9 + $0xed8] sm:$0xff]  ;;  %v3309_v13 = vld [vmem:[#allocation9 + $0xf60] sm:$0xff] }
 0x1a4   : > { %v2678_v48 = vmax.f32 %v2674_v45, 0.0  ;;  %v2573_v3 = vadd.f32 %v2572_v14, %v8614_v54  ;;  %v2300_v54 = vadd.f32 %v8599_v43, %v8591_v26  ;;  %v3369_v26 = vld [vmem:[#allocation9 + $0x1140] sm:$0xff]  ;;  %v3291_v41 = vld [vmem:[#allocation9 + $0xed0] sm:$0xff]  ;;  %v3284_v39 = vld [vmem:[#allocation9 + $0xe98] sm:$0xff] }
 0x1a5   : > { %3214 = vmatpush.msra.mxu2 %v2739_v32  ;;  %v3363_v32 = vld [vmem:[#allocation9 + $0x1110] sm:$0xff] }
 0x1a6   : > { %v2686_v29 = vrot.slane %v2678_v48, 7  ;;  %v2592_v6 = vpop.f32.mrf.mxu0  ;;  %v2409_v53 = vadd.f32 %v8612_v51, %v2300_v54  ;;  %v3323_v48 = vld [vmem:[#allocation9 + $0xfd0] sm:$0xff] }
 0x1a7   : > { %3215 = vmatpush.msra.mxu2 %v2737_v49  ;;  %v2655_v21 = vadd.f32 %v2592_v6, %v2513_v1  ;;  %v3325_v49 = vld [vmem:[#allocation9 + $0xfe0] sm:$0xff]  ;;  %v3347_v1 = vld [vmem:[#allocation9 + $0x1090] sm:$0xff] }
 0x1a8   : > { %2694 = vst [vmem:[#allocation3 + $0x8] sm:$0xfe] %v2686_v29  ;;  %v2413_v43 = vmax.f32 %v2160_v34, %v2409_v53  ;;  %v3319_v29 = vld [vmem:[#allocation9 + $0xfb0] sm:$0xff]  ;;  %v3345_v6 = vld [vmem:[#allocation9 + $0x1080] sm:$0xff]  ;;  %v3282_v34 = vld [vmem:[#allocation9 + $0xe88] sm:$0xff] }
 0x1a9   : > { %v2659_v10 = vmax.f32 %v2411_v23, %v2655_v21  ;;  %v3317_v23 = vld [vmem:[#allocation9 + $0xfa0] sm:$0xff]  ;;  %v3343_v21 = vld [vmem:[#allocation9 + $0x1070] sm:$0xff] }
 0x1aa   : > { %v3315_v57 = vld [vmem:[#allocation9 + $0xf90] sm:$0xff]  ;;  %v3281_v53 = vld [vmem:[#allocation9 + $0xe80] sm:$0xff] }
 0x1ab   : > { %v2673_v33 = vadd.f32 %v2665_v27, %v2659_v10  ;;  %v2552_v5 = vpop.f32.mrf.mxu2  ;;  %v3294_v27 = vld [vmem:[#allocation9 + $0xee8] sm:$0xff]  ;;  %v3341_v10 = vld [vmem:[#allocation9 + $0x1060] sm:$0xff]  ;;  %v3335_v54 = vld [vmem:[#allocation9 + $0x1030] sm:$0xff] }
 0x1ac   : > { %v2652_v60 = vpop.f32.mrf.mxu3  ;;  %v2553_v15 = vadd.f32 %v2552_v5, %v2472_v44  ;;  %v3355_v44 = vld [vmem:[#allocation9 + $0x10d0] sm:$0xff] }
 0x1ad   : > { %v2677_v36 = vmax.f32 %v2673_v33, 0.0  ;;  %v2658_v20 = vadd.f32 %v2652_v60, %v2573_v3  ;;  %v3289_v3 = vld [vmem:[#allocation9 + $0xec0] sm:$0xff]  ;;  %v3339_v5 = vld [vmem:[#allocation9 + $0x1050] sm:$0xff] }
 0x1ae   : > { %v3313_v33 = vld [vmem:[#allocation9 + $0xf80] sm:$0xff] }
 0x1af   : > { %v2685_v9 = vrot.slane %v2677_v36, 7  ;;  %v2662_v55 = vmax.f32 %v2414_v63, %v2658_v20  ;;  %v2701_v7 = vld [vmem:[#allocation3 + $0x8] sm:$0x7f]  ;;  %v3287_v63 = vld [vmem:[#allocation9 + $0xeb0] sm:$0xff] }
 0x1b0   : > { %3136 = vmatmul.f32.vlgmr.msra.gmra.mxu3 %v2701_v7  ;;  %v3311_v36 = vld [vmem:[#allocation9 + $0xf70] sm:$0xff]  ;;  %v3337_v20 = vld [vmem:[#allocation9 + $0x1040] sm:$0xff] }
 0x1b1   : > { %2693 = vst [vmem:[#allocation3] sm:$0xfe] %v2685_v9  ;;  %v2676_v50 = vadd.f32 %v2668_v62, %v2662_v55  ;;  %3458 = vmatpush.msra.mxu3 %v3375_v28  ;;  %v3285_v28 = vld [vmem:[#allocation9 + $0xea0] sm:$0xff]  ;;  %v3286_v9 = vld [vmem:[#allocation9 + $0xea8] sm:$0xff]  ;;  %v3283_v55 = vld [vmem:[#allocation9 + $0xe90] sm:$0xff] }
 0x1b3   : > { %v2680_v17 = vmax.f32 %v2676_v50, 0.0  ;;  %3459 = vmatpush.msra.mxu3 %v3373_v12  ;;  %v3333_v12 = vld [vmem:[#allocation9 + $0x1020] sm:$0xff] }
 0x1b4   : > { %v2632_v61 = vpop.f32.mrf.mxu2  ;;  %v3305_v50 = vld [vmem:[#allocation9 + $0xf40] sm:$0xff] }
 0x1b5   : > { %v2688_v25 = vrot.slane %v2680_v17, 7  ;;  %v2657_v35 = vadd.f32 %v2632_v61, %v2553_v15  ;;  %3460 = vmatpush.msra.mxu3 %v3371_v31  ;;  %v3331_v31 = vld [vmem:[#allocation9 + $0x1010] sm:$0xff] }
 0x1b6   : > { %v3279_v15 = vld [vmem:[#allocation9 + $0xe70] sm:$0xff] }
 0x1b7   : > { %2697 = vst.msk [vmem:[#allocation3 + $0x18] sm:$0xfe] %vm2696_vm4, %v2688_v25  ;;  %v2661_v51 = vmax.f32 %v2413_v43, %v2657_v35  ;;  %3461 = vmatpush.msra.mxu3 %v3369_v26  ;;  %v3303_v61 = vld [vmem:[#allocation9 + $0xf30] sm:$0xff]  ;;  %v3329_v26 = vld [vmem:[#allocation9 + $0x1000] sm:$0xff]  ;;  %v3280_v43 = vld [vmem:[#allocation9 + $0xe78] sm:$0xff] }
 0x1b8   : > { %v2700_v18 = vld [vmem:[#allocation3] sm:$0x7f] }
 0x1b9   : > { %v2675_v22 = vadd.f32 %v2667_v56, %v2661_v51  ;;  %3116 = vmatmul.f32.vlgmr.msrb.gmra.mxu2 %v2700_v18  ;;  %3462 = vmatpush.msra.mxu3 %v3367_v42  ;;  %v3376_v35 = vld [vmem:[#allocation9 + $0x1178] sm:$0xff]  ;;  %v3277_v56 = vld [vmem:[#allocation9 + $0xe60] sm:$0xff]  ;;  %v3278_v51 = vld [vmem:[#allocation9 + $0xe68] sm:$0xff] }
 0x1ba   : > { %3430 = vmatpush.msrb.mxu2 %v3359_v52  ;;  %v3301_v42 = vld [vmem:[#allocation9 + $0xf20] sm:$0xff]  ;;  %v3374_v52 = vld [vmem:[#allocation9 + $0x1168] sm:$0xff] }
 0x1bb   : > { %v2679_v45 = vmax.f32 %v2675_v22, 0.0  ;;  %3463 = vmatpush.msra.mxu3 %v3365_v11  ;;  %v3299_v11 = vld [vmem:[#allocation9 + $0xf10] sm:$0xff]  ;;  %v3276_v22 = vld [vmem:[#allocation9 + $0xe58] sm:$0xff] }
 0x1bc   : > { %3431 = vmatpush.msrb.mxu2 %v3357_v30  ;;  %v3372_v30 = vld [vmem:[#allocation9 + $0x1158] sm:$0xff] }
 0x1bd   : > { %v2687_v38 = vrot.slane %v2679_v45, 7  ;;  %3464 = vmatpush.msra.mxu3 %v3363_v32  ;;  %v3273_v32 = vld [vmem:[#allocation9 + $0xe40] sm:$0xff] }
 0x1be   : > { %3432 = vmatpush.msrb.mxu2 %v3355_v44  ;;  %v8654_v14 = vld [vmem:[#allocation3 + $0x18] sm:$0x7f]  ;;  %v3261_v45 = vld [vmem:[#allocation3 + $0x8] sm:$0xfe] }
 0x1bf   : > { %2695 = vst [vmem:[#allocation3 + $0x10] sm:$0xfe] %v2687_v38  ;;  %6179 = vmatmul.msk.f32.vlgmr.msrb.gmra.mxu1 %vm2933_vm3, %v8654_v14  ;;  %3465 = vmatpush.msra.mxu3 %v3361_v46  ;;  %v3263_v60 = vld [vmem:[#allocation3 + $0x18] sm:$0xfe]  ;;  %v3297_v44 = vld [vmem:[#allocation9 + $0xf00] sm:$0xff]  ;;  %v3274_v46 = vld [vmem:[#allocation9 + $0xe48] sm:$0xff] }
 0x1c0   : > { %3410 = vmatpush.msrb.mxu1 %v3327_v40  ;;  %3433 = vmatpush.msrb.mxu2 %v3353_v4  ;;  %v8660_v62 = vrot.slane %v3263_v60, 1  ;;  %v3370_v38 = vld [vmem:[#allocation9 + $0x1148] sm:$0xff]  ;;  %v8667_v40 = vrot.slane %v3261_v45, 1  ;;  %v3360_v4 = vld [vmem:[#allocation9 + $0x10f8] sm:$0xff]  ;;  %v3726_v60 = vld [vmem:[#allocation9 + $0xc60] sm:$0xff] }
 0x1c1   : > { %3216 = vmatmul.f32.vlgmr.msra.gmra.mxu2 %v2701_v7  ;;  %v3307_v7 = vld [vmem:[#allocation9 + $0xf50] sm:$0xff]  ;;  %v3710_v45 = vld [vmem:[#allocation9 + $0xbe0] sm:$0xff] }
 0x1c2   : > { %3411 = vmatpush.msrb.mxu1 %v3325_v49  ;;  %3434 = vmatpush.msrb.mxu2 %v3351_v58  ;;  %v3271_v49 = vld [vmem:[#allocation9 + $0xe30] sm:$0xff]  ;;  %v3272_v58 = vld [vmem:[#allocation9 + $0xe38] sm:$0xff] }
 0x1c4   : > { %3412 = vmatpush.msrb.mxu1 %v3323_v48  ;;  %3435 = vmatpush.msrb.mxu2 %v3349_v19  ;;  %v3368_v48 = vld [vmem:[#allocation9 + $0x1138] sm:$0xff]  ;;  %v3358_v19 = vld [vmem:[#allocation9 + $0x10e8] sm:$0xff] }
 0x1c6   : > { %3413 = vmatpush.msrb.mxu1 %v3321_v16  ;;  %3436 = vmatpush.msrb.mxu2 %v3347_v1  ;;  %v2702_v0 = vld [vmem:[#allocation3 + $0x10] sm:$0x7f]  ;;  %v3269_v16 = vld [vmem:[#allocation9 + $0xe20] sm:$0xff] }
 0x1c7   : > { %3156 = vmatmul.f32.vlgmr.msra.gmra.mxu0 %v2702_v0  ;;  %3196 = vmatmul.f32.vlgmr.msra.gmra.mxu1 %v2700_v18  ;;  %v3262_v17 = vld [vmem:[#allocation3 + $0x10] sm:$0xfe] }
 0x1c8   : > { %3236 = vmatmul.f32.vlgmr.msrb.gmra.mxu3 %v2702_v0  ;;  %3390 = vmatpush.msra.mxu0 %v3295_v24  ;;  %v8664_v25 = vrot.slane %v3262_v17, 1  ;;  %v3275_v18 = vld [vmem:[#allocation9 + $0xe50] sm:$0xff]  ;;  %v3270_v1 = vld [vmem:[#allocation9 + $0xe28] sm:$0xff]  ;;  %v3356_v0 = vld [vmem:[#allocation9 + $0x10d8] sm:$0xff] }
 0x1c9   : > { %3414 = vmatpush.msrb.mxu1 %v3319_v29  ;;  %3437 = vmatpush.msrb.mxu2 %v3345_v6  ;;  %v3366_v24 = vld [vmem:[#allocation9 + $0x1128] sm:$0xff]  ;;  %v3267_v29 = vld [vmem:[#allocation9 + $0xe10] sm:$0xff]  ;;  %v3268_v6 = vld [vmem:[#allocation9 + $0xe18] sm:$0xff] }
 0x1ca   : > { %3470 = vmatpush.msrb.mxu3 %v3296_v2  ;;  %3391 = vmatpush.msra.mxu0 %v3293_v8  ;;  %v3364_v2 = vld [vmem:[#allocation9 + $0x1118] sm:$0xff] }
 0x1cb   : > { %3415 = vmatpush.msrb.mxu1 %v3317_v23  ;;  %3438 = vmatpush.msrb.mxu2 %v3343_v21  ;;  %v3260_v8 = vld [vmem:[#allocation3] sm:$0xfe]  ;;  %v3354_v23 = vld [vmem:[#allocation9 + $0x10c8] sm:$0xff] }
 0x1cc   : > { %3471 = vmatpush.msrb.mxu3 %v3294_v27  ;;  %3392 = vmatpush.msra.mxu0 %v3291_v41  ;;  %v3265_v21 = vld [vmem:[#allocation9 + $0xe00] sm:$0xff]  ;;  %v3266_v27 = vld [vmem:[#allocation9 + $0xe08] sm:$0xff]  ;;  %v8670_v41 = vrot.slane %v3260_v8, 1  ;;  %v3316_v17 = vld [vmem:[#allocation9 + $0xf98] sm:$0xff] }
 0x1cd   : > { %3416 = vmatpush.msrb.mxu1 %v3315_v57  ;;  %3439 = vmatpush.msrb.mxu2 %v3341_v10  ;;  %v3328_v57 = vld [vmem:[#allocation9 + $0xff8] sm:$0xff]  ;;  %v3702_v8 = vld [vmem:[#allocation9 + $0xba0] sm:$0xff] }
 0x1ce   : > { %3472 = vmatpush.msrb.mxu3 %v3292_v47  ;;  %3393 = vmatpush.msra.mxu0 %v3289_v3  ;;  %v3352_v10 = vld [vmem:[#allocation9 + $0x10b8] sm:$0xff]  ;;  %v3362_v47 = vld [vmem:[#allocation9 + $0x1108] sm:$0xff]  ;;  %v3728_v3 = vld [vmem:[#allocation9 + $0xc70] sm:$0xff] }
 0x1cf   : > { %3417 = vmatpush.msrb.mxu1 %v3313_v33  ;;  %3440 = vmatpush.msrb.mxu2 %v3339_v5  ;;  %v3696_v33 = vld [vmem:[#allocation9 + $0xb70] sm:$0xff]  ;;  %v3326_v5 = vld [vmem:[#allocation9 + $0xfe8] sm:$0xff] }
 0x1d0   : > { %3473 = vmatpush.msrb.mxu3 %v3290_v59  ;;  %6180 = vmatmul.msk.f32.vlgmr.msrb.gmra.mxu0 %vm2933_vm3, %v8654_v14  ;;  %v3350_v59 = vld [vmem:[#allocation9 + $0x10a8] sm:$0xff] }
 0x1d1   : > { %3394 = vmatpush.msra.mxu0 %v3287_v63  ;;  %3418 = vmatpush.msrb.mxu1 %v3311_v36  ;;  %v3694_v63 = vld [vmem:[#allocation9 + $0xb60] sm:$0xff]  ;;  %v3324_v36 = vld [vmem:[#allocation9 + $0xfd8] sm:$0xff] }
 0x1d2   : > { %3441 = vmatpush.msrb.mxu2 %v3337_v20  ;;  %6181 = vmatmul.msk.f32.vlgmr.msra.gmra.mxu3 %vm2933_vm3, %v8660_v62  ;;  %v3348_v20 = vld [vmem:[#allocation9 + $0x1098] sm:$0xff] }
 0x1d3   : > { %3474 = vmatpush.msrb.mxu3 %v3288_v37  ;;  %3395 = vmatpush.msra.mxu0 %v3285_v28  ;;  %v3724_v37 = vld [vmem:[#allocation9 + $0xc50] sm:$0xff] }
 0x1d4   : > { %3419 = vmatpush.msrb.mxu1 %v3309_v13  ;;  %3442 = vmatpush.msrb.mxu2 %v3335_v54  ;;  %v3692_v28 = vld [vmem:[#allocation9 + $0xb50] sm:$0xff]  ;;  %v3322_v13 = vld [vmem:[#allocation9 + $0xfc8] sm:$0xff] }
 0x1d5   : > { %3475 = vmatpush.msrb.mxu3 %v3286_v9  ;;  %3396 = vmatpush.msra.mxu0 %v3283_v55  ;;  %v3346_v54 = vld [vmem:[#allocation9 + $0x1088] sm:$0xff]  ;;  %v3722_v9 = vld [vmem:[#allocation9 + $0xc40] sm:$0xff] }
 0x1d6   : > { %3420 = vmatpush.msrb.mxu1 %v3307_v7  ;;  %3443 = vmatpush.msrb.mxu2 %v3333_v12  ;;  %v3690_v55 = vld [vmem:[#allocation9 + $0xb40] sm:$0xff]  ;;  %v3320_v7 = vld [vmem:[#allocation9 + $0xfb8] sm:$0xff] }
 0x1d7   : > { %3476 = vmatpush.msrb.mxu3 %v3284_v39  ;;  %3397 = vmatpush.msra.mxu0 %v3281_v53  ;;  %v3344_v12 = vld [vmem:[#allocation9 + $0x1078] sm:$0xff]  ;;  %v3720_v39 = vld [vmem:[#allocation9 + $0xc30] sm:$0xff] }
 0x1d8   : > { %3421 = vmatpush.msrb.mxu1 %v3305_v50  ;;  %3444 = vmatpush.msrb.mxu2 %v3331_v31  ;;  %v3688_v53 = vld [vmem:[#allocation9 + $0xb30] sm:$0xff]  ;;  %v3318_v50 = vld [vmem:[#allocation9 + $0xfa8] sm:$0xff] }
 0x1d9   : > { %3477 = vmatpush.msrb.mxu3 %v3282_v34  ;;  %3398 = vmatpush.msra.mxu0 %v3279_v15  ;;  %v3342_v31 = vld [vmem:[#allocation9 + $0x1068] sm:$0xff]  ;;  %v3718_v34 = vld [vmem:[#allocation9 + $0xc20] sm:$0xff] }
 0x1da   : > { %3422 = vmatpush.msrb.mxu1 %v3303_v61  ;;  %3445 = vmatpush.msrb.mxu2 %v3329_v26  ;;  %v3686_v15 = vld [vmem:[#allocation9 + $0xb20] sm:$0xff]  ;;  %v3340_v61 = vld [vmem:[#allocation9 + $0x1058] sm:$0xff]  ;;  %v3716_v26 = vld [vmem:[#allocation9 + $0xc10] sm:$0xff] }
 0x1db   : > { %3478 = vmatpush.msrb.mxu3 %v3280_v43  ;;  %3446 = vmatmul.f32.vlgmr.msrb.gmra.mxu2 %v8664_v25  ;;  %v3684_v43 = vld [vmem:[#allocation9 + $0xb10] sm:$0xff] }
 0x1dc   : > { %3538 = vmatpush.msra.mxu2 %v3376_v35  ;;  %3399 = vmatpush.msra.mxu0 %v3277_v56  ;;  %v3314_v35 = vld [vmem:[#allocation9 + $0xf88] sm:$0xff] }
 0x1dd   : > { %3423 = vmatpush.msrb.mxu1 %v3301_v42  ;;  %3479 = vmatpush.msrb.mxu3 %v3278_v51  ;;  %v3338_v56 = vld [vmem:[#allocation9 + $0x1048] sm:$0xff]  ;;  %v3714_v42 = vld [vmem:[#allocation9 + $0xc00] sm:$0xff] }
 0x1de   : > { %3539 = vmatpush.msra.mxu2 %v3374_v52  ;;  %3400 = vmatpush.msra.mxu0 %v3275_v18  ;;  %v3682_v51 = vld [vmem:[#allocation9 + $0xb00] sm:$0xff]  ;;  %v3312_v52 = vld [vmem:[#allocation9 + $0xf78] sm:$0xff] }
 0x1df   : > { %3424 = vmatpush.msrb.mxu1 %v3299_v11  ;;  %3480 = vmatpush.msrb.mxu3 %v3276_v22  ;;  %v3336_v18 = vld [vmem:[#allocation9 + $0x1038] sm:$0xff]  ;;  %v3712_v11 = vld [vmem:[#allocation9 + $0xbf0] sm:$0xff] }
 0x1e0   : > { %3540 = vmatpush.msra.mxu2 %v3372_v30  ;;  %3401 = vmatpush.msra.mxu0 %v3273_v32  ;;  %v3680_v22 = vld [vmem:[#allocation9 + $0xaf0] sm:$0xff]  ;;  %v3310_v30 = vld [vmem:[#allocation9 + $0xf68] sm:$0xff] }
 0x1e1   : > { %3425 = vmatpush.msrb.mxu1 %v3297_v44  ;;  %3481 = vmatpush.msrb.mxu3 %v3274_v46  ;;  %v3334_v32 = vld [vmem:[#allocation9 + $0x1028] sm:$0xff]  ;;  %v3678_v44 = vld [vmem:[#allocation9 + $0xae0] sm:$0xff]  ;;  %v3308_v46 = vld [vmem:[#allocation9 + $0xf58] sm:$0xff] }
 0x1e2   : > { %3426 = vmatmul.f32.vlgmr.msrb.gmra.mxu1 %v8667_v40  ;;  %3541 = vmatpush.msra.mxu2 %v3370_v38  ;;  %v3332_v38 = vld [vmem:[#allocation9 + $0x1018] sm:$0xff] }
 0x1e3   : > { %3510 = vmatpush.msra.mxu1 %v3360_v4  ;;  %3402 = vmatpush.msra.mxu0 %v3271_v49  ;;  %v3708_v4 = vld [vmem:[#allocation9 + $0xbd0] sm:$0xff] }
 0x1e4   : > { %3482 = vmatpush.msrb.mxu3 %v3272_v58  ;;  %3542 = vmatpush.msra.mxu2 %v3368_v48  ;;  %v3676_v49 = vld [vmem:[#allocation9 + $0xad0] sm:$0xff]  ;;  %v3306_v58 = vld [vmem:[#allocation9 + $0xf48] sm:$0xff] }
 0x1e5   : > { %3511 = vmatpush.msra.mxu1 %v3358_v19  ;;  %3403 = vmatpush.msra.mxu0 %v3269_v16  ;;  %v3330_v48 = vld [vmem:[#allocation9 + $0x1008] sm:$0xff]  ;;  %v3706_v19 = vld [vmem:[#allocation9 + $0xbc0] sm:$0xff] }
 0x1e6   : > { %3483 = vmatpush.msrb.mxu3 %v3270_v1  ;;  %3543 = vmatpush.msra.mxu2 %v3366_v24  ;;  %v3674_v16 = vld [vmem:[#allocation9 + $0xac0] sm:$0xff]  ;;  %v3776_v1 = vld [vmem:[#allocation9 + $0xdf0] sm:$0xff]  ;;  %v3304_v24 = vld [vmem:[#allocation9 + $0xf38] sm:$0xff] }
 0x1e7   : > { %3512 = vmatpush.msra.mxu1 %v3356_v0  ;;  %3404 = vmatpush.msra.mxu0 %v3267_v29  ;;  %v3704_v0 = vld [vmem:[#allocation9 + $0xbb0] sm:$0xff] }
 0x1e8   : > { %3484 = vmatpush.msrb.mxu3 %v3268_v6  ;;  %3544 = vmatpush.msra.mxu2 %v3364_v2  ;;  %v3672_v29 = vld [vmem:[#allocation9 + $0xab0] sm:$0xff]  ;;  %v3774_v6 = vld [vmem:[#allocation9 + $0xde0] sm:$0xff]  ;;  %v3302_v2 = vld [vmem:[#allocation9 + $0xf28] sm:$0xff] }
 0x1e9   : > { %3513 = vmatpush.msra.mxu1 %v3354_v23  ;;  %3405 = vmatpush.msra.mxu0 %v3265_v21  ;;  %v3670_v23 = vld [vmem:[#allocation9 + $0xaa0] sm:$0xff]  ;;  %v3772_v21 = vld [vmem:[#allocation9 + $0xdd0] sm:$0xff] }
 0x1ea   : > { %3485 = vmatpush.msrb.mxu3 %v3266_v27  ;;  %3406 = vmatmul.f32.vlgmr.msra.gmra.mxu0 %v8670_v41  ;;  %v3300_v27 = vld [vmem:[#allocation9 + $0xf18] sm:$0xff] }
 0x1eb   : > { %3486 = vmatmul.f32.vlgmr.msrb.gmra.mxu3 %v8670_v41  ;;  %3490 = vmatpush.msrb.mxu0 %v3328_v57  ;;  %v3700_v57 = vld [vmem:[#allocation9 + $0xb90] sm:$0xff] }
 0x1ec   : > { %3514 = vmatpush.msra.mxu1 %v3352_v10  ;;  %3545 = vmatpush.msra.mxu2 %v3362_v47  ;;  %v3668_v10 = vld [vmem:[#allocation9 + $0xa90] sm:$0xff]  ;;  %v3770_v47 = vld [vmem:[#allocation9 + $0xdc0] sm:$0xff] }
 0x1ed   : > { %3798 = vmatpush.msra.mxu3 %v3728_v3  ;;  %6182 = vmatmul.msk.f32.vlgmr.msra.gmra.mxu2 %vm2933_vm3, %v8660_v62  ;;  %v3298_v3 = vld [vmem:[#allocation9 + $0xf08] sm:$0xff] }
 0x1ee   : > { %3778 = vmatpush.msrb.mxu2 %v3696_v33  ;;  %3491 = vmatpush.msrb.mxu0 %v3326_v5  ;;  %v3698_v33 = vld [vmem:[#allocation9 + $0xb80] sm:$0xff] }
 0x1ef   : > { %3515 = vmatpush.msra.mxu1 %v3350_v59  ;;  %3799 = vmatpush.msra.mxu3 %v3726_v60  ;;  %v3666_v5 = vld [vmem:[#allocation9 + $0xa80] sm:$0xff]  ;;  %v3760_v59 = vld [vmem:[#allocation9 + $0xd70] sm:$0xff] }
 0x1f0   : > { %3779 = vmatpush.msrb.mxu2 %v3694_v63  ;;  %3492 = vmatpush.msrb.mxu0 %v3324_v36  ;;  %v3768_v60 = vld [vmem:[#allocation9 + $0xdb0] sm:$0xff]  ;;  %v3761_v63 = vld [vmem:[#allocation9 + $0xd78] sm:$0xff]  ;;  %v8678_v36 = vld [vmem:[#allocation2 + $0x8] sm:$0x7f] }
 0x1f1   : > { %3516 = vmatpush.msra.mxu1 %v3348_v20  ;;  %3800 = vmatpush.msra.mxu3 %v3724_v37  ;;  %v3729_v20 = vld [vmem:[#allocation9 + $0xc78] sm:$0xff]  ;;  %v3758_v37 = vld [vmem:[#allocation9 + $0xd60] sm:$0xff] }
 0x1f2   : > { %3780 = vmatpush.msrb.mxu2 %v3692_v28  ;;  %3493 = vmatpush.msrb.mxu0 %v3322_v13  ;;  %v3766_v28 = vld [vmem:[#allocation9 + $0xda0] sm:$0xff]  ;;  %v3759_v13 = vld [vmem:[#allocation9 + $0xd68] sm:$0xff] }
 0x1f3   : > { %3517 = vmatpush.msra.mxu1 %v3346_v54  ;;  %3801 = vmatpush.msra.mxu3 %v3722_v9  ;;  %v8681_v54 = vld [vmem:[#allocation2] sm:$0x7f]  ;;  %v3727_v9 = vld [vmem:[#allocation9 + $0xc68] sm:$0xff] }
 0x1f4   : > { %3781 = vmatpush.msrb.mxu2 %v3690_v55  ;;  %3494 = vmatpush.msrb.mxu0 %v3320_v7  ;;  %v3756_v55 = vld [vmem:[#allocation9 + $0xd50] sm:$0xff] }
 0x1f5   : > { %3518 = vmatpush.msra.mxu1 %v3344_v12  ;;  %3802 = vmatpush.msra.mxu3 %v3720_v39  ;;  %v3764_v7 = vld [vmem:[#allocation9 + $0xd90] sm:$0xff]  ;;  %v3757_v12 = vld [vmem:[#allocation9 + $0xd58] sm:$0xff] }
 0x1f6   : > { %3782 = vmatpush.msrb.mxu2 %v3688_v53  ;;  %3495 = vmatpush.msrb.mxu0 %v3318_v50  ;;  %v3725_v39 = vld [vmem:[#allocation9 + $0xc58] sm:$0xff]  ;;  %v3754_v53 = vld [vmem:[#allocation9 + $0xd40] sm:$0xff] }
 0x1f7   : > { %3519 = vmatpush.msra.mxu1 %v3342_v31  ;;  %3803 = vmatpush.msra.mxu3 %v3718_v34  ;;  %v3762_v50 = vld [vmem:[#allocation9 + $0xd80] sm:$0xff]  ;;  %v3755_v31 = vld [vmem:[#allocation9 + $0xd48] sm:$0xff] }
 0x1f8   : > { %3783 = vmatpush.msrb.mxu2 %v3686_v15  ;;  %3496 = vmatpush.msrb.mxu0 %v3316_v17  ;;  %v3723_v34 = vld [vmem:[#allocation9 + $0xc48] sm:$0xff]  ;;  %v3697_v15 = vld [vmem:[#allocation9 + $0xb78] sm:$0xff]  ;;  %v3752_v17 = vld [vmem:[#allocation9 + $0xd30] sm:$0xff] }
 0x1f9   : > { %3520 = vmatpush.msra.mxu1 %v3340_v61  ;;  %3804 = vmatpush.msra.mxu3 %v3716_v26  ;;  %v3753_v61 = vld [vmem:[#allocation9 + $0xd38] sm:$0xff] }
 0x1fa   : > { %3784 = vmatpush.msrb.mxu2 %v3684_v43  ;;  %3497 = vmatpush.msrb.mxu0 %v3314_v35  ;;  %v3721_v26 = vld [vmem:[#allocation9 + $0xc38] sm:$0xff]  ;;  %v3695_v35 = vld [vmem:[#allocation9 + $0xb68] sm:$0xff] }
 0x1fb   : > { %3521 = vmatpush.msra.mxu1 %v3338_v56  ;;  %3805 = vmatpush.msra.mxu3 %v3714_v42  ;;  %v8684_v43 = vld [vmem:[#allocation2 + $0x18] sm:$0x7f]  ;;  %v3750_v56 = vld [vmem:[#allocation9 + $0xd20] sm:$0xff]  ;;  %v3751_v42 = vld [vmem:[#allocation9 + $0xd28] sm:$0xff] }
 0x1fc   : > { %3785 = vmatpush.msrb.mxu2 %v3682_v51  ;;  %3498 = vmatpush.msrb.mxu0 %v3312_v52  ;;  %v3719_v51 = vld [vmem:[#allocation9 + $0xc28] sm:$0xff]  ;;  %v3693_v52 = vld [vmem:[#allocation9 + $0xb58] sm:$0xff] }
 0x1fd   : > { %3522 = vmatpush.msra.mxu1 %v3336_v18  ;;  %3806 = vmatpush.msra.mxu3 %v3712_v11  ;;  %v3748_v18 = vld [vmem:[#allocation9 + $0xd10] sm:$0xff]  ;;  %v3749_v11 = vld [vmem:[#allocation9 + $0xd18] sm:$0xff] }
 0x1fe   : > { %3786 = vmatpush.msrb.mxu2 %v3680_v22  ;;  %3499 = vmatpush.msrb.mxu0 %v3310_v30  ;;  %v3717_v22 = vld [vmem:[#allocation9 + $0xc18] sm:$0xff]  ;;  %v3691_v30 = vld [vmem:[#allocation9 + $0xb48] sm:$0xff] }
 0x1ff   : > { %3523 = vmatpush.msra.mxu1 %v3334_v32  ;;  %3807 = vmatpush.msra.mxu3 %v3710_v45  ;;  %v3746_v32 = vld [vmem:[#allocation9 + $0xd00] sm:$0xff]  ;;  %v3747_v45 = vld [vmem:[#allocation9 + $0xd08] sm:$0xff] }
 0x200   : > { %3787 = vmatpush.msrb.mxu2 %v3678_v44  ;;  %3500 = vmatpush.msrb.mxu0 %v3308_v46  ;;  %v3715_v44 = vld [vmem:[#allocation9 + $0xc08] sm:$0xff]  ;;  %v3689_v46 = vld [vmem:[#allocation9 + $0xb38] sm:$0xff] }
 0x201   : > { %3524 = vmatpush.msra.mxu1 %v3332_v38  ;;  %3808 = vmatpush.msra.mxu3 %v3708_v4  ;;  %v3744_v38 = vld [vmem:[#allocation9 + $0xcf0] sm:$0xff]  ;;  %v3745_v4 = vld [vmem:[#allocation9 + $0xcf8] sm:$0xff] }
 0x202   : > { %3788 = vmatpush.msrb.mxu2 %v3676_v49  ;;  %3501 = vmatpush.msrb.mxu0 %v3306_v58  ;;  %v3713_v49 = vld [vmem:[#allocation9 + $0xbf8] sm:$0xff]  ;;  %v3687_v58 = vld [vmem:[#allocation9 + $0xb28] sm:$0xff] }
 0x203   : > { %3525 = vmatpush.msra.mxu1 %v3330_v48  ;;  %3809 = vmatpush.msra.mxu3 %v3706_v19  ;;  %v3742_v48 = vld [vmem:[#allocation9 + $0xce0] sm:$0xff]  ;;  %v3743_v19 = vld [vmem:[#allocation9 + $0xce8] sm:$0xff] }
 0x204   : > { %3526 = vmatmul.f32.vlgmr.msra.gmra.mxu1 %v8664_v25  ;;  %3789 = vmatpush.msrb.mxu2 %v3674_v16  ;;  %v3711_v16 = vld [vmem:[#allocation9 + $0xbe8] sm:$0xff] }
 0x205   : > { %3846 = vmatpush.msrb.mxu1 %v3776_v1  ;;  %3502 = vmatpush.msrb.mxu0 %v3304_v24  ;;  %v3685_v1 = vld [vmem:[#allocation9 + $0xb18] sm:$0xff]  ;;  %v3740_v24 = vld [vmem:[#allocation9 + $0xcd0] sm:$0xff] }
 0x206   : > { %3810 = vmatpush.msra.mxu3 %v3704_v0  ;;  %3790 = vmatpush.msrb.mxu2 %v3672_v29  ;;  %v3741_v0 = vld [vmem:[#allocation9 + $0xcd8] sm:$0xff] }
 0x207   : > { %3847 = vmatpush.msrb.mxu1 %v3774_v6  ;;  %3503 = vmatpush.msrb.mxu0 %v3302_v2  ;;  %v3709_v29 = vld [vmem:[#allocation9 + $0xbd8] sm:$0xff]  ;;  %v3683_v6 = vld [vmem:[#allocation9 + $0xb08] sm:$0xff]  ;;  %v3738_v2 = vld [vmem:[#allocation9 + $0xcc0] sm:$0xff] }
 0x208   : > { %3811 = vmatpush.msra.mxu3 %v3702_v8  ;;  %3791 = vmatpush.msrb.mxu2 %v3670_v23  ;;  %v3739_v8 = vld [vmem:[#allocation9 + $0xcc8] sm:$0xff] }
 0x209   : > { %3848 = vmatpush.msrb.mxu1 %v3772_v21  ;;  %3504 = vmatpush.msrb.mxu0 %v3300_v27  ;;  %v3707_v23 = vld [vmem:[#allocation9 + $0xbc8] sm:$0xff]  ;;  %v3681_v21 = vld [vmem:[#allocation9 + $0xaf8] sm:$0xff]  ;;  %v3736_v27 = vld [vmem:[#allocation9 + $0xcb0] sm:$0xff] }
 0x20a   : > { %3812 = vmatpush.msra.mxu3 %v3700_v57  ;;  %3792 = vmatpush.msrb.mxu2 %v3668_v10  ;;  %v3737_v57 = vld [vmem:[#allocation9 + $0xcb8] sm:$0xff] }
 0x20b   : > { %3849 = vmatpush.msrb.mxu1 %v3770_v47  ;;  %3505 = vmatpush.msrb.mxu0 %v3298_v3  ;;  %v3705_v10 = vld [vmem:[#allocation9 + $0xbb8] sm:$0xff]  ;;  %v3679_v47 = vld [vmem:[#allocation9 + $0xae8] sm:$0xff]  ;;  %v3734_v3 = vld [vmem:[#allocation9 + $0xca0] sm:$0xff] }
 0x20c   : > { %3813 = vmatpush.msra.mxu3 %v3698_v33  ;;  %3506 = vmatmul.f32.vlgmr.msrb.gmra.mxu0 %v8667_v40  ;;  %v3735_v33 = vld [vmem:[#allocation9 + $0xca8] sm:$0xff] }
 0x20d   : > { %3793 = vmatpush.msrb.mxu2 %v3666_v5  ;;  %3814 = vmatmul.f32.vlgmr.msra.gmra.mxu3 %v8678_v36  ;;  %v3703_v5 = vld [vmem:[#allocation9 + $0xba8] sm:$0xff] }
 0x20e   : > { %3818 = vmatpush.msra.mxu0 %v3760_v59  ;;  %3850 = vmatpush.msrb.mxu1 %v3768_v60  ;;  %v3677_v59 = vld [vmem:[#allocation9 + $0xad8] sm:$0xff]  ;;  %v3732_v60 = vld [vmem:[#allocation9 + $0xc90] sm:$0xff] }
 0x20f   : > { %3898 = vmatpush.msrb.mxu3 %v3761_v63  ;;  %3794 = vmatmul.f32.vlgmr.msrb.gmra.mxu2 %v8681_v54  ;;  %v3733_v63 = vld [vmem:[#allocation9 + $0xc98] sm:$0xff] }
 0x210   : > { %3878 = vmatpush.msra.mxu2 %v3729_v20  ;;  %3819 = vmatpush.msra.mxu0 %v3758_v37  ;;  %v3701_v20 = vld [vmem:[#allocation9 + $0xb98] sm:$0xff]  ;;  %v3675_v37 = vld [vmem:[#allocation9 + $0xac8] sm:$0xff] }
 0x211   : > { %3851 = vmatpush.msrb.mxu1 %v3766_v28  ;;  %3899 = vmatpush.msrb.mxu3 %v3759_v13  ;;  %v3730_v28 = vld [vmem:[#allocation9 + $0xc80] sm:$0xff]  ;;  %v3731_v13 = vld [vmem:[#allocation9 + $0xc88] sm:$0xff] }
 0x212   : > { %3879 = vmatpush.msra.mxu2 %v3727_v9  ;;  %3820 = vmatpush.msra.mxu0 %v3756_v55  ;;  %v3673_v9 = vld [vmem:[#allocation9 + $0xab8] sm:$0xff]  ;;  %v3699_v55 = vld [vmem:[#allocation9 + $0xb88] sm:$0xff] }
 0x213   : > { %3852 = vmatpush.msrb.mxu1 %v3764_v7  ;;  %3900 = vmatpush.msrb.mxu3 %v3757_v12  ;;  %v3777_v7 = vld [vmem:[#allocation9 + $0xdf8] sm:$0xff]  ;;  %v6488_v12 = vld [vmem:[#allocation2 + $0x10] sm:$0x7f] }
 0x214   : > { %3880 = vmatpush.msra.mxu2 %v3725_v39  ;;  %3821 = vmatpush.msra.mxu0 %v3754_v53  ;;  %v3663_v39 = vld [vmem:[#allocation9 + $0x6f0] sm:$0xff] }
 0x215   : > { %3853 = vmatpush.msrb.mxu1 %v3762_v50  ;;  %3901 = vmatpush.msrb.mxu3 %v3755_v31  ;;  %v3647_v53 = vld [vmem:[#allocation9 + $0x670] sm:$0xff]  ;;  %v3671_v50 = vld [vmem:[#allocation9 + $0xaa8] sm:$0xff] }
 0x216   : > { %6183 = vmatmul.msk.f32.vlgmr.msrb.gmra.mxu1 %vm2933_vm3, %v8684_v43  ;;  %3881 = vmatpush.msra.mxu2 %v3723_v34  ;;  %v3775_v31 = vld [vmem:[#allocation9 + $0xde8] sm:$0xff]  ;;  %v3661_v34 = vld [vmem:[#allocation9 + $0x6e0] sm:$0xff] }
 0x217   : > { %3858 = vmatpush.msra.mxu1 %v3697_v15  ;;  %3822 = vmatpush.msra.mxu0 %v3752_v17  ;;  %v3645_v15 = vld [vmem:[#allocation9 + $0x660] sm:$0xff]  ;;  %v3669_v17 = vld [vmem:[#allocation9 + $0xa98] sm:$0xff] }
 0x218   : > { %3902 = vmatpush.msrb.mxu3 %v3753_v61  ;;  %3882 = vmatpush.msra.mxu2 %v3721_v26  ;;  %v3773_v61 = vld [vmem:[#allocation9 + $0xdd8] sm:$0xff]  ;;  %v3659_v26 = vld [vmem:[#allocation9 + $0x6d0] sm:$0xff] }
 0x219   : > { %3859 = vmatpush.msra.mxu1 %v3695_v35  ;;  %3823 = vmatpush.msra.mxu0 %v3750_v56  ;;  %v3643_v35 = vld [vmem:[#allocation9 + $0x650] sm:$0xff]  ;;  %v3667_v56 = vld [vmem:[#allocation9 + $0xa88] sm:$0xff] }
 0x21a   : > { %3903 = vmatpush.msrb.mxu3 %v3751_v42  ;;  %3883 = vmatpush.msra.mxu2 %v3719_v51  ;;  %v3771_v42 = vld [vmem:[#allocation9 + $0xdc8] sm:$0xff]  ;;  %v3657_v51 = vld [vmem:[#allocation9 + $0x6c0] sm:$0xff] }
 0x21b   : > { %3860 = vmatpush.msra.mxu1 %v3693_v52  ;;  %3824 = vmatpush.msra.mxu0 %v3748_v18  ;;  %v3641_v52 = vld [vmem:[#allocation9 + $0x640] sm:$0xff]  ;;  %v3769_v18 = vld [vmem:[#allocation9 + $0xdb8] sm:$0xff] }
 0x21c   : > { %3904 = vmatpush.msrb.mxu3 %v3749_v11  ;;  %3884 = vmatpush.msra.mxu2 %v3717_v22  ;;  %v3655_v11 = vld [vmem:[#allocation9 + $0x6b0] sm:$0xff] }
 0x21d   : > { %3861 = vmatpush.msra.mxu1 %v3691_v30  ;;  %3825 = vmatpush.msra.mxu0 %v3746_v32  ;;  %v3639_v22 = vld [vmem:[#allocation9 + $0x630] sm:$0xff]  ;;  %v3613_v30 = vld [vmem:[#allocation9 + $0x560] sm:$0xff]  ;;  %v3767_v32 = vld [vmem:[#allocation9 + $0xda8] sm:$0xff] }
 0x21e   : > { %3905 = vmatpush.msrb.mxu3 %v3747_v45  ;;  %3885 = vmatpush.msra.mxu2 %v3715_v44  ;;  %v3653_v45 = vld [vmem:[#allocation9 + $0x6a0] sm:$0xff] }
 0x21f   : > { %3862 = vmatpush.msra.mxu1 %v3689_v46  ;;  %3826 = vmatpush.msra.mxu0 %v3744_v38  ;;  %v3637_v44 = vld [vmem:[#allocation9 + $0x620] sm:$0xff]  ;;  %v3611_v46 = vld [vmem:[#allocation9 + $0x550] sm:$0xff]  ;;  %v3765_v38 = vld [vmem:[#allocation9 + $0xd98] sm:$0xff] }
 0x220   : > { %3906 = vmatpush.msrb.mxu3 %v3745_v4  ;;  %3886 = vmatpush.msra.mxu2 %v3713_v49  ;;  %v3651_v4 = vld [vmem:[#allocation9 + $0x690] sm:$0xff] }
 0x221   : > { %3863 = vmatpush.msra.mxu1 %v3687_v58  ;;  %3827 = vmatpush.msra.mxu0 %v3742_v48  ;;  %v3635_v49 = vld [vmem:[#allocation9 + $0x610] sm:$0xff]  ;;  %v3609_v58 = vld [vmem:[#allocation9 + $0x540] sm:$0xff]  ;;  %v3763_v48 = vld [vmem:[#allocation9 + $0xd88] sm:$0xff] }
 0x222   : > { %3907 = vmatpush.msrb.mxu3 %v3743_v19  ;;  %3887 = vmatpush.msra.mxu2 %v3711_v16  ;;  %v3583_v19 = vld [vmem:[#allocation9 + $0x470] sm:$0xff] }
 0x223   : > { %3864 = vmatpush.msra.mxu1 %v3685_v1  ;;  %3828 = vmatpush.msra.mxu0 %v3740_v24  ;;  %v3607_v16 = vld [vmem:[#allocation9 + $0x530] sm:$0xff]  ;;  %v3633_v1 = vld [vmem:[#allocation9 + $0x600] sm:$0xff]  ;;  %v3584_v24 = vld [vmem:[#allocation9 + $0x478] sm:$0xff] }
 0x224   : > { %3908 = vmatpush.msrb.mxu3 %v3741_v0  ;;  %3888 = vmatpush.msra.mxu2 %v3709_v29  ;;  %v3581_v0 = vld [vmem:[#allocation9 + $0x460] sm:$0xff] }
 0x225   : > { %3865 = vmatpush.msra.mxu1 %v3683_v6  ;;  %3829 = vmatpush.msra.mxu0 %v3738_v2  ;;  %v3605_v29 = vld [vmem:[#allocation9 + $0x520] sm:$0xff]  ;;  %v3631_v6 = vld [vmem:[#allocation9 + $0x5f0] sm:$0xff]  ;;  %v3582_v2 = vld [vmem:[#allocation9 + $0x468] sm:$0xff] }
 0x226   : > { %3909 = vmatpush.msrb.mxu3 %v3739_v8  ;;  %3889 = vmatpush.msra.mxu2 %v3707_v23  ;;  %v3579_v8 = vld [vmem:[#allocation9 + $0x450] sm:$0xff]  ;;  %v8694_v23 = vpop.f32.mrf.mxu0 }
 0x227   : > { %3866 = vmatpush.msra.mxu1 %v3681_v21  ;;  %3830 = vmatpush.msra.mxu0 %v3736_v27  ;;  %v3603_v21 = vld [vmem:[#allocation9 + $0x510] sm:$0xff]  ;;  %v3629_v27 = vld [vmem:[#allocation9 + $0x5e0] sm:$0xff] }
 0x228   : > { %3910 = vmatpush.msrb.mxu3 %v3737_v57  ;;  %3890 = vmatpush.msra.mxu2 %v3705_v10  ;;  %v3577_v57 = vld [vmem:[#allocation9 + $0x440] sm:$0xff]  ;;  %v8696_v10 = vpop.f32.mrf.mxu1 }
 0x229   : > { %3867 = vmatpush.msra.mxu1 %v3679_v47  ;;  %3831 = vmatpush.msra.mxu0 %v3734_v3  ;;  %v8698_v47 = vpop.f32.mrf.mxu2  ;;  %v3601_v3 = vld [vmem:[#allocation9 + $0x500] sm:$0xff] }
 0x22a   : > { %3911 = vmatpush.msrb.mxu3 %v3735_v33  ;;  %3891 = vmatpush.msra.mxu2 %v3703_v5  ;;  %v3578_v33 = vld [vmem:[#allocation9 + $0x448] sm:$0xff]  ;;  %v3575_v5 = vld [vmem:[#allocation9 + $0x430] sm:$0xff] }
 0x22b   : > { %3868 = vmatpush.msra.mxu1 %v3677_v59  ;;  %3832 = vmatpush.msra.mxu0 %v3732_v60  ;;  %v8700_v59 = vpop.f32.mrf.mxu3  ;;  %v3599_v60 = vld [vmem:[#allocation9 + $0x4f0] sm:$0xff] }
 0x22c   : > { %3912 = vmatpush.msrb.mxu3 %v3733_v63  ;;  %3892 = vmatpush.msra.mxu2 %v3701_v20  ;;  %v3625_v63 = vld [vmem:[#allocation9 + $0x5c0] sm:$0xff]  ;;  %v3576_v20 = vld [vmem:[#allocation9 + $0x438] sm:$0xff] }
 0x22d   : > { %3869 = vmatpush.msra.mxu1 %v3675_v37  ;;  %3833 = vmatpush.msra.mxu0 %v3730_v28  ;;  %v3573_v37 = vld [vmem:[#allocation9 + $0x420] sm:$0xff] }
 0x22e   : > { %3913 = vmatpush.msrb.mxu3 %v3731_v13  ;;  %3834 = vmatmul.f32.vlgmr.msra.gmra.mxu0 %v6488_v12  ;;  %v3597_v28 = vld [vmem:[#allocation9 + $0x4e0] sm:$0xff]  ;;  %v3623_v13 = vld [vmem:[#allocation9 + $0x5b0] sm:$0xff] }
 0x22f   : > { %3870 = vmatpush.msra.mxu1 %v3673_v9  ;;  %3893 = vmatpush.msra.mxu2 %v3699_v55  ;;  %v3574_v9 = vld [vmem:[#allocation9 + $0x428] sm:$0xff]  ;;  %v3571_v55 = vld [vmem:[#allocation9 + $0x410] sm:$0xff] }
 0x230   : > { %3914 = vmatmul.f32.vlgmr.msrb.gmra.mxu3 %v6488_v12  ;;  %3926 = vmatpush.msrb.mxu0 %v3777_v7  ;;  %v3595_v7 = vld [vmem:[#allocation9 + $0x4d0] sm:$0xff]  ;;  %v3621_v12 = vld [vmem:[#allocation9 + $0x5a0] sm:$0xff] }
 0x231   : > { %4006 = vmatpush.msra.mxu3 %v3663_v39  ;;  %3894 = vmatmul.f32.vlgmr.msra.gmra.mxu2 %v8678_v36  ;;  %v3615_v36 = vld [vmem:[#allocation9 + $0x570] sm:$0xff]  ;;  %v3572_v39 = vld [vmem:[#allocation9 + $0x418] sm:$0xff] }
 0x232   : > { %3978 = vmatpush.msrb.mxu2 %v3647_v53  ;;  %3871 = vmatpush.msra.mxu1 %v3671_v50  ;;  %v3569_v53 = vld [vmem:[#allocation9 + $0x400] sm:$0xff]  ;;  %v8702_v50 = vpop.f32.mrf.mxu0 }
 0x233   : > { %3927 = vmatpush.msrb.mxu0 %v3775_v31  ;;  %4007 = vmatpush.msra.mxu3 %v3661_v34  ;;  %v8704_v31 = vpop.f32.mrf.mxu1  ;;  %v3593_v34 = vld [vmem:[#allocation9 + $0x4c0] sm:$0xff] }
 0x234   : > { %3979 = vmatpush.msrb.mxu2 %v3645_v15  ;;  %3872 = vmatpush.msra.mxu1 %v3669_v17  ;;  %v3619_v15 = vld [vmem:[#allocation9 + $0x590] sm:$0xff]  ;;  %v3570_v17 = vld [vmem:[#allocation9 + $0x408] sm:$0xff] }
 0x235   : > { %3928 = vmatpush.msrb.mxu0 %v3773_v61  ;;  %4008 = vmatpush.msra.mxu3 %v3659_v26  ;;  %v3567_v61 = vld [vmem:[#allocation9 + $0x3f0] sm:$0xff]  ;;  %v8706_v26 = vpop.f32.mrf.mxu2 }
 0x236   : > { %3980 = vmatpush.msrb.mxu2 %v3643_v35  ;;  %3873 = vmatpush.msra.mxu1 %v3667_v56  ;;  %v3591_v35 = vld [vmem:[#allocation9 + $0x4b0] sm:$0xff]  ;;  %v3617_v56 = vld [vmem:[#allocation9 + $0x580] sm:$0xff] }
 0x237   : > { %3929 = vmatpush.msrb.mxu0 %v3771_v42  ;;  %4009 = vmatpush.msra.mxu3 %v3657_v51  ;;  %v3568_v42 = vld [vmem:[#allocation9 + $0x3f8] sm:$0xff]  ;;  %v8708_v51 = vpop.f32.mrf.mxu3 }
 0x238   : > { %3874 = vmatmul.f32.vlgmr.msra.gmra.mxu1 %v8681_v54  ;;  %3981 = vmatpush.msrb.mxu2 %v3641_v52  ;;  %v3649_v54 = vld [vmem:[#allocation9 + $0x680] sm:$0xff]  ;;  %v3664_v52 = vld [vmem:[#allocation9 + $0x6f8] sm:$0xff] }
 0x239   : > { %3958 = vmatpush.msrb.mxu1 %v3615_v36  ;;  %3930 = vmatpush.msrb.mxu0 %v3769_v18  ;;  %v3565_v36 = vld [vmem:[#allocation9 + $0x3e0] sm:$0xff] }
 0x23a   : > { %4010 = vmatpush.msra.mxu3 %v3655_v11  ;;  %3982 = vmatpush.msrb.mxu2 %v3639_v22  ;;  %v3589_v18 = vld [vmem:[#allocation9 + $0x4a0] sm:$0xff]  ;;  %v3566_v11 = vld [vmem:[#allocation9 + $0x3e8] sm:$0xff] }
 0x23b   : > { %3959 = vmatpush.msrb.mxu1 %v3613_v30  ;;  %3931 = vmatpush.msrb.mxu0 %v3767_v32  ;;  %v8710_v22 = vld [vmem:[#allocation3 + $0x10] sm:$0x7f] }
 0x23c   : > { %4011 = vmatpush.msra.mxu3 %v3653_v45  ;;  %3983 = vmatpush.msrb.mxu2 %v3637_v44  ;;  %v3662_v30 = vld [vmem:[#allocation9 + $0x6e8] sm:$0xff]  ;;  %v3563_v32 = vld [vmem:[#allocation9 + $0x3d0] sm:$0xff]  ;;  %v3564_v44 = vld [vmem:[#allocation9 + $0x3d8] sm:$0xff] }
 0x23d   : > { %3960 = vmatpush.msrb.mxu1 %v3611_v46  ;;  %3932 = vmatpush.msrb.mxu0 %v3765_v38  ;;  %v3587_v45 = vld [vmem:[#allocation9 + $0x490] sm:$0xff]  ;;  %v8713_v46 = vpop.f32.mrf.mxu1 }
 0x23e   : > { %4012 = vmatpush.msra.mxu3 %v3651_v4  ;;  %3984 = vmatpush.msrb.mxu2 %v3635_v49  ;;  %v3660_v4 = vld [vmem:[#allocation9 + $0x6d8] sm:$0xff]  ;;  %v3561_v49 = vld [vmem:[#allocation9 + $0x3c0] sm:$0xff] }
 0x23f   : > { %3961 = vmatpush.msrb.mxu1 %v3609_v58  ;;  %3933 = vmatpush.msrb.mxu0 %v3763_v48  ;;  %v3585_v58 = vld [vmem:[#allocation9 + $0x480] sm:$0xff]  ;;  %v3562_v48 = vld [vmem:[#allocation9 + $0x3c8] sm:$0xff] }
 0x240   : > { %4013 = vmatpush.msra.mxu3 %v3649_v54  ;;  %6184 = vmatmul.msk.f32.vlgmr.msrb.gmra.mxu0 %vm2933_vm3, %v8684_v43  ;;  %v3580_v43 = vld [vmem:[#allocation9 + $0x458] sm:$0xff]  ;;  %v8717_v54 = vpop.f32.mrf.mxu2 }
 0x241   : > { %3938 = vmatpush.msra.mxu0 %v3583_v19  ;;  %3962 = vmatpush.msrb.mxu1 %v3607_v16  ;;  %v3658_v19 = vld [vmem:[#allocation9 + $0x6c8] sm:$0xff]  ;;  %v3648_v16 = vld [vmem:[#allocation9 + $0x678] sm:$0xff] }
 0x242   : > { %3985 = vmatpush.msrb.mxu2 %v3633_v1  ;;  %6185 = vmatmul.msk.f32.vlgmr.msra.gmra.mxu3 %vm2933_vm3, %v8654_v14  ;;  %v3627_v14 = vld [vmem:[#allocation9 + $0x5d0] sm:$0xff] }
 0x243   : > { %4018 = vmatpush.msrb.mxu3 %v3584_v24  ;;  %3939 = vmatpush.msra.mxu0 %v3581_v0  ;;  %v3559_v1 = vld [vmem:[#allocation9 + $0x3b0] sm:$0xff]  ;;  %v8719_v24 = vpop.f32.mrf.mxu3  ;;  %v3560_v0 = vld [vmem:[#allocation9 + $0x3b8] sm:$0xff] }
 0x244   : > { %3963 = vmatpush.msrb.mxu1 %v3605_v29  ;;  %3986 = vmatpush.msrb.mxu2 %v3631_v6  ;;  %v8715_v38 = vpop.f32.mrf.mxu0  ;;  %v3656_v29 = vld [vmem:[#allocation9 + $0x6b8] sm:$0xff]  ;;  %v8721_v6 = vld [vmem:[#allocation3 + $0x8] sm:$0x7f] }
 0x245   : > { %4019 = vmatpush.msrb.mxu3 %v3582_v2  ;;  %3940 = vmatpush.msra.mxu0 %v3579_v8  ;;  %v3646_v2 = vld [vmem:[#allocation9 + $0x668] sm:$0xff]  ;;  %v3557_v8 = vld [vmem:[#allocation9 + $0x3a0] sm:$0xff] }
 0x246   : > { %3964 = vmatpush.msrb.mxu1 %v3603_v21  ;;  %3987 = vmatpush.msrb.mxu2 %v3629_v27  ;;  %v3558_v21 = vld [vmem:[#allocation9 + $0x3a8] sm:$0xff] }
 0x247   : > { %4020 = vmatpush.msrb.mxu3 %v3580_v43  ;;  %3941 = vmatpush.msra.mxu0 %v3577_v57  ;;  %v3654_v27 = vld [vmem:[#allocation9 + $0x6a8] sm:$0xff]  ;;  %v3644_v43 = vld [vmem:[#allocation9 + $0x658] sm:$0xff]  ;;  %v3555_v57 = vld [vmem:[#allocation9 + $0x390] sm:$0xff] }
 0x248   : > { %3965 = vmatpush.msrb.mxu1 %v3601_v3  ;;  %3988 = vmatpush.msrb.mxu2 %v3627_v14  ;;  %v3556_v3 = vld [vmem:[#allocation9 + $0x398] sm:$0xff] }
 0x249   : > { %4021 = vmatpush.msrb.mxu3 %v3578_v33  ;;  %3942 = vmatpush.msra.mxu0 %v3575_v5  ;;  %v3652_v14 = vld [vmem:[#allocation9 + $0x698] sm:$0xff]  ;;  %v3642_v33 = vld [vmem:[#allocation9 + $0x648] sm:$0xff]  ;;  %v3553_v5 = vld [vmem:[#allocation9 + $0x380] sm:$0xff] }
 0x24a   : > { %3966 = vmatpush.msrb.mxu1 %v3599_v60  ;;  %3989 = vmatpush.msrb.mxu2 %v3625_v63  ;;  %v8724_v60 = vpop.f32.mrf.mxu1 }
 0x24b   : > { %4022 = vmatpush.msrb.mxu3 %v3576_v20  ;;  %3943 = vmatpush.msra.mxu0 %v3573_v37  ;;  %v3554_v20 = vld [vmem:[#allocation9 + $0x388] sm:$0xff]  ;;  %v3616_v37 = vld [vmem:[#allocation9 + $0x578] sm:$0xff] }
 0x24c   : > { %3967 = vmatpush.msrb.mxu1 %v3597_v28  ;;  %3990 = vmatpush.msrb.mxu2 %v3623_v13  ;;  %v8728_v28 = vpop.f32.mrf.mxu2  ;;  %v8730_v13 = vpop.f32.mrf.mxu3 }
 0x24d   : > { %4023 = vmatpush.msrb.mxu3 %v3574_v9  ;;  %3944 = vmatpush.msra.mxu0 %v3571_v55  ;;  %v8726_v63 = vpop.f32.mrf.mxu0  ;;  %v3640_v9 = vld [vmem:[#allocation9 + $0x638] sm:$0xff]  ;;  %v3650_v55 = vld [vmem:[#allocation9 + $0x688] sm:$0xff] }
 0x24e   : > { %3968 = vmatpush.msrb.mxu1 %v3595_v7  ;;  %3991 = vmatpush.msrb.mxu2 %v3621_v12  ;;  %v6491_v7 = vld [vmem:[#allocation3] sm:$0x7f]  ;;  %v4161_v12 = vld [vmem:[#allocation9 + $0x1370] sm:$0xff] }
 0x24f   : > { %4024 = vmatpush.msrb.mxu3 %v3572_v39  ;;  %3945 = vmatpush.msra.mxu0 %v3569_v53  ;;  %v4129_v39 = vld [vmem:[#allocation9 + $0x1270] sm:$0xff]  ;;  %v3614_v53 = vld [vmem:[#allocation9 + $0x568] sm:$0xff] }
 0x250   : > { %3969 = vmatpush.msrb.mxu1 %v3593_v34  ;;  %3992 = vmatpush.msrb.mxu2 %v3619_v15  ;;  %v3638_v34 = vld [vmem:[#allocation9 + $0x628] sm:$0xff]  ;;  %v4159_v15 = vld [vmem:[#allocation9 + $0x1360] sm:$0xff] }
 0x251   : > { %4025 = vmatpush.msrb.mxu3 %v3570_v17  ;;  %3946 = vmatpush.msra.mxu0 %v3567_v61  ;;  %v6492_v17 = vld [vmem:[#allocation3 + $0x18] sm:$0x7f]  ;;  %v4127_v61 = vld [vmem:[#allocation9 + $0x1260] sm:$0xff] }
 0x252   : > { %3970 = vmatpush.msrb.mxu1 %v3591_v35  ;;  %3993 = vmatpush.msrb.mxu2 %v3617_v56  ;;  %v3612_v35 = vld [vmem:[#allocation9 + $0x558] sm:$0xff] }
 0x253   : > { %4026 = vmatpush.msrb.mxu3 %v3568_v42  ;;  %3994 = vmatmul.f32.vlgmr.msrb.gmra.mxu2 %v8710_v22  ;;  %v3636_v56 = vld [vmem:[#allocation9 + $0x618] sm:$0xff]  ;;  %v4157_v42 = vld [vmem:[#allocation9 + $0x1350] sm:$0xff] }
 0x254   : > { %4086 = vmatpush.msra.mxu2 %v3664_v52  ;;  %3947 = vmatpush.msra.mxu0 %v3565_v36  ;;  %v4125_v52 = vld [vmem:[#allocation9 + $0x1250] sm:$0xff]  ;;  %v3610_v36 = vld [vmem:[#allocation9 + $0x548] sm:$0xff] }
 0x255   : > { %3971 = vmatpush.msrb.mxu1 %v3589_v18  ;;  %4027 = vmatpush.msrb.mxu3 %v3566_v11 }
 0x256   : > { %4087 = vmatpush.msra.mxu2 %v3662_v30  ;;  %3948 = vmatpush.msra.mxu0 %v3563_v32  ;;  %v3634_v30 = vld [vmem:[#allocation9 + $0x608] sm:$0xff]  ;;  %v4155_v32 = vld [vmem:[#allocation9 + $0x1340] sm:$0xff] }
 0x257   : > { %3972 = vmatpush.msrb.mxu1 %v3587_v45  ;;  %4028 = vmatpush.msrb.mxu3 %v3564_v44  ;;  %v4123_v44 = vld [vmem:[#allocation9 + $0x1240] sm:$0xff] }
 0x258   : > { %4088 = vmatpush.msra.mxu2 %v3660_v4  ;;  %3949 = vmatpush.msra.mxu0 %v3561_v49  ;;  %v3608_v4 = vld [vmem:[#allocation9 + $0x538] sm:$0xff] }
 0x259   : > { %3973 = vmatpush.msrb.mxu1 %v3585_v58  ;;  %4029 = vmatpush.msrb.mxu3 %v3562_v48  ;;  %v3632_v58 = vld [vmem:[#allocation9 + $0x5f8] sm:$0xff]  ;;  %v4153_v48 = vld [vmem:[#allocation9 + $0x1330] sm:$0xff] }
 0x25a   : > { %3974 = vmatmul.f32.vlgmr.msrb.gmra.mxu1 %v8721_v6  ;;  %4089 = vmatpush.msra.mxu2 %v3658_v19 }
 0x25b   : > { %4058 = vmatpush.msra.mxu1 %v3648_v16  ;;  %3950 = vmatpush.msra.mxu0 %v3559_v1  ;;  %v3467_v16 = vpop.f32.mrf.mxu3  ;;  %v4121_v1 = vld [vmem:[#allocation9 + $0x1230] sm:$0xff] }
 0x25c   : > { %4030 = vmatpush.msrb.mxu3 %v3560_v0  ;;  %4090 = vmatpush.msra.mxu2 %v3656_v29  ;;  %v3606_v0 = vld [vmem:[#allocation9 + $0x528] sm:$0xff] }
 0x25d   : > { %4059 = vmatpush.msra.mxu1 %v3646_v2  ;;  %3951 = vmatpush.msra.mxu0 %v3557_v8  ;;  %v3630_v29 = vld [vmem:[#allocation9 + $0x5e8] sm:$0xff]  ;;  %v4151_v2 = vld [vmem:[#allocation9 + $0x1320] sm:$0xff] }
 0x25e   : > { %4031 = vmatpush.msrb.mxu3 %v3558_v21  ;;  %4091 = vmatpush.msra.mxu2 %v3654_v27  ;;  %v3447_v49 = vpop.f32.mrf.mxu2  ;;  %v4119_v21 = vld [vmem:[#allocation9 + $0x1220] sm:$0xff]  ;;  %v3604_v27 = vld [vmem:[#allocation9 + $0x518] sm:$0xff] }
 0x25f   : > { %4060 = vmatpush.msra.mxu1 %v3644_v43  ;;  %3952 = vmatpush.msra.mxu0 %v3555_v57  ;;  %v3427_v18 = vpop.f32.mrf.mxu1  ;;  %v3628_v43 = vld [vmem:[#allocation9 + $0x5d8] sm:$0xff]  ;;  %v4149_v57 = vld [vmem:[#allocation9 + $0x1310] sm:$0xff] }
 0x260   : > { %4032 = vmatpush.msrb.mxu3 %v3556_v3  ;;  %4092 = vmatpush.msra.mxu2 %v3652_v14  ;;  %v4117_v3 = vld [vmem:[#allocation9 + $0x1210] sm:$0xff]  ;;  %v3602_v14 = vld [vmem:[#allocation9 + $0x508] sm:$0xff] }
 0x261   : > { %4061 = vmatpush.msra.mxu1 %v3642_v33  ;;  %3953 = vmatpush.msra.mxu0 %v3553_v5  ;;  %v3626_v33 = vld [vmem:[#allocation9 + $0x5c8] sm:$0xff]  ;;  %v4147_v5 = vld [vmem:[#allocation9 + $0x1300] sm:$0xff] }
 0x262   : > { %4033 = vmatpush.msrb.mxu3 %v3554_v20  ;;  %3954 = vmatmul.f32.vlgmr.msra.gmra.mxu0 %v6491_v7  ;;  %v4115_v20 = vld [vmem:[#allocation9 + $0x1200] sm:$0xff] }
 0x263   : > { %4034 = vmatmul.f32.vlgmr.msrb.gmra.mxu3 %v6491_v7  ;;  %4038 = vmatpush.msrb.mxu0 %v3616_v37  ;;  %v3600_v37 = vld [vmem:[#allocation9 + $0x4f8] sm:$0xff]  ;;  %v4113_v7 = vld [vmem:[#allocation9 + $0x11f0] sm:$0xff] }
 0x264   : > { %4062 = vmatpush.msra.mxu1 %v3640_v9  ;;  %4093 = vmatpush.msra.mxu2 %v3650_v55  ;;  %v3624_v9 = vld [vmem:[#allocation9 + $0x5b8] sm:$0xff]  ;;  %v4145_v55 = vld [vmem:[#allocation9 + $0x12f0] sm:$0xff] }
 0x265   : > { %4231 = vmatpush.msra.mxu3 %v4161_v12  ;;  %6186 = vmatmul.msk.f32.vlgmr.msra.gmra.mxu2 %vm2933_vm3, %v6492_v17  ;;  %v3598_v12 = vld [vmem:[#allocation9 + $0x4e8] sm:$0xff]  ;;  %v3620_v17 = vld [vmem:[#allocation9 + $0x598] sm:$0xff] }
 0x266   : > { %4211 = vmatpush.msrb.mxu2 %v4129_v39  ;;  %4039 = vmatpush.msrb.mxu0 %v3614_v53  ;;  %v3622_v39 = vld [vmem:[#allocation9 + $0x5a8] sm:$0xff]  ;;  %v4143_v53 = vld [vmem:[#allocation9 + $0x12e0] sm:$0xff] }
 0x267   : > { %4063 = vmatpush.msra.mxu1 %v3638_v34  ;;  %4232 = vmatpush.msra.mxu3 %v4159_v15  ;;  %v3407_v11 = vpop.f32.mrf.mxu0  ;;  %v4111_v34 = vld [vmem:[#allocation9 + $0x11e0] sm:$0xff]  ;;  %v3596_v15 = vld [vmem:[#allocation9 + $0x4d8] sm:$0xff] }
 0x268   : > { %4212 = vmatpush.msrb.mxu2 %v4127_v61  ;;  %4040 = vmatpush.msrb.mxu0 %v3612_v35  ;;  %v3428_v45 = vadd.f32 %v3427_v18, %v3407_v11  ;;  %v4141_v61 = vld [vmem:[#allocation9 + $0x12d0] sm:$0xff]  ;;  %v3592_v11 = vld [vmem:[#allocation9 + $0x4b8] sm:$0xff] }
 0x269   : > { %4064 = vmatpush.msra.mxu1 %v3636_v56  ;;  %4233 = vmatpush.msra.mxu3 %v4157_v42  ;;  %v4109_v35 = vld [vmem:[#allocation9 + $0x11d0] sm:$0xff]  ;;  %v3594_v56 = vld [vmem:[#allocation9 + $0x4c8] sm:$0xff] }
 0x26a   : > { %4213 = vmatpush.msrb.mxu2 %v4125_v52  ;;  %4041 = vmatpush.msrb.mxu0 %v3610_v36  ;;  %v3448_v19 = vadd.f32 %v3447_v49, %v3428_v45  ;;  %v3618_v42 = vld [vmem:[#allocation9 + $0x588] sm:$0xff]  ;;  %v4139_v52 = vld [vmem:[#allocation9 + $0x12c0] sm:$0xff]  ;;  %v4209_v18 = vld [vmem:[#allocation9 + $0x14f0] sm:$0xff] }
 0x26b   : > { %4065 = vmatpush.msra.mxu1 %v3634_v30  ;;  %4234 = vmatpush.msra.mxu3 %v4155_v32  ;;  %v4107_v36 = vld [vmem:[#allocation9 + $0x11c0] sm:$0xff]  ;;  %v4137_v30 = vld [vmem:[#allocation9 + $0x12b0] sm:$0xff] }
 0x26c   : > { %4214 = vmatpush.msrb.mxu2 %v4123_v44  ;;  %4042 = vmatpush.msrb.mxu0 %v3608_v4  ;;  %v8733_v8 = vadd.f32 %v3467_v16, %v3448_v19  ;;  %v4105_v32 = vld [vmem:[#allocation9 + $0x11b0] sm:$0xff]  ;;  %v4207_v45 = vld [vmem:[#allocation9 + $0x14e0] sm:$0xff]  ;;  %v3590_v44 = vld [vmem:[#allocation9 + $0x4a8] sm:$0xff]  ;;  %v3055_v4 = vadd.f32 %v8702_v50, %v8708_v51 }
 0x26d   : > { %4066 = vmatpush.msra.mxu1 %v3632_v58  ;;  %4235 = vmatpush.msra.mxu3 %v4153_v48  ;;  %v4135_v49 = vld [vmem:[#allocation9 + $0x12a0] sm:$0xff]  ;;  %v4205_v48 = vld [vmem:[#allocation9 + $0x14d0] sm:$0xff]  ;;  %v3588_v19 = vld [vmem:[#allocation9 + $0x498] sm:$0xff] }
 0x26e   : > { %4215 = vmatpush.msrb.mxu2 %v4121_v1  ;;  %4043 = vmatpush.msrb.mxu0 %v3606_v0  ;;  %v4103_v58 = vld [vmem:[#allocation9 + $0x11a0] sm:$0xff]  ;;  %v4133_v16 = vld [vmem:[#allocation9 + $0x1290] sm:$0xff]  ;;  %v3586_v0 = vld [vmem:[#allocation9 + $0x488] sm:$0xff] }
 0x26f   : > { %4067 = vmatpush.msra.mxu1 %v3630_v29  ;;  %4236 = vmatpush.msra.mxu3 %v4151_v2  ;;  %v4101_v1 = vld [vmem:[#allocation9 + $0x1190] sm:$0xff]  ;;  %v3075_v29 = vadd.f32 %v8704_v31, %v3055_v4  ;;  %v4131_v50 = vld [vmem:[#allocation9 + $0x1280] sm:$0xff]  ;;  %v4162_v31 = vld [vmem:[#allocation9 + $0x1378] sm:$0xff] }
 0x270   : > { %4216 = vmatpush.msrb.mxu2 %v4119_v21  ;;  %4044 = vmatpush.msrb.mxu0 %v3604_v27  ;;  %v4099_v51 = vld [vmem:[#allocation9 + $0x1180] sm:$0xff]  ;;  %v4193_v21 = vld [vmem:[#allocation9 + $0x1470] sm:$0xff] }
 0x271   : > { %4068 = vmatpush.msra.mxu1 %v3628_v43  ;;  %4237 = vmatpush.msra.mxu3 %v4149_v57  ;;  %v3095_v2 = vadd.f32 %v8706_v26, %v3075_v29  ;;  %v4201_v27 = vld [vmem:[#allocation9 + $0x14b0] sm:$0xff]  ;;  %v4194_v43 = vld [vmem:[#allocation9 + $0x1478] sm:$0xff]  ;;  %v4160_v26 = vld [vmem:[#allocation9 + $0x1368] sm:$0xff] }
 0x272   : > { %4217 = vmatpush.msrb.mxu2 %v4117_v3  ;;  %4045 = vmatpush.msrb.mxu0 %v3602_v14  ;;  %v4191_v3 = vld [vmem:[#allocation9 + $0x1460] sm:$0xff]  ;;  %v4122_v29 = vld [vmem:[#allocation9 + $0x1238] sm:$0xff] }
 0x273   : > { %4069 = vmatpush.msra.mxu1 %v3626_v33  ;;  %4238 = vmatpush.msra.mxu3 %v4147_v5  ;;  %v3198_v57 = vadd.f32 %v8724_v60, %v3095_v2  ;;  %v4199_v14 = vld [vmem:[#allocation9 + $0x14a0] sm:$0xff]  ;;  %v4192_v33 = vld [vmem:[#allocation9 + $0x1468] sm:$0xff]  ;;  %v4189_v5 = vld [vmem:[#allocation9 + $0x1450] sm:$0xff] }
 0x274   : > { %4218 = vmatpush.msrb.mxu2 %v4115_v20  ;;  %4046 = vmatpush.msrb.mxu0 %v3600_v37  ;;  %v3487_v20 = vpop.f32.mrf.mxu3  ;;  %v4190_v37 = vld [vmem:[#allocation9 + $0x1458] sm:$0xff] }
 0x275   : > { %4070 = vmatpush.msra.mxu1 %v3624_v9  ;;  %4239 = vmatpush.msra.mxu3 %v4145_v55  ;;  %v3218_v60 = vadd.f32 %v8728_v28, %v3198_v57  ;;  %v4158_v9 = vld [vmem:[#allocation9 + $0x1358] sm:$0xff]  ;;  %v4187_v55 = vld [vmem:[#allocation9 + $0x1440] sm:$0xff]  ;;  %v4144_v57 = vld [vmem:[#allocation9 + $0x12e8] sm:$0xff] }
 0x276   : > { %4219 = vmatpush.msrb.mxu2 %v4113_v7  ;;  %4047 = vmatpush.msrb.mxu0 %v3598_v12  ;;  %v3547_v12 = vpop.f32.mrf.mxu2  ;;  %v4130_v28 = vld [vmem:[#allocation9 + $0x1278] sm:$0xff] }
 0x277   : > { %4071 = vmatpush.msra.mxu1 %v3622_v39  ;;  %4240 = vmatpush.msra.mxu3 %v4143_v53  ;;  %v4195_v39 = vld [vmem:[#allocation9 + $0x1480] sm:$0xff]  ;;  %v4188_v53 = vld [vmem:[#allocation9 + $0x1448] sm:$0xff]  ;;  %v4146_v2 = vld [vmem:[#allocation9 + $0x12f8] sm:$0xff] }
 0x278   : > { %4220 = vmatpush.msrb.mxu2 %v4111_v34  ;;  %4048 = vmatpush.msrb.mxu0 %v3596_v15  ;;  %v3238_v15 = vadd.f32 %v8730_v13, %v3218_v60  ;;  %v4169_v60 = vld [vmem:[#allocation9 + $0x13b0] sm:$0xff] }
 0x279   : > { %4072 = vmatpush.msra.mxu1 %v3620_v17  ;;  %4241 = vmatpush.msra.mxu3 %v4141_v61  ;;  %v4156_v17 = vld [vmem:[#allocation9 + $0x1348] sm:$0xff] }
 0x27a   : > { %4221 = vmatpush.msrb.mxu2 %v4109_v35  ;;  %4049 = vmatpush.msrb.mxu0 %v3594_v56  ;;  %v4185_v35 = vld [vmem:[#allocation9 + $0x1430] sm:$0xff] }
 0x27b   : > { %4073 = vmatpush.msra.mxu1 %v3618_v42  ;;  %4242 = vmatpush.msra.mxu3 %v4139_v52  ;;  %v4186_v42 = vld [vmem:[#allocation9 + $0x1438] sm:$0xff] }
 0x27c   : > { %4074 = vmatmul.f32.vlgmr.msra.gmra.mxu1 %v8710_v22  ;;  %4222 = vmatpush.msrb.mxu2 %v4107_v36  ;;  %v4203_v22 = vld [vmem:[#allocation9 + $0x14c0] sm:$0xff]  ;;  %v4154_v52 = vld [vmem:[#allocation9 + $0x1338] sm:$0xff]  ;;  %v4128_v36 = vld [vmem:[#allocation9 + $0x1268] sm:$0xff] }
 0x27d   : > { %4279 = vmatpush.msrb.mxu1 %v4209_v18  ;;  %4050 = vmatpush.msrb.mxu0 %v3592_v11  ;;  %v4183_v18 = vld [vmem:[#allocation9 + $0x1420] sm:$0xff]  ;;  %v3258_v11 = vadd.f32 %v8726_v63, %v3238_v15  ;;  %v4165_v15 = vld [vmem:[#allocation9 + $0x1390] sm:$0xff] }
 0x27e   : > { %4243 = vmatpush.msra.mxu3 %v4137_v30  ;;  %4223 = vmatpush.msrb.mxu2 %v4105_v32  ;;  %v4184_v30 = vld [vmem:[#allocation9 + $0x1428] sm:$0xff] }
 0x27f   : > { %4280 = vmatpush.msrb.mxu1 %v4207_v45  ;;  %4051 = vmatpush.msrb.mxu0 %v3590_v44  ;;  %v4152_v32 = vld [vmem:[#allocation9 + $0x1328] sm:$0xff]  ;;  %v4126_v45 = vld [vmem:[#allocation9 + $0x1258] sm:$0xff]  ;;  %v4181_v44 = vld [vmem:[#allocation9 + $0x1410] sm:$0xff] }
 0x280   : > { %4244 = vmatpush.msra.mxu3 %v4135_v49  ;;  %4224 = vmatpush.msrb.mxu2 %v4103_v58  ;;  %v4182_v49 = vld [vmem:[#allocation9 + $0x1418] sm:$0xff] }
 0x281   : > { %4281 = vmatpush.msrb.mxu1 %v4205_v48  ;;  %4052 = vmatpush.msrb.mxu0 %v3588_v19  ;;  %v3527_v61 = vpop.f32.mrf.mxu1  ;;  %v4150_v58 = vld [vmem:[#allocation9 + $0x1318] sm:$0xff]  ;;  %v4124_v19 = vld [vmem:[#allocation9 + $0x1248] sm:$0xff] }
 0x282   : > { %4245 = vmatpush.msra.mxu3 %v4133_v16  ;;  %4225 = vmatpush.msrb.mxu2 %v4101_v1  ;;  %v4179_v16 = vld [vmem:[#allocation9 + $0x1400] sm:$0xff]  ;;  %v4180_v1 = vld [vmem:[#allocation9 + $0x1408] sm:$0xff] }
 0x283   : > { %4282 = vmatpush.msrb.mxu1 %v4203_v22  ;;  %4053 = vmatpush.msrb.mxu0 %v3586_v0  ;;  %v4148_v22 = vld [vmem:[#allocation9 + $0x1308] sm:$0xff] }
 0x284   : > { %4246 = vmatpush.msra.mxu3 %v4131_v50  ;;  %4054 = vmatmul.f32.vlgmr.msrb.gmra.mxu0 %v8721_v6  ;;  %v4197_v6 = vld [vmem:[#allocation9 + $0x1490] sm:$0xff] }
 0x285   : > { %4226 = vmatpush.msrb.mxu2 %v4099_v51  ;;  %4247 = vmatmul.f32.vlgmr.msra.gmra.mxu3 %v8667_v40  ;;  %v4177_v50 = vld [vmem:[#allocation9 + $0x13f0] sm:$0xff]  ;;  %v4178_v51 = vld [vmem:[#allocation9 + $0x13f8] sm:$0xff] }
 0x286   : > { %4251 = vmatpush.msra.mxu0 %v4193_v21  ;;  %4283 = vmatpush.msrb.mxu1 %v4201_v27  ;;  %v4120_v21 = vld [vmem:[#allocation9 + $0x1228] sm:$0xff]  ;;  %v4175_v27 = vld [vmem:[#allocation9 + $0x13e0] sm:$0xff] }
 0x287   : > { %4331 = vmatpush.msrb.mxu3 %v4194_v43  ;;  %4227 = vmatmul.f32.vlgmr.msrb.gmra.mxu2 %v8670_v41  ;;  %v4176_v43 = vld [vmem:[#allocation9 + $0x13e8] sm:$0xff] }
 0x288   : > { %4311 = vmatpush.msra.mxu2 %v4162_v31  ;;  %4252 = vmatpush.msra.mxu0 %v4191_v3  ;;  %v4118_v31 = vld [vmem:[#allocation9 + $0x1218] sm:$0xff]  ;;  %v4173_v3 = vld [vmem:[#allocation9 + $0x13d0] sm:$0xff] }
 0x289   : > { %4284 = vmatpush.msrb.mxu1 %v4199_v14  ;;  %4332 = vmatpush.msrb.mxu3 %v4192_v33  ;;  %v3507_v7 = vpop.f32.mrf.mxu0  ;;  %v4174_v14 = vld [vmem:[#allocation9 + $0x13d8] sm:$0xff] }
 0x28a   : > { %4312 = vmatpush.msra.mxu2 %v4160_v26  ;;  %4253 = vmatpush.msra.mxu0 %v4189_v5  ;;  %v3508_v34 = vadd.f32 %v3507_v7, %v3487_v20  ;;  %v4142_v33 = vld [vmem:[#allocation9 + $0x12d8] sm:$0xff]  ;;  %v4116_v26 = vld [vmem:[#allocation9 + $0x1208] sm:$0xff]  ;;  %v4171_v5 = vld [vmem:[#allocation9 + $0x13c0] sm:$0xff] }
 0x28b   : > { %4285 = vmatpush.msrb.mxu1 %v4197_v6  ;;  %4333 = vmatpush.msrb.mxu3 %v4190_v37  ;;  %v4172_v20 = vld [vmem:[#allocation9 + $0x13c8] sm:$0xff]  ;;  %v4114_v37 = vld [vmem:[#allocation9 + $0x11f8] sm:$0xff] }
 0x28c   : > { %4313 = vmatpush.msra.mxu2 %v4158_v9  ;;  %4254 = vmatpush.msra.mxu0 %v4187_v55  ;;  %v3528_v56 = vadd.f32 %v3527_v61, %v3508_v34  ;;  %v4140_v6 = vld [vmem:[#allocation9 + $0x12c8] sm:$0xff]  ;;  %v4170_v9 = vld [vmem:[#allocation9 + $0x13b8] sm:$0xff] }
 0x28d   : > { %4286 = vmatpush.msrb.mxu1 %v4195_v39  ;;  %4334 = vmatpush.msrb.mxu3 %v4188_v53  ;;  %v4138_v55 = vld [vmem:[#allocation9 + $0x12b8] sm:$0xff]  ;;  %v4112_v7 = vld [vmem:[#allocation9 + $0x11e8] sm:$0xff] }
 0x28e   : > { %6187 = vmatmul.msk.f32.vlgmr.msrb.gmra.mxu1 %vm2933_vm3, %v8660_v62  ;;  %4314 = vmatpush.msra.mxu2 %v4156_v17  ;;  %v3548_v13 = vadd.f32 %v3547_v12, %v3528_v56  ;;  %v4167_v12 = vld [vmem:[#allocation9 + $0x13a0] sm:$0xff]  ;;  %v4168_v39 = vld [vmem:[#allocation9 + $0x13a8] sm:$0xff]  ;;  %v4110_v34 = vld [vmem:[#allocation9 + $0x11d8] sm:$0xff] }
 0x28f   : > { %4291 = vmatpush.msra.mxu1 %v4130_v28  ;;  %4255 = vmatpush.msra.mxu0 %v4185_v35  ;;  %v4136_v53 = vld [vmem:[#allocation9 + $0x12a8] sm:$0xff]  ;;  %v4166_v17 = vld [vmem:[#allocation9 + $0x1398] sm:$0xff]  ;;  %v4163_v35 = vld [vmem:[#allocation9 + $0x1380] sm:$0xff] }
 0x290   : > { %4335 = vmatpush.msrb.mxu3 %v4186_v42  ;;  %4315 = vmatpush.msra.mxu2 %v4154_v52  ;;  %v3815_v4 = vpop.f32.mrf.mxu3  ;;  %v8749_v48 = vadd.f32 %v3548_v13, %v3258_v11  ;;  %v4134_v61 = vld [vmem:[#allocation9 + $0x1298] sm:$0xff]  ;;  %v4108_v28 = vld [vmem:[#allocation9 + $0x11c8] sm:$0xff]  ;;  %v6493_v11 = vld [vmem:[#allocation9 + $0xa70] sm:$0xff] }
 0x291   : > { %4292 = vmatpush.msra.mxu1 %v4128_v36  ;;  %4256 = vmatpush.msra.mxu0 %v4183_v18  ;;  %v4164_v56 = vld [vmem:[#allocation9 + $0x1388] sm:$0xff]  ;;  %v4106_v42 = vld [vmem:[#allocation9 + $0x11b8] sm:$0xff] }
 0x292   : > { %4336 = vmatpush.msrb.mxu3 %v4184_v30  ;;  %4316 = vmatpush.msra.mxu2 %v4152_v32  ;;  %v3795_v63 = vpop.f32.mrf.mxu2  ;;  %v4132_v52 = vld [vmem:[#allocation9 + $0x1288] sm:$0xff]  ;;  %v4210_v36 = vld [vmem:[#allocation9 + $0x14f8] sm:$0xff]  ;;  %v6494_v32 = vld [vmem:[#allocation9 + $0x9f0] sm:$0xff] }
 0x293   : > { %4293 = vmatpush.msra.mxu1 %v4126_v45  ;;  %4257 = vmatpush.msra.mxu0 %v4181_v44  ;;  %v8751_v0 = vadd.f32 %v3815_v4, %v3795_v63  ;;  %v4104_v18 = vld [vmem:[#allocation9 + $0x11a8] sm:$0xff]  ;;  %v4102_v30 = vld [vmem:[#allocation9 + $0x1198] sm:$0xff]  ;;  %v6495_v44 = vld [vmem:[#allocation9 + $0xa60] sm:$0xff]  ;;  %v3855_v63 = vpop.f32.mrf.mxu1 }
 0x294   : > { %4337 = vmatpush.msrb.mxu3 %v4182_v49  ;;  %4317 = vmatpush.msra.mxu2 %v4150_v58  ;;  %v4208_v13 = vld [vmem:[#allocation9 + $0x14e8] sm:$0xff]  ;;  %v4206_v45 = vld [vmem:[#allocation9 + $0x14d8] sm:$0xff]  ;;  %v6496_v58 = vld [vmem:[#allocation9 + $0x9e0] sm:$0xff] }
 0x295   : > { %4294 = vmatpush.msra.mxu1 %v4124_v19  ;;  %4258 = vmatpush.msra.mxu0 %v4179_v16  ;;  %v4100_v4 = vld [vmem:[#allocation9 + $0x1188] sm:$0xff] }
 0x296   : > { %4338 = vmatpush.msrb.mxu3 %v4180_v1  ;;  %4318 = vmatpush.msra.mxu2 %v4148_v22  ;;  %v4204_v19 = vld [vmem:[#allocation9 + $0x14c8] sm:$0xff]  ;;  %v6497_v1 = vld [vmem:[#allocation9 + $0xa50] sm:$0xff] }
 0x297   : > { %4295 = vmatpush.msra.mxu1 %v4122_v29  ;;  %4259 = vmatpush.msra.mxu0 %v4177_v50  ;;  %v6498_v22 = vld [vmem:[#allocation9 + $0x9d0] sm:$0xff]  ;;  %v4202_v29 = vld [vmem:[#allocation9 + $0x14b8] sm:$0xff] }
 0x298   : > { %4339 = vmatpush.msrb.mxu3 %v4178_v51  ;;  %4319 = vmatpush.msra.mxu2 %v4146_v2  ;;  %v6499_v51 = vld [vmem:[#allocation9 + $0xa40] sm:$0xff] }
 0x299   : > { %4296 = vmatpush.msra.mxu1 %v4120_v21  ;;  %4260 = vmatpush.msra.mxu0 %v4175_v27  ;;  %v6500_v2 = vld [vmem:[#allocation9 + $0x9c0] sm:$0xff]  ;;  %v4200_v21 = vld [vmem:[#allocation9 + $0x14a8] sm:$0xff]  ;;  %v6501_v27 = vld [vmem:[#allocation9 + $0x8f0] sm:$0xff] }
 0x29a   : > { %4340 = vmatpush.msrb.mxu3 %v4176_v43  ;;  %4320 = vmatpush.msra.mxu2 %v4144_v57  ;;  %v6503_v43 = vld [vmem:[#allocation9 + $0x9b0] sm:$0xff]  ;;  %v4198_v57 = vld [vmem:[#allocation9 + $0x1498] sm:$0xff] }
 0x29b   : > { %4297 = vmatpush.msra.mxu1 %v4118_v31  ;;  %4261 = vmatpush.msra.mxu0 %v4173_v3  ;;  %v6504_v31 = vld [vmem:[#allocation9 + $0x8e0] sm:$0xff] }
 0x29c   : > { %4341 = vmatpush.msrb.mxu3 %v4174_v14  ;;  %4321 = vmatpush.msra.mxu2 %v4142_v33  ;;  %v6505_v3 = vld [vmem:[#allocation9 + $0xa20] sm:$0xff]  ;;  %v4196_v33 = vld [vmem:[#allocation9 + $0x1488] sm:$0xff] }
 0x29d   : > { %4298 = vmatpush.msra.mxu1 %v4116_v26  ;;  %4262 = vmatpush.msra.mxu0 %v4171_v5  ;;  %v6506_v14 = vld [vmem:[#allocation9 + $0x9a0] sm:$0xff]  ;;  %v6507_v5 = vld [vmem:[#allocation9 + $0x8d0] sm:$0xff] }
 0x29e   : > { %4342 = vmatpush.msrb.mxu3 %v4172_v20  ;;  %4322 = vmatpush.msra.mxu2 %v4140_v6  ;;  %v6508_v6 = vld [vmem:[#allocation9 + $0xa10] sm:$0xff] }
 0x29f   : > { %4299 = vmatpush.msra.mxu1 %v4114_v37  ;;  %4263 = vmatpush.msra.mxu0 %v4169_v60  ;;  %v6509_v37 = vld [vmem:[#allocation9 + $0x990] sm:$0xff] }
 0x2a0   : > { %4343 = vmatpush.msrb.mxu3 %v4170_v9  ;;  %4323 = vmatpush.msra.mxu2 %v4138_v55  ;;  %v6510_v9 = vld [vmem:[#allocation9 + $0x8c0] sm:$0xff] }
 0x2a1   : > { %4300 = vmatpush.msra.mxu1 %v4112_v7  ;;  %4264 = vmatpush.msra.mxu0 %v4167_v12  ;;  %v6511_v7 = vld [vmem:[#allocation9 + $0xa00] sm:$0xff] }
 0x2a2   : > { %4344 = vmatpush.msrb.mxu3 %v4168_v39  ;;  %4324 = vmatpush.msra.mxu2 %v4136_v53  ;;  %v6512_v39 = vld [vmem:[#allocation9 + $0x7f0] sm:$0xff] }
 0x2a3   : > { %4301 = vmatpush.msra.mxu1 %v4110_v34  ;;  %4265 = vmatpush.msra.mxu0 %v4165_v15  ;;  %v6513_v53 = vld [vmem:[#allocation9 + $0x8b0] sm:$0xff]  ;;  %v6514_v34 = vld [vmem:[#allocation9 + $0x980] sm:$0xff]  ;;  %v6515_v15 = vld [vmem:[#allocation9 + $0x7f8] sm:$0xff] }
 0x2a4   : > { %4345 = vmatpush.msrb.mxu3 %v4166_v17  ;;  %4325 = vmatpush.msra.mxu2 %v4134_v61  ;;  %v6516_v17 = vld [vmem:[#allocation9 + $0x7e0] sm:$0xff] }
 0x2a5   : > { %4302 = vmatpush.msra.mxu1 %v4108_v28  ;;  %4266 = vmatpush.msra.mxu0 %v4163_v35  ;;  %v6517_v61 = vld [vmem:[#allocation9 + $0x8a0] sm:$0xff]  ;;  %v6518_v28 = vld [vmem:[#allocation9 + $0x970] sm:$0xff]  ;;  %v6519_v35 = vld [vmem:[#allocation9 + $0x7e8] sm:$0xff] }
 0x2a6   : > { %4346 = vmatpush.msrb.mxu3 %v4164_v56  ;;  %4267 = vmatmul.f32.vlgmr.msra.gmra.mxu0 %v8664_v25  ;;  %v6520_v56 = vld [vmem:[#allocation9 + $0x7d0] sm:$0xff] }
 0x2a7   : > { %4303 = vmatpush.msra.mxu1 %v4106_v42  ;;  %4326 = vmatpush.msra.mxu2 %v4132_v52  ;;  %v6521_v52 = vld [vmem:[#allocation9 + $0x890] sm:$0xff] }
 0x2a8   : > { %4347 = vmatmul.f32.vlgmr.msrb.gmra.mxu3 %v8664_v25  ;;  %4359 = vmatpush.msrb.mxu0 %v4210_v36  ;;  %v6522_v36 = vld [vmem:[#allocation9 + $0x960] sm:$0xff] }
 0x2a9   : > { %4443 = vmatpush.msra.mxu3 %v6493_v11  ;;  %4327 = vmatmul.f32.vlgmr.msra.gmra.mxu2 %v8667_v40  ;;  %v6524_v11 = vld [vmem:[#allocation9 + $0x7c0] sm:$0xff] }
 0x2aa   : > { %4415 = vmatpush.msrb.mxu2 %v6494_v32  ;;  %4304 = vmatpush.msra.mxu1 %v4104_v18  ;;  %v6526_v32 = vld [vmem:[#allocation9 + $0x950] sm:$0xff] }
 0x2ab   : > { %4360 = vmatpush.msrb.mxu0 %v4208_v13  ;;  %4444 = vmatpush.msra.mxu3 %v6495_v44  ;;  %v3835_v49 = vpop.f32.mrf.mxu0  ;;  %v6523_v13 = vld [vmem:[#allocation9 + $0x7d8] sm:$0xff]  ;;  %v6528_v44 = vld [vmem:[#allocation9 + $0x7b0] sm:$0xff] }
 0x2ac   : > { %4416 = vmatpush.msrb.mxu2 %v6496_v58  ;;  %4305 = vmatpush.msra.mxu1 %v4102_v30  ;;  %v3836_v16 = vadd.f32 %v3835_v49, %v8751_v0  ;;  %v6502_v0 = vld [vmem:[#allocation9 + $0xa30] sm:$0xff]  ;;  %v6525_v30 = vld [vmem:[#allocation9 + $0x880] sm:$0xff]  ;;  %v6531_v58 = vld [vmem:[#allocation9 + $0x7b8] sm:$0xff] }
 0x2ad   : > { %4361 = vmatpush.msrb.mxu0 %v4206_v45  ;;  %4445 = vmatpush.msra.mxu3 %v6497_v1  ;;  %v6527_v45 = vld [vmem:[#allocation9 + $0x7c8] sm:$0xff]  ;;  %v6530_v49 = vld [vmem:[#allocation9 + $0x940] sm:$0xff] }
 0x2ae   : > { %4417 = vmatpush.msrb.mxu2 %v6498_v22  ;;  %4306 = vmatpush.msra.mxu1 %v4100_v4  ;;  %v8757_v50 = vadd.f32 %v3855_v63, %v3836_v16  ;;  %v6529_v4 = vld [vmem:[#allocation9 + $0x870] sm:$0xff]  ;;  %v6533_v16 = vld [vmem:[#allocation9 + $0x860] sm:$0xff]  ;;  %v6535_v1 = vld [vmem:[#allocation9 + $0x7a8] sm:$0xff] }
 0x2af   : > { %4362 = vmatpush.msrb.mxu0 %v4204_v19  ;;  %4446 = vmatpush.msra.mxu3 %v6499_v51  ;;  %v6532_v19 = vld [vmem:[#allocation9 + $0x7a0] sm:$0xff]  ;;  %v6534_v63 = vld [vmem:[#allocation9 + $0x930] sm:$0xff] }
 0x2b0   : > { %4307 = vmatmul.f32.vlgmr.msra.gmra.mxu1 %v8670_v41  ;;  %4418 = vmatpush.msrb.mxu2 %v6500_v2  ;;  %v6536_v22 = vld [vmem:[#allocation9 + $0x790] sm:$0xff]  ;;  %v6538_v51 = vld [vmem:[#allocation9 + $0x920] sm:$0xff]  ;;  %v6539_v2 = vld [vmem:[#allocation9 + $0x798] sm:$0xff] }
 0x2b1   : > { %4395 = vmatpush.msrb.mxu1 %v6501_v27  ;;  %4363 = vmatpush.msrb.mxu0 %v4202_v29  ;;  %v6537_v29 = vld [vmem:[#allocation9 + $0x850] sm:$0xff]  ;;  %v6541_v27 = vld [vmem:[#allocation9 + $0x840] sm:$0xff] }
 0x2b2   : > { %4447 = vmatpush.msra.mxu3 %v6502_v0  ;;  %4419 = vmatpush.msrb.mxu2 %v6503_v43  ;;  %v6542_v0 = vld [vmem:[#allocation9 + $0x910] sm:$0xff]  ;;  %v6543_v43 = vld [vmem:[#allocation9 + $0x788] sm:$0xff] }
 0x2b3   : > { %4396 = vmatpush.msrb.mxu1 %v6504_v31  ;;  %4364 = vmatpush.msrb.mxu0 %v4200_v21  ;;  %v3915_v55 = vpop.f32.mrf.mxu3  ;;  %v6540_v21 = vld [vmem:[#allocation9 + $0x780] sm:$0xff]  ;;  %v6545_v31 = vld [vmem:[#allocation9 + $0x830] sm:$0xff] }
 0x2b4   : > { %4448 = vmatpush.msra.mxu3 %v6505_v3  ;;  %4420 = vmatpush.msrb.mxu2 %v6506_v14  ;;  %v3895_v26 = vpop.f32.mrf.mxu2  ;;  %v6546_v3 = vld [vmem:[#allocation9 + $0x900] sm:$0xff]  ;;  %v6547_v14 = vld [vmem:[#allocation9 + $0x778] sm:$0xff] }
 0x2b5   : > { %4397 = vmatpush.msrb.mxu1 %v6507_v5  ;;  %4365 = vmatpush.msrb.mxu0 %v4198_v57  ;;  %v3875_v20 = vpop.f32.mrf.mxu1  ;;  %v6544_v57 = vld [vmem:[#allocation9 + $0x770] sm:$0xff]  ;;  %v6550_v5 = vld [vmem:[#allocation9 + $0x820] sm:$0xff] }
 0x2b6   : > { %4449 = vmatpush.msra.mxu3 %v6508_v6  ;;  %4421 = vmatpush.msrb.mxu2 %v6509_v37  ;;  %v3896_v60 = vadd.f32 %v3895_v26, %v3875_v20  ;;  %v6549_v26 = vld [vmem:[#allocation9 + $0x760] sm:$0xff]  ;;  %v6551_v20 = vld [vmem:[#allocation9 + $0x768] sm:$0xff]  ;;  %v6553_v37 = vld [vmem:[#allocation9 + $0x750] sm:$0xff] }
 0x2b7   : > { %4398 = vmatpush.msrb.mxu1 %v6510_v9  ;;  %4366 = vmatpush.msrb.mxu0 %v4196_v33  ;;  %v6548_v33 = vld [vmem:[#allocation9 + $0xa78] sm:$0xff]  ;;  %v6552_v6 = vld [vmem:[#allocation9 + $0xa68] sm:$0xff] }
 0x2b8   : > { %4450 = vmatpush.msra.mxu3 %v6511_v7  ;;  %6188 = vmatmul.msk.f32.vlgmr.msrb.gmra.mxu0 %vm2933_vm3, %v8660_v62  ;;  %v3916_v12 = vadd.f32 %v3915_v55, %v3896_v60  ;;  %v6554_v60 = vld [vmem:[#allocation9 + $0x810] sm:$0xff]  ;;  %v6555_v9 = vld [vmem:[#allocation9 + $0x758] sm:$0xff]  ;;  %v6557_v7 = vld [vmem:[#allocation9 + $0x740] sm:$0xff] }
 0x2b9   : > { %4375 = vmatpush.msra.mxu0 %v6512_v39  ;;  %4399 = vmatpush.msrb.mxu1 %v6513_v53  ;;  %v6556_v55 = vld [vmem:[#allocation9 + $0xa58] sm:$0xff]  ;;  %v6559_v39 = vld [vmem:[#allocation9 + $0x748] sm:$0xff] }
 0x2ba   : > { %4422 = vmatpush.msrb.mxu2 %v6514_v34  ;;  %6189 = vmatmul.msk.f32.vlgmr.msra.gmra.mxu3 %vm2933_vm3, %v8660_v62  ;;  %v6560_v53 = vld [vmem:[#allocation9 + $0xa48] sm:$0xff]  ;;  %v6561_v34 = vld [vmem:[#allocation9 + $0x9f8] sm:$0xff] }
 0x2bb   : > { %4455 = vmatpush.msrb.mxu3 %v6515_v15  ;;  %4376 = vmatpush.msra.mxu0 %v6516_v17  ;;  %v6562_v15 = vld [vmem:[#allocation9 + $0x730] sm:$0xff]  ;;  %v6563_v17 = vld [vmem:[#allocation9 + $0x738] sm:$0xff] }
 0x2bc   : > { %4400 = vmatpush.msrb.mxu1 %v6517_v61  ;;  %4423 = vmatpush.msrb.mxu2 %v6518_v28  ;;  %v6564_v61 = vld [vmem:[#allocation9 + $0xa38] sm:$0xff]  ;;  %v6565_v28 = vld [vmem:[#allocation9 + $0x9e8] sm:$0xff] }
 0x2bd   : > { %4456 = vmatpush.msrb.mxu3 %v6519_v35  ;;  %4377 = vmatpush.msra.mxu0 %v6520_v56  ;;  %v3935_v42 = vpop.f32.mrf.mxu0  ;;  %v6566_v35 = vld [vmem:[#allocation9 + $0x720] sm:$0xff]  ;;  %v6567_v56 = vld [vmem:[#allocation9 + $0x728] sm:$0xff] }
 0x2be   : > { %4401 = vmatpush.msrb.mxu1 %v6521_v52  ;;  %4424 = vmatpush.msrb.mxu2 %v6522_v36  ;;  %v8764_v18 = vadd.f32 %v3935_v42, %v3916_v12  ;;  %v6558_v12 = vld [vmem:[#allocation9 + $0x800] sm:$0xff]  ;;  %v6568_v42 = vld [vmem:[#allocation9 + $0xa28] sm:$0xff]  ;;  %v6569_v52 = vld [vmem:[#allocation9 + $0x9d8] sm:$0xff] }
 0x2bf   : > { %4457 = vmatpush.msrb.mxu3 %v6523_v13  ;;  %4378 = vmatpush.msra.mxu0 %v6524_v11  ;;  %v6570_v36 = vld [vmem:[#allocation9 + $0x710] sm:$0xff]  ;;  %v6571_v13 = vld [vmem:[#allocation9 + $0x718] sm:$0xff] }
 0x2c0   : > { %4402 = vmatpush.msrb.mxu1 %v6525_v30  ;;  %4425 = vmatpush.msrb.mxu2 %v6526_v32  ;;  %v6572_v11 = vld [vmem:[#allocation9 + $0xa18] sm:$0xff]  ;;  %v6573_v30 = vld [vmem:[#allocation9 + $0x9c8] sm:$0xff]  ;;  %v6574_v32 = vld [vmem:[#allocation9 + $0x700] sm:$0xff] }
 0x2c1   : > { %4458 = vmatpush.msrb.mxu3 %v6527_v45  ;;  %4379 = vmatpush.msra.mxu0 %v6528_v44  ;;  %v6575_v45 = vld [vmem:[#allocation9 + $0x708] sm:$0xff]  ;;  %v6576_v44 = vld [vmem:[#allocation9 + $0x8f8] sm:$0xff] }
 0x2c2   : > { %4403 = vmatpush.msrb.mxu1 %v6529_v4  ;;  %4426 = vmatpush.msrb.mxu2 %v6530_v49  ;;  %v6577_v4 = vld [vmem:[#allocation9 + $0x9b8] sm:$0xff]  ;;  %v6578_v49 = vld [vmem:[#allocation9 + $0xa08] sm:$0xff] }
 0x2c3   : > { %4459 = vmatpush.msrb.mxu3 %v6531_v58  ;;  %4380 = vmatpush.msra.mxu0 %v6532_v19  ;;  %v6579_v58 = vld [vmem:[#allocation9 + $0x1f0] sm:$0xff] }
 0x2c4   : > { %4404 = vmatpush.msrb.mxu1 %v6533_v16  ;;  %4427 = vmatpush.msrb.mxu2 %v6534_v63  ;;  %v6580_v16 = vld [vmem:[#allocation9 + $0xf0] sm:$0xff]  ;;  %v6581_v63 = vld [vmem:[#allocation9 + $0x8e8] sm:$0xff] }
 0x2c5   : > { %4460 = vmatpush.msrb.mxu3 %v6535_v1  ;;  %4381 = vmatpush.msra.mxu0 %v6536_v22  ;;  %v4015_v19 = vpop.f32.mrf.mxu3  ;;  %v6582_v1 = vld [vmem:[#allocation9 + $0x9a8] sm:$0xff]  ;;  %v6583_v22 = vld [vmem:[#allocation9 + $0x1e0] sm:$0xff] }
 0x2c6   : > { %4405 = vmatpush.msrb.mxu1 %v6537_v29  ;;  %4428 = vmatpush.msrb.mxu2 %v6538_v51  ;;  %v6584_v51 = vld [vmem:[#allocation9 + $0xe0] sm:$0xff] }
 0x2c7   : > { %4461 = vmatpush.msrb.mxu3 %v6539_v2  ;;  %4382 = vmatpush.msra.mxu0 %v6540_v21  ;;  %v6585_v2 = vld [vmem:[#allocation9 + $0x8d8] sm:$0xff] }
 0x2c8   : > { %4406 = vmatpush.msrb.mxu1 %v6541_v27  ;;  %4429 = vmatpush.msrb.mxu2 %v6542_v0  ;;  %v6586_v27 = vld [vmem:[#allocation9 + $0x998] sm:$0xff]  ;;  %v6587_v0 = vld [vmem:[#allocation9 + $0x1d0] sm:$0xff] }
 0x2c9   : > { %4462 = vmatpush.msrb.mxu3 %v6543_v43  ;;  %4383 = vmatpush.msra.mxu0 %v6544_v57  ;;  %v6588_v57 = vld [vmem:[#allocation9 + $0xd0] sm:$0xff] }
 0x2ca   : > { %4407 = vmatpush.msrb.mxu1 %v6545_v31  ;;  %4430 = vmatpush.msrb.mxu2 %v6546_v3  ;;  %v6589_v31 = vld [vmem:[#allocation9 + $0x8c8] sm:$0xff] }
 0x2cb   : > { %4463 = vmatpush.msrb.mxu3 %v6547_v14  ;;  %4431 = vmatmul.f32.vlgmr.msrb.gmra.mxu2 %v8664_v25  ;;  %v6590_v14 = vld [vmem:[#allocation9 + $0x988] sm:$0xff] }
 0x2cc   : > { %4523 = vmatpush.msra.mxu2 %v6548_v33  ;;  %4384 = vmatpush.msra.mxu0 %v6549_v26  ;;  %v6591_v33 = vld [vmem:[#allocation9 + $0x1c0] sm:$0xff] }
 0x2cd   : > { %4408 = vmatpush.msrb.mxu1 %v6550_v5  ;;  %4464 = vmatpush.msrb.mxu3 %v6551_v20  ;;  %v6592_v5 = vld [vmem:[#allocation9 + $0xc0] sm:$0xff]  ;;  %v6593_v20 = vld [vmem:[#allocation9 + $0x8b8] sm:$0xff] }
 0x2ce   : > { %4524 = vmatpush.msra.mxu2 %v6552_v6  ;;  %4385 = vmatpush.msra.mxu0 %v6553_v37  ;;  %v6594_v6 = vld [vmem:[#allocation9 + $0x978] sm:$0xff]  ;;  %v6595_v37 = vld [vmem:[#allocation9 + $0x1b0] sm:$0xff] }
 0x2cf   : > { %4409 = vmatpush.msrb.mxu1 %v6554_v60  ;;  %4465 = vmatpush.msrb.mxu3 %v6555_v9  ;;  %v6596_v60 = vld [vmem:[#allocation9 + $0xb0] sm:$0xff]  ;;  %v6597_v9 = vld [vmem:[#allocation9 + $0x8a8] sm:$0xff] }
 0x2d0   : > { %4525 = vmatpush.msra.mxu2 %v6556_v55  ;;  %4386 = vmatpush.msra.mxu0 %v6557_v7 }
 0x2d1   : > { %4410 = vmatpush.msrb.mxu1 %v6558_v12  ;;  %4466 = vmatpush.msrb.mxu3 %v6559_v39  ;;  %v6598_v12 = vld [vmem:[#allocation9 + $0x968] sm:$0xff]  ;;  %v6599_v39 = vld [vmem:[#allocation9 + $0x1a0] sm:$0xff] }
 0x2d2   : > { %4411 = vmatmul.f32.vlgmr.msrb.gmra.mxu1 %v8667_v40  ;;  %4526 = vmatpush.msra.mxu2 %v6560_v53 }
 0x2d3   : > { %4495 = vmatpush.msra.mxu1 %v6561_v34  ;;  %4387 = vmatpush.msra.mxu0 %v6562_v15  ;;  %v6600_v34 = vld [vmem:[#allocation9 + $0xa0] sm:$0xff]  ;;  %v6601_v15 = vld [vmem:[#allocation9 + $0x898] sm:$0xff] }
 0x2d4   : > { %4467 = vmatpush.msrb.mxu3 %v6563_v17  ;;  %4527 = vmatpush.msra.mxu2 %v6564_v61  ;;  %v6602_v17 = vld [vmem:[#allocation9 + $0x958] sm:$0xff]  ;;  %v6603_v61 = vld [vmem:[#allocation9 + $0x190] sm:$0xff] }
 0x2d5   : > { %4496 = vmatpush.msra.mxu1 %v6565_v28  ;;  %4388 = vmatpush.msra.mxu0 %v6566_v35  ;;  %v6604_v28 = vld [vmem:[#allocation9 + $0x90] sm:$0xff]  ;;  %v6605_v35 = vld [vmem:[#allocation9 + $0x888] sm:$0xff] }
 0x2d6   : > { %4468 = vmatpush.msrb.mxu3 %v6567_v56  ;;  %4528 = vmatpush.msra.mxu2 %v6568_v42  ;;  %v3995_v26 = vpop.f32.mrf.mxu2  ;;  %v6606_v56 = vld [vmem:[#allocation9 + $0x948] sm:$0xff]  ;;  %v6607_v42 = vld [vmem:[#allocation9 + $0x180] sm:$0xff] }
 0x2d7   : > { %4497 = vmatpush.msra.mxu1 %v6569_v52  ;;  %4389 = vmatpush.msra.mxu0 %v6570_v36  ;;  %v3975_v43 = vpop.f32.mrf.mxu1  ;;  %v6608_v52 = vld [vmem:[#allocation9 + $0x80] sm:$0xff]  ;;  %v6610_v36 = vld [vmem:[#allocation9 + $0x938] sm:$0xff] }
 0x2d8   : > { %4469 = vmatpush.msrb.mxu3 %v6571_v13  ;;  %4529 = vmatpush.msra.mxu2 %v6572_v11  ;;  %v6611_v13 = vld [vmem:[#allocation9 + $0x170] sm:$0xff] }
 0x2d9   : > { %4498 = vmatpush.msra.mxu1 %v6573_v30  ;;  %4390 = vmatpush.msra.mxu0 %v6574_v32  ;;  %v6612_v11 = vld [vmem:[#allocation9 + $0x70] sm:$0xff]  ;;  %v6613_v30 = vld [vmem:[#allocation9 + $0x868] sm:$0xff] }
 0x2da   : > { %4470 = vmatpush.msrb.mxu3 %v6575_v45  ;;  %4391 = vmatmul.f32.vlgmr.msra.gmra.mxu0 %v8670_v41  ;;  %v6614_v32 = vld [vmem:[#allocation9 + $0x928] sm:$0xff]  ;;  %v6615_v45 = vld [vmem:[#allocation9 + $0x160] sm:$0xff] }
 0x2db   : > { %4471 = vmatmul.f32.vlgmr.msrb.gmra.mxu3 %v8670_v41  ;;  %4475 = vmatpush.msrb.mxu0 %v6576_v44  ;;  %v6616_v44 = vld [vmem:[#allocation9 + $0x60] sm:$0xff] }
 0x2dc   : > { %4499 = vmatpush.msra.mxu1 %v6577_v4  ;;  %4530 = vmatpush.msra.mxu2 %v6578_v49  ;;  %v6617_v4 = vld [vmem:[#allocation9 + $0x858] sm:$0xff] }
 0x2dd   : > { %4555 = vmatpush.msra.mxu3 %v6579_v58  ;;  %6190 = vmatmul.msk.f32.vlgmr.msra.gmra.mxu2 %vm2933_vm3, %v8660_v62  ;;  %v6618_v49 = vld [vmem:[#allocation9 + $0x918] sm:$0xff]  ;;  %v6619_v58 = vld [vmem:[#allocation9 + $0x150] sm:$0xff] }
 0x2de   : > { %4535 = vmatpush.msrb.mxu2 %v6580_v16  ;;  %4476 = vmatpush.msrb.mxu0 %v6581_v63  ;;  %v6621_v16 = vld [vmem:[#allocation9 + $0x848] sm:$0xff] }
 0x2df   : > { %4500 = vmatpush.msra.mxu1 %v6582_v1  ;;  %4556 = vmatpush.msra.mxu3 %v6583_v22  ;;  %v3955_v29 = vpop.f32.mrf.mxu0  ;;  %v6622_v63 = vld [vmem:[#allocation9 + $0x908] sm:$0xff]  ;;  %v6623_v1 = vld [vmem:[#allocation9 + $0x140] sm:$0xff] }
 0x2e0   : > { %4536 = vmatpush.msrb.mxu2 %v6584_v51  ;;  %4477 = vmatpush.msrb.mxu0 %v6585_v2  ;;  %v3956_v21 = vadd.f32 %v3955_v29, %v8757_v50  ;;  %v6624_v22 = vld [vmem:[#allocation9 + $0x40] sm:$0xff]  ;;  %v6625_v29 = vld [vmem:[#allocation9 + $0x370] sm:$0xff]  ;;  %v6626_v51 = vld [vmem:[#allocation9 + $0x838] sm:$0xff] }
 0x2e1   : > { %4501 = vmatpush.msra.mxu1 %v6586_v27  ;;  %4557 = vmatpush.msra.mxu3 %v6587_v0  ;;  %v6627_v2 = vld [vmem:[#allocation9 + $0x130] sm:$0xff]  ;;  %v6629_v27 = vld [vmem:[#allocation9 + $0x360] sm:$0xff]  ;;  %v6630_v0 = vld [vmem:[#allocation9 + $0x828] sm:$0xff] }
 0x2e2   : > { %4537 = vmatpush.msrb.mxu2 %v6588_v57  ;;  %4478 = vmatpush.msrb.mxu0 %v6589_v31  ;;  %v3976_v3 = vadd.f32 %v3975_v43, %v3956_v21  ;;  %v6628_v21 = vld [vmem:[#allocation9 + $0x30] sm:$0xff]  ;;  %v6631_v43 = vld [vmem:[#allocation9 + $0x120] sm:$0xff] }
 0x2e3   : > { %4502 = vmatpush.msra.mxu1 %v6590_v14  ;;  %4558 = vmatpush.msra.mxu3 %v6591_v33  ;;  %v6632_v57 = vld [vmem:[#allocation9 + $0x20] sm:$0xff]  ;;  %v6633_v31 = vld [vmem:[#allocation9 + $0x350] sm:$0xff] }
 0x2e4   : > { %4538 = vmatpush.msrb.mxu2 %v6592_v5  ;;  %4479 = vmatpush.msrb.mxu0 %v6593_v20  ;;  %v3996_v50 = vadd.f32 %v3995_v26, %v3976_v3  ;;  %v6634_v3 = vld [vmem:[#allocation9 + $0x818] sm:$0xff]  ;;  %v6635_v14 = vld [vmem:[#allocation9 + $0x110] sm:$0xff]  ;;  %v6637_v26 = vld [vmem:[#allocation9 + $0x340] sm:$0xff] }
 0x2e5   : > { %4503 = vmatpush.msra.mxu1 %v6594_v6  ;;  %4559 = vmatpush.msra.mxu3 %v6595_v37  ;;  %v6636_v33 = vld [vmem:[#allocation9 + $0x10] sm:$0xff]  ;;  %v6638_v5 = vld [vmem:[#allocation9 + $0x808] sm:$0xff]  ;;  %v6639_v20 = vld [vmem:[#allocation9 + $0x100] sm:$0xff] }
 0x2e6   : > { %4539 = vmatpush.msrb.mxu2 %v6596_v60  ;;  %4480 = vmatpush.msrb.mxu0 %v6597_v9  ;;  %v4035_v55 = vpop.f32.mrf.mxu3  ;;  %v8773_v7 = vadd.f32 %v4015_v19, %v3996_v50  ;;  %v6620_v19 = vld [vmem:[#allocation9 + $0x50] sm:$0xff]  ;;  %v6640_v50 = vld [vmem:[#allocation9] sm:$0xff]  ;;  %v6644_v9 = vld [vmem:[#allocation9 + $0x2f8] sm:$0xff] }
 0x2e7   : > { %4504 = vmatpush.msra.mxu1 %v6598_v12  ;;  %4560 = vmatpush.msra.mxu3 %v6599_v39  ;;  %v8776_v53 = vadd.f32 %v4035_v55, %v8764_v18  ;;  %v6609_v18 = vld [vmem:[#allocation9 + $0x878] sm:$0xff]  ;;  %v8780_v6 = vld [vmem:[#allocation2 + $0x8] sm:$0x7f]  ;;  %v6642_v37 = vld [vmem:[#allocation9 + $0x2f0] sm:$0xff] }
 0x2e8   : > { %4540 = vmatpush.msrb.mxu2 %v6600_v34  ;;  %4481 = vmatpush.msrb.mxu0 %v6601_v15  ;;  %v6643_v60 = vld [vmem:[#allocation9 + $0x330] sm:$0xff]  ;;  %v8783_v55 = vld [vmem:[#allocation2] sm:$0x7f]  ;;  %v6649_v15 = vld [vmem:[#allocation9 + $0x2e8] sm:$0xff] }
 0x2e9   : > { %4505 = vmatpush.msra.mxu1 %v6602_v17  ;;  %4561 = vmatpush.msra.mxu3 %v6603_v61  ;;  %v6646_v12 = vld [vmem:[#allocation9 + $0x1f8] sm:$0xff]  ;;  %v6647_v39 = vld [vmem:[#allocation9 + $0x2e0] sm:$0xff]  ;;  %v4095_v61 = vpop.f32.mrf.mxu2 }
 0x2ea   : > { %4541 = vmatpush.msrb.mxu2 %v6604_v28  ;;  %4482 = vmatpush.msrb.mxu0 %v6605_v35  ;;  %v6648_v34 = vld [vmem:[#allocation9 + $0x320] sm:$0xff]  ;;  %v6650_v28 = vld [vmem:[#allocation9 + $0x1e8] sm:$0xff]  ;;  %v6651_v35 = vld [vmem:[#allocation9 + $0x2d0] sm:$0xff] }
 0x2eb   : > { %4506 = vmatpush.msra.mxu1 %v6606_v56  ;;  %4562 = vmatpush.msra.mxu3 %v6607_v42  ;;  %v6652_v42 = vld [vmem:[#allocation9 + $0x310] sm:$0xff] }
 0x2ec   : > { %4542 = vmatpush.msrb.mxu2 %v6608_v52  ;;  %4483 = vmatpush.msrb.mxu0 %v6609_v18  ;;  %v6653_v52 = vld [vmem:[#allocation9 + $0x2d8] sm:$0xff] }
 0x2ed   : > { %4507 = vmatpush.msra.mxu1 %v6610_v36  ;;  %4563 = vmatpush.msra.mxu3 %v6611_v13  ;;  %v6654_v36 = vld [vmem:[#allocation9 + $0x1d8] sm:$0xff]  ;;  %v6655_v13 = vld [vmem:[#allocation9 + $0x2c0] sm:$0xff] }
 0x2ee   : > { %4543 = vmatpush.msrb.mxu2 %v6612_v11  ;;  %4484 = vmatpush.msrb.mxu0 %v6613_v30  ;;  %v6656_v30 = vld [vmem:[#allocation9 + $0x300] sm:$0xff] }
 0x2ef   : > { %4508 = vmatpush.msra.mxu1 %v6614_v32  ;;  %4564 = vmatpush.msra.mxu3 %v6615_v45  ;;  %v6657_v32 = vld [vmem:[#allocation9 + $0x2c8] sm:$0xff]  ;;  %v8787_v45 = vld [vmem:[#allocation2 + $0x18] sm:$0x7f] }
 0x2f0   : > { %4544 = vmatpush.msrb.mxu2 %v6616_v44  ;;  %4485 = vmatpush.msrb.mxu0 %v6617_v4  ;;  %v6660_v4 = vld [vmem:[#allocation9 + $0xf8] sm:$0xff] }
 0x2f1   : > { %4509 = vmatpush.msra.mxu1 %v6618_v49  ;;  %4565 = vmatpush.msra.mxu3 %v6619_v58  ;;  %v6661_v49 = vld [vmem:[#allocation9 + $0x2b0] sm:$0xff]  ;;  %v6662_v58 = vld [vmem:[#allocation9 + $0x2b8] sm:$0xff] }
 0x2f2   : > { %4545 = vmatpush.msrb.mxu2 %v6620_v19  ;;  %4486 = vmatpush.msrb.mxu0 %v6621_v16  ;;  %v6663_v19 = vld [vmem:[#allocation9 + $0x1b8] sm:$0xff] }
 0x2f3   : > { %4510 = vmatpush.msra.mxu1 %v6622_v63  ;;  %4566 = vmatpush.msra.mxu3 %v6623_v1  ;;  %v6664_v63 = vld [vmem:[#allocation9 + $0xe8] sm:$0xff]  ;;  %v6665_v1 = vld [vmem:[#allocation9 + $0x2a0] sm:$0xff] }
 0x2f4   : > { %4511 = vmatmul.f32.vlgmr.msra.gmra.mxu1 %v8664_v25  ;;  %4546 = vmatpush.msrb.mxu2 %v6624_v22  ;;  %v6666_v22 = vld [vmem:[#allocation9 + $0x2a8] sm:$0xff] }
 0x2f5   : > { %4603 = vmatpush.msrb.mxu1 %v6625_v29  ;;  %4487 = vmatpush.msrb.mxu0 %v6626_v51  ;;  %v6667_v29 = vld [vmem:[#allocation9 + $0x1a8] sm:$0xff] }
 0x2f6   : > { %4567 = vmatpush.msra.mxu3 %v6627_v2  ;;  %4547 = vmatpush.msrb.mxu2 %v6628_v21  ;;  %v6668_v2 = vld [vmem:[#allocation9 + $0xd8] sm:$0xff]  ;;  %v6669_v21 = vld [vmem:[#allocation9 + $0x290] sm:$0xff] }
 0x2f7   : > { %4604 = vmatpush.msrb.mxu1 %v6629_v27  ;;  %4488 = vmatpush.msrb.mxu0 %v6630_v0  ;;  %v6670_v0 = vld [vmem:[#allocation9 + $0x298] sm:$0xff] }
 0x2f8   : > { %4568 = vmatpush.msra.mxu3 %v6631_v43  ;;  %4548 = vmatpush.msrb.mxu2 %v6632_v57  ;;  %v6671_v43 = vld [vmem:[#allocation9 + $0x198] sm:$0xff]  ;;  %v6672_v57 = vld [vmem:[#allocation9 + $0xc8] sm:$0xff] }
 0x2f9   : > { %4605 = vmatpush.msrb.mxu1 %v6633_v31  ;;  %4489 = vmatpush.msrb.mxu0 %v6634_v3  ;;  %v4075_v18 = vpop.f32.mrf.mxu1  ;;  %v6673_v31 = vld [vmem:[#allocation9 + $0x280] sm:$0xff]  ;;  %v6674_v3 = vld [vmem:[#allocation9 + $0x288] sm:$0xff] }
 0x2fa   : > { %4569 = vmatpush.msra.mxu3 %v6635_v14  ;;  %4549 = vmatpush.msrb.mxu2 %v6636_v33  ;;  %v6675_v14 = vld [vmem:[#allocation9 + $0x188] sm:$0xff]  ;;  %v6676_v33 = vld [vmem:[#allocation9 + $0xb8] sm:$0xff] }
 0x2fb   : > { %4606 = vmatpush.msrb.mxu1 %v6637_v26  ;;  %4490 = vmatpush.msrb.mxu0 %v6638_v5  ;;  %v6677_v26 = vld [vmem:[#allocation9 + $0x270] sm:$0xff]  ;;  %v6678_v5 = vld [vmem:[#allocation9 + $0x278] sm:$0xff] }
 0x2fc   : > { %4570 = vmatpush.msra.mxu3 %v6639_v20  ;;  %4491 = vmatmul.f32.vlgmr.msrb.gmra.mxu0 %v8667_v40  ;;  %v6679_v20 = vld [vmem:[#allocation9 + $0x178] sm:$0xff] }
 0x2fd   : > { %4550 = vmatpush.msrb.mxu2 %v6640_v50  ;;  %4571 = vmatmul.f32.vlgmr.msra.gmra.mxu3 %v8780_v6  ;;  %v6680_v50 = vld [vmem:[#allocation9 + $0xa8] sm:$0xff] }
 0x2fe   : > { %4575 = vmatpush.msra.mxu0 %v6642_v37  ;;  %4607 = vmatpush.msrb.mxu1 %v6643_v60  ;;  %v6681_v37 = vld [vmem:[#allocation9 + $0x260] sm:$0xff]  ;;  %v6682_v60 = vld [vmem:[#allocation9 + $0x268] sm:$0xff] }
 0x2ff   : > { %4655 = vmatpush.msrb.mxu3 %v6644_v9  ;;  %4551 = vmatmul.f32.vlgmr.msrb.gmra.mxu2 %v8783_v55  ;;  %v6683_v9 = vld [vmem:[#allocation9 + $0x168] sm:$0xff] }
 0x300   : > { %4635 = vmatpush.msra.mxu2 %v6646_v12  ;;  %4576 = vmatpush.msra.mxu0 %v6647_v39  ;;  %v6684_v12 = vld [vmem:[#allocation9 + $0x98] sm:$0xff]  ;;  %v6685_v39 = vld [vmem:[#allocation9 + $0x250] sm:$0xff] }
 0x301   : > { %4608 = vmatpush.msrb.mxu1 %v6648_v34  ;;  %4656 = vmatpush.msrb.mxu3 %v6649_v15  ;;  %v4055_v17 = vpop.f32.mrf.mxu0  ;;  %v2975_v34 = vadd.f32 %v8696_v10, %v8694_v23  ;;  %v6686_v15 = vld [vmem:[#allocation9 + $0x258] sm:$0xff]  ;;  %v6696_v10 = vld [vmem:[#allocation9 + $0x68] sm:$0xff] }
 0x302   : > { %4636 = vmatpush.msra.mxu2 %v6650_v28  ;;  %4577 = vmatpush.msra.mxu0 %v6651_v35  ;;  %v4056_v56 = vadd.f32 %v4055_v17, %v8776_v53  ;;  %v6659_v53 = vld [vmem:[#allocation9 + $0x1c8] sm:$0xff]  ;;  %v6687_v17 = vld [vmem:[#allocation9 + $0x158] sm:$0xff]  ;;  %v6689_v28 = vld [vmem:[#allocation9 + $0x240] sm:$0xff] }
 0x303   : > { %4609 = vmatpush.msrb.mxu1 %v6652_v42  ;;  %4657 = vmatpush.msrb.mxu3 %v6653_v52  ;;  %v2995_v35 = vadd.f32 %v8698_v47, %v2975_v34  ;;  %v6691_v42 = vld [vmem:[#allocation9 + $0x148] sm:$0xff]  ;;  %v6692_v52 = vld [vmem:[#allocation9 + $0x78] sm:$0xff] }
 0x304   : > { %4637 = vmatpush.msra.mxu2 %v6654_v36  ;;  %4578 = vmatpush.msra.mxu0 %v6655_v13  ;;  %v4076_v11 = vadd.f32 %v4075_v18, %v4056_v56  ;;  %v6690_v56 = vld [vmem:[#allocation9 + $0x248] sm:$0xff]  ;;  %v6693_v18 = vld [vmem:[#allocation9 + $0x230] sm:$0xff]  ;;  %v6694_v36 = vld [vmem:[#allocation9 + $0x238] sm:$0xff] }
 0x305   : > { %4610 = vmatpush.msrb.mxu1 %v6656_v30  ;;  %4658 = vmatpush.msrb.mxu3 %v6657_v32  ;;  %v6695_v23 = vld [vmem:[#allocation9 + $0x138] sm:$0xff]  ;;  %v6697_v13 = vld [vmem:[#allocation9 + $0x220] sm:$0xff]  ;;  %v6698_v30 = vld [vmem:[#allocation9 + $0x228] sm:$0xff] }
 0x306   : > { %6191 = vmatmul.msk.f32.vlgmr.msrb.gmra.mxu1 %vm2933_vm3, %v8787_v45  ;;  %4638 = vmatpush.msra.mxu2 %v6659_v53  ;;  %v8791_v44 = vadd.f32 %v4095_v61, %v4076_v11  ;;  %v6688_v61 = vld [vmem:[#allocation9 + $0x88] sm:$0xff]  ;;  %v3015_v11 = vadd.f32 %v8700_v59, %v2995_v35  ;;  %v6700_v32 = vld [vmem:[#allocation9 + $0x58] sm:$0xff]  ;;  %v6701_v53 = vld [vmem:[#allocation9 + $0x210] sm:$0xff] }
 0x307   : > { %4615 = vmatpush.msra.mxu1 %v6660_v4  ;;  %4579 = vmatpush.msra.mxu0 %v6661_v49  ;;  %v6699_v47 = vld [vmem:[#allocation9 + $0x128] sm:$0xff]  ;;  %v6702_v49 = vld [vmem:[#allocation9 + $0x218] sm:$0xff]  ;;  %v6731_v35 = vld [vmem:[#allocation9 + $0x1120] sm:$0xff] }
 0x308   : > { %4659 = vmatpush.msrb.mxu3 %v6662_v58  ;;  %4639 = vmatpush.msra.mxu2 %v6663_v19  ;;  %v4248_v16 = vpop.f32.mrf.mxu3  ;;  %v3118_v4 = vadd.f32 %v8717_v54, %v3015_v11  ;;  %v6703_v58 = vld [vmem:[#allocation9 + $0x118] sm:$0xff]  ;;  %v6704_v19 = vld [vmem:[#allocation9 + $0x48] sm:$0xff]  ;;  %v6737_v11 = vld [vmem:[#allocation9 + $0xfc0] sm:$0xff] }
 0x309   : > { %4616 = vmatpush.msra.mxu1 %v6664_v63  ;;  %4580 = vmatpush.msra.mxu0 %v6665_v1  ;;  %v6706_v63 = vld [vmem:[#allocation9 + $0x208] sm:$0xff]  ;;  %v6708_v1 = vld [vmem:[#allocation9 + $0x38] sm:$0xff] }
 0x30a   : > { %4660 = vmatpush.msrb.mxu3 %v6666_v22  ;;  %4640 = vmatpush.msra.mxu2 %v6667_v29  ;;  %v4228_v51 = vpop.f32.mrf.mxu2  ;;  %v8800_v59 = vld [vmem:[#allocation2 + $0x10] sm:$0x7f]  ;;  %v3138_v54 = vadd.f32 %v8719_v24, %v3118_v4  ;;  %v6710_v29 = vld [vmem:[#allocation9 + $0x378] sm:$0xff]  ;;  %v6716_v24 = vld [vmem:[#allocation9 + $0x10e0] sm:$0xff] }
 0x30b   : > { %4617 = vmatpush.msra.mxu1 %v6668_v2  ;;  %4581 = vmatpush.msra.mxu0 %v6669_v21  ;;  %v8793_v27 = vadd.f32 %v4248_v16, %v4228_v51  ;;  %v6705_v16 = vld [vmem:[#allocation9 + $0x200] sm:$0xff]  ;;  %v6709_v22 = vld [vmem:[#allocation9 + $0x108] sm:$0xff]  ;;  %v6711_v51 = vld [vmem:[#allocation9 + $0x1170] sm:$0xff] }
 0x30c   : > { %4661 = vmatpush.msrb.mxu3 %v6670_v0  ;;  %4641 = vmatpush.msra.mxu2 %v6671_v43  ;;  %v3158_v2 = vadd.f32 %v8715_v38, %v3138_v54  ;;  %v6712_v21 = vld [vmem:[#allocation9 + $0x10f0] sm:$0xff]  ;;  %v6713_v0 = vld [vmem:[#allocation9 + $0x28] sm:$0xff]  ;;  %v6726_v34 = vld [vmem:[#allocation9 + $0x338] sm:$0xff] }
 0x30d   : > { %4618 = vmatpush.msra.mxu1 %v6672_v57  ;;  %4582 = vmatpush.msra.mxu0 %v6673_v31  ;;  %v6714_v43 = vld [vmem:[#allocation9 + $0x368] sm:$0xff]  ;;  %v6715_v57 = vld [vmem:[#allocation9 + $0x1160] sm:$0xff] }
 0x30e   : > { %4662 = vmatpush.msrb.mxu3 %v6674_v3  ;;  %4642 = vmatpush.msra.mxu2 %v6675_v14  ;;  %v6717_v3 = vld [vmem:[#allocation9 + $0x18] sm:$0xff]  ;;  %v3178_v38 = vadd.f32 %v8713_v46, %v3158_v2  ;;  %v6725_v46 = vld [vmem:[#allocation9 + $0xff0] sm:$0xff]  ;;  %v6747_v54 = vld [vmem:[#allocation9 + $0xee8] sm:$0xff] }
 0x30f   : > { %4619 = vmatpush.msra.mxu1 %v6676_v33  ;;  %4583 = vmatpush.msra.mxu0 %v6677_v26  ;;  %v4288_v33 = vpop.f32.mrf.mxu1  ;;  %v6718_v26 = vld [vmem:[#allocation9 + $0x358] sm:$0xff]  ;;  %v6749_v2 = vld [vmem:[#allocation9 + $0xf90] sm:$0xff] }
 0x310   : > { %4663 = vmatpush.msrb.mxu3 %v6678_v5  ;;  %4643 = vmatpush.msra.mxu2 %v6679_v20  ;;  %v6719_v5 = vld [vmem:[#allocation9 + $0x1150] sm:$0xff] }
 0x311   : > { %4620 = vmatpush.msra.mxu1 %v6680_v50  ;;  %4584 = vmatpush.msra.mxu0 %v6681_v37  ;;  %v6720_v20 = vld [vmem:[#allocation9 + $0x10d0] sm:$0xff]  ;;  %v6721_v50 = vld [vmem:[#allocation9 + $0x8] sm:$0xff] }
 0x312   : > { %4664 = vmatpush.msrb.mxu3 %v6682_v60  ;;  %4644 = vmatpush.msra.mxu2 %v6683_v9  ;;  %v6722_v60 = vld [vmem:[#allocation9 + $0x348] sm:$0xff]  ;;  %v6723_v9 = vld [vmem:[#allocation9 + $0x1140] sm:$0xff] }
 0x313   : > { %4621 = vmatpush.msra.mxu1 %v6684_v12  ;;  %4585 = vmatpush.msra.mxu0 %v6685_v39  ;;  %v8810_v12 = vadd.f32 %v8733_v8, %v3178_v38  ;;  %v6729_v8 = vld [vmem:[#allocation9 + $0xfe0] sm:$0xff] }
 0x314   : > { %4665 = vmatpush.msrb.mxu3 %v6686_v15  ;;  %4645 = vmatpush.msra.mxu2 %v6687_v17  ;;  %v6727_v15 = vld [vmem:[#allocation9 + $0x1130] sm:$0xff] }
 0x315   : > { %4622 = vmatpush.msra.mxu1 %v6688_v61  ;;  %4586 = vmatpush.msra.mxu0 %v6689_v28  ;;  %v6728_v17 = vld [vmem:[#allocation9 + $0x10b0] sm:$0xff]  ;;  %v6730_v28 = vld [vmem:[#allocation9 + $0x328] sm:$0xff] }
 0x316   : > { %4666 = vmatpush.msrb.mxu3 %v6690_v56  ;;  %4646 = vmatpush.msra.mxu2 %v6691_v42  ;;  %v6732_v56 = vld [vmem:[#allocation9 + $0x10a0] sm:$0xff]  ;;  %v6733_v42 = vld [vmem:[#allocation9 + $0xfd0] sm:$0xff] }
 0x317   : > { %4623 = vmatpush.msra.mxu1 %v6692_v52  ;;  %4587 = vmatpush.msra.mxu0 %v6693_v18  ;;  %v6734_v52 = vld [vmem:[#allocation9 + $0x318] sm:$0xff] }
 0x318   : > { %4667 = vmatpush.msrb.mxu3 %v6694_v36  ;;  %4647 = vmatpush.msra.mxu2 %v6695_v23  ;;  %v4698_v18 = vld [vmem:[#allocation2 + $0x18] sm:$0xfe] }
 0x319   : > { %4624 = vmatpush.msra.mxu1 %v6696_v10  ;;  %4588 = vmatpush.msra.mxu0 %v6697_v13  ;;  %v6735_v23 = vld [vmem:[#allocation9 + $0x1110] sm:$0xff] }
 0x31a   : > { %4668 = vmatpush.msrb.mxu3 %v6698_v30  ;;  %4648 = vmatpush.msra.mxu2 %v6699_v47  ;;  %v6736_v10 = vld [vmem:[#allocation9 + $0x1090] sm:$0xff]  ;;  %v6738_v30 = vld [vmem:[#allocation9 + $0x308] sm:$0xff] }
 0x31b   : > { %4625 = vmatpush.msra.mxu1 %v6700_v32  ;;  %4589 = vmatpush.msra.mxu0 %v6701_v53  ;;  %v6739_v32 = vld [vmem:[#allocation9 + $0x1100] sm:$0xff]  ;;  %v8820_v53 = vrot.slane %v4698_v18, 1  ;;  %v6775_v18 = vld [vmem:[#allocation9 + $0xe78] sm:$0xff] }
 0x31c   : > { %4669 = vmatpush.msrb.mxu3 %v6702_v49  ;;  %4649 = vmatpush.msra.mxu2 %v6703_v58  ;;  %v6740_v49 = vld [vmem:[#allocation9 + $0xef0] sm:$0xff] }
 0x31d   : > { %4626 = vmatpush.msra.mxu1 %v6704_v19  ;;  %4590 = vmatpush.msra.mxu0 %v6705_v16  ;;  %v6741_v58 = vld [vmem:[#allocation9 + $0xfb0] sm:$0xff]  ;;  %v6742_v19 = vld [vmem:[#allocation9 + $0x1080] sm:$0xff]  ;;  %v6743_v16 = vld [vmem:[#allocation9 + $0xef8] sm:$0xff] }
 0x31e   : > { %4670 = vmatpush.msrb.mxu3 %v6706_v63  ;;  %4591 = vmatmul.f32.vlgmr.msra.gmra.mxu0 %v8800_v59  ;;  %v6744_v63 = vld [vmem:[#allocation9 + $0xee0] sm:$0xff] }
 0x31f   : > { %4627 = vmatpush.msra.mxu1 %v6708_v1  ;;  %4650 = vmatpush.msra.mxu2 %v6709_v22  ;;  %v6745_v1 = vld [vmem:[#allocation9 + $0xfa0] sm:$0xff]  ;;  %v6746_v22 = vld [vmem:[#allocation9 + $0x1070] sm:$0xff] }
 0x320   : > { %4671 = vmatmul.f32.vlgmr.msrb.gmra.mxu3 %v8800_v59  ;;  %4683 = vmatpush.msrb.mxu0 %v6710_v29  ;;  %v6748_v29 = vld [vmem:[#allocation9 + $0xed0] sm:$0xff] }
 0x321   : > { %4780 = vmatpush.msra.mxu3 %v6711_v51  ;;  %4651 = vmatmul.f32.vlgmr.msra.gmra.mxu2 %v8780_v6 }
 0x322   : > { %4752 = vmatpush.msrb.mxu2 %v6712_v21  ;;  %4628 = vmatpush.msra.mxu1 %v6713_v0  ;;  %v6750_v21 = vld [vmem:[#allocation9 + $0x1060] sm:$0xff] }
 0x323   : > { %4684 = vmatpush.msrb.mxu0 %v6714_v43  ;;  %4781 = vmatpush.msra.mxu3 %v6715_v57  ;;  %v4268_v31 = vpop.f32.mrf.mxu0  ;;  %v6751_v43 = vld [vmem:[#allocation9 + $0xed8] sm:$0xff]  ;;  %v6752_v57 = vld [vmem:[#allocation9 + $0xec0] sm:$0xff] }
 0x324   : > { %4753 = vmatpush.msrb.mxu2 %v6716_v24  ;;  %4629 = vmatpush.msra.mxu1 %v6717_v3  ;;  %v4269_v14 = vadd.f32 %v4268_v31, %v8793_v27  ;;  %v6724_v27 = vld [vmem:[#allocation9 + $0x10c0] sm:$0xff]  ;;  %v6754_v24 = vld [vmem:[#allocation9 + $0x1050] sm:$0xff] }
 0x325   : > { %4685 = vmatpush.msrb.mxu0 %v6718_v26  ;;  %4782 = vmatpush.msra.mxu3 %v6719_v5  ;;  %v6753_v31 = vld [vmem:[#allocation9 + $0xf80] sm:$0xff]  ;;  %v6757_v26 = vld [vmem:[#allocation9 + $0xf70] sm:$0xff] }
 0x326   : > { %4754 = vmatpush.msrb.mxu2 %v6720_v20  ;;  %4630 = vmatpush.msra.mxu1 %v6721_v50  ;;  %v4289_v37 = vadd.f32 %v4288_v33, %v4269_v14  ;;  %v6755_v14 = vld [vmem:[#allocation9 + $0xec8] sm:$0xff]  ;;  %v6756_v33 = vld [vmem:[#allocation9 + $0xeb0] sm:$0xff]  ;;  %v6758_v5 = vld [vmem:[#allocation9 + $0x1040] sm:$0xff] }
 0x327   : > { %4686 = vmatpush.msrb.mxu0 %v6722_v60  ;;  %4783 = vmatpush.msra.mxu3 %v6723_v9  ;;  %v6759_v20 = vld [vmem:[#allocation9 + $0xeb8] sm:$0xff]  ;;  %v6760_v50 = vld [vmem:[#allocation9 + $0xea0] sm:$0xff]  ;;  %v6762_v60 = vld [vmem:[#allocation9 + $0x1030] sm:$0xff] }
 0x328   : > { %4631 = vmatmul.f32.vlgmr.msra.gmra.mxu1 %v8783_v55  ;;  %4755 = vmatpush.msrb.mxu2 %v6724_v27  ;;  %v8814_v39 = vadd.f32 %v4289_v37, %v8773_v7  ;;  %v6761_v37 = vld [vmem:[#allocation9 + $0xf60] sm:$0xff]  ;;  %v6764_v9 = vld [vmem:[#allocation9 + $0xe90] sm:$0xff] }
 0x329   : > { %4732 = vmatpush.msrb.mxu1 %v6725_v46  ;;  %4687 = vmatpush.msrb.mxu0 %v6726_v34  ;;  %v6765_v27 = vld [vmem:[#allocation9 + $0xf50] sm:$0xff]  ;;  %v6766_v46 = vld [vmem:[#allocation9 + $0x1020] sm:$0xff] }
 0x32a   : > { %4784 = vmatpush.msra.mxu3 %v6727_v15  ;;  %4756 = vmatpush.msrb.mxu2 %v6728_v17  ;;  %v4373_v61 = vmax.f32 %v8810_v12, %v8814_v39  ;;  %v4697_v34 = vld [vmem:[#allocation2 + $0x10] sm:$0xfe]  ;;  %v6767_v15 = vld [vmem:[#allocation9 + $0xe98] sm:$0xff]  ;;  %v6768_v17 = vld [vmem:[#allocation9 + $0xe80] sm:$0xff] }
 0x32b   : > { %4733 = vmatpush.msrb.mxu1 %v6729_v8  ;;  %4688 = vmatpush.msrb.mxu0 %v6730_v28  ;;  %v4348_v47 = vpop.f32.mrf.mxu3  ;;  %v6769_v8 = vld [vmem:[#allocation9 + $0xf40] sm:$0xff]  ;;  %v6770_v28 = vld [vmem:[#allocation9 + $0x1010] sm:$0xff] }
 0x32c   : > { %4785 = vmatpush.msra.mxu3 %v6731_v35  ;;  %4757 = vmatpush.msrb.mxu2 %v6732_v56  ;;  %v4328_v7 = vpop.f32.mrf.mxu2  ;;  %v6771_v35 = vld [vmem:[#allocation9 + $0xe88] sm:$0xff]  ;;  %v6772_v56 = vld [vmem:[#allocation9 + $0xe70] sm:$0xff] }
 0x32d   : > { %4734 = vmatpush.msrb.mxu1 %v6733_v42  ;;  %4689 = vmatpush.msrb.mxu0 %v6734_v52  ;;  %v4308_v36 = vpop.f32.mrf.mxu1  ;;  %v6773_v42 = vld [vmem:[#allocation9 + $0xf30] sm:$0xff]  ;;  %v6774_v52 = vld [vmem:[#allocation9 + $0x1000] sm:$0xff] }
 0x32e   : > { %4786 = vmatpush.msra.mxu3 %v6735_v23  ;;  %4758 = vmatpush.msrb.mxu2 %v6736_v10  ;;  %v4329_v13 = vadd.f32 %v4328_v7, %v4308_v36  ;;  %v8829_v7 = vrot.slane %v4697_v34, 1  ;;  %v6776_v36 = vld [vmem:[#allocation9 + $0x1178] sm:$0xff]  ;;  %v6777_v23 = vld [vmem:[#allocation9 + $0xe60] sm:$0xff]  ;;  %v6810_v34 = vld [vmem:[#allocation9 + $0x10a8] sm:$0xff] }
 0x32f   : > { %4735 = vmatpush.msrb.mxu1 %v6737_v11  ;;  %4690 = vmatpush.msrb.mxu0 %v6738_v30  ;;  %v6778_v10 = vld [vmem:[#allocation9 + $0xf20] sm:$0xff]  ;;  %v6780_v30 = vld [vmem:[#allocation9 + $0x1168] sm:$0xff]  ;;  %v7063_v12 = vld [vmem:[#allocation9 + $0x12f0] sm:$0xff] }
 0x330   : > { %4787 = vmatpush.msra.mxu3 %v6739_v32  ;;  %6192 = vmatmul.msk.f32.vlgmr.msrb.gmra.mxu0 %vm2933_vm3, %v8787_v45  ;;  %v4349_v4 = vadd.f32 %v4348_v47, %v4329_v13  ;;  %v6779_v13 = vld [vmem:[#allocation9 + $0xe68] sm:$0xff]  ;;  %v6781_v47 = vld [vmem:[#allocation9 + $0xe50] sm:$0xff] }
 0x331   : > { %4712 = vmatpush.msra.mxu0 %v6740_v49  ;;  %4736 = vmatpush.msrb.mxu1 %v6741_v58  ;;  %v4696_v11 = vld [vmem:[#allocation2 + $0x8] sm:$0xfe]  ;;  %v6782_v32 = vld [vmem:[#allocation9 + $0xf10] sm:$0xff]  ;;  %v6784_v49 = vld [vmem:[#allocation9 + $0x1158] sm:$0xff] }
 0x332   : > { %4759 = vmatpush.msrb.mxu2 %v6742_v19  ;;  %6193 = vmatmul.msk.f32.vlgmr.msra.gmra.mxu3 %vm2933_vm3, %v8820_v53  ;;  %v6785_v58 = vld [vmem:[#allocation9 + $0xe40] sm:$0xff]  ;;  %v8832_v19 = vrot.slane %v4696_v11, 1  ;;  %v6818_v11 = vld [vmem:[#allocation9 + $0x1088] sm:$0xff]  ;;  %v7064_v39 = vld [vmem:[#allocation9 + $0x11f0] sm:$0xff] }
 0x333   : > { %4792 = vmatpush.msrb.mxu3 %v6743_v16  ;;  %4713 = vmatpush.msra.mxu0 %v6744_v63  ;;  %v6786_v16 = vld [vmem:[#allocation9 + $0xf00] sm:$0xff]  ;;  %v6787_v63 = vld [vmem:[#allocation9 + $0xe48] sm:$0xff] }
 0x334   : > { %4737 = vmatpush.msrb.mxu1 %v6745_v1  ;;  %4760 = vmatpush.msrb.mxu2 %v6746_v22  ;;  %v6788_v1 = vld [vmem:[#allocation9 + $0x1148] sm:$0xff]  ;;  %v6789_v22 = vld [vmem:[#allocation9 + $0x10f8] sm:$0xff] }
 0x335   : > { %4793 = vmatpush.msrb.mxu3 %v6747_v54  ;;  %4714 = vmatpush.msra.mxu0 %v6748_v29  ;;  %v4368_v51 = vpop.f32.mrf.mxu0  ;;  %v6790_v54 = vld [vmem:[#allocation9 + $0xe30] sm:$0xff]  ;;  %v6791_v29 = vld [vmem:[#allocation9 + $0xe38] sm:$0xff] }
 0x336   : > { %4738 = vmatpush.msrb.mxu1 %v6749_v2  ;;  %4761 = vmatpush.msrb.mxu2 %v6750_v21  ;;  %v4369_v0 = vadd.f32 %v4368_v51, %v4349_v4  ;;  %v6783_v4 = vld [vmem:[#allocation9 + $0xe58] sm:$0xff]  ;;  %v6793_v2 = vld [vmem:[#allocation9 + $0x10e8] sm:$0xff]  ;;  %v6794_v21 = vld [vmem:[#allocation9 + $0xe20] sm:$0xff] }
 0x337   : > { %4794 = vmatpush.msrb.mxu3 %v6751_v43  ;;  %4715 = vmatpush.msra.mxu0 %v6752_v57  ;;  %v6792_v51 = vld [vmem:[#allocation9 + $0x1138] sm:$0xff]  ;;  %v6795_v43 = vld [vmem:[#allocation9 + $0xe28] sm:$0xff] }
 0x338   : > { %4739 = vmatpush.msrb.mxu1 %v6753_v31  ;;  %4762 = vmatpush.msrb.mxu2 %v6754_v24  ;;  %v8825_v3 = vadd.f32 %v4369_v0, %v8791_v44  ;;  %v6763_v44 = vld [vmem:[#allocation9 + $0xea8] sm:$0xff]  ;;  %v4695_v0 = vld [vmem:[#allocation2] sm:$0xfe]  ;;  %v6798_v24 = vld [vmem:[#allocation9 + $0xe10] sm:$0xff] }
 0x339   : > { %4795 = vmatpush.msrb.mxu3 %v6755_v14  ;;  %4716 = vmatpush.msra.mxu0 %v6756_v33  ;;  %v6796_v57 = vld [vmem:[#allocation9 + $0x1128] sm:$0xff]  ;;  %v6797_v31 = vld [vmem:[#allocation9 + $0x10d8] sm:$0xff] }
 0x33a   : > { %4740 = vmatpush.msrb.mxu1 %v6757_v26  ;;  %4763 = vmatpush.msrb.mxu2 %v6758_v5  ;;  %v4374_v38 = vmax.f32 %v8749_v48, %v8825_v3  ;;  %v6799_v14 = vld [vmem:[#allocation9 + $0xe18] sm:$0xff]  ;;  %v8835_v26 = vrot.slane %v4695_v0, 1  ;;  %v6801_v5 = vld [vmem:[#allocation9 + $0x10c8] sm:$0xff]  ;;  %v7127_v48 = vld [vmem:[#allocation9 + $0x13f0] sm:$0xff] }
 0x33b   : > { %4796 = vmatpush.msrb.mxu3 %v6759_v20  ;;  %4717 = vmatpush.msra.mxu0 %v6760_v50  ;;  %v6800_v33 = vld [vmem:[#allocation9 + $0x1118] sm:$0xff]  ;;  %v6802_v20 = vld [vmem:[#allocation9 + $0xe00] sm:$0xff]  ;;  %v6803_v50 = vld [vmem:[#allocation9 + $0xe08] sm:$0xff] }
 0x33c   : > { %4741 = vmatpush.msrb.mxu1 %v6761_v37  ;;  %4764 = vmatpush.msrb.mxu2 %v6762_v60  ;;  %v6804_v37 = vld [vmem:[#allocation9 + $0xff8] sm:$0xff]  ;;  %v6833_v0 = vld [vmem:[#allocation9 + $0xf88] sm:$0xff] }
 0x33d   : > { %4797 = vmatpush.msrb.mxu3 %v6763_v44  ;;  %4718 = vmatpush.msra.mxu0 %v6764_v9  ;;  %v6805_v60 = vld [vmem:[#allocation9 + $0x10b8] sm:$0xff]  ;;  %v6806_v44 = vld [vmem:[#allocation9 + $0x1108] sm:$0xff]  ;;  %v6807_v9 = vld [vmem:[#allocation9 + $0xc70] sm:$0xff] }
 0x33e   : > { %4742 = vmatpush.msrb.mxu1 %v6765_v27  ;;  %4765 = vmatpush.msrb.mxu2 %v6766_v46  ;;  %v6808_v27 = vld [vmem:[#allocation9 + $0xb70] sm:$0xff]  ;;  %v6809_v46 = vld [vmem:[#allocation9 + $0xfe8] sm:$0xff]  ;;  %v7128_v3 = vld [vmem:[#allocation9 + $0x13f8] sm:$0xff] }
 0x33f   : > { %4798 = vmatpush.msrb.mxu3 %v6767_v15  ;;  %4719 = vmatpush.msra.mxu0 %v6768_v17  ;;  %v6811_v15 = vld [vmem:[#allocation9 + $0xc60] sm:$0xff] }
 0x340   : > { %4743 = vmatpush.msrb.mxu1 %v6769_v8  ;;  %4766 = vmatpush.msrb.mxu2 %v6770_v28  ;;  %v6812_v28 = vld [vmem:[#allocation9 + $0xb60] sm:$0xff] }
 0x341   : > { %4799 = vmatpush.msrb.mxu3 %v6771_v35  ;;  %4720 = vmatpush.msra.mxu0 %v6772_v56  ;;  %v6813_v35 = vld [vmem:[#allocation9 + $0xfd8] sm:$0xff] }
 0x342   : > { %4744 = vmatpush.msrb.mxu1 %v6773_v42  ;;  %4767 = vmatpush.msrb.mxu2 %v6774_v52  ;;  %v6814_v42 = vld [vmem:[#allocation9 + $0x1098] sm:$0xff]  ;;  %v6815_v52 = vld [vmem:[#allocation9 + $0xc50] sm:$0xff] }
 0x343   : > { %4800 = vmatpush.msrb.mxu3 %v6775_v18  ;;  %4768 = vmatmul.f32.vlgmr.msrb.gmra.mxu2 %v8829_v7 }
 0x344   : > { %4860 = vmatpush.msra.mxu2 %v6776_v36  ;;  %4721 = vmatpush.msra.mxu0 %v6777_v23  ;;  %v6816_v36 = vld [vmem:[#allocation9 + $0xb50] sm:$0xff]  ;;  %v6817_v23 = vld [vmem:[#allocation9 + $0xfc8] sm:$0xff] }
 0x345   : > { %4745 = vmatpush.msrb.mxu1 %v6778_v10  ;;  %4801 = vmatpush.msrb.mxu3 %v6779_v13  ;;  %v4452_v13 = vpop.f32.mrf.mxu3 }
 0x346   : > { %4861 = vmatpush.msra.mxu2 %v6780_v30  ;;  %4722 = vmatpush.msra.mxu0 %v6781_v47  ;;  %v6819_v30 = vld [vmem:[#allocation9 + $0xc40] sm:$0xff] }
 0x347   : > { %4746 = vmatpush.msrb.mxu1 %v6782_v32  ;;  %4802 = vmatpush.msrb.mxu3 %v6783_v4  ;;  %v6820_v47 = vld [vmem:[#allocation9 + $0xb40] sm:$0xff]  ;;  %v6821_v32 = vld [vmem:[#allocation9 + $0xfb8] sm:$0xff] }
 0x348   : > { %4862 = vmatpush.msra.mxu2 %v6784_v49  ;;  %4723 = vmatpush.msra.mxu0 %v6785_v58  ;;  %v6822_v49 = vld [vmem:[#allocation9 + $0x1078] sm:$0xff]  ;;  %v6823_v58 = vld [vmem:[#allocation9 + $0xc30] sm:$0xff] }
 0x349   : > { %4747 = vmatpush.msrb.mxu1 %v6786_v16  ;;  %4803 = vmatpush.msrb.mxu3 %v6787_v63  ;;  %v6824_v16 = vld [vmem:[#allocation9 + $0xb30] sm:$0xff]  ;;  %v6825_v63 = vld [vmem:[#allocation9 + $0xfa8] sm:$0xff] }
 0x34a   : > { %4748 = vmatmul.f32.vlgmr.msrb.gmra.mxu1 %v8832_v19  ;;  %4863 = vmatpush.msra.mxu2 %v6788_v1  ;;  %v6826_v1 = vld [vmem:[#allocation9 + $0x1068] sm:$0xff] }
 0x34b   : > { %4832 = vmatpush.msra.mxu1 %v6789_v22  ;;  %4724 = vmatpush.msra.mxu0 %v6790_v54  ;;  %v6827_v22 = vld [vmem:[#allocation9 + $0xc20] sm:$0xff] }
 0x34c   : > { %4804 = vmatpush.msrb.mxu3 %v6791_v29  ;;  %4864 = vmatpush.msra.mxu2 %v6792_v51  ;;  %v6828_v54 = vld [vmem:[#allocation9 + $0xb20] sm:$0xff]  ;;  %v6829_v29 = vld [vmem:[#allocation9 + $0xf98] sm:$0xff] }
 0x34d   : > { %4833 = vmatpush.msra.mxu1 %v6793_v2  ;;  %4725 = vmatpush.msra.mxu0 %v6794_v21  ;;  %v6830_v51 = vld [vmem:[#allocation9 + $0x1058] sm:$0xff]  ;;  %v6831_v2 = vld [vmem:[#allocation9 + $0xc10] sm:$0xff] }
 0x34e   : > { %4805 = vmatpush.msrb.mxu3 %v6795_v43  ;;  %4865 = vmatpush.msra.mxu2 %v6796_v57  ;;  %v4432_v18 = vpop.f32.mrf.mxu2  ;;  %v6832_v21 = vld [vmem:[#allocation9 + $0xb10] sm:$0xff]  ;;  %v6834_v43 = vld [vmem:[#allocation9 + $0x1048] sm:$0xff]  ;;  %v6835_v57 = vld [vmem:[#allocation9 + $0xc00] sm:$0xff] }
 0x34f   : > { %4834 = vmatpush.msra.mxu1 %v6797_v31  ;;  %4726 = vmatpush.msra.mxu0 %v6798_v24  ;;  %v4412_v17 = vpop.f32.mrf.mxu1  ;;  %v6836_v31 = vld [vmem:[#allocation9 + $0xb00] sm:$0xff]  ;;  %v6837_v24 = vld [vmem:[#allocation9 + $0xf78] sm:$0xff] }
 0x350   : > { %4806 = vmatpush.msrb.mxu3 %v6799_v14  ;;  %4866 = vmatpush.msra.mxu2 %v6800_v33  ;;  %v6838_v14 = vld [vmem:[#allocation9 + $0x1038] sm:$0xff]  ;;  %v6839_v33 = vld [vmem:[#allocation9 + $0xbf0] sm:$0xff] }
 0x351   : > { %4835 = vmatpush.msra.mxu1 %v6801_v5  ;;  %4727 = vmatpush.msra.mxu0 %v6802_v20  ;;  %v6840_v5 = vld [vmem:[#allocation9 + $0xaf0] sm:$0xff]  ;;  %v6841_v20 = vld [vmem:[#allocation9 + $0xf68] sm:$0xff] }
 0x352   : > { %4807 = vmatpush.msrb.mxu3 %v6803_v50  ;;  %4728 = vmatmul.f32.vlgmr.msra.gmra.mxu0 %v8835_v26  ;;  %v6842_v50 = vld [vmem:[#allocation9 + $0x1028] sm:$0xff] }
 0x353   : > { %4808 = vmatmul.f32.vlgmr.msrb.gmra.mxu3 %v8835_v26  ;;  %4812 = vmatpush.msrb.mxu0 %v6804_v37  ;;  %v6843_v37 = vld [vmem:[#allocation9 + $0xbe0] sm:$0xff] }
 0x354   : > { %4836 = vmatpush.msra.mxu1 %v6805_v60  ;;  %4867 = vmatpush.msra.mxu2 %v6806_v44  ;;  %v6844_v60 = vld [vmem:[#allocation9 + $0xae0] sm:$0xff]  ;;  %v6845_v44 = vld [vmem:[#allocation9 + $0xf58] sm:$0xff] }
 0x355   : > { %4896 = vmatpush.msra.mxu3 %v6807_v9  ;;  %6194 = vmatmul.msk.f32.vlgmr.msra.gmra.mxu2 %vm2933_vm3, %v8820_v53  ;;  %v6846_v9 = vld [vmem:[#allocation9 + $0x1018] sm:$0xff] }
 0x356   : > { %4876 = vmatpush.msrb.mxu2 %v6808_v27  ;;  %4813 = vmatpush.msrb.mxu0 %v6809_v46  ;;  %v6847_v27 = vld [vmem:[#allocation9 + $0xbd0] sm:$0xff] }
 0x357   : > { %4837 = vmatpush.msra.mxu1 %v6810_v34  ;;  %4897 = vmatpush.msra.mxu3 %v6811_v15  ;;  %v4392_v8 = vpop.f32.mrf.mxu0  ;;  %v6848_v46 = vld [vmem:[#allocation9 + $0xad0] sm:$0xff]  ;;  %v6849_v34 = vld [vmem:[#allocation9 + $0xf48] sm:$0xff] }
 0x358   : > { %4877 = vmatpush.msrb.mxu2 %v6812_v28  ;;  %4814 = vmatpush.msrb.mxu0 %v6813_v35  ;;  %v4413_v56 = vadd.f32 %v4412_v17, %v4392_v8  ;;  %v6850_v15 = vld [vmem:[#allocation9 + $0x1008] sm:$0xff]  ;;  %v6851_v17 = vld [vmem:[#allocation9 + $0xbc0] sm:$0xff]  ;;  %v6853_v28 = vld [vmem:[#allocation9 + $0xdf0] sm:$0xff] }
 0x359   : > { %4838 = vmatpush.msra.mxu1 %v6814_v42  ;;  %4898 = vmatpush.msra.mxu3 %v6815_v52  ;;  %v6852_v8 = vld [vmem:[#allocation9 + $0xac0] sm:$0xff]  ;;  %v6854_v35 = vld [vmem:[#allocation9 + $0xf38] sm:$0xff]  ;;  %v6856_v42 = vld [vmem:[#allocation9 + $0xab0] sm:$0xff] }
 0x35a   : > { %4878 = vmatpush.msrb.mxu2 %v6816_v36  ;;  %4815 = vmatpush.msrb.mxu0 %v6817_v23  ;;  %v4433_v10 = vadd.f32 %v4432_v18, %v4413_v56  ;;  %v6855_v56 = vld [vmem:[#allocation9 + $0xbb0] sm:$0xff]  ;;  %v6857_v52 = vld [vmem:[#allocation9 + $0xde0] sm:$0xff]  ;;  %v6858_v18 = vld [vmem:[#allocation9 + $0xf28] sm:$0xff] }
 0x35b   : > { %4839 = vmatpush.msra.mxu1 %v6818_v11  ;;  %4899 = vmatpush.msra.mxu3 %v6819_v30  ;;  %v6859_v36 = vld [vmem:[#allocation9 + $0xba0] sm:$0xff]  ;;  %v6863_v11 = vld [vmem:[#allocation9 + $0xb90] sm:$0xff] }
 0x35c   : > { %4879 = vmatpush.msrb.mxu2 %v6820_v47  ;;  %4816 = vmatpush.msrb.mxu0 %v6821_v32  ;;  %v8841_v4 = vadd.f32 %v4452_v13, %v4433_v10  ;;  %v6860_v23 = vld [vmem:[#allocation9 + $0xaa0] sm:$0xff]  ;;  %v6861_v10 = vld [vmem:[#allocation9 + $0xdd0] sm:$0xff]  ;;  %v6862_v13 = vld [vmem:[#allocation9 + $0xf18] sm:$0xff] }
 0x35d   : > { %4840 = vmatpush.msra.mxu1 %v6822_v49  ;;  %4900 = vmatpush.msra.mxu3 %v6823_v58  ;;  %v6864_v30 = vld [vmem:[#allocation9 + $0xa90] sm:$0xff]  ;;  %v6865_v47 = vld [vmem:[#allocation9 + $0xdc0] sm:$0xff]  ;;  %v6866_v32 = vld [vmem:[#allocation9 + $0xf08] sm:$0xff] }
 0x35e   : > { %4880 = vmatpush.msrb.mxu2 %v6824_v16  ;;  %4817 = vmatpush.msrb.mxu0 %v6825_v63  ;;  %v6867_v49 = vld [vmem:[#allocation9 + $0xb80] sm:$0xff]  ;;  %v6869_v16 = vld [vmem:[#allocation9 + $0xd70] sm:$0xff] }
 0x35f   : > { %4841 = vmatpush.msra.mxu1 %v6826_v1  ;;  %4901 = vmatpush.msra.mxu3 %v6827_v22  ;;  %v6868_v58 = vld [vmem:[#allocation9 + $0xa80] sm:$0xff]  ;;  %v6870_v63 = vld [vmem:[#allocation9 + $0xdb0] sm:$0xff]  ;;  %v6871_v1 = vld [vmem:[#allocation9 + $0xd78] sm:$0xff] }
 0x360   : > { %4881 = vmatpush.msrb.mxu2 %v6828_v54  ;;  %4818 = vmatpush.msrb.mxu0 %v6829_v29  ;;  %v6872_v22 = vld [vmem:[#allocation9 + $0xc78] sm:$0xff]  ;;  %v6873_v54 = vld [vmem:[#allocation9 + $0xd60] sm:$0xff]  ;;  %v4472_v29 = vpop.f32.mrf.mxu3 }
 0x361   : > { %4842 = vmatpush.msra.mxu1 %v6830_v51  ;;  %4902 = vmatpush.msra.mxu3 %v6831_v2  ;;  %v6874_v51 = vld [vmem:[#allocation9 + $0xda0] sm:$0xff]  ;;  %v6875_v2 = vld [vmem:[#allocation9 + $0xd68] sm:$0xff] }
 0x362   : > { %4882 = vmatpush.msrb.mxu2 %v6832_v21  ;;  %4819 = vmatpush.msrb.mxu0 %v6833_v0  ;;  %v6876_v0 = vld [vmem:[#allocation9 + $0xc68] sm:$0xff] }
 0x363   : > { %4843 = vmatpush.msra.mxu1 %v6834_v43  ;;  %4903 = vmatpush.msra.mxu3 %v6835_v57  ;;  %v6877_v43 = vld [vmem:[#allocation9 + $0xd50] sm:$0xff] }
 0x364   : > { %4883 = vmatpush.msrb.mxu2 %v6836_v31  ;;  %4820 = vmatpush.msrb.mxu0 %v6837_v24  ;;  %v6878_v31 = vld [vmem:[#allocation9 + $0xd90] sm:$0xff]  ;;  %v6879_v24 = vld [vmem:[#allocation9 + $0xd58] sm:$0xff] }
 0x365   : > { %4844 = vmatpush.msra.mxu1 %v6838_v14  ;;  %4904 = vmatpush.msra.mxu3 %v6839_v33  ;;  %v6880_v33 = vld [vmem:[#allocation9 + $0xc58] sm:$0xff] }
 0x366   : > { %4884 = vmatpush.msrb.mxu2 %v6840_v5  ;;  %4821 = vmatpush.msrb.mxu0 %v6841_v20  ;;  %v6881_v5 = vld [vmem:[#allocation9 + $0xd40] sm:$0xff] }
 0x367   : > { %4845 = vmatpush.msra.mxu1 %v6842_v50  ;;  %4905 = vmatpush.msra.mxu3 %v6843_v37  ;;  %v4532_v50 = vpop.f32.mrf.mxu2  ;;  %v6882_v37 = vld [vmem:[#allocation9 + $0xd80] sm:$0xff] }
 0x368   : > { %4885 = vmatpush.msrb.mxu2 %v6844_v60  ;;  %4822 = vmatpush.msrb.mxu0 %v6845_v44  ;;  %v6883_v60 = vld [vmem:[#allocation9 + $0xd48] sm:$0xff] }
 0x369   : > { %4846 = vmatpush.msra.mxu1 %v6846_v9  ;;  %4906 = vmatpush.msra.mxu3 %v6847_v27  ;;  %v6884_v44 = vld [vmem:[#allocation9 + $0xc48] sm:$0xff]  ;;  %v6885_v27 = vld [vmem:[#allocation9 + $0xb78] sm:$0xff] }
 0x36a   : > { %4886 = vmatpush.msrb.mxu2 %v6848_v46  ;;  %4823 = vmatpush.msrb.mxu0 %v6849_v34  ;;  %v6886_v46 = vld [vmem:[#allocation9 + $0xd30] sm:$0xff]  ;;  %v6887_v34 = vld [vmem:[#allocation9 + $0xd38] sm:$0xff] }
 0x36b   : > { %4847 = vmatpush.msra.mxu1 %v6850_v15  ;;  %4907 = vmatpush.msra.mxu3 %v6851_v17  ;;  %v6888_v15 = vld [vmem:[#allocation9 + $0xc38] sm:$0xff]  ;;  %v6889_v17 = vld [vmem:[#allocation9 + $0xb68] sm:$0xff] }
 0x36c   : > { %4848 = vmatmul.f32.vlgmr.msra.gmra.mxu1 %v8829_v7  ;;  %4887 = vmatpush.msrb.mxu2 %v6852_v8  ;;  %v6890_v8 = vld [vmem:[#allocation9 + $0xd20] sm:$0xff] }
 0x36d   : > { %4944 = vmatpush.msrb.mxu1 %v6853_v28  ;;  %4824 = vmatpush.msrb.mxu0 %v6854_v35  ;;  %v6891_v28 = vld [vmem:[#allocation9 + $0xd28] sm:$0xff] }
 0x36e   : > { %4908 = vmatpush.msra.mxu3 %v6855_v56  ;;  %4888 = vmatpush.msrb.mxu2 %v6856_v42  ;;  %v6892_v35 = vld [vmem:[#allocation9 + $0xc28] sm:$0xff]  ;;  %v6893_v56 = vld [vmem:[#allocation9 + $0xb58] sm:$0xff]  ;;  %v6894_v42 = vld [vmem:[#allocation9 + $0xd10] sm:$0xff] }
 0x36f   : > { %4945 = vmatpush.msrb.mxu1 %v6857_v52  ;;  %4825 = vmatpush.msrb.mxu0 %v6858_v18  ;;  %v6895_v52 = vld [vmem:[#allocation9 + $0xd18] sm:$0xff] }
 0x370   : > { %4909 = vmatpush.msra.mxu3 %v6859_v36  ;;  %4889 = vmatpush.msrb.mxu2 %v6860_v23  ;;  %v6896_v18 = vld [vmem:[#allocation9 + $0xc18] sm:$0xff]  ;;  %v6897_v36 = vld [vmem:[#allocation9 + $0xb48] sm:$0xff]  ;;  %v6898_v23 = vld [vmem:[#allocation9 + $0xd00] sm:$0xff] }
 0x371   : > { %4946 = vmatpush.msrb.mxu1 %v6861_v10  ;;  %4826 = vmatpush.msrb.mxu0 %v6862_v13  ;;  %v4512_v14 = vpop.f32.mrf.mxu1  ;;  %v6899_v10 = vld [vmem:[#allocation9 + $0xd08] sm:$0xff] }
 0x372   : > { %4910 = vmatpush.msra.mxu3 %v6863_v11  ;;  %4890 = vmatpush.msrb.mxu2 %v6864_v30  ;;  %v6900_v13 = vld [vmem:[#allocation9 + $0xc08] sm:$0xff]  ;;  %v6901_v11 = vld [vmem:[#allocation9 + $0xb38] sm:$0xff]  ;;  %v6902_v30 = vld [vmem:[#allocation9 + $0xcf0] sm:$0xff] }
 0x373   : > { %4947 = vmatpush.msrb.mxu1 %v6865_v47  ;;  %4827 = vmatpush.msrb.mxu0 %v6866_v32  ;;  %v6903_v47 = vld [vmem:[#allocation9 + $0xcf8] sm:$0xff] }
 0x374   : > { %4911 = vmatpush.msra.mxu3 %v6867_v49  ;;  %4828 = vmatmul.f32.vlgmr.msrb.gmra.mxu0 %v8832_v19  ;;  %v6904_v32 = vld [vmem:[#allocation9 + $0xbf8] sm:$0xff]  ;;  %v6905_v49 = vld [vmem:[#allocation9 + $0xb28] sm:$0xff] }
 0x375   : > { %4891 = vmatpush.msrb.mxu2 %v6868_v58  ;;  %4912 = vmatmul.f32.vlgmr.msra.gmra.mxu3 %v8667_v40  ;;  %v6906_v58 = vld [vmem:[#allocation9 + $0xce0] sm:$0xff] }
 0x376   : > { %4916 = vmatpush.msra.mxu0 %v6869_v16  ;;  %4948 = vmatpush.msrb.mxu1 %v6870_v63  ;;  %v6907_v16 = vld [vmem:[#allocation9 + $0xce8] sm:$0xff] }
 0x377   : > { %4996 = vmatpush.msrb.mxu3 %v6871_v1  ;;  %4892 = vmatmul.f32.vlgmr.msrb.gmra.mxu2 %v8670_v41  ;;  %v6908_v63 = vld [vmem:[#allocation9 + $0xbe8] sm:$0xff]  ;;  %v6909_v1 = vld [vmem:[#allocation9 + $0xb18] sm:$0xff] }
 0x378   : > { %4976 = vmatpush.msra.mxu2 %v6872_v22  ;;  %4917 = vmatpush.msra.mxu0 %v6873_v54  ;;  %v6910_v22 = vld [vmem:[#allocation9 + $0xcd0] sm:$0xff]  ;;  %v6911_v54 = vld [vmem:[#allocation9 + $0xcd8] sm:$0xff] }
 0x379   : > { %4949 = vmatpush.msrb.mxu1 %v6874_v51  ;;  %4997 = vmatpush.msrb.mxu3 %v6875_v2  ;;  %v4492_v21 = vpop.f32.mrf.mxu0  ;;  %v6913_v51 = vld [vmem:[#allocation9 + $0xb08] sm:$0xff]  ;;  %v6914_v2 = vld [vmem:[#allocation9 + $0xcc0] sm:$0xff] }
 0x37a   : > { %4977 = vmatpush.msra.mxu2 %v6876_v0  ;;  %4918 = vmatpush.msra.mxu0 %v6877_v43  ;;  %v4493_v57 = vadd.f32 %v4492_v21, %v4472_v29  ;;  %v6912_v29 = vld [vmem:[#allocation9 + $0xbd8] sm:$0xff]  ;;  %v6915_v21 = vld [vmem:[#allocation9 + $0xcc8] sm:$0xff] }
 0x37b   : > { %4950 = vmatpush.msrb.mxu1 %v6878_v31  ;;  %4998 = vmatpush.msrb.mxu3 %v6879_v24  ;;  %v6916_v0 = vld [vmem:[#allocation9 + $0xbc8] sm:$0xff]  ;;  %v6917_v43 = vld [vmem:[#allocation9 + $0xaf8] sm:$0xff] }
 0x37c   : > { %4978 = vmatpush.msra.mxu2 %v6880_v33  ;;  %4919 = vmatpush.msra.mxu0 %v6881_v5  ;;  %v4513_v20 = vadd.f32 %v4512_v14, %v4493_v57  ;;  %v6918_v57 = vld [vmem:[#allocation9 + $0xcb0] sm:$0xff]  ;;  %v6919_v31 = vld [vmem:[#allocation9 + $0xcb8] sm:$0xff]  ;;  %v6921_v14 = vld [vmem:[#allocation9 + $0xae8] sm:$0xff] }
 0x37d   : > { %4951 = vmatpush.msrb.mxu1 %v6882_v37  ;;  %4999 = vmatpush.msrb.mxu3 %v6883_v60  ;;  %v6920_v24 = vld [vmem:[#allocation9 + $0xbb8] sm:$0xff]  ;;  %v6922_v33 = vld [vmem:[#allocation9 + $0xca0] sm:$0xff]  ;;  %v6923_v5 = vld [vmem:[#allocation9 + $0xca8] sm:$0xff] }
 0x37e   : > { %6195 = vmatmul.msk.f32.vlgmr.msrb.gmra.mxu1 %vm2933_vm3, %v8660_v62  ;;  %4979 = vmatpush.msra.mxu2 %v6884_v44  ;;  %v8849_v9 = vadd.f32 %v4532_v50, %v4513_v20  ;;  %v6924_v20 = vld [vmem:[#allocation9 + $0xba8] sm:$0xff]  ;;  %v6925_v50 = vld [vmem:[#allocation9 + $0xad8] sm:$0xff]  ;;  %v6926_v37 = vld [vmem:[#allocation9 + $0xc90] sm:$0xff] }
 0x37f   : > { %4956 = vmatpush.msra.mxu1 %v6885_v27  ;;  %4920 = vmatpush.msra.mxu0 %v6886_v46  ;;  %v6927_v60 = vld [vmem:[#allocation9 + $0xc98] sm:$0xff]  ;;  %v6929_v27 = vld [vmem:[#allocation9 + $0xac8] sm:$0xff]  ;;  %v6930_v46 = vld [vmem:[#allocation9 + $0xc80] sm:$0xff] }
 0x380   : > { %5000 = vmatpush.msrb.mxu3 %v6887_v34  ;;  %4980 = vmatpush.msra.mxu2 %v6888_v15  ;;  %v6928_v44 = vld [vmem:[#allocation9 + $0xb98] sm:$0xff]  ;;  %v6931_v34 = vld [vmem:[#allocation9 + $0xc88] sm:$0xff] }
 0x381   : > { %4957 = vmatpush.msra.mxu1 %v6889_v17  ;;  %4921 = vmatpush.msra.mxu0 %v6890_v8  ;;  %v6932_v15 = vld [vmem:[#allocation9 + $0xab8] sm:$0xff]  ;;  %v6933_v17 = vld [vmem:[#allocation9 + $0xb88] sm:$0xff] }
 0x382   : > { %5001 = vmatpush.msrb.mxu3 %v6891_v28  ;;  %4981 = vmatpush.msra.mxu2 %v6892_v35  ;;  %v6934_v8 = vld [vmem:[#allocation9 + $0xdf8] sm:$0xff]  ;;  %v6935_v28 = vld [vmem:[#allocation9 + $0x6f0] sm:$0xff] }
 0x383   : > { %4958 = vmatpush.msra.mxu1 %v6893_v56  ;;  %4922 = vmatpush.msra.mxu0 %v6894_v42  ;;  %v6936_v35 = vld [vmem:[#allocation9 + $0x670] sm:$0xff]  ;;  %v6937_v56 = vld [vmem:[#allocation9 + $0xaa8] sm:$0xff] }
 0x384   : > { %5002 = vmatpush.msrb.mxu3 %v6895_v52  ;;  %4982 = vmatpush.msra.mxu2 %v6896_v18  ;;  %v6938_v42 = vld [vmem:[#allocation9 + $0xde8] sm:$0xff]  ;;  %v6939_v52 = vld [vmem:[#allocation9 + $0x6e0] sm:$0xff] }
 0x385   : > { %4959 = vmatpush.msra.mxu1 %v6897_v36  ;;  %4923 = vmatpush.msra.mxu0 %v6898_v23  ;;  %v6940_v18 = vld [vmem:[#allocation9 + $0x660] sm:$0xff]  ;;  %v6941_v36 = vld [vmem:[#allocation9 + $0xa98] sm:$0xff]  ;;  %v8854_v23 = vpop.f32.mrf.mxu1 }
 0x386   : > { %5003 = vmatpush.msrb.mxu3 %v6899_v10  ;;  %4983 = vmatpush.msra.mxu2 %v6900_v13  ;;  %v6943_v10 = vld [vmem:[#allocation9 + $0x6d0] sm:$0xff] }
 0x387   : > { %4960 = vmatpush.msra.mxu1 %v6901_v11  ;;  %4924 = vmatpush.msra.mxu0 %v6902_v30  ;;  %v6944_v13 = vld [vmem:[#allocation9 + $0x650] sm:$0xff]  ;;  %v8856_v11 = vpop.f32.mrf.mxu2  ;;  %v6946_v30 = vld [vmem:[#allocation9 + $0xdc8] sm:$0xff] }
 0x388   : > { %5004 = vmatpush.msrb.mxu3 %v6903_v47  ;;  %4984 = vmatpush.msra.mxu2 %v6904_v32  ;;  %v6947_v47 = vld [vmem:[#allocation9 + $0x6c0] sm:$0xff] }
 0x389   : > { %4961 = vmatpush.msra.mxu1 %v6905_v49  ;;  %4925 = vmatpush.msra.mxu0 %v6906_v58  ;;  %v6948_v32 = vld [vmem:[#allocation9 + $0x640] sm:$0xff]  ;;  %v8859_v49 = vpop.f32.mrf.mxu3  ;;  %v6949_v58 = vld [vmem:[#allocation9 + $0x570] sm:$0xff] }
 0x38a   : > { %5005 = vmatpush.msrb.mxu3 %v6907_v16  ;;  %4985 = vmatpush.msra.mxu2 %v6908_v63  ;;  %v6950_v16 = vld [vmem:[#allocation9 + $0xdb8] sm:$0xff]  ;;  %v6951_v63 = vld [vmem:[#allocation9 + $0x6b0] sm:$0xff] }
 0x38b   : > { %4962 = vmatpush.msra.mxu1 %v6909_v1  ;;  %4926 = vmatpush.msra.mxu0 %v6910_v22  ;;  %v6952_v1 = vld [vmem:[#allocation9 + $0x630] sm:$0xff]  ;;  %v6953_v22 = vld [vmem:[#allocation9 + $0x560] sm:$0xff] }
 0x38c   : > { %5006 = vmatpush.msrb.mxu3 %v6911_v54  ;;  %4986 = vmatpush.msra.mxu2 %v6912_v29  ;;  %v6954_v54 = vld [vmem:[#allocation9 + $0xda8] sm:$0xff]  ;;  %v6955_v29 = vld [vmem:[#allocation9 + $0x6a0] sm:$0xff] }
 0x38d   : > { %4963 = vmatpush.msra.mxu1 %v6913_v51  ;;  %4927 = vmatpush.msra.mxu0 %v6914_v2  ;;  %v6956_v51 = vld [vmem:[#allocation9 + $0x620] sm:$0xff]  ;;  %v6958_v2 = vld [vmem:[#allocation9 + $0xd98] sm:$0xff] }
 0x38e   : > { %5007 = vmatpush.msrb.mxu3 %v6915_v21  ;;  %4987 = vmatpush.msra.mxu2 %v6916_v0 }
 0x38f   : > { %4964 = vmatpush.msra.mxu1 %v6917_v43  ;;  %4928 = vmatpush.msra.mxu0 %v6918_v57  ;;  %v6959_v43 = vld [vmem:[#allocation9 + $0x690] sm:$0xff] }
 0x390   : > { %5008 = vmatpush.msrb.mxu3 %v6919_v31  ;;  %4988 = vmatpush.msra.mxu2 %v6920_v24  ;;  %v6960_v57 = vld [vmem:[#allocation9 + $0x610] sm:$0xff]  ;;  %v6961_v24 = vld [vmem:[#allocation9 + $0x540] sm:$0xff] }
 0x391   : > { %4965 = vmatpush.msra.mxu1 %v6921_v14  ;;  %4929 = vmatpush.msra.mxu0 %v6922_v33  ;;  %v6962_v14 = vld [vmem:[#allocation9 + $0xd88] sm:$0xff] }
 0x392   : > { %5009 = vmatpush.msrb.mxu3 %v6923_v5  ;;  %4989 = vmatpush.msra.mxu2 %v6924_v20  ;;  %v6963_v5 = vld [vmem:[#allocation9 + $0x680] sm:$0xff] }
 0x393   : > { %4966 = vmatpush.msra.mxu1 %v6925_v50  ;;  %4930 = vmatpush.msra.mxu0 %v6926_v37  ;;  %v6964_v50 = vld [vmem:[#allocation9 + $0x470] sm:$0xff] }
 0x394   : > { %5010 = vmatpush.msrb.mxu3 %v6927_v60  ;;  %4990 = vmatpush.msra.mxu2 %v6928_v44  ;;  %v6965_v37 = vld [vmem:[#allocation9 + $0x530] sm:$0xff]  ;;  %v6966_v44 = vld [vmem:[#allocation9 + $0x600] sm:$0xff] }
 0x395   : > { %4967 = vmatpush.msra.mxu1 %v6929_v27  ;;  %4931 = vmatpush.msra.mxu0 %v6930_v46  ;;  %v6967_v27 = vld [vmem:[#allocation9 + $0x478] sm:$0xff]  ;;  %v6968_v46 = vld [vmem:[#allocation9 + $0x460] sm:$0xff] }
 0x396   : > { %5011 = vmatpush.msrb.mxu3 %v6931_v34  ;;  %4932 = vmatmul.f32.vlgmr.msra.gmra.mxu0 %v8664_v25  ;;  %v6969_v34 = vld [vmem:[#allocation9 + $0x520] sm:$0xff] }
 0x397   : > { %4968 = vmatpush.msra.mxu1 %v6932_v15  ;;  %4991 = vmatpush.msra.mxu2 %v6933_v17  ;;  %v6970_v15 = vld [vmem:[#allocation9 + $0x5f0] sm:$0xff] }
 0x398   : > { %5012 = vmatmul.f32.vlgmr.msrb.gmra.mxu3 %v8664_v25  ;;  %5024 = vmatpush.msrb.mxu0 %v6934_v8  ;;  %v6942_v25 = vld [vmem:[#allocation9 + $0xdd8] sm:$0xff]  ;;  %v6972_v17 = vld [vmem:[#allocation9 + $0x450] sm:$0xff] }
 0x399   : > { %5104 = vmatpush.msra.mxu3 %v6935_v28  ;;  %4992 = vmatmul.f32.vlgmr.msra.gmra.mxu2 %v8667_v40  ;;  %v6945_v40 = vld [vmem:[#allocation9 + $0xa88] sm:$0xff]  ;;  %v6973_v28 = vld [vmem:[#allocation9 + $0x510] sm:$0xff] }
 0x39a   : > { %5076 = vmatpush.msrb.mxu2 %v6936_v35  ;;  %4969 = vmatpush.msra.mxu1 %v6937_v56  ;;  %v6974_v35 = vld [vmem:[#allocation9 + $0x5e0] sm:$0xff] }
 0x39b   : > { %5025 = vmatpush.msrb.mxu0 %v6938_v42  ;;  %5105 = vmatpush.msra.mxu3 %v6939_v52  ;;  %v8861_v21 = vpop.f32.mrf.mxu0  ;;  %v6975_v42 = vld [vmem:[#allocation9 + $0x458] sm:$0xff]  ;;  %v6976_v52 = vld [vmem:[#allocation9 + $0x440] sm:$0xff] }
 0x39c   : > { %5077 = vmatpush.msrb.mxu2 %v6940_v18  ;;  %4970 = vmatpush.msra.mxu1 %v6941_v36  ;;  %v6977_v18 = vld [vmem:[#allocation9 + $0x500] sm:$0xff]  ;;  %v6978_v36 = vld [vmem:[#allocation9 + $0x5d0] sm:$0xff] }
 0x39d   : > { %5026 = vmatpush.msrb.mxu0 %v6942_v25  ;;  %5106 = vmatpush.msra.mxu3 %v6943_v10  ;;  %v6979_v25 = vld [vmem:[#allocation9 + $0x448] sm:$0xff]  ;;  %v6980_v10 = vld [vmem:[#allocation9 + $0x430] sm:$0xff] }
 0x39e   : > { %5078 = vmatpush.msrb.mxu2 %v6944_v13  ;;  %4971 = vmatpush.msra.mxu1 %v6945_v40  ;;  %v6981_v13 = vld [vmem:[#allocation9 + $0x4f0] sm:$0xff]  ;;  %v6982_v40 = vld [vmem:[#allocation9 + $0x5c0] sm:$0xff] }
 0x39f   : > { %5027 = vmatpush.msrb.mxu0 %v6946_v30  ;;  %5107 = vmatpush.msra.mxu3 %v6947_v47  ;;  %v6983_v30 = vld [vmem:[#allocation9 + $0x438] sm:$0xff]  ;;  %v6984_v47 = vld [vmem:[#allocation9 + $0x420] sm:$0xff] }
 0x3a0   : > { %4972 = vmatmul.f32.vlgmr.msra.gmra.mxu1 %v8670_v41  ;;  %5079 = vmatpush.msrb.mxu2 %v6948_v32  ;;  %v6957_v41 = vld [vmem:[#allocation9 + $0x550] sm:$0xff]  ;;  %v6985_v32 = vld [vmem:[#allocation9 + $0x4e0] sm:$0xff] }
 0x3a1   : > { %5056 = vmatpush.msrb.mxu1 %v6949_v58  ;;  %5028 = vmatpush.msrb.mxu0 %v6950_v16  ;;  %v6986_v58 = vld [vmem:[#allocation9 + $0x5b0] sm:$0xff]  ;;  %v6987_v16 = vld [vmem:[#allocation9 + $0x428] sm:$0xff] }
 0x3a2   : > { %5108 = vmatpush.msra.mxu3 %v6951_v63  ;;  %5080 = vmatpush.msrb.mxu2 %v6952_v1  ;;  %v6988_v63 = vld [vmem:[#allocation9 + $0x410] sm:$0xff] }
 0x3a3   : > { %5057 = vmatpush.msrb.mxu1 %v6953_v22  ;;  %5029 = vmatpush.msrb.mxu0 %v6954_v54  ;;  %v4672_v60 = vpop.f32.mrf.mxu3  ;;  %v6989_v1 = vld [vmem:[#allocation9 + $0x4d0] sm:$0xff]  ;;  %v6990_v22 = vld [vmem:[#allocation9 + $0x5a0] sm:$0xff]  ;;  %v6991_v54 = vld [vmem:[#allocation9 + $0x418] sm:$0xff] }
 0x3a4   : > { %5109 = vmatpush.msra.mxu3 %v6955_v29  ;;  %5081 = vmatpush.msrb.mxu2 %v6956_v51  ;;  %v4652_v33 = vpop.f32.mrf.mxu2  ;;  %v6992_v29 = vld [vmem:[#allocation9 + $0x400] sm:$0xff] }
 0x3a5   : > { %5058 = vmatpush.msrb.mxu1 %v6957_v41  ;;  %5030 = vmatpush.msrb.mxu0 %v6958_v2  ;;  %v4632_v0 = vpop.f32.mrf.mxu1  ;;  %v6993_v51 = vld [vmem:[#allocation9 + $0x4c0] sm:$0xff]  ;;  %v6994_v41 = vld [vmem:[#allocation9 + $0x590] sm:$0xff]  ;;  %v6995_v2 = vld [vmem:[#allocation9 + $0x408] sm:$0xff] }
 0x3a6   : > { %5110 = vmatpush.msra.mxu3 %v6959_v43  ;;  %5082 = vmatpush.msrb.mxu2 %v6960_v57  ;;  %v4633_v31 = vadd.f32 %v4632_v0, %v8849_v9  ;;  %v6996_v0 = vld [vmem:[#allocation9 + $0x3f0] sm:$0xff]  ;;  %v6998_v57 = vld [vmem:[#allocation9 + $0x580] sm:$0xff] }
 0x3a7   : > { %5059 = vmatpush.msrb.mxu1 %v6961_v24  ;;  %5031 = vmatpush.msrb.mxu0 %v6962_v14  ;;  %v6997_v43 = vld [vmem:[#allocation9 + $0x4b0] sm:$0xff]  ;;  %v7000_v24 = vld [vmem:[#allocation9 + $0x6f8] sm:$0xff]  ;;  %v7001_v14 = vld [vmem:[#allocation9 + $0x3e0] sm:$0xff] }
 0x3a8   : > { %5111 = vmatpush.msra.mxu3 %v6963_v5  ;;  %6196 = vmatmul.msk.f32.vlgmr.msrb.gmra.mxu0 %vm2933_vm3, %v8660_v62  ;;  %v4653_v20 = vadd.f32 %v4652_v33, %v4633_v31  ;;  %v6971_v62 = vld [vmem:[#allocation9 + $0x468] sm:$0xff]  ;;  %v6999_v31 = vld [vmem:[#allocation9 + $0x3f8] sm:$0xff]  ;;  %v7002_v33 = vld [vmem:[#allocation9 + $0x4a0] sm:$0xff] }
 0x3a9   : > { %5036 = vmatpush.msra.mxu0 %v6964_v50  ;;  %5060 = vmatpush.msrb.mxu1 %v6965_v37  ;;  %v7003_v5 = vld [vmem:[#allocation9 + $0x3e8] sm:$0xff]  ;;  %v7005_v50 = vld [vmem:[#allocation9 + $0x3d0] sm:$0xff] }
 0x3aa   : > { %5083 = vmatpush.msrb.mxu2 %v6966_v44  ;;  %6197 = vmatmul.msk.f32.vlgmr.msra.gmra.mxu3 %vm2933_vm3, %v8787_v45  ;;  %v4673_v9 = vadd.f32 %v4672_v60, %v4653_v20  ;;  %v7004_v20 = vld [vmem:[#allocation9 + $0x6e8] sm:$0xff]  ;;  %v7006_v37 = vld [vmem:[#allocation9 + $0x490] sm:$0xff]  ;;  %v7007_v60 = vld [vmem:[#allocation9 + $0x3d8] sm:$0xff] }
 0x3ab   : > { %5116 = vmatpush.msrb.mxu3 %v6967_v27  ;;  %5037 = vmatpush.msra.mxu0 %v6968_v46  ;;  %v7008_v44 = vld [vmem:[#allocation9 + $0x6d8] sm:$0xff]  ;;  %v7010_v27 = vld [vmem:[#allocation9 + $0x480] sm:$0xff]  ;;  %v7011_v46 = vld [vmem:[#allocation9 + $0x3c8] sm:$0xff] }
 0x3ac   : > { %5061 = vmatpush.msrb.mxu1 %v6969_v34  ;;  %5084 = vmatpush.msrb.mxu2 %v6970_v15  ;;  %v7012_v34 = vld [vmem:[#allocation9 + $0x6c8] sm:$0xff]  ;;  %v7013_v15 = vld [vmem:[#allocation9 + $0x678] sm:$0xff] }
 0x3ad   : > { %5117 = vmatpush.msrb.mxu3 %v6971_v62  ;;  %5038 = vmatpush.msra.mxu0 %v6972_v17  ;;  %v4692_v8 = vpop.f32.mrf.mxu0  ;;  %v7014_v62 = vld [vmem:[#allocation9 + $0x3b0] sm:$0xff]  ;;  %v7015_v17 = vld [vmem:[#allocation9 + $0x3b8] sm:$0xff] }
 0x3ae   : > { %5062 = vmatpush.msrb.mxu1 %v6973_v28  ;;  %5085 = vmatpush.msrb.mxu2 %v6974_v35  ;;  %v8868_v56 = vadd.f32 %v4692_v8, %v4673_v9  ;;  %v7009_v9 = vld [vmem:[#allocation9 + $0x3c0] sm:$0xff]  ;;  %v7016_v8 = vld [vmem:[#allocation9 + $0x6b8] sm:$0xff]  ;;  %v7017_v28 = vld [vmem:[#allocation9 + $0x668] sm:$0xff] }
 0x3af   : > { %5118 = vmatpush.msrb.mxu3 %v6975_v42  ;;  %5039 = vmatpush.msra.mxu0 %v6976_v52  ;;  %v7018_v35 = vld [vmem:[#allocation9 + $0x3a0] sm:$0xff]  ;;  %v7019_v42 = vld [vmem:[#allocation9 + $0x3a8] sm:$0xff] }
 0x3b0   : > { %5063 = vmatpush.msrb.mxu1 %v6977_v18  ;;  %5086 = vmatpush.msrb.mxu2 %v6978_v36  ;;  %v7020_v52 = vld [vmem:[#allocation9 + $0x6a8] sm:$0xff]  ;;  %v7021_v18 = vld [vmem:[#allocation9 + $0x658] sm:$0xff] }
 0x3b1   : > { %5119 = vmatpush.msrb.mxu3 %v6979_v25  ;;  %5040 = vmatpush.msra.mxu0 %v6980_v10  ;;  %v7023_v36 = vld [vmem:[#allocation9 + $0x398] sm:$0xff]  ;;  %v7025_v10 = vld [vmem:[#allocation9 + $0x648] sm:$0xff] }
 0x3b2   : > { %5064 = vmatpush.msrb.mxu1 %v6981_v13  ;;  %5087 = vmatpush.msrb.mxu2 %v6982_v40  ;;  %v7024_v25 = vld [vmem:[#allocation9 + $0x698] sm:$0xff]  ;;  %v7026_v13 = vld [vmem:[#allocation9 + $0x380] sm:$0xff]  ;;  %v4553_v40 = vadd.f32 %v8856_v11, %v8841_v4  ;;  %v7032_v4 = vld [vmem:[#allocation9 + $0x1270] sm:$0xff] }
 0x3b3   : > { %5120 = vmatpush.msrb.mxu3 %v6983_v30  ;;  %5041 = vmatpush.msra.mxu0 %v6984_v47  ;;  %v7027_v30 = vld [vmem:[#allocation9 + $0x388] sm:$0xff]  ;;  %v7028_v47 = vld [vmem:[#allocation9 + $0x578] sm:$0xff] }
 0x3b4   : > { %5065 = vmatpush.msrb.mxu1 %v6985_v32  ;;  %5088 = vmatpush.msrb.mxu2 %v6986_v58  ;;  %v7029_v32 = vld [vmem:[#allocation9 + $0x638] sm:$0xff]  ;;  %v7030_v58 = vld [vmem:[#allocation9 + $0x688] sm:$0xff] }
 0x3b5   : > { %5121 = vmatpush.msrb.mxu3 %v6987_v16  ;;  %5042 = vmatpush.msra.mxu0 %v6988_v63  ;;  %v7031_v16 = vld [vmem:[#allocation9 + $0x1370] sm:$0xff]  ;;  %v4573_v63 = vadd.f32 %v8859_v49, %v4553_v40  ;;  %v7033_v11 = vld [vmem:[#allocation9 + $0x568] sm:$0xff]  ;;  %v7069_v40 = vld [vmem:[#allocation9 + $0x4d8] sm:$0xff] }
 0x3b6   : > { %5066 = vmatpush.msrb.mxu1 %v6989_v1  ;;  %5089 = vmatpush.msrb.mxu2 %v6990_v22  ;;  %v7034_v1 = vld [vmem:[#allocation9 + $0x628] sm:$0xff]  ;;  %v7039_v49 = vld [vmem:[#allocation9 + $0x1350] sm:$0xff] }
 0x3b7   : > { %5122 = vmatpush.msrb.mxu3 %v6991_v54  ;;  %5043 = vmatpush.msra.mxu0 %v6992_v29  ;;  %v4593_v29 = vadd.f32 %v8861_v21, %v4573_v63  ;;  %v7075_v63 = vld [vmem:[#allocation9 + $0x12c0] sm:$0xff] }
 0x3b8   : > { %5067 = vmatpush.msrb.mxu1 %v6993_v51  ;;  %5090 = vmatpush.msrb.mxu2 %v6994_v41  ;;  %v7036_v51 = vld [vmem:[#allocation9 + $0x1260] sm:$0xff]  ;;  %v7037_v41 = vld [vmem:[#allocation9 + $0x558] sm:$0xff] }
 0x3b9   : > { %5123 = vmatpush.msrb.mxu3 %v6995_v2  ;;  %5044 = vmatpush.msra.mxu0 %v6996_v0  ;;  %v4613_v21 = vadd.f32 %v8854_v23, %v4593_v29  ;;  %v7053_v23 = vld [vmem:[#allocation9 + $0x518] sm:$0xff]  ;;  %v7082_v29 = vld [vmem:[#allocation9 + $0x4a8] sm:$0xff] }
 0x3ba   : > { %5068 = vmatpush.msrb.mxu1 %v6997_v43  ;;  %5091 = vmatpush.msrb.mxu2 %v6998_v57  ;;  %v7040_v43 = vld [vmem:[#allocation9 + $0x1250] sm:$0xff]  ;;  %v7041_v57 = vld [vmem:[#allocation9 + $0x548] sm:$0xff] }
 0x3bb   : > { %5124 = vmatpush.msrb.mxu3 %v6999_v31  ;;  %5092 = vmatmul.f32.vlgmr.msrb.gmra.mxu2 %v8800_v59 }
 0x3bc   : > { %5184 = vmatpush.msra.mxu2 %v7000_v24  ;;  %5045 = vmatpush.msra.mxu0 %v7001_v14  ;;  %v4789_v24 = vpop.f32.mrf.mxu3  ;;  %v7042_v14 = vld [vmem:[#allocation9 + $0x608] sm:$0xff] }
 0x3bd   : > { %5069 = vmatpush.msrb.mxu1 %v7002_v33  ;;  %5125 = vmatpush.msrb.mxu3 %v7003_v5  ;;  %v7043_v33 = vld [vmem:[#allocation9 + $0x1340] sm:$0xff] }
 0x3be   : > { %5185 = vmatpush.msra.mxu2 %v7004_v20  ;;  %5046 = vmatpush.msra.mxu0 %v7005_v50  ;;  %v7044_v5 = vld [vmem:[#allocation9 + $0x1240] sm:$0xff]  ;;  %v7045_v20 = vld [vmem:[#allocation9 + $0x538] sm:$0xff] }
 0x3bf   : > { %5070 = vmatpush.msrb.mxu1 %v7006_v37  ;;  %5126 = vmatpush.msrb.mxu3 %v7007_v60  ;;  %v7046_v37 = vld [vmem:[#allocation9 + $0x5f8] sm:$0xff]  ;;  %v7047_v60 = vld [vmem:[#allocation9 + $0x1330] sm:$0xff] }
 0x3c0   : > { %5186 = vmatpush.msra.mxu2 %v7008_v44  ;;  %5047 = vmatpush.msra.mxu0 %v7009_v9  ;;  %v7048_v44 = vld [vmem:[#allocation9 + $0x1230] sm:$0xff]  ;;  %v7049_v9 = vld [vmem:[#allocation9 + $0x528] sm:$0xff] }
 0x3c1   : > { %5071 = vmatpush.msrb.mxu1 %v7010_v27  ;;  %5127 = vmatpush.msrb.mxu3 %v7011_v46  ;;  %v7050_v46 = vld [vmem:[#allocation9 + $0x5e8] sm:$0xff] }
 0x3c2   : > { %5072 = vmatmul.f32.vlgmr.msrb.gmra.mxu1 %v8780_v6  ;;  %5187 = vmatpush.msra.mxu2 %v7012_v34  ;;  %v7022_v6 = vld [vmem:[#allocation9 + $0x390] sm:$0xff]  ;;  %v7051_v34 = vld [vmem:[#allocation9 + $0x1320] sm:$0xff] }
 0x3c3   : > { %5156 = vmatpush.msra.mxu1 %v7013_v15  ;;  %5048 = vmatpush.msra.mxu0 %v7014_v62  ;;  %v7052_v15 = vld [vmem:[#allocation9 + $0x1220] sm:$0xff] }
 0x3c4   : > { %5128 = vmatpush.msrb.mxu3 %v7015_v17  ;;  %5188 = vmatpush.msra.mxu2 %v7016_v8  ;;  %v7054_v17 = vld [vmem:[#allocation9 + $0x5d8] sm:$0xff]  ;;  %v7055_v8 = vld [vmem:[#allocation9 + $0x1310] sm:$0xff] }
 0x3c5   : > { %5157 = vmatpush.msra.mxu1 %v7017_v28  ;;  %5049 = vmatpush.msra.mxu0 %v7018_v35  ;;  %v7056_v28 = vld [vmem:[#allocation9 + $0x1210] sm:$0xff]  ;;  %v7057_v35 = vld [vmem:[#allocation9 + $0x508] sm:$0xff] }
 0x3c6   : > { %5129 = vmatpush.msrb.mxu3 %v7019_v42  ;;  %5189 = vmatpush.msra.mxu2 %v7020_v52  ;;  %v4769_v0 = vpop.f32.mrf.mxu2  ;;  %v7058_v42 = vld [vmem:[#allocation9 + $0x5c8] sm:$0xff]  ;;  %v7059_v52 = vld [vmem:[#allocation9 + $0x1300] sm:$0xff] }
 0x3c7   : > { %5158 = vmatpush.msra.mxu1 %v7021_v18  ;;  %5050 = vmatpush.msra.mxu0 %v7022_v6  ;;  %v4749_v22 = vpop.f32.mrf.mxu1  ;;  %v7060_v18 = vld [vmem:[#allocation9 + $0x1200] sm:$0xff]  ;;  %v7061_v6 = vld [vmem:[#allocation9 + $0x4f8] sm:$0xff] }
 0x3c8   : > { %5130 = vmatpush.msrb.mxu3 %v7023_v36  ;;  %5190 = vmatpush.msra.mxu2 %v7024_v25  ;;  %v7062_v36 = vld [vmem:[#allocation9 + $0x5b8] sm:$0xff]  ;;  %v7066_v25 = vld [vmem:[#allocation9 + $0x5a8] sm:$0xff] }
 0x3c9   : > { %5159 = vmatpush.msra.mxu1 %v7025_v10  ;;  %5051 = vmatpush.msra.mxu0 %v7026_v13  ;;  %v7067_v10 = vld [vmem:[#allocation9 + $0x12e0] sm:$0xff] }
 0x3ca   : > { %5131 = vmatpush.msrb.mxu3 %v7027_v30  ;;  %5052 = vmatmul.f32.vlgmr.msra.gmra.mxu0 %v8783_v55  ;;  %v7068_v13 = vld [vmem:[#allocation9 + $0x11e0] sm:$0xff]  ;;  %v7070_v30 = vld [vmem:[#allocation9 + $0x598] sm:$0xff] }
 0x3cb   : > { %5132 = vmatmul.f32.vlgmr.msrb.gmra.mxu3 %v8783_v55  ;;  %5136 = vmatpush.msrb.mxu0 %v7028_v47  ;;  %v7035_v55 = vld [vmem:[#allocation9 + $0x1360] sm:$0xff]  ;;  %v7071_v47 = vld [vmem:[#allocation9 + $0x12d0] sm:$0xff] }
 0x3cc   : > { %5160 = vmatpush.msra.mxu1 %v7029_v32  ;;  %5191 = vmatpush.msra.mxu2 %v7030_v58  ;;  %v7072_v32 = vld [vmem:[#allocation9 + $0x11d0] sm:$0xff]  ;;  %v7073_v58 = vld [vmem:[#allocation9 + $0x4c8] sm:$0xff] }
 0x3cd   : > { %5216 = vmatpush.msra.mxu3 %v7031_v16  ;;  %6198 = vmatmul.msk.f32.vlgmr.msra.gmra.mxu2 %vm2933_vm3, %v8787_v45  ;;  %v7038_v45 = vld [vmem:[#allocation9 + $0x618] sm:$0xff]  ;;  %v7074_v16 = vld [vmem:[#allocation9 + $0x588] sm:$0xff] }
 0x3ce   : > { %5196 = vmatpush.msrb.mxu2 %v7032_v4  ;;  %5137 = vmatpush.msrb.mxu0 %v7033_v11  ;;  %v7076_v4 = vld [vmem:[#allocation9 + $0x11c0] sm:$0xff]  ;;  %v7077_v11 = vld [vmem:[#allocation9 + $0x14f0] sm:$0xff] }
 0x3cf   : > { %5161 = vmatpush.msra.mxu1 %v7034_v1  ;;  %5217 = vmatpush.msra.mxu3 %v7035_v55  ;;  %v4729_v54 = vpop.f32.mrf.mxu0  ;;  %v7078_v1 = vld [vmem:[#allocation9 + $0x4b8] sm:$0xff]  ;;  %v7079_v55 = vld [vmem:[#allocation9 + $0x12b0] sm:$0xff] }
 0x3d0   : > { %5197 = vmatpush.msrb.mxu2 %v7036_v51  ;;  %5138 = vmatpush.msrb.mxu0 %v7037_v41  ;;  %v4750_v2 = vadd.f32 %v4749_v22, %v4729_v54  ;;  %v7080_v22 = vld [vmem:[#allocation9 + $0x11b0] sm:$0xff]  ;;  %v7081_v54 = vld [vmem:[#allocation9 + $0x14e0] sm:$0xff] }
 0x3d1   : > { %5162 = vmatpush.msra.mxu1 %v7038_v45  ;;  %5218 = vmatpush.msra.mxu3 %v7039_v49  ;;  %v7083_v51 = vld [vmem:[#allocation9 + $0x12a0] sm:$0xff]  ;;  %v7087_v45 = vld [vmem:[#allocation9 + $0x1290] sm:$0xff] }
 0x3d2   : > { %5198 = vmatpush.msrb.mxu2 %v7040_v43  ;;  %5139 = vmatpush.msrb.mxu0 %v7041_v57  ;;  %v4770_v31 = vadd.f32 %v4769_v0, %v4750_v2  ;;  %v7084_v41 = vld [vmem:[#allocation9 + $0x11a0] sm:$0xff]  ;;  %v7085_v2 = vld [vmem:[#allocation9 + $0x14d0] sm:$0xff]  ;;  %v7090_v43 = vld [vmem:[#allocation9 + $0x488] sm:$0xff] }
 0x3d3   : > { %5163 = vmatpush.msra.mxu1 %v7042_v14  ;;  %5219 = vmatpush.msra.mxu3 %v7043_v33  ;;  %v7088_v49 = vld [vmem:[#allocation9 + $0x1190] sm:$0xff]  ;;  %v7089_v0 = vld [vmem:[#allocation9 + $0x14c0] sm:$0xff] }
 0x3d4   : > { %5199 = vmatpush.msrb.mxu2 %v7044_v5  ;;  %5140 = vmatpush.msrb.mxu0 %v7045_v20  ;;  %v4790_v50 = vadd.f32 %v4789_v24, %v4770_v31  ;;  %v7091_v57 = vld [vmem:[#allocation9 + $0x1280] sm:$0xff]  ;;  %v7094_v14 = vld [vmem:[#allocation9 + $0x1470] sm:$0xff]  ;;  %v7097_v5 = vld [vmem:[#allocation9 + $0x1378] sm:$0xff] }
 0x3d5   : > { %5164 = vmatpush.msra.mxu1 %v7046_v37  ;;  %5220 = vmatpush.msra.mxu3 %v7047_v60  ;;  %v7092_v31 = vld [vmem:[#allocation2 + $0x8] sm:$0x7f]  ;;  %v7095_v33 = vld [vmem:[#allocation9 + $0x14b0] sm:$0xff] }
 0x3d6   : > { %5200 = vmatpush.msrb.mxu2 %v7048_v44  ;;  %5141 = vmatpush.msrb.mxu0 %v7049_v9  ;;  %v4872_v27 = vadd.f32 %v4790_v50, %v4613_v21  ;;  %v7093_v24 = vld [vmem:[#allocation9 + $0x1180] sm:$0xff]  ;;  %v7096_v21 = vld [vmem:[#allocation9 + $0x1478] sm:$0xff]  ;;  %v4809_v50 = vpop.f32.mrf.mxu3  ;;  %v7100_v60 = vld [vmem:[#allocation9 + $0x1468] sm:$0xff] }
 0x3d7   : > { %5165 = vmatpush.msra.mxu1 %v7050_v46  ;;  %5221 = vmatpush.msra.mxu3 %v7051_v34  ;;  %v7098_v20 = vld [vmem:[#allocation9 + $0x1460] sm:$0xff]  ;;  %v7101_v9 = vld [vmem:[#allocation9 + $0x1368] sm:$0xff]  ;;  %v7103_v34 = vld [vmem:[#allocation9 + $0x1490] sm:$0xff] }
 0x3d8   : > { %5201 = vmatpush.msrb.mxu2 %v7052_v15  ;;  %5142 = vmatpush.msrb.mxu0 %v7053_v23  ;;  %v8884_v62 = vmax.f32 %v4373_v61, %v4872_v27  ;;  %v7065_v61 = vld [vmem:[#allocation9 + $0x4e8] sm:$0xff]  ;;  %v7099_v37 = vld [vmem:[#allocation9 + $0x14a0] sm:$0xff]  ;;  %v7102_v27 = vld [vmem:[#allocation9 + $0x1450] sm:$0xff] }
 0x3d9   : > { %5166 = vmatpush.msra.mxu1 %v7054_v17  ;;  %5222 = vmatpush.msra.mxu3 %v7055_v8  ;;  %v7104_v15 = vld [vmem:[#allocation9 + $0x1458] sm:$0xff]  ;;  %v7106_v8 = vld [vmem:[#allocation9 + $0x1440] sm:$0xff] }
 0x3da   : > { %5202 = vmatpush.msrb.mxu2 %v7056_v28  ;;  %5143 = vmatpush.msrb.mxu0 %v7057_v35  ;;  %v7105_v17 = vld [vmem:[#allocation9 + $0x1358] sm:$0xff]  ;;  %v4869_v35 = vpop.f32.mrf.mxu2 }
 0x3db   : > { %5167 = vmatpush.msra.mxu1 %v7058_v42  ;;  %5223 = vmatpush.msra.mxu3 %v7059_v52  ;;  %v7107_v42 = vld [vmem:[#allocation9 + $0x1480] sm:$0xff]  ;;  %v7108_v52 = vld [vmem:[#allocation9 + $0x1448] sm:$0xff] }
 0x3dc   : > { %5203 = vmatpush.msrb.mxu2 %v7060_v18  ;;  %5144 = vmatpush.msrb.mxu0 %v7061_v6  ;;  %v7109_v18 = vld [vmem:[#allocation9 + $0x1348] sm:$0xff] }
 0x3dd   : > { %5168 = vmatpush.msra.mxu1 %v7062_v36  ;;  %5224 = vmatpush.msra.mxu3 %v7063_v12  ;;  %v7110_v36 = vld [vmem:[#allocation9 + $0x1278] sm:$0xff]  ;;  %v7111_v12 = vld [vmem:[#allocation9 + $0x1430] sm:$0xff] }
 0x3de   : > { %5204 = vmatpush.msrb.mxu2 %v7064_v39  ;;  %5145 = vmatpush.msrb.mxu0 %v7065_v61  ;;  %v7112_v39 = vld [vmem:[#allocation9 + $0x1438] sm:$0xff] }
 0x3df   : > { %5169 = vmatpush.msra.mxu1 %v7066_v25  ;;  %5225 = vmatpush.msra.mxu3 %v7067_v10  ;;  %v7113_v61 = vld [vmem:[#allocation9 + $0x1338] sm:$0xff]  ;;  %v7114_v10 = vld [vmem:[#allocation9 + $0x1268] sm:$0xff] }
 0x3e0   : > { %5205 = vmatpush.msrb.mxu2 %v7068_v13  ;;  %5146 = vmatpush.msrb.mxu0 %v7069_v40  ;;  %v7115_v13 = vld [vmem:[#allocation9 + $0x1420] sm:$0xff]  ;;  %v7116_v40 = vld [vmem:[#allocation9 + $0x1428] sm:$0xff] }
 0x3e1   : > { %5170 = vmatpush.msra.mxu1 %v7070_v30  ;;  %5226 = vmatpush.msra.mxu3 %v7071_v47  ;;  %v7117_v30 = vld [vmem:[#allocation9 + $0x1328] sm:$0xff] }
 0x3e2   : > { %5206 = vmatpush.msrb.mxu2 %v7072_v32  ;;  %5147 = vmatpush.msrb.mxu0 %v7073_v58  ;;  %v7118_v32 = vld [vmem:[#allocation9 + $0x1258] sm:$0xff]  ;;  %v7119_v58 = vld [vmem:[#allocation9 + $0x1410] sm:$0xff] }
 0x3e3   : > { %5171 = vmatpush.msra.mxu1 %v7074_v16  ;;  %5227 = vmatpush.msra.mxu3 %v7075_v63  ;;  %v7120_v16 = vld [vmem:[#allocation9 + $0x1418] sm:$0xff]  ;;  %v7122_v63 = vld [vmem:[#allocation9 + $0x1248] sm:$0xff] }
 0x3e4   : > { %5172 = vmatmul.f32.vlgmr.msra.gmra.mxu1 %v8800_v59  ;;  %5207 = vmatpush.msrb.mxu2 %v7076_v4  ;;  %v7086_v59 = vld [vmem:[#allocation9 + $0x498] sm:$0xff]  ;;  %v7123_v4 = vld [vmem:[#allocation9 + $0x1400] sm:$0xff] }
 0x3e5   : > { %5264 = vmatpush.msrb.mxu1 %v7077_v11  ;;  %5148 = vmatpush.msrb.mxu0 %v7078_v1  ;;  %v7124_v11 = vld [vmem:[#allocation9 + $0x1408] sm:$0xff] }
 0x3e6   : > { %5228 = vmatpush.msra.mxu3 %v7079_v55  ;;  %5208 = vmatpush.msrb.mxu2 %v7080_v22  ;;  %v7125_v1 = vld [vmem:[#allocation9 + $0x1308] sm:$0xff]  ;;  %v7126_v55 = vld [vmem:[#allocation9 + $0x1238] sm:$0xff] }
 0x3e7   : > { %5265 = vmatpush.msrb.mxu1 %v7081_v54  ;;  %5149 = vmatpush.msrb.mxu0 %v7082_v29  ;;  %v7130_v22 = vld [vmem:[#allocation9 + $0x1228] sm:$0xff]  ;;  %v7131_v54 = vld [vmem:[#allocation9 + $0x13e0] sm:$0xff] }
 0x3e8   : > { %5229 = vmatpush.msra.mxu3 %v7083_v51  ;;  %5209 = vmatpush.msrb.mxu2 %v7084_v41  ;;  %v7132_v29 = vld [vmem:[#allocation9 + $0x13e8] sm:$0xff]  ;;  %v7134_v41 = vld [vmem:[#allocation9 + $0x1218] sm:$0xff] }
 0x3e9   : > { %5266 = vmatpush.msrb.mxu1 %v7085_v2  ;;  %5150 = vmatpush.msrb.mxu0 %v7086_v59  ;;  %v4849_v23 = vpop.f32.mrf.mxu1  ;;  %v7133_v51 = vld [vmem:[#allocation9 + $0x12e8] sm:$0xff]  ;;  %v7135_v2 = vld [vmem:[#allocation9 + $0x13d0] sm:$0xff]  ;;  %v7136_v59 = vld [vmem:[#allocation9 + $0x13d8] sm:$0xff] }
 0x3ea   : > { %5230 = vmatpush.msra.mxu3 %v7087_v45  ;;  %5210 = vmatpush.msrb.mxu2 %v7088_v49  ;;  %v7137_v45 = vld [vmem:[#allocation9 + $0x12d8] sm:$0xff]  ;;  %v7138_v49 = vld [vmem:[#allocation9 + $0x1208] sm:$0xff] }
 0x3eb   : > { %5267 = vmatpush.msrb.mxu1 %v7089_v0  ;;  %5151 = vmatpush.msrb.mxu0 %v7090_v43  ;;  %v7139_v0 = vld [vmem:[#allocation9 + $0x13c0] sm:$0xff]  ;;  %v7140_v43 = vld [vmem:[#allocation9 + $0x13c8] sm:$0xff] }
 0x3ec   : > { %5231 = vmatpush.msra.mxu3 %v7091_v57  ;;  %5152 = vmatmul.f32.vlgmr.msrb.gmra.mxu0 %v7092_v31  ;;  %v7141_v57 = vld [vmem:[#allocation9 + $0x12c8] sm:$0xff]  ;;  %v7142_v31 = vld [vmem:[#allocation9 + $0x11f8] sm:$0xff] }
 0x3ed   : > { %5211 = vmatpush.msrb.mxu2 %v7093_v24  ;;  %5232 = vmatmul.f32.vlgmr.msra.gmra.mxu3 %v8832_v19  ;;  %v7143_v24 = vld [vmem:[#allocation9 + $0x13b0] sm:$0xff] }
 0x3ee   : > { %5236 = vmatpush.msra.mxu0 %v7094_v14  ;;  %5268 = vmatpush.msrb.mxu1 %v7095_v33  ;;  %v7144_v14 = vld [vmem:[#allocation9 + $0x13b8] sm:$0xff] }
 0x3ef   : > { %5316 = vmatpush.msrb.mxu3 %v7096_v21  ;;  %5212 = vmatmul.f32.vlgmr.msrb.gmra.mxu2 %v8835_v26  ;;  %v7145_v33 = vld [vmem:[#allocation9 + $0x12b8] sm:$0xff]  ;;  %v7146_v21 = vld [vmem:[#allocation9 + $0x11e8] sm:$0xff] }
 0x3f0   : > { %5296 = vmatpush.msra.mxu2 %v7097_v5  ;;  %5237 = vmatpush.msra.mxu0 %v7098_v20  ;;  %v7147_v5 = vld [vmem:[#allocation9 + $0x13a0] sm:$0xff]  ;;  %v7148_v20 = vld [vmem:[#allocation9 + $0x13a8] sm:$0xff] }
 0x3f1   : > { %5269 = vmatpush.msrb.mxu1 %v7099_v37  ;;  %5317 = vmatpush.msrb.mxu3 %v7100_v60  ;;  %v4829_v44 = vpop.f32.mrf.mxu0  ;;  %v7150_v37 = vld [vmem:[#allocation9 + $0x11d8] sm:$0xff]  ;;  %v7151_v60 = vld [vmem:[#allocation9 + $0x1390] sm:$0xff] }
 0x3f2   : > { %5297 = vmatpush.msra.mxu2 %v7101_v9  ;;  %5238 = vmatpush.msra.mxu0 %v7102_v27  ;;  %v4830_v46 = vadd.f32 %v4829_v44, %v4809_v50  ;;  %v7149_v50 = vld [vmem:[#allocation9 + $0x12a8] sm:$0xff]  ;;  %v7152_v44 = vld [vmem:[#allocation9 + $0x1398] sm:$0xff] }
 0x3f3   : > { %5270 = vmatpush.msrb.mxu1 %v7103_v34  ;;  %5318 = vmatpush.msrb.mxu3 %v7104_v15  ;;  %v7153_v9 = vld [vmem:[#allocation9 + $0x1298] sm:$0xff]  ;;  %v7154_v27 = vld [vmem:[#allocation9 + $0x11c8] sm:$0xff] }
 0x3f4   : > { %5298 = vmatpush.msra.mxu2 %v7105_v17  ;;  %5239 = vmatpush.msra.mxu0 %v7106_v8  ;;  %v4850_v28 = vadd.f32 %v4849_v23, %v4830_v46  ;;  %v7155_v46 = vld [vmem:[#allocation9 + $0x1380] sm:$0xff]  ;;  %v7156_v34 = vld [vmem:[#allocation9 + $0x1388] sm:$0xff]  ;;  %v7157_v15 = vld [vmem:[#allocation9 + $0x11b8] sm:$0xff] }
 0x3f5   : > { %5271 = vmatpush.msrb.mxu1 %v7107_v42  ;;  %5319 = vmatpush.msrb.mxu3 %v7108_v52  ;;  %v7158_v23 = vld [vmem:[#allocation9 + $0x1288] sm:$0xff]  ;;  %v7159_v17 = vld [vmem:[#allocation9 + $0x14f8] sm:$0xff] }
 0x3f6   : > { %6199 = vmatmul.msk.f32.vlgmr.msrb.gmra.mxu1 %vm2933_vm3, %v8820_v53  ;;  %5299 = vmatpush.msra.mxu2 %v7109_v18  ;;  %v4870_v6 = vadd.f32 %v4869_v35, %v4850_v28  ;;  %v7160_v8 = vld [vmem:[#allocation9 + $0x11a8] sm:$0xff]  ;;  %v7162_v35 = vld [vmem:[#allocation9 + $0x1198] sm:$0xff] }
 0x3f7   : > { %5276 = vmatpush.msra.mxu1 %v7110_v36  ;;  %5240 = vmatpush.msra.mxu0 %v7111_v12  ;;  %v7161_v28 = vld [vmem:[#allocation9 + $0x14e8] sm:$0xff]  ;;  %v7163_v42 = vld [vmem:[#allocation9 + $0x14d8] sm:$0xff] }
 0x3f8   : > { %5320 = vmatpush.msrb.mxu3 %v7112_v39  ;;  %5300 = vmatpush.msra.mxu2 %v7113_v61  ;;  %v4873_v25 = vadd.f32 %v4870_v6, %v8868_v56  ;;  %v7121_v56 = vld [vmem:[#allocation9 + $0x1318] sm:$0xff]  ;;  %v7164_v52 = vld [vmem:[#allocation9 + $0x1188] sm:$0xff] }
 0x3f9   : > { %5277 = vmatpush.msra.mxu1 %v7114_v10  ;;  %5241 = vmatpush.msra.mxu0 %v7115_v13  ;;  %v7165_v18 = vld [vmem:[#allocation9 + $0x14c8] sm:$0xff]  ;;  %v7166_v6 = vld [vmem:[#allocation9 + $0x14b8] sm:$0xff] }
 0x3fa   : > { %5321 = vmatpush.msrb.mxu3 %v7116_v40  ;;  %5301 = vmatpush.msra.mxu2 %v7117_v30  ;;  %v8895_v47 = vmax.f32 %v4374_v38, %v4873_v25  ;;  %v7129_v38 = vld [vmem:[#allocation9 + $0x12f8] sm:$0xff]  ;;  %v6215_v39 = vld [vmem:[%s9610_s5 + $0x150] sm:$0xff]  ;;  %v6214_v61 = vld [vmem:[%s9610_s5 + $0x148] sm:$0xff] }
 0x3fb   : > { %5278 = vmatpush.msra.mxu1 %v7118_v32  ;;  %5242 = vmatpush.msra.mxu0 %v7119_v58  ;;  %v7168_v36 = vld [vmem:[#allocation9 + $0x1498] sm:$0xff]  ;;  %v5384_v10 = vld [vmem:[%s9610_s5 + $0x70] sm:$0xff]  ;;  %v5383_v40 = vld [vmem:[%s9610_s5 + $0x68] sm:$0xff] }
 0x3fc   : > { %5322 = vmatpush.msrb.mxu3 %v7120_v16  ;;  %5302 = vmatpush.msra.mxu2 %v7121_v56  ;;  %v6216_v12 = vld [vmem:[%s9610_s5 + $0x158] sm:$0xff]  ;;  %v6211_v13 = vld [vmem:[%s9610_s5 + $0x130] sm:$0xff]  ;;  %v6210_v30 = vld [vmem:[%s9610_s5 + $0x128] sm:$0xff] }
 0x3fd   : > { %5279 = vmatpush.msra.mxu1 %v7122_v63  ;;  %5243 = vmatpush.msra.mxu0 %v7123_v4  ;;  %v6212_v25 = vld [vmem:[%s9610_s5 + $0x138] sm:$0xff]  ;;  %v5382_v32 = vld [vmem:[%s9610_s5 + $0x60] sm:$0xff]  ;;  %v5380_v63 = vld [vmem:[%s9610_s5 + $0x50] sm:$0xff] }
 0x3fe   : > { %5323 = vmatpush.msrb.mxu3 %v7124_v11  ;;  %5303 = vmatpush.msra.mxu2 %v7125_v1  ;;  %v6209_v58 = vld [vmem:[%s9610_s5 + $0x120] sm:$0xff]  ;;  %v5381_v16 = vld [vmem:[%s9610_s5 + $0x58] sm:$0xff]  ;;  %v6207_v4 = vld [vmem:[%s9610_s5 + $0x110] sm:$0xff] }
 0x3ff   : > { %5280 = vmatpush.msra.mxu1 %v7126_v55  ;;  %5244 = vmatpush.msra.mxu0 %v7127_v48  ;;  %v6208_v56 = vld [vmem:[%s9610_s5 + $0x118] sm:$0xff]  ;;  %v5379_v11 = vld [vmem:[%s9610_s5 + $0x48] sm:$0xff]  ;;  %v5378_v55 = vld [vmem:[%s9610_s5 + $0x40] sm:$0xff] }
 0x400   : > { %5324 = vmatpush.msrb.mxu3 %v7128_v3  ;;  %5304 = vmatpush.msra.mxu2 %v7129_v38  ;;  %v6206_v1 = vld [vmem:[%s9610_s5 + $0x108] sm:$0xff]  ;;  %v6228_v48 = vld [vmem:[%s9610_s5 + $0x1b8] sm:$0xff]  ;;  %v6205_v3 = vld [vmem:[%s9610_s5 + $0x100] sm:$0xff] }
 0x401   : > { %5281 = vmatpush.msra.mxu1 %v7130_v22  ;;  %5245 = vmatpush.msra.mxu0 %v7131_v54  ;;  %v5377_v38 = vld [vmem:[%s9610_s5 + $0x38] sm:$0xff]  ;;  %v6227_v22 = vld [vmem:[%s9610_s5 + $0x1b0] sm:$0xff] }
 0x402   : > { %5325 = vmatpush.msrb.mxu3 %v7132_v29  ;;  %5305 = vmatpush.msra.mxu2 %v7133_v51  ;;  %v6204_v54 = vld [vmem:[%s9610_s5 + $0xf8] sm:$0xff]  ;;  %v5376_v29 = vld [vmem:[%s9610_s5 + $0x30] sm:$0xff]  ;;  %v6226_v51 = vld [vmem:[%s9610_s5 + $0x1a8] sm:$0xff] }
 0x403   : > { %5282 = vmatpush.msra.mxu1 %v7134_v41  ;;  %5246 = vmatpush.msra.mxu0 %v7135_v2  ;;  %v6203_v41 = vld [vmem:[%s9610_s5 + $0xf0] sm:$0xff]  ;;  %v5375_v2 = vld [vmem:[%s9610_s5 + $0x28] sm:$0xff] }
 0x404   : > { %5326 = vmatpush.msrb.mxu3 %v7136_v59  ;;  %5306 = vmatpush.msra.mxu2 %v7137_v45  ;;  %v6225_v59 = vld [vmem:[%s9610_s5 + $0x1a0] sm:$0xff]  ;;  %v5397_v45 = vld [vmem:[%s9610_s5 + $0xd8] sm:$0xff] }
 0x405   : > { %5283 = vmatpush.msra.mxu1 %v7138_v49  ;;  %5247 = vmatpush.msra.mxu0 %v7139_v0  ;;  %v6202_v49 = vld [vmem:[%s9610_s5 + $0xe8] sm:$0xff]  ;;  %v5374_v0 = vld [vmem:[%s9610_s5 + $0x20] sm:$0xff] }
 0x406   : > { %5327 = vmatpush.msrb.mxu3 %v7140_v43  ;;  %5307 = vmatpush.msra.mxu2 %v7141_v57  ;;  %v5396_v43 = vld [vmem:[%s9610_s5 + $0xd0] sm:$0xff]  ;;  %v6224_v57 = vld [vmem:[%s9610_s5 + $0x198] sm:$0xff] }
 0x407   : > { %5284 = vmatpush.msra.mxu1 %v7142_v31  ;;  %5248 = vmatpush.msra.mxu0 %v7143_v24  ;;  %v6201_v31 = vld [vmem:[%s9610_s5 + $0xe0] sm:$0xff]  ;;  %v5373_v24 = vld [vmem:[%s9610_s5 + $0x18] sm:$0xff] }
 0x408   : > { %5328 = vmatpush.msrb.mxu3 %v7144_v14  ;;  %5308 = vmatpush.msra.mxu2 %v7145_v33  ;;  %v5395_v14 = vld [vmem:[%s9610_s5 + $0xc8] sm:$0xff]  ;;  %v6223_v33 = vld [vmem:[%s9610_s5 + $0x190] sm:$0xff] }
 0x409   : > { %5285 = vmatpush.msra.mxu1 %v7146_v21  ;;  %5249 = vmatpush.msra.mxu0 %v7147_v5  ;;  %v6275_v21 = vld [vmem:[%s9610_s5 + $0x318] sm:$0xff]  ;;  %v5372_v5 = vld [vmem:[%s9610_s5 + $0x10] sm:$0xff] }
 0x40a   : > { %5329 = vmatpush.msrb.mxu3 %v7148_v20  ;;  %5309 = vmatpush.msra.mxu2 %v7149_v50  ;;  %v5394_v20 = vld [vmem:[%s9610_s5 + $0xc0] sm:$0xff]  ;;  %v6222_v50 = vld [vmem:[%s9610_s5 + $0x188] sm:$0xff] }
 0x40b   : > { %5286 = vmatpush.msra.mxu1 %v7150_v37  ;;  %5250 = vmatpush.msra.mxu0 %v7151_v60  ;;  %v6274_v37 = vld [vmem:[%s9610_s5 + $0x310] sm:$0xff]  ;;  %v5371_v60 = vld [vmem:[%s9610_s5 + $0x8] sm:$0xff] }
 0x40c   : > { %5330 = vmatpush.msrb.mxu3 %v7152_v44  ;;  %5310 = vmatpush.msra.mxu2 %v7153_v9  ;;  %v5393_v44 = vld [vmem:[%s9610_s5 + $0xb8] sm:$0xff]  ;;  %v6221_v9 = vld [vmem:[%s9610_s5 + $0x180] sm:$0xff] }
 0x40d   : > { %5287 = vmatpush.msra.mxu1 %v7154_v27  ;;  %5251 = vmatpush.msra.mxu0 %v7155_v46  ;;  %v6273_v27 = vld [vmem:[%s9610_s5 + $0x308] sm:$0xff]  ;;  %v5370_v46 = vld [vmem:[%s9610_s5] sm:$0xff] }
 0x40e   : > { %5331 = vmatpush.msrb.mxu3 %v7156_v34  ;;  %5252 = vmatmul.f32.vlgmr.msra.gmra.mxu0 %v8829_v7  ;;  %v5392_v34 = vld [vmem:[%s9610_s5 + $0xb0] sm:$0xff] }
 0x40f   : > { %5288 = vmatpush.msra.mxu1 %v7157_v15  ;;  %5311 = vmatpush.msra.mxu2 %v7158_v23  ;;  %v6220_v15 = vld [vmem:[%s9610_s5 + $0x178] sm:$0xff]  ;;  %v6272_v23 = vld [vmem:[%s9610_s5 + $0x300] sm:$0xff] }
 0x410   : > { %5332 = vmatmul.f32.vlgmr.msrb.gmra.mxu3 %v8829_v7  ;;  %5344 = vmatpush.msrb.mxu0 %v7159_v17  ;;  %v7167_v7 = vld [vmem:[#allocation9 + $0x14a8] sm:$0xff]  ;;  %v6287_v17 = vld [vmem:[%s9610_s5 + $0x378] sm:$0xff] }
 0x411   : > { %5312 = vmatmul.f32.vlgmr.msra.gmra.mxu2 %v8832_v19  ;;  %5289 = vmatpush.msra.mxu1 %v7160_v8  ;;  %v7169_v19 = vld [vmem:[#allocation9 + $0x1488] sm:$0xff] }
 0x412   : > { %5345 = vmatpush.msrb.mxu0 %v7161_v28  ;;  %5501 = vmatpush.msra.mxu3 %v5397_v45  ;;  %v5391_v8 = vld [vmem:[%s9610_s5 + $0xa8] sm:$0xff]  ;;  %v6219_v28 = vld [vmem:[%s9610_s5 + $0x170] sm:$0xff] }
 0x413   : > { %5290 = vmatpush.msra.mxu1 %v7162_v35  ;;  %v6271_v35 = vld [vmem:[%s9610_s5 + $0x2f8] sm:$0xff]  ;;  %v6241_v45 = vld [vmem:[%s9610_s5 + $0x210] sm:$0xff] }
 0x414   : > { %5346 = vmatpush.msrb.mxu0 %v7163_v42  ;;  %5502 = vmatpush.msra.mxu3 %v5396_v43  ;;  %v6286_v42 = vld [vmem:[%s9610_s5 + $0x370] sm:$0xff]  ;;  %v6263_v43 = vld [vmem:[%s9610_s5 + $0x2b8] sm:$0xff] }
 0x415   : > { %5291 = vmatpush.msra.mxu1 %v7164_v52  ;;  %v5390_v52 = vld [vmem:[%s9610_s5 + $0xa0] sm:$0xff] }
 0x416   : > { %5347 = vmatpush.msrb.mxu0 %v7165_v18  ;;  %5292 = vmatmul.f32.vlgmr.msra.gmra.mxu1 %v8835_v26  ;;  %v5385_v26 = vld [vmem:[%s9610_s5 + $0x78] sm:$0xff]  ;;  %v6218_v18 = vld [vmem:[%s9610_s5 + $0x168] sm:$0xff] }
 0x417   : > { %5477 = vmatpush.msrb.mxu2 %v5385_v26  ;;  %5459 = vmatpush.msrb.mxu1 %v6228_v48  ;;  %v6246_v26 = vld [vmem:[%s9610_s5 + $0x238] sm:$0xff] }
 0x418   : > { %5348 = vmatpush.msrb.mxu0 %v7166_v6  ;;  %5503 = vmatpush.msra.mxu3 %v5395_v14  ;;  %v6270_v6 = vld [vmem:[%s9610_s5 + $0x2f0] sm:$0xff] }
 0x419   : > { %5478 = vmatpush.msrb.mxu2 %v5384_v10  ;;  %5460 = vmatpush.msrb.mxu1 %v6227_v22  ;;  %v6268_v10 = vld [vmem:[%s9610_s5 + $0x2e0] sm:$0xff]  ;;  %v6265_v22 = vld [vmem:[%s9610_s5 + $0x2c8] sm:$0xff]  ;;  %v6262_v14 = vld [vmem:[%s9610_s5 + $0x2b0] sm:$0xff] }
 0x41a   : > { %5349 = vmatpush.msrb.mxu0 %v7167_v7  ;;  %5504 = vmatpush.msra.mxu3 %v5394_v20  ;;  %v6285_v7 = vld [vmem:[%s9610_s5 + $0x368] sm:$0xff] }
 0x41b   : > { %5479 = vmatpush.msrb.mxu2 %v5383_v40  ;;  %5461 = vmatpush.msrb.mxu1 %v6226_v51  ;;  %v6245_v40 = vld [vmem:[%s9610_s5 + $0x230] sm:$0xff] }
 0x41c   : > { %5350 = vmatpush.msrb.mxu0 %v7168_v36  ;;  %5505 = vmatpush.msra.mxu3 %v5393_v44  ;;  %v5389_v36 = vld [vmem:[%s9610_s5 + $0x98] sm:$0xff]  ;;  %v6257_v51 = vld [vmem:[%s9610_s5 + $0x290] sm:$0xff] }
 0x41d   : > { %5480 = vmatpush.msrb.mxu2 %v5382_v32  ;;  %5462 = vmatpush.msrb.mxu1 %v6225_v59  ;;  %v9116_v32 = vpop.f32.mrf.mxu1  ;;  %v6238_v44 = vld [vmem:[%s9610_s5 + $0x1f8] sm:$0xff] }
 0x41e   : > { %5351 = vmatpush.msrb.mxu0 %v7169_v19  ;;  %5506 = vmatpush.msra.mxu3 %v5392_v34  ;;  %v6217_v19 = vld [vmem:[%s9610_s5 + $0x160] sm:$0xff] }
 0x41f   : > { %6200 = vmatmul.msk.f32.vlgmr.msrb.gmra.mxu0 %vm2933_vm3, %v8820_v53  ;;  %v6213_v53 = vld [vmem:[%s9610_s5 + $0x140] sm:$0xff]  ;;  %5481 = vmatpush.msrb.mxu2 %v5381_v16  ;;  %v6267_v16 = vld [vmem:[%s9610_s5 + $0x2d8] sm:$0xff] }
 0x420   : > { %5435 = vmatpush.msra.mxu0 %v6216_v12  ;;  %5463 = vmatpush.msrb.mxu1 %v6224_v57  ;;  %v6269_v12 = vld [vmem:[%s9610_s5 + $0x2e8] sm:$0xff]  ;;  %v6278_v57 = vld [vmem:[%s9610_s5 + $0x330] sm:$0xff] }
 0x421   : > { %5482 = vmatpush.msrb.mxu2 %v5380_v63  ;;  %5507 = vmatpush.msra.mxu3 %v5391_v8  ;;  %v6244_v63 = vld [vmem:[%s9610_s5 + $0x228] sm:$0xff] }
 0x422   : > { %5436 = vmatpush.msra.mxu0 %v6215_v39  ;;  %5464 = vmatpush.msrb.mxu1 %v6223_v33  ;;  %v6284_v39 = vld [vmem:[%s9610_s5 + $0x360] sm:$0xff]  ;;  %v6277_v33 = vld [vmem:[%s9610_s5 + $0x328] sm:$0xff] }
 0x423   : > { %5483 = vmatpush.msrb.mxu2 %v5379_v11  ;;  %5508 = vmatpush.msra.mxu3 %v5390_v52  ;;  %v6266_v11 = vld [vmem:[%s9610_s5 + $0x2d0] sm:$0xff] }
 0x424   : > { %5437 = vmatpush.msra.mxu0 %v6214_v61  ;;  %5465 = vmatpush.msrb.mxu1 %v6222_v50  ;;  %v9098_v61 = vpop.f32.mrf.mxu3  ;;  %v6254_v50 = vld [vmem:[%s9610_s5 + $0x278] sm:$0xff] }
 0x425   : > { %5484 = vmatpush.msrb.mxu2 %v5378_v55  ;;  %5509 = vmatpush.msra.mxu3 %v5389_v36  ;;  %v6234_v36 = vld [vmem:[%s9610_s5 + $0x1d8] sm:$0xff] }
 0x426   : > { %5438 = vmatpush.msra.mxu0 %v6213_v53  ;;  %5466 = vmatpush.msrb.mxu1 %v6221_v9  ;;  %v9100_v53 = vpop.f32.mrf.mxu2  ;;  %v6253_v9 = vld [vmem:[%s9610_s5 + $0x270] sm:$0xff] }
 0x427   : > { %5485 = vmatpush.msrb.mxu2 %v5377_v38  ;;  %v6258_v38 = vld [vmem:[%s9610_s5 + $0x298] sm:$0xff] }
 0x428   : > { %5439 = vmatpush.msra.mxu0 %v6212_v25  ;;  %5467 = vmatpush.msrb.mxu1 %v6220_v15  ;;  %v5388_v25 = vld [vmem:[%s9610_s5 + $0x90] sm:$0xff] }
 0x429   : > { %5486 = vmatpush.msrb.mxu2 %v5376_v29  ;;  %5510 = vmatpush.msra.mxu3 %v5388_v25  ;;  %v6242_v29 = vld [vmem:[%s9610_s5 + $0x218] sm:$0xff]  ;;  %v6237_v15 = vld [vmem:[%s9610_s5 + $0x1f0] sm:$0xff]  ;;  %v6232_v25 = vld [vmem:[%s9610_s5 + $0x1c8] sm:$0xff] }
 0x42a   : > { %5440 = vmatpush.msra.mxu0 %v6211_v13  ;;  %5468 = vmatpush.msrb.mxu1 %v6219_v28  ;;  %v6283_v13 = vld [vmem:[%s9610_s5 + $0x358] sm:$0xff]  ;;  %v6236_v28 = vld [vmem:[%s9610_s5 + $0x1e8] sm:$0xff] }
 0x42b   : > { %5487 = vmatpush.msrb.mxu2 %v5375_v2  ;;  %v6279_v2 = vld [vmem:[%s9610_s5 + $0x338] sm:$0xff] }
 0x42c   : > { %5441 = vmatpush.msra.mxu0 %v6210_v30  ;;  %5469 = vmatpush.msrb.mxu1 %v6218_v18  ;;  %v9114_v30 = vpop.f32.mrf.mxu0  ;;  %v9139_v55 = vpop.f32.mrf.mxu3  ;;  %v6235_v18 = vld [vmem:[%s9610_s5 + $0x1e0] sm:$0xff] }
 0x42d   : > { %5488 = vmatpush.msrb.mxu2 %v5374_v0  ;;  %v9175_v0 = vpop.f32.mrf.mxu1 }
 0x42e   : > { %5442 = vmatpush.msra.mxu0 %v6209_v58  ;;  %5470 = vmatpush.msrb.mxu1 %v6217_v19  ;;  %v5387_v58 = vld [vmem:[%s9610_s5 + $0x88] sm:$0xff]  ;;  %v9141_v48 = vpop.f32.mrf.mxu2  ;;  %v6249_v19 = vld [vmem:[%s9610_s5 + $0x250] sm:$0xff] }
 0x42f   : > { %5489 = vmatpush.msrb.mxu2 %v5373_v24  ;;  %5511 = vmatpush.msra.mxu3 %v5387_v58  ;;  %v6255_v24 = vld [vmem:[%s9610_s5 + $0x280] sm:$0xff] }
 0x430   : > { %5443 = vmatpush.msra.mxu0 %v6208_v56  ;;  %5551 = vmatpush.msra.mxu1 %v6246_v26  ;;  %v6282_v56 = vld [vmem:[%s9610_s5 + $0x350] sm:$0xff] }
 0x431   : > { %5490 = vmatpush.msrb.mxu2 %v5372_v5  ;;  %v6233_v26 = vld [vmem:[%s9610_s5 + $0x1d0] sm:$0xff] }
 0x432   : > { %5444 = vmatpush.msra.mxu0 %v6207_v4  ;;  %5552 = vmatpush.msra.mxu1 %v6245_v40  ;;  %v5386_v4 = vld [vmem:[%s9610_s5 + $0x80] sm:$0xff] }
 0x433   : > { %5491 = vmatpush.msrb.mxu2 %v5371_v60  ;;  %5512 = vmatpush.msra.mxu3 %v5386_v4  ;;  %v6276_v60 = vld [vmem:[%s9610_s5 + $0x320] sm:$0xff] }
 0x434   : > { %5445 = vmatpush.msra.mxu0 %v6206_v1  ;;  %5553 = vmatpush.msra.mxu1 %v6244_v63  ;;  %v6281_v1 = vld [vmem:[%s9610_s5 + $0x348] sm:$0xff]  ;;  %v9167_v59 = vpop.f32.mrf.mxu0  ;;  %v9198_v5 = vpop.f32.mrf.mxu3 }
 0x435   : > { %5492 = vmatpush.msrb.mxu2 %v5370_v46  ;;  %5575 = vmatpush.msrb.mxu3 %v6258_v38  ;;  %v4914_v46 = vadd.f32 %v9098_v61, %v9100_v53  ;;  %v6248_v61 = vld [vmem:[%s9610_s5 + $0x248] sm:$0xff] }
 0x436   : > { %5446 = vmatpush.msra.mxu0 %v6205_v3  ;;  %v6243_v3 = vld [vmem:[%s9610_s5 + $0x220] sm:$0xff] }
 0x437   : > { %5650 = vmatpush.msra.mxu2 %v6287_v17  ;;  %5554 = vmatpush.msra.mxu1 %v6243_v3  ;;  %v4934_v17 = vadd.f32 %v9114_v30, %v4914_v46 }
 0x438   : > { %5447 = vmatpush.msra.mxu0 %v6204_v54  ;;  %v6280_v54 = vld [vmem:[%s9610_s5 + $0x340] sm:$0xff]  ;;  %5576 = vmatpush.msrb.mxu3 %v6257_v51 }
 0x439   : > { %5651 = vmatpush.msra.mxu2 %v6286_v42  ;;  %5555 = vmatpush.msra.mxu1 %v6242_v29 }
 0x43a   : > { %5448 = vmatpush.msra.mxu0 %v6203_v41  ;;  %v6264_v41 = vld [vmem:[%s9610_s5 + $0x2c0] sm:$0xff] }
 0x43b   : > { %5652 = vmatpush.msra.mxu2 %v6285_v7  ;;  %5556 = vmatpush.msra.mxu1 %v6241_v45  ;;  %v4954_v7 = vadd.f32 %v9116_v32, %v4934_v17  ;;  %v6231_v32 = vld [vmem:[%s9610_s5 + $0x1c0] sm:$0xff]  ;;  %v6341_v17 = vld [vmem:[%s9610_s5 + $0x518] sm:$0xff] }
 0x43c   : > { %5449 = vmatpush.msra.mxu0 %v6202_v49  ;;  %v6256_v49 = vld [vmem:[%s9610_s5 + $0x288] sm:$0xff] }
 0x43d   : > { %5653 = vmatpush.msra.mxu2 %v6284_v39  ;;  %5577 = vmatpush.msrb.mxu3 %v6256_v49 }
 0x43e   : > { %5450 = vmatpush.msra.mxu0 %v6201_v31  ;;  %v6240_v31 = vld [vmem:[%s9610_s5 + $0x208] sm:$0xff]  ;;  %v5093_v20 = vpop.f32.mrf.mxu2 }
 0x43f   : > { %5654 = vmatpush.msra.mxu2 %v6283_v13  ;;  %5557 = vmatpush.msra.mxu1 %v6240_v31  ;;  %v5073_v8 = vpop.f32.mrf.mxu1 }
 0x440   : > { %5626 = vmatpush.msrb.mxu0 %v6275_v21  ;;  %v6239_v21 = vld [vmem:[%s9610_s5 + $0x200] sm:$0xff]  ;;  %5578 = vmatpush.msrb.mxu3 %v6255_v24 }
 0x441   : > { %5655 = vmatpush.msra.mxu2 %v6282_v56  ;;  %5558 = vmatpush.msra.mxu1 %v6239_v21  ;;  %v4994_v56 = vadd.f32 %v9141_v48, %v9175_v0  ;;  %v6344_v21 = vld [vmem:[%s9610_s5 + $0x530] sm:$0xff] }
 0x442   : > { %5627 = vmatpush.msrb.mxu0 %v6274_v37  ;;  %v6261_v37 = vld [vmem:[%s9610_s5 + $0x2a8] sm:$0xff]  ;;  %5579 = vmatpush.msrb.mxu3 %v6254_v50  ;;  %v6330_v50 = vld [vmem:[%s9610_s5 + $0x4c0] sm:$0xff] }
 0x443   : > { %5656 = vmatpush.msra.mxu2 %v6281_v1  ;;  %5559 = vmatpush.msra.mxu1 %v6238_v44  ;;  %v5360_v1 = vld [vmem:[#allocation10] sm:$0x3] }
 0x444   : > { %5628 = vmatpush.msrb.mxu0 %v6273_v27  ;;  %v6260_v27 = vld [vmem:[%s9610_s5 + $0x2a0] sm:$0xff]  ;;  %5580 = vmatpush.msrb.mxu3 %v6253_v9  ;;  %v5362_v29 = vperm.slane %v5360_v1, 0  ;;  %v6329_v9 = vld [vmem:[%s9610_s5 + $0x4b8] sm:$0xff] }
 0x445   : > { %5657 = vmatpush.msra.mxu2 %v6280_v54  ;;  %5560 = vmatpush.msra.mxu1 %v6237_v15 }
 0x446   : > { %5629 = vmatpush.msrb.mxu0 %v6272_v23  ;;  %v6252_v23 = vld [vmem:[%s9610_s5 + $0x268] sm:$0xff] }
 0x447   : > { %5658 = vmatpush.msra.mxu2 %v6279_v2  ;;  %v5053_v34 = vpop.f32.mrf.mxu0  ;;  %5581 = vmatpush.msrb.mxu3 %v6252_v23  ;;  %v6328_v23 = vld [vmem:[%s9610_s5 + $0x4b0] sm:$0xff] }
 0x448   : > { %5630 = vmatpush.msrb.mxu0 %v6271_v35  ;;  %v6251_v35 = vld [vmem:[%s9610_s5 + $0x260] sm:$0xff]  ;;  %5561 = vmatpush.msra.mxu1 %v6236_v28  ;;  %v6327_v28 = vld [vmem:[%s9610_s5 + $0x4a8] sm:$0xff] }
 0x449   : > { %5659 = vmatpush.msra.mxu2 %v6278_v57  ;;  %5582 = vmatpush.msrb.mxu3 %v6251_v35  ;;  %v6333_v57 = vld [vmem:[%s9610_s5 + $0x4d8] sm:$0xff]  ;;  %v6340_v35 = vld [vmem:[%s9610_s5 + $0x510] sm:$0xff] }
 0x44a   : > { %5631 = vmatpush.msrb.mxu0 %v6270_v6  ;;  %v6250_v6 = vld [vmem:[%s9610_s5 + $0x258] sm:$0xff]  ;;  %5562 = vmatpush.msra.mxu1 %v6235_v18 }
 0x44b   : > { %5660 = vmatpush.msra.mxu2 %v6277_v33  ;;  %5583 = vmatpush.msrb.mxu3 %v6250_v6  ;;  %v6331_v33 = vld [vmem:[%s9610_s5 + $0x4c8] sm:$0xff]  ;;  %v6304_v18 = vld [vmem:[%s9610_s5 + $0x3f8] sm:$0xff] }
 0x44c   : > { %5632 = vmatpush.msrb.mxu0 %v6269_v12  ;;  %v5054_v12 = vadd.f32 %v5053_v34, %v4954_v7  ;;  %5563 = vmatpush.msra.mxu1 %v6234_v36  ;;  %v5363_v34 = vperm.slane %v5360_v1, 1  ;;  %v6339_v6 = vld [vmem:[%s9610_s5 + $0x508] sm:$0xff]  ;;  %v6299_v1 = vld [vmem:[%s9610_s5 + $0x3d0] sm:$0xff] }
 0x44d   : > { %5661 = vmatpush.msra.mxu2 %v6276_v60  ;;  %5584 = vmatpush.msrb.mxu3 %v6249_v19  ;;  %v6303_v19 = vld [vmem:[%s9610_s5 + $0x3f0] sm:$0xff] }
 0x44e   : > { %5633 = vmatpush.msrb.mxu0 %v6268_v10  ;;  %v5133_v42 = vpop.f32.mrf.mxu3  ;;  %5564 = vmatpush.msra.mxu1 %v6233_v26  ;;  %v6247_v10 = vld [vmem:[%s9610_s5 + $0x240] sm:$0xff]  ;;  %v5074_v13 = vadd.f32 %v5073_v8, %v5054_v12  ;;  %v6316_v12 = vld [vmem:[%s9610_s5 + $0x458] sm:$0xff] }
 0x44f   : > { %5585 = vmatpush.msrb.mxu3 %v6248_v61  ;;  %v6338_v26 = vld [vmem:[%s9610_s5 + $0x500] sm:$0xff]  ;;  %v6302_v61 = vld [vmem:[%s9610_s5 + $0x3e8] sm:$0xff] }
 0x450   : > { %5634 = vmatpush.msrb.mxu0 %v6267_v16  ;;  %v9233_v52 = vpop.f32.mrf.mxu2  ;;  %5565 = vmatpush.msra.mxu1 %v6232_v25  ;;  %v5094_v58 = vadd.f32 %v5093_v20, %v5074_v13  ;;  %v6324_v25 = vld [vmem:[%s9610_s5 + $0x490] sm:$0xff]  ;;  %v6301_v13 = vld [vmem:[%s9610_s5 + $0x3e0] sm:$0xff] }
 0x451   : > { %5586 = vmatpush.msrb.mxu3 %v6247_v10  ;;  %v6337_v10 = vld [vmem:[%s9610_s5 + $0x4f8] sm:$0xff] }
 0x452   : > { %5635 = vmatpush.msrb.mxu0 %v6266_v11  ;;  %5566 = vmatpush.msra.mxu1 %v6231_v32  ;;  %v5114_v3 = vadd.f32 %v9198_v5, %v5094_v58  ;;  %v6336_v32 = vld [vmem:[%s9610_s5 + $0x4f0] sm:$0xff]  ;;  %v6313_v58 = vld [vmem:[%s9610_s5 + $0x440] sm:$0xff] }
 0x454   : > { %5636 = vmatpush.msrb.mxu0 %v6265_v22  ;;  %v5014_v22 = vadd.f32 %v9139_v55, %v4994_v56  ;;  %v6300_v56 = vld [vmem:[%s9610_s5 + $0x3d8] sm:$0xff] }
 0x456   : > { %5637 = vmatpush.msrb.mxu0 %v6264_v41  ;;  %v5034_v51 = vadd.f32 %v9167_v59, %v5014_v22  ;;  %v6345_v59 = vld [vmem:[%s9610_s5 + $0x538] sm:$0xff]  ;;  %v6334_v22 = vld [vmem:[%s9610_s5 + $0x4e0] sm:$0xff] }
 0x458   : > { %5638 = vmatpush.msrb.mxu0 %v6263_v43  ;;  %v5134_v2 = vadd.f32 %v5133_v42, %v5034_v51  ;;  %v6320_v51 = vld [vmem:[%s9610_s5 + $0x470] sm:$0xff] }
 0x45a   : > { %5639 = vmatpush.msrb.mxu0 %v6262_v14 }
 0x45c   : > { %5640 = vmatpush.msrb.mxu0 %v6261_v37  ;;  %v6343_v37 = vld [vmem:[%s9610_s5 + $0x528] sm:$0xff] }
 0x45e   : > { %5641 = vmatpush.msrb.mxu0 %v6260_v27  ;;  %v6342_v27 = vld [vmem:[%s9610_s5 + $0x520] sm:$0xff] }
 0x461   : > { %v5173_v53 = vpop.f32.mrf.mxu1 }
 0x469   : > { %v5153_v39 = vpop.f32.mrf.mxu0 }
 0x46a   : > { %v5154_v48 = vadd.f32 %v5153_v39, %v5134_v2  ;;  %v6325_v39 = vld [vmem:[%s9610_s5 + $0x498] sm:$0xff]  ;;  %v6297_v2 = vld [vmem:[%s9610_s5 + $0x3c0] sm:$0xff] }
 0x46c   : > { %v5174_v24 = vadd.f32 %v5173_v53, %v5154_v48  ;;  %v6315_v53 = vld [vmem:[%s9610_s5 + $0x450] sm:$0xff]  ;;  %v6309_v48 = vld [vmem:[%s9610_s5 + $0x420] sm:$0xff] }
 0x46e   : > { %v5194_v60 = vadd.f32 %v9233_v52, %v5174_v24  ;;  %v6326_v52 = vld [vmem:[%s9610_s5 + $0x4a0] sm:$0xff]  ;;  %v6307_v24 = vld [vmem:[%s9610_s5 + $0x410] sm:$0xff] }
 0x470   : > { %v5233_v40 = vpop.f32.mrf.mxu3 }
 0x472   : > { %v5213_v30 = vpop.f32.mrf.mxu2 }
 0x473   : > { %v5234_v16 = vadd.f32 %v5233_v40, %v5213_v30  ;;  %v5273_v4 = vpop.f32.mrf.mxu1  ;;  %v6314_v40 = vld [vmem:[%s9610_s5 + $0x448] sm:$0xff] }
 0x474   : > { %v6323_v30 = vld [vmem:[%s9610_s5 + $0x488] sm:$0xff] }
 0x48b   : > { %v5253_v63 = vpop.f32.mrf.mxu0 }
 0x48c   : > { %v5254_v11 = vadd.f32 %v5253_v63, %v5234_v16  ;;  %v6322_v63 = vld [vmem:[%s9610_s5 + $0x480] sm:$0xff] }
 0x48e   : > { %v5274_v38 = vadd.f32 %v5273_v4, %v5254_v11  ;;  %v6335_v4 = vld [vmem:[%s9610_s5 + $0x4e8] sm:$0xff] }
 0x490   : > { %v5356_v54 = vadd.f32 %v5274_v38, %v5114_v3  ;;  %v6312_v3 = vld [vmem:[%s9610_s5 + $0x438] sm:$0xff] }
 0x491   : > { %v6321_v38 = vld [vmem:[%s9610_s5 + $0x478] sm:$0xff] }
 0x492   : > { %v5358_v41 = vmax.f32 %v8884_v62, %v5356_v54  ;;  %v6332_v62 = vld [vmem:[%s9610_s5 + $0x4d0] sm:$0xff]  ;;  %v6298_v54 = vld [vmem:[%s9610_s5 + $0x3c8] sm:$0xff] }
 0x493   : > { %v5293_v49 = vpop.f32.mrf.mxu1  ;;  %v5333_v14 = vpop.f32.mrf.mxu3 }
 0x494   : > { %v5366_v45 = vadd.f32 %v5362_v29, %v5358_v41  ;;  %v5313_v43 = vpop.f32.mrf.mxu2  ;;  %v6311_v29 = vld [vmem:[%s9610_s5 + $0x430] sm:$0xff] }
 0x495   : > { %v5314_v31 = vadd.f32 %v5313_v43, %v5293_v49  ;;  %v6319_v49 = vld [vmem:[%s9610_s5 + $0x468] sm:$0xff]  ;;  %v6296_v43 = vld [vmem:[%s9610_s5 + $0x3b8] sm:$0xff] }
 0x496   : > { %v9269_v0 = vmax.f32 %v5366_v45, 0.0  ;;  %v6310_v45 = vld [vmem:[%s9610_s5 + $0x428] sm:$0xff] }
 0x497   : > { %v5334_v5 = vadd.f32 %v5333_v14, %v5314_v31  ;;  %v6295_v31 = vld [vmem:[%s9610_s5 + $0x3b0] sm:$0xff]  ;;  %v6293_v14 = vld [vmem:[%s9610_s5 + $0x3a0] sm:$0xff] }
 0x498   : > { %5493 = vmatmul.f32.vlgmr.msrb.gmra.mxu2 %v9269_v0  ;;  %v5429_v55 = vrot.slane %v9269_v0, 1  ;;  %v5621_v15 = vrot.slane %v9269_v0, 3  ;;  %v5546_v11 = vrot.slane %v9269_v0, 2 }
 0x499   : > { %5776 = vmatpush.msrb.mxu2 %v6333_v57  ;;  %v6318_v57 = vld [vmem:[%s9610_s5 + $0x460] sm:$0xff] }
 0x49a   : > { %5451 = vmatmul.f32.vlgmr.msra.gmra.mxu0 %v5429_v55  ;;  %v6308_v55 = vld [vmem:[%s9610_s5 + $0x418] sm:$0xff] }
 0x49b   : > { %5777 = vmatpush.msrb.mxu2 %v6332_v62  ;;  %5800 = vmatpush.msra.mxu0 %v6345_v59  ;;  %v5771_v62 = vrot.slane %v9269_v0, 5  ;;  %v6294_v59 = vld [vmem:[%s9610_s5 + $0x3a8] sm:$0xff] }
 0x49c   : > { %v5353_v20 = vpop.f32.mrf.mxu0 }
 0x49d   : > { %v5354_v44 = vadd.f32 %v5353_v20, %v5334_v5  ;;  %5778 = vmatpush.msrb.mxu2 %v6331_v33  ;;  %5801 = vmatpush.msra.mxu0 %v6344_v21  ;;  %v6306_v33 = vld [vmem:[%s9610_s5 + $0x408] sm:$0xff]  ;;  %v6292_v21 = vld [vmem:[%s9610_s5 + $0x398] sm:$0xff]  ;;  %v6305_v5 = vld [vmem:[%s9610_s5 + $0x400] sm:$0xff] }
 0x49f   : > { %v5357_v46 = vadd.f32 %v5354_v44, %v5194_v60  ;;  %5779 = vmatpush.msrb.mxu2 %v6330_v50  ;;  %5802 = vmatpush.msra.mxu0 %v6343_v37  ;;  %v6362_v50 = vld [vmem:[%s9610_s5 + $0x5b8] sm:$0xff]  ;;  %v6291_v37 = vld [vmem:[%s9610_s5 + $0x390] sm:$0xff]  ;;  %v6290_v44 = vld [vmem:[%s9610_s5 + $0x388] sm:$0xff] }
 0x4a0   : > { %v6361_v60 = vld [vmem:[%s9610_s5 + $0x5b0] sm:$0xff] }
 0x4a1   : > { %v5359_v8 = vmax.f32 %v8895_v47, %v5357_v46  ;;  %5780 = vmatpush.msrb.mxu2 %v6329_v9  ;;  %5803 = vmatpush.msra.mxu0 %v6342_v27  ;;  %v6360_v9 = vld [vmem:[%s9610_s5 + $0x5a8] sm:$0xff]  ;;  %v6289_v27 = vld [vmem:[%s9610_s5 + $0x380] sm:$0xff]  ;;  %v5696_v46 = vrot.slane %v9269_v0, 4 }
 0x4a2   : > { %5642 = vmatmul.f32.vlgmr.msrb.gmra.mxu0 %v5621_v15  ;;  %v6374_v15 = vld [vmem:[%s9610_s5 + $0x618] sm:$0xff] }
 0x4a3   : > { %v5367_v42 = vadd.f32 %v5363_v34, %v5359_v8  ;;  %5781 = vmatpush.msrb.mxu2 %v6328_v23  ;;  %5804 = vmatpush.msra.mxu0 %v6341_v17  ;;  %v6359_v34 = vld [vmem:[%s9610_s5 + $0x5a0] sm:$0xff]  ;;  %v6358_v23 = vld [vmem:[%s9610_s5 + $0x598] sm:$0xff]  ;;  %v6373_v17 = vld [vmem:[%s9610_s5 + $0x610] sm:$0xff] }
 0x4a4   : > { %v6357_v8 = vld [vmem:[%s9610_s5 + $0x590] sm:$0xff] }
 0x4a5   : > { %v9318_v47 = vmax.f32 %v5367_v42, 0.0  ;;  %5782 = vmatpush.msrb.mxu2 %v6327_v28  ;;  %5805 = vmatpush.msra.mxu0 %v6340_v35  ;;  %v6372_v28 = vld [vmem:[%s9610_s5 + $0x608] sm:$0xff]  ;;  %v6371_v42 = vld [vmem:[%s9610_s5 + $0x600] sm:$0xff] }
 0x4a6   : > { %v6356_v35 = vld [vmem:[%s9610_s5 + $0x588] sm:$0xff] }
 0x4a7   : > { %6230 = vmatmul.msk.f32.vlgmr.msra.gmra.mxu3 %vm5432_vm5, %v9318_v47  ;;  %5783 = vmatpush.msrb.mxu2 %v6326_v52  ;;  %v5430_v7 = vrot.slane %v9318_v47, 1  ;;  %v5622_v36 = vrot.slane %v9318_v47, 3  ;;  %v5547_v16 = vrot.slane %v9318_v47, 2  ;;  %v5772_v41 = vrot.slane %v9318_v47, 5  ;;  %v6355_v52 = vld [vmem:[%s9610_s5 + $0x580] sm:$0xff] }
 0x4a8   : > { %5701 = vmatpush.msra.mxu3 %v6304_v18  ;;  %5806 = vmatpush.msra.mxu0 %v6339_v6  ;;  %v5697_v20 = vrot.slane %v9318_v47, 4  ;;  %v6370_v18 = vld [vmem:[%s9610_s5 + $0x5f8] sm:$0xff] }
 0x4a9   : > { %6229 = vmatmul.msk.f32.vlgmr.msrb.gmra.mxu1 %vm5432_vm5, %v5430_v7  ;;  %6288 = vmatmul.msk.f32.vlgmr.msra.gmra.mxu2 %vm5432_vm5, %v5622_v36  ;;  %v6354_v6 = vld [vmem:[%s9610_s5 + $0x578] sm:$0xff]  ;;  %v6369_v7 = vld [vmem:[%s9610_s5 + $0x5f0] sm:$0xff] }
 0x4aa   : > { %5702 = vmatpush.msra.mxu3 %v6303_v19  ;;  %5725 = vmatpush.msrb.mxu1 %v6316_v12  ;;  %v6353_v36 = vld [vmem:[%s9610_s5 + $0x570] sm:$0xff]  ;;  %v6368_v19 = vld [vmem:[%s9610_s5 + $0x5e8] sm:$0xff] }
 0x4ab   : > { %5784 = vmatpush.msrb.mxu2 %v6325_v39  ;;  %5807 = vmatpush.msra.mxu0 %v6338_v26  ;;  %v6352_v12 = vld [vmem:[%s9610_s5 + $0x568] sm:$0xff]  ;;  %v6367_v39 = vld [vmem:[%s9610_s5 + $0x5e0] sm:$0xff] }
 0x4ac   : > { %5703 = vmatpush.msra.mxu3 %v6302_v61  ;;  %5726 = vmatpush.msrb.mxu1 %v6315_v53  ;;  %v6351_v26 = vld [vmem:[%s9610_s5 + $0x560] sm:$0xff]  ;;  %v6366_v61 = vld [vmem:[%s9610_s5 + $0x5d8] sm:$0xff] }
 0x4ad   : > { %5785 = vmatpush.msrb.mxu2 %v6324_v25  ;;  %5808 = vmatpush.msra.mxu0 %v6337_v10  ;;  %v6350_v53 = vld [vmem:[%s9610_s5 + $0x558] sm:$0xff]  ;;  %v6365_v25 = vld [vmem:[%s9610_s5 + $0x5d0] sm:$0xff] }
 0x4ae   : > { %5704 = vmatpush.msra.mxu3 %v6301_v13  ;;  %5727 = vmatpush.msrb.mxu1 %v6314_v40  ;;  %v6349_v10 = vld [vmem:[%s9610_s5 + $0x550] sm:$0xff]  ;;  %v6364_v13 = vld [vmem:[%s9610_s5 + $0x5c8] sm:$0xff] }
 0x4af   : > { %5786 = vmatpush.msrb.mxu2 %v6323_v30  ;;  %5809 = vmatpush.msra.mxu0 %v6336_v32  ;;  %v6348_v40 = vld [vmem:[%s9610_s5 + $0x548] sm:$0xff]  ;;  %v6363_v30 = vld [vmem:[%s9610_s5 + $0x5c0] sm:$0xff]  ;;  %v5847_v32 = vrot.slane %v9318_v47, 6  ;;  %v5901_v47 = vld [vmem:[%s9612_s7 + $0x30] sm:$0xff] }
 0x4b0   : > { %6259 = vmatmul.msk.f32.vlgmr.msrb.gmra.mxu3 %vm5432_vm5, %v5547_v16  ;;  %5728 = vmatpush.msrb.mxu1 %v6313_v58  ;;  %v6347_v58 = vld [vmem:[%s9610_s5 + $0x540] sm:$0xff]  ;;  %v5846_v16 = vrot.slane %v9269_v0, 6 }
 0x4b1   : > { %5705 = vmatpush.msra.mxu3 %v6300_v56  ;;  %5787 = vmatpush.msrb.mxu2 %v6322_v63  ;;  %v5902_v56 = vld [vmem:[%s9612_s7 + $0x38] sm:$0xff]  ;;  %v5900_v63 = vld [vmem:[%s9612_s7 + $0x28] sm:$0xff]  ;;  %v5899_v0 = vld [vmem:[%s9612_s7 + $0x20] sm:$0xff] }
 0x4b2   : > { %5810 = vmatpush.msra.mxu0 %v6335_v4  ;;  %5567 = vmatmul.f32.vlgmr.msra.gmra.mxu1 %v5546_v11  ;;  %v5898_v4 = vld [vmem:[%s9612_s7 + $0x18] sm:$0xff]  ;;  %v5897_v11 = vld [vmem:[%s9612_s7 + $0x10] sm:$0xff] }
 0x4b3   : > { %5706 = vmatpush.msra.mxu3 %v6299_v1  ;;  %5729 = vmatpush.msrb.mxu1 %v6312_v3  ;;  %v5896_v3 = vld [vmem:[%s9612_s7 + $0x8] sm:$0xff] }
 0x4b4   : > { %5788 = vmatpush.msrb.mxu2 %v6321_v38  ;;  %5811 = vmatpush.msra.mxu0 %v6334_v22  ;;  %v5895_v22 = vld [vmem:[%s9612_s7] sm:$0xff] }
 0x4b5   : > { %5707 = vmatpush.msra.mxu3 %v6298_v54  ;;  %5730 = vmatpush.msrb.mxu1 %v6311_v29 }
 0x4b6   : > { %6346 = vmatmul.msk.f32.vlgmr.msra.gmra.mxu0 %vm5432_vm5, %v5772_v41  ;;  %5789 = vmatpush.msrb.mxu2 %v6320_v51 }
 0x4b7   : > { %5708 = vmatpush.msra.mxu3 %v6297_v2  ;;  %5731 = vmatpush.msrb.mxu1 %v6310_v45 }
 0x4b8   : > { %5790 = vmatpush.msrb.mxu2 %v6319_v49  ;;  %5915 = vmatpush.msrb.mxu0 %v5902_v56 }
 0x4b9   : > { %5709 = vmatpush.msra.mxu3 %v6296_v43  ;;  %5732 = vmatpush.msrb.mxu1 %v6309_v48 }
 0x4ba   : > { %5791 = vmatpush.msrb.mxu2 %v6318_v57  ;;  %5916 = vmatpush.msrb.mxu0 %v5901_v47 }
 0x4bb   : > { %5710 = vmatpush.msra.mxu3 %v6295_v31  ;;  %5733 = vmatpush.msrb.mxu1 %v6308_v55 }
 0x4bc   : > { %5792 = vmatmul.f32.vlgmr.msrb.gmra.mxu2 %v5771_v62  ;;  %5917 = vmatpush.msrb.mxu0 %v5900_v63 }
 0x4bd   : > { %5711 = vmatpush.msra.mxu3 %v6294_v59  ;;  %5734 = vmatpush.msrb.mxu1 %v6307_v24 }
 0x4be   : > { %5918 = vmatpush.msrb.mxu0 %v5899_v0 }
 0x4bf   : > { %5712 = vmatpush.msra.mxu3 %v6293_v14  ;;  %5735 = vmatpush.msrb.mxu1 %v6306_v33 }
 0x4c0   : > { %5919 = vmatpush.msrb.mxu0 %v5898_v4 }
 0x4c1   : > { %5713 = vmatpush.msra.mxu3 %v6292_v21  ;;  %5736 = vmatpush.msrb.mxu1 %v6305_v5 }
 0x4c2   : > { %6317 = vmatmul.msk.f32.vlgmr.msrb.gmra.mxu1 %vm5432_vm5, %v5697_v20  ;;  %5920 = vmatpush.msrb.mxu0 %v5897_v11 }
 0x4c3   : > { %5851 = vmatpush.msra.mxu1 %v6362_v50  ;;  %5714 = vmatpush.msra.mxu3 %v6291_v37 }
 0x4c4   : > { %5921 = vmatpush.msrb.mxu0 %v5896_v3 }
 0x4c5   : > { %5852 = vmatpush.msra.mxu1 %v6361_v60  ;;  %5715 = vmatpush.msra.mxu3 %v6290_v44 }
 0x4c6   : > { %5922 = vmatpush.msrb.mxu0 %v5895_v22 }
 0x4c7   : > { %5853 = vmatpush.msra.mxu1 %v6360_v9  ;;  %5716 = vmatpush.msra.mxu3 %v6289_v27  ;;  %v5892_v9 = vld [vmem:[#allocation12] sm:$0x1] }
 0x4c8   : > { %5717 = vmatmul.f32.vlgmr.msra.gmra.mxu3 %v5696_v46 }
 0x4c9   : > { %5854 = vmatpush.msra.mxu1 %v6359_v34  ;;  %5875 = vmatpush.msrb.mxu3 %v6374_v15  ;;  %v5903_v15 = vld [vmem:[#allocation13] sm:$0x1] }
 0x4cb   : > { %5855 = vmatpush.msra.mxu1 %v6358_v23  ;;  %5876 = vmatpush.msrb.mxu3 %v6373_v17 }
 0x4cd   : > { %5856 = vmatpush.msra.mxu1 %v6357_v8  ;;  %5877 = vmatpush.msrb.mxu3 %v6372_v28 }
 0x4cf   : > { %5857 = vmatpush.msra.mxu1 %v6356_v35  ;;  %5878 = vmatpush.msrb.mxu3 %v6371_v42 }
 0x4d1   : > { %5858 = vmatpush.msra.mxu1 %v6355_v52  ;;  %5879 = vmatpush.msrb.mxu3 %v6370_v18 }
 0x4d3   : > { %5859 = vmatpush.msra.mxu1 %v6354_v6  ;;  %5880 = vmatpush.msrb.mxu3 %v6369_v7 }
 0x4d5   : > { %5860 = vmatpush.msra.mxu1 %v6353_v36  ;;  %5881 = vmatpush.msrb.mxu3 %v6368_v19 }
 0x4d7   : > { %5861 = vmatpush.msra.mxu1 %v6352_v12  ;;  %5882 = vmatpush.msrb.mxu3 %v6367_v39 }
 0x4d9   : > { %5862 = vmatpush.msra.mxu1 %v6351_v26  ;;  %5883 = vmatpush.msrb.mxu3 %v6366_v61 }
 0x4db   : > { %5863 = vmatpush.msra.mxu1 %v6350_v53  ;;  %5884 = vmatpush.msrb.mxu3 %v6365_v25 }
 0x4dd   : > { %5864 = vmatpush.msra.mxu1 %v6349_v10  ;;  %5885 = vmatpush.msrb.mxu3 %v6364_v13 }
 0x4df   : > { %5865 = vmatpush.msra.mxu1 %v6348_v40  ;;  %5886 = vmatpush.msrb.mxu3 %v6363_v30 }
 0x4e0   : > { %6375 = vmatmul.msk.f32.vlgmr.msrb.gmra.mxu3 %vm5432_vm5, %v5847_v32 }
 0x4e1   : > { %5866 = vmatpush.msra.mxu1 %v6347_v58 }
 0x4e2   : > { %5867 = vmatmul.f32.vlgmr.msra.gmra.mxu1 %v5846_v16 }
 0x517   : > { %v5452_v54 = vpop.f32.mrf.mxu0 }
 0x51b   : > { %v5494_v29 = vpop.f32.mrf.mxu2 }
 0x51f   : > { %v5643_v57 = vpop.f32.mrf.mxu0 }
 0x526   : > { %v5472_v38 = vpop.f32.mrf.mxu1 }
 0x527   : > { %v5473_v51 = vadd.f32 %v5472_v38, %v5452_v54 }
 0x529   : > { %v5495_v45 = vadd.f32 %v5494_v29, %v5473_v51 }
 0x52a   : > { %v5514_v1 = vpop.f32.mrf.mxu3 }
 0x52b   : > { %v5515_v48 = vadd.f32 %v5514_v1, %v5495_v45 }
 0x52c   : > { %v5663_v43 = vpop.f32.mrf.mxu2 }
 0x52d   : > { %v5664_v59 = vadd.f32 %v5663_v43, %v5643_v57 }
 0x52f   : > { %v5568_v2 = vpop.f32.mrf.mxu1 }
 0x533   : > { %v5588_v41 = vpop.f32.mrf.mxu3  ;;  %v5813_v5 = vpop.f32.mrf.mxu0 }
 0x534   : > { %v5589_v49 = vadd.f32 %v5588_v41, %v5568_v2 }
 0x536   : > { %v5591_v55 = vadd.f32 %v5589_v49, %v5515_v48 }
 0x538   : > { %v5666_v14 = vadd.f32 %v5664_v59, %v5591_v55 }
 0x53f   : > { %v5738_v62 = vpop.f32.mrf.mxu1  ;;  %v5793_v33 = vpop.f32.mrf.mxu2 }
 0x540   : > { %v5814_v20 = vadd.f32 %v5813_v5, %v5793_v33 }
 0x54b   : > { %v5718_v31 = vpop.f32.mrf.mxu3 }
 0x54c   : > { %v5739_v24 = vadd.f32 %v5738_v62, %v5718_v31 }
 0x54e   : > { %v5741_v21 = vadd.f32 %v5739_v24, %v5666_v14 }
 0x550   : > { %v5816_v60 = vadd.f32 %v5814_v20, %v5741_v21 }
 0x55f   : > { %v5868_v50 = vpop.f32.mrf.mxu1 }
 0x563   : > { %v5888_v37 = vpop.f32.mrf.mxu3 }
 0x564   : > { %v5889_v44 = vadd.f32 %v5888_v37, %v5868_v50 }
 0x566   : > { %v5891_v27 = vadd.f32 %v5889_v44, %v5816_v60 }
 0x568   : > { %v5893_v46 = vadd.f32 %v5892_v9, %v5891_v27 }
 0x56a   : > { %v5894_v34 = vmax.f32 %v5893_v46, 0.0 }
 0x56c   : > { %6376 = vmatmul.msk.f32.vlgmr.msrb.gmra.mxu0 %vm2933_vm3, %v5894_v34 }
 0x5e9   : > { %v5924_v23 = vpop.f32.mrf.mxu0 }
 0x5ea   : > { %v5925_v17 = vadd.f32 %v5924_v23, %v5903_v15 }
 0x5ec   : > { %5928 = vst.msk [vmem:[%s416_s21] sm:$0x1] %vm5927_vm6, %v5925_v17 }
 0x5ed   : > { %7377 = shalt.err (!%p7374_p8)
}
 0x5ee   : > { %6404 = dma.vmem_to_hbm [thread:$0]  (%p7529_p5), %s5941_s14, 16, %s5943_s16, %s5930_s17  }
 0x5ef PF: > { %p6441_p9 = scmp.ge.s32.totalorder %s7428_s12, 2  ;;  %s5954_s2 = sand.u32 1, %s7416_s30  }
 0x5f0   : > { %s5955_s4 = scalar_lea.sflag [#allocation6], %s5954_s2 }
 0x5f1   : > { %p6426_p10 = pnand %p6441_p9, %p7533_p6 }
 0x5f3   : > { %p6427_p11 = pneg %p6426_p10 }
 0x5f5   : > { %7411 = dma.done.wait (%p6427_p11), %s5955_s4, 16  }
 0x5f6   : > { %7413 = vsyncadd (%p6427_p11), %s5955_s4, 4294967280  ;;  %s9936_s11 = sld [smem:[#allocation21_spill]]  ;;  %p23_p12 = scmp.ge.s32.totalorder %s7516_s15, 4  }
 0x5f7   : > { %s9937_s22 = sld [smem:[#allocation22_spill]]  ;;  %s9938_s30 = smov %s7420_s10 }
 0x5f8   : > { %s9941_s12 = smov %s7516_s15 }
 0x5f9   :  { %25 = sbr.rel (!%p23_p12) target bundleno = 12 (0xc), region = 136 }
 0x5fc   : > { %s9939_s10 = smov %s9936_s11 }
 0x5fd   : > { %s9940_s11 = smov %s9937_s22 }
 0x5fe   :  { %5960 = vsyncpa [#allocation5], 1 }
 0x5ff   :  { %5962 = vsyncpa [#allocation5 + $0x1], 1 }
 0x600   :  { %5963 = vsyncpa [#allocation8], 1 }
 0x601   :  { %5964 = vsyncpa [#allocation11], 1 }
 0x602   :  { %5965 = vsyncpa [#allocation14], 1 }
 0x603   :  { %5966 = vsyncpa [#allocation6], 1 }
 0x604   :  { %5968 = vsyncpa [#allocation6 + $0x1], 1 }

</bundles_post_ra>
